<compile_context>
chip_gen: v7x
topology: tpu7x:2x2x1
jax: 0.10.0
libtpu: 0.0.40
codegen_flags: <defaults>
</compile_context>

<pallas_src>
import jax
import jax.numpy as jnp
from jax.experimental import pallas as pl
from jax.experimental.pallas import tpu as pltpu

# Hidden sizes are fixed by the PyTorch module: 2048 -> 1024 -> 512.
_H1, _H2, _H3 = 2048, 1024, 512
_B1_OFF = 0
_B2_OFF = _H1                 # 2048
_B3_OFF = _H1 + _H2           # 3072
_B4_OFF = _H1 + _H2 + _H3     # 3584  (all multiples of 128 -> aligned lane slices)


def _fused_mlp_kernel(x_ref, w1_ref, w2_ref, w3_ref, w4_ref, b_ref, o_ref):
    n_out = o_ref.shape[1]

    # Layer 1: (M, K) @ (K, 2048) + b1 -> ReLU   (bf16 operands, f32 accumulation)
    h = jnp.dot(x_ref[...].astype(jnp.bfloat16), w1_ref[...],
                preferred_element_type=jnp.float32)
    h = jnp.maximum(h + b_ref[:, _B1_OFF:_B1_OFF + _H1], 0.0)

    # Layer 2: (M, 2048) @ (2048, 1024) + b2 -> ReLU
    h = jnp.dot(h.astype(jnp.bfloat16), w2_ref[...],
                preferred_element_type=jnp.float32)
    h = jnp.maximum(h + b_ref[:, _B2_OFF:_B2_OFF + _H2], 0.0)

    # Layer 3: (M, 1024) @ (1024, 512) + b3 -> ReLU
    h = jnp.dot(h.astype(jnp.bfloat16), w3_ref[...],
                preferred_element_type=jnp.float32)
    h = jnp.maximum(h + b_ref[:, _B3_OFF:_B3_OFF + _H3], 0.0)

    # Layer 4: (M, 512) @ (512, n_out) + b4 -> Sigmoid  (f32 elementwise, then cast)
    y = jnp.dot(h.astype(jnp.bfloat16), w4_ref[...],
                preferred_element_type=jnp.float32)
    y = y + b_ref[:, _B4_OFF:_B4_OFF + n_out]
    o_ref[...] = jax.nn.sigmoid(y).astype(o_ref.dtype)


def fused_mlp(x, params):
    """x: (M, input_size) f32; params: list of (W(in,out) f32, b(out,) f32)."""
    (w1, b1), (w2, b2), (w3, b3), (w4, b4) = params
    M, K = x.shape
    assert w1.shape == (K, _H1) and w2.shape == (_H1, _H2) and w3.shape == (_H2, _H3)
    n_out = w4.shape[1]

    # bf16 weights: halves the HBM weight stream (the dominant cost of this kernel).
    w1b = w1.astype(jnp.bfloat16)
    w2b = w2.astype(jnp.bfloat16)
    w3b = w3.astype(jnp.bfloat16)
    w4b = w4.astype(jnp.bfloat16)

    # Single f32 bias row (one DMA), padded to a multiple of 128 lanes.
    bias = jnp.concatenate([b1, b2, b3, b4])
    pad = (-bias.shape[0]) % 128
    if pad:
        bias = jnp.pad(bias, (0, pad))
    bias = bias.reshape(1, -1)

    # Whole-array VMEM residency: no grid, no block tiling, no accumulator.
    # bf16 weights + f32 biases/activations ~= 5.5 MiB, well under the 32 MiB scoped
    # limit on every generation (v7x physical VMEM = 64 MiB).
    vmem_spec = pl.BlockSpec(memory_space=pltpu.MemorySpace.VMEM)

    return pl.pallas_call(
        _fused_mlp_kernel,
        out_shape=jax.ShapeDtypeStruct((M, n_out), x.dtype),
        in_specs=[vmem_spec] * 6,
        out_specs=vmem_spec,
        compiler_params=pltpu.CompilerParams(
            vmem_limit_bytes=32 * 1024 * 1024,
        ),
    )(x, w1b, w2b, w3b, w4b, bias)


def init_mlp_params(key, input_size, output_size):
    """Deterministic init mirroring nn.Linear shapes (stored transposed: (in, out))."""
    sizes = [(input_size, _H1), (_H1, _H2), (_H2, _H3), (_H3, output_size)]
    params = []
    for idx, (fan_in, fan_out) in enumerate(sizes):
        kw, kb, key = jax.random.split(jax.random.fold_in(key, idx), 3)
        bound = 1.0 / jnp.sqrt(fan_in)
        w = jax.random.uniform(kw, (fan_in, fan_out), jnp.float32, -bound, bound)
        b = jax.random.uniform(kb, (fan_out,), jnp.float32, -bound, bound)
        params.append((w, b))
    return params


@jax.jit
def mlp_forward(x, params):
    return fused_mlp(x, params)


def mlp_reference_f32(x, params):
    (w1, b1), (w2, b2), (w3, b3), (w4, b4) = params
    h = jnp.maximum(x @ w1 + b1, 0.0)
    h = jnp.maximum(h @ w2 + b2, 0.0)
    h = jnp.maximum(h @ w3 + b3, 0.0)
    return jax.nn.sigmoid(h @ w4 + b4)


def mlp_reference_bf16w(x, params):
    """Reference matching the kernel's mixed precision (bf16 dots, f32 elementwise)."""
    def lin(a, w, b):
        return jnp.dot(a.astype(jnp.bfloat16), w.astype(jnp.bfloat16),
                       preferred_element_type=jnp.float32) + b
    (w1, b1), (w2, b2), (w3, b3), (w4, b4) = params
    h = jnp.maximum(lin(x, w1, b1), 0.0)
    h = jnp.maximum(lin(h, w2, b2), 0.0)
    h = jnp.maximum(lin(h, w3, b3), 0.0)
    return jax.nn.sigmoid(lin(h, w4, b4))


if __name__ == "__main__":
    key = jax.random.PRNGKey(0)
    batch, input_size, output_size = 8, 32, 8

    kx, kp = jax.random.split(key)
    x = jax.random.normal(kx, (batch, input_size), jnp.float32)
    params = init_mlp_params(kp, input_size, output_size)

    out = mlp_forward(x, params)
    out = jax.block_until_ready(out)
    assert out.shape == (batch, output_size)

    # Tight check vs a precision-matched (bf16-weight) reference.
    ref_bf16 = mlp_reference_bf16w(x, params)
    assert jnp.allclose(out, ref_bf16, atol=2e-3, rtol=2e-3)

    # Loose semantic check vs the full-f32 reference (bf16 weights -> ~1e-2 error).
    ref_f32 = mlp_reference_f32(x, params)
    assert jnp.allclose(out, ref_f32, atol=5e-2, rtol=5e-2)

    print("KERNEL_OK")
</pallas_src>

<mosaic_0001>
module attributes {stable_mosaic.version = 11 : i64} {
  func.func @_fused_mlp_kernel(%arg0: memref<8x32xf32, #tpu.memory_space<vmem>>, %arg1: memref<32x2048xbf16, #tpu.memory_space<vmem>>, %arg2: memref<2048x1024xbf16, #tpu.memory_space<vmem>>, %arg3: memref<1024x512xbf16, #tpu.memory_space<vmem>>, %arg4: memref<512x8xbf16, #tpu.memory_space<vmem>>, %arg5: memref<1x3712xf32, #tpu.memory_space<vmem>>, %arg6: memref<8x8xf32, #tpu.memory_space<vmem>>) attributes {dimension_semantics = [], scalar_prefetch = 0 : i64, scratch_operands = 0 : i64, tpu.core_type = #tpu.core_type<tc>} {
    %c0 = arith.constant 0 : index
    %c0_0 = arith.constant 0 : index
    %0 = vector.load %arg0[%c0, %c0_0] : memref<8x32xf32, #tpu.memory_space<vmem>>, vector<8x32xf32>
    %1 = arith.truncf %0 : vector<8x32xf32> to vector<8x32xbf16>
    %c0_1 = arith.constant 0 : index
    %c0_2 = arith.constant 0 : index
    %2 = vector.load %arg1[%c0_1, %c0_2] : memref<32x2048xbf16, #tpu.memory_space<vmem>>, vector<32x2048xbf16>
    %cst = arith.constant dense<0.000000e+00> : vector<8x2048xf32>
    %3 = tpu.matmul %1, %2, %cst {dimension_numbers = #tpu.dot_dimension_numbers<[1], [0], [0], [1], [0, 0, 1, 1], [], []>} : vector<8x32xbf16>, vector<32x2048xbf16>, vector<8x2048xf32> -> vector<8x2048xf32>
    %c0_3 = arith.constant 0 : index
    %c0_4 = arith.constant 0 : index
    %4 = vector.load %arg5[%c0_3, %c0_4] : memref<1x3712xf32, #tpu.memory_space<vmem>>, vector<1x2048xf32>
    %5 = vector.broadcast %4 : vector<1x2048xf32> to vector<8x2048xf32>
    %6 = arith.addf %3, %5 : vector<8x2048xf32>
    %cst_5 = arith.constant 0.000000e+00 : f32
    %7 = vector.broadcast %cst_5 : f32 to vector<8x2048xf32>
    %8 = arith.maximumf %6, %7 : vector<8x2048xf32>
    %9 = arith.truncf %8 : vector<8x2048xf32> to vector<8x2048xbf16>
    %c0_6 = arith.constant 0 : index
    %c0_7 = arith.constant 0 : index
    %10 = vector.load %arg2[%c0_6, %c0_7] : memref<2048x1024xbf16, #tpu.memory_space<vmem>>, vector<2048x1024xbf16>
    %cst_8 = arith.constant dense<0.000000e+00> : vector<8x1024xf32>
    %11 = tpu.matmul %9, %10, %cst_8 {dimension_numbers = #tpu.dot_dimension_numbers<[1], [0], [0], [1], [0, 0, 1, 1], [], []>} : vector<8x2048xbf16>, vector<2048x1024xbf16>, vector<8x1024xf32> -> vector<8x1024xf32>
    %c0_9 = arith.constant 0 : index
    %c2048 = arith.constant 2048 : index
    %12 = vector.load %arg5[%c0_9, %c2048] : memref<1x3712xf32, #tpu.memory_space<vmem>>, vector<1x1024xf32>
    %13 = vector.broadcast %12 : vector<1x1024xf32> to vector<8x1024xf32>
    %14 = arith.addf %11, %13 : vector<8x1024xf32>
    %cst_10 = arith.constant 0.000000e+00 : f32
    %15 = vector.broadcast %cst_10 : f32 to vector<8x1024xf32>
    %16 = arith.maximumf %14, %15 : vector<8x1024xf32>
    %17 = arith.truncf %16 : vector<8x1024xf32> to vector<8x1024xbf16>
    %c0_11 = arith.constant 0 : index
    %c0_12 = arith.constant 0 : index
    %18 = vector.load %arg3[%c0_11, %c0_12] : memref<1024x512xbf16, #tpu.memory_space<vmem>>, vector<1024x512xbf16>
    %cst_13 = arith.constant dense<0.000000e+00> : vector<8x512xf32>
    %19 = tpu.matmul %17, %18, %cst_13 {dimension_numbers = #tpu.dot_dimension_numbers<[1], [0], [0], [1], [0, 0, 1, 1], [], []>} : vector<8x1024xbf16>, vector<1024x512xbf16>, vector<8x512xf32> -> vector<8x512xf32>
    %c0_14 = arith.constant 0 : index
    %c3072 = arith.constant 3072 : index
    %20 = vector.load %arg5[%c0_14, %c3072] : memref<1x3712xf32, #tpu.memory_space<vmem>>, vector<1x512xf32>
    %21 = vector.broadcast %20 : vector<1x512xf32> to vector<8x512xf32>
    %22 = arith.addf %19, %21 : vector<8x512xf32>
    %cst_15 = arith.constant 0.000000e+00 : f32
    %23 = vector.broadcast %cst_15 : f32 to vector<8x512xf32>
    %24 = arith.maximumf %22, %23 : vector<8x512xf32>
    %25 = arith.truncf %24 : vector<8x512xf32> to vector<8x512xbf16>
    %c0_16 = arith.constant 0 : index
    %c0_17 = arith.constant 0 : index
    %26 = vector.load %arg4[%c0_16, %c0_17] : memref<512x8xbf16, #tpu.memory_space<vmem>>, vector<512x8xbf16>
    %cst_18 = arith.constant dense<0.000000e+00> : vector<8x8xf32>
    %27 = tpu.matmul %25, %26, %cst_18 {dimension_numbers = #tpu.dot_dimension_numbers<[1], [0], [0], [1], [0, 0, 1, 1], [], []>} : vector<8x512xbf16>, vector<512x8xbf16>, vector<8x8xf32> -> vector<8x8xf32>
    %c0_19 = arith.constant 0 : index
    %c3584 = arith.constant 3584 : index
    %28 = vector.load %arg5[%c0_19, %c3584] : memref<1x3712xf32, #tpu.memory_space<vmem>>, vector<1x8xf32>
    %29 = vector.broadcast %28 : vector<1x8xf32> to vector<8x8xf32>
    %30 = arith.addf %27, %29 : vector<8x8xf32>
    %31 = arith.negf %30 : vector<8x8xf32>
    %32 = math.exp %31 : vector<8x8xf32>
    %cst_20 = arith.constant 1.000000e+00 : f32
    %33 = vector.broadcast %cst_20 : f32 to vector<8x8xf32>
    %34 = arith.addf %33, %32 : vector<8x8xf32>
    %35 = arith.divf %33, %34 : vector<8x8xf32>
    %c0_21 = arith.constant 0 : index
    %c0_22 = arith.constant 0 : index
    %36 = vector.load %arg6[%c0_21, %c0_22] : memref<8x8xf32, #tpu.memory_space<vmem>>, vector<8x8xf32>
    tpu.vector_store %arg6[%c0_21, %c0_22], %35 {strides = array<i32>} : memref<8x8xf32, #tpu.memory_space<vmem>>, vector<8x8xf32>,
    return
  }
}

</mosaic_0001>

<bundles_post_ra>
// kernel: mlp_forward.1
= control target key start
LH: loop header
LB: loop body
LE: loop exit
PB: predicated region body
PF: predicated region fallthrough
CT: control target
= control target key end

     0   :  { %v12435_v6 = vmov 0   ;;  %vm303_vm0 = vcmask 261120   ;;  %s16803_s0 = inlined_call_operand.vmem [shape: f32[8,32], index: 0, kind: input, shape index: {}]   ;;  %s16804_s1 = inlined_call_operand.vmem [shape: bf16[32,2048], index: 1, kind: input, shape index: {}]   ;;  %s16805_s2 = inlined_call_operand.vmem [shape: bf16[2048,1024], index: 2, kind: input, shape index: {}]   ;;  %s16806_s3 = inlined_call_operand.vmem [shape: bf16[1024,512], index: 3, kind: input, shape index: {}]   ;;  %s16807_s4 = inlined_call_operand.vmem [shape: bf16[512,8], index: 4, kind: input, shape index: {}]   ;;  %s16808_s5 = inlined_call_operand.vmem [shape: f32[1,3712], index: 5, kind: input, shape index: {}]   ;;  %s16809_s6 = inlined_call_operand.hbm [shape: f32[8,8], index: 6, kind: output, shape index: {}]  }
   0x1   :  { %v27_v0 = vld [vmem:[%s16804_s1] sm:$0xff]  ;;  %339 = vmatprep.mubr.bf16.mxu0 %v12435_v6  ;;  %v28_v7 = vld [vmem:[%s16804_s1 + $0x8] sm:$0xff]  ;;  %380 = vmatprep.mubr.bf16.mxu1 %v12435_v6  ;;  %v29_v15 = vld [vmem:[%s16804_s1 + $0x10] sm:$0xff] }
   0x2   :  { %v35_v1 = vld [vmem:[%s16804_s1 + $0x40] sm:$0xff]  ;;  %v36_v9 = vld [vmem:[%s16804_s1 + $0x48] sm:$0xff]  ;;  %v37_v16 = vld [vmem:[%s16804_s1 + $0x50] sm:$0xff] }
   0x3   :  { %v43_v2 = vld [vmem:[%s16804_s1 + $0x80] sm:$0xff]  ;;  %v10441_v3 = vcombine.high %v27_v0, %v35_v1  ;;  %v10440_v4 = vcombine.low %v27_v0, %v35_v1  ;;  %v44_v10 = vld [vmem:[%s16804_s1 + $0x88] sm:$0xff]  ;;  %v10443_v12 = vcombine.high %v28_v7, %v36_v9  ;;  %v10442_v13 = vcombine.low %v28_v7, %v36_v9  ;;  %v30_v19 = vld [vmem:[%s16804_s1 + $0x18] sm:$0xff] }
   0x4   :  { %v51_v5 = vld [vmem:[%s16804_s1 + $0xc0] sm:$0xff]  ;;  %v52_v11 = vld [vmem:[%s16804_s1 + $0xc8] sm:$0xff]  ;;  %v38_v20 = vld [vmem:[%s16804_s1 + $0x58] sm:$0xff]  ;;  %v10445_v21 = vcombine.high %v29_v15, %v37_v16  ;;  %v10444_v27 = vcombine.low %v29_v15, %v37_v16 }
   0x5   :  { %v10457_v8 = vcombine.high %v43_v2, %v51_v5  ;;  %307 = vmatprep.subr.bf16.mxu0 %v10441_v3  ;;  %v10459_v14 = vcombine.high %v44_v10, %v52_v11  ;;  %v10456_v17 = vcombine.low %v43_v2, %v51_v5  ;;  %v25_v18 = vld [vmem:[%s16803_s0] sm:$0xff]  ;;  %348 = vmatprep.subr.bf16.mxu1 %v10443_v12  ;;  %v45_v23 = vld [vmem:[%s16804_s1 + $0x90] sm:$0xff]  ;;  %v46_v28 = vld [vmem:[%s16804_s1 + $0x98] sm:$0xff] }
   0x6   :  { %308 = vmatpush1.bf16.msra.mxu0 %v10440_v4  ;;  %349 = vmatpush1.bf16.msra.mxu1 %v10442_v13  ;;  %v10458_v22 = vcombine.low %v44_v10, %v52_v11  ;;  %v53_v24 = vld [vmem:[%s16804_s1 + $0xd0] sm:$0xff]  ;;  %v12519_v25 = vpack.c.bf16 %v25_v18, %v25_v18  ;;  %v10447_v26 = vcombine.high %v30_v19, %v38_v20  ;;  %v54_v29 = vld [vmem:[%s16804_s1 + $0xd8] sm:$0xff]  ;;  %v31_v32 = vld [vmem:[%s16804_s1 + $0x20] sm:$0xff] }
   0x7   :  { %309 = vmatprep.subr.bf16.mxu0 %v10457_v8  ;;  %350 = vmatprep.subr.bf16.mxu1 %v10459_v14  ;;  %v10461_v30 = vcombine.high %v45_v23, %v53_v24  ;;  %v10446_v31 = vcombine.low %v30_v19, %v38_v20  ;;  %v39_v33 = vld [vmem:[%s16804_s1 + $0x60] sm:$0xff]  ;;  %v10463_v34 = vcombine.high %v46_v28, %v54_v29  ;;  %v32_v36 = vld [vmem:[%s16804_s1 + $0x28] sm:$0xff]  ;;  %v33_v48 = vld [vmem:[%s16804_s1 + $0x30] sm:$0xff] }
   0x8   :  { %v10460_v35 = vcombine.low %v45_v23, %v53_v24  ;;  %v40_v37 = vld [vmem:[%s16804_s1 + $0x68] sm:$0xff]  ;;  %v10449_v38 = vcombine.high %v31_v32, %v39_v33  ;;  %v10462_v39 = vcombine.low %v46_v28, %v54_v29  ;;  %v47_v40 = vld [vmem:[%s16804_s1 + $0xa0] sm:$0xff]  ;;  %v10448_v43 = vcombine.low %v31_v32, %v39_v33  ;;  %v41_v49 = vld [vmem:[%s16804_s1 + $0x70] sm:$0xff] }
   0x9   :  { %v55_v41 = vld [vmem:[%s16804_s1 + $0xe0] sm:$0xff]  ;;  %v10451_v42 = vcombine.high %v32_v36, %v40_v37  ;;  %v48_v44 = vld [vmem:[%s16804_s1 + $0xa8] sm:$0xff]  ;;  %v10450_v47 = vcombine.low %v32_v36, %v40_v37  ;;  %v34_v52 = vld [vmem:[%s16804_s1 + $0x38] sm:$0xff]  ;;  %v10453_v54 = vcombine.high %v33_v48, %v41_v49  ;;  %v10452_v59 = vcombine.low %v33_v48, %v41_v49 }
   0xa   :  { %310 = vmatpush1.bf16.msra.mxu0 %v10456_v17  ;;  %351 = vmatpush1.bf16.msra.mxu1 %v10458_v22  ;;  %v56_v45 = vld [vmem:[%s16804_s1 + $0xe8] sm:$0xff]  ;;  %v10465_v46 = vcombine.high %v47_v40, %v55_v41  ;;  %v10464_v51 = vcombine.low %v47_v40, %v55_v41  ;;  %v42_v53 = vld [vmem:[%s16804_s1 + $0x78] sm:$0xff]  ;;  %v49_v56 = vld [vmem:[%s16804_s1 + $0xb0] sm:$0xff] }
   0xb   :  { %389 = vmatprep.subr.bf16.mxu0 %v10445_v21  ;;  %430 = vmatprep.subr.bf16.mxu1 %v10447_v26  ;;  %v10467_v50 = vcombine.high %v48_v44, %v56_v45  ;;  %v10466_v55 = vcombine.low %v48_v44, %v56_v45  ;;  %v57_v57 = vld [vmem:[%s16804_s1 + $0xf0] sm:$0xff]  ;;  %v10455_v58 = vcombine.high %v34_v52, %v42_v53  ;;  %v50_v60 = vld [vmem:[%s16804_s1 + $0xb8] sm:$0xff]  ;;  %v667_v0 = vld [vmem:[%s16805_s2] sm:$0xff] }
   0xc   :  { %v58_v61 = vld [vmem:[%s16804_s1 + $0xf8] sm:$0xff]  ;;  %v10469_v62 = vcombine.high %v49_v56, %v57_v57  ;;  %v10454_v63 = vcombine.low %v34_v52, %v42_v53  ;;  %v671_v1 = vld [vmem:[%s16805_s2 + $0x20] sm:$0xff]  ;;  %v10468_v3 = vcombine.low %v49_v56, %v57_v57  ;;  %v668_v4 = vld [vmem:[%s16805_s2 + $0x8] sm:$0xff] }
   0xd   :  { %10472 = vmatmul.mubr.msk.bf16.vlgmr.msra.gmra.mrb[0].mxu0 %vm303_vm0, %v12519_v25  ;;  %10473 = vmatmul.mubr.msk.bf16.vlgmr.msra.gmra.mrb[0].mxu1 %vm303_vm0, %v12519_v25  ;;  %v10471_v2 = vcombine.high %v50_v60, %v58_v61  ;;  %v672_v5 = vld [vmem:[%s16805_s2 + $0x28] sm:$0xff]  ;;  %v10481_v7 = vcombine.high %v667_v0, %v671_v1  ;;  %v675_v8 = vld [vmem:[%s16805_s2 + $0x40] sm:$0xff]  ;;  %v10470_v10 = vcombine.low %v50_v60, %v58_v61 }
   0xe   :  { %390 = vmatpush1.bf16.msra.mxu0 %v10444_v27  ;;  %421 = vmatprep.mubr.bf16.mxu0 %v12435_v6  ;;  %v679_v9 = vld [vmem:[%s16805_s2 + $0x60] sm:$0xff]  ;;  %v676_v11 = vld [vmem:[%s16805_s2 + $0x48] sm:$0xff]  ;;  %v10483_v13 = vcombine.high %v668_v4, %v672_v5  ;;  %v10480_v14 = vcombine.low %v667_v0, %v671_v1  ;;  %v10482_v17 = vcombine.low %v668_v4, %v672_v5 }
   0xf   :  { %391 = vmatprep.subr.bf16.mxu0 %v10461_v30  ;;  %431 = vmatpush1.bf16.msra.mxu1 %v10446_v31  ;;  %v680_v12 = vld [vmem:[%s16805_s2 + $0x68] sm:$0xff]  ;;  %v683_v15 = vld [vmem:[%s16805_s2 + $0x80] sm:$0xff]  ;;  %v10489_v16 = vcombine.high %v675_v8, %v679_v9  ;;  %v10488_v21 = vcombine.low %v675_v8, %v679_v9 }
  0x10   :  { %462 = vmatprep.mubr.bf16.mxu1 %v12435_v6  ;;  %432 = vmatprep.subr.bf16.mxu1 %v10463_v34  ;;  %v684_v18 = vld [vmem:[%s16805_s2 + $0x88] sm:$0xff]  ;;  %v10491_v20 = vcombine.high %v676_v11, %v680_v12  ;;  %v691_v22 = vld [vmem:[%s16805_s2 + $0xc0] sm:$0xff]  ;;  %v10490_v26 = vcombine.low %v676_v11, %v680_v12 }
  0x11   :  { %v688_v19 = vld [vmem:[%s16805_s2 + $0xa8] sm:$0xff]  ;;  %v695_v23 = vld [vmem:[%s16805_s2 + $0xe0] sm:$0xff] }
  0x12   :  { %392 = vmatpush1.bf16.msra.mxu0 %v10460_v35  ;;  %v692_v27 = vld [vmem:[%s16805_s2 + $0xc8] sm:$0xff]  ;;  %v10499_v29 = vcombine.high %v684_v18, %v688_v19  ;;  %v703_v31 = vld [vmem:[%s16805_s2 + $0x120] sm:$0xff]  ;;  %v10505_v32 = vcombine.high %v691_v22, %v695_v23  ;;  %v10498_v33 = vcombine.low %v684_v18, %v688_v19  ;;  %v10504_v37 = vcombine.low %v691_v22, %v695_v23 }
  0x13   :  { %471 = vmatprep.subr.bf16.mxu0 %v10449_v38  ;;  %433 = vmatpush1.bf16.msra.mxu1 %v10462_v39  ;;  %v696_v28 = vld [vmem:[%s16805_s2 + $0xe8] sm:$0xff]  ;;  %v707_v38 = vld [vmem:[%s16805_s2 + $0x140] sm:$0xff] }
  0x14   :  { %512 = vmatprep.subr.bf16.mxu1 %v10451_v42  ;;  %v700_v34 = vld [vmem:[%s16805_s2 + $0x108] sm:$0xff]  ;;  %v10507_v36 = vcombine.high %v692_v27, %v696_v28  ;;  %v711_v39 = vld [vmem:[%s16805_s2 + $0x160] sm:$0xff]  ;;  %v10506_v41 = vcombine.low %v692_v27, %v696_v28 }
  0x15   :  { %10474 = vmatmul.mubr.msk.bf16.vlgmr.msra.gmra.mrb[4].mxu0 %vm303_vm0, %v12519_v25  ;;  %v704_v35 = vld [vmem:[%s16805_s2 + $0x128] sm:$0xff]  ;;  %v10521_v48 = vcombine.high %v707_v38, %v711_v39  ;;  %v10520_v53 = vcombine.low %v707_v38, %v711_v39  ;;  %v743_v8 = vld [vmem:[%s16805_s2 + $0x260] sm:$0xff] }
  0x16   :  { %472 = vmatpush1.bf16.msra.mxu0 %v10448_v43  ;;  %503 = vmatprep.mubr.bf16.mxu0 %v12435_v6  ;;  %v708_v42 = vld [vmem:[%s16805_s2 + $0x148] sm:$0xff]  ;;  %v10515_v44 = vcombine.high %v700_v34, %v704_v35  ;;  %v10514_v49 = vcombine.low %v700_v34, %v704_v35  ;;  %v755_v22 = vld [vmem:[%s16805_s2 + $0x2c0] sm:$0xff] }
  0x17   :  { %10475 = vmatmul.mubr.msk.bf16.vlgmr.msra.gmra.mrb[4].mxu1 %vm303_vm0, %v12519_v25  ;;  %473 = vmatprep.subr.bf16.mxu0 %v10465_v46  ;;  %v712_v43 = vld [vmem:[%s16805_s2 + $0x168] sm:$0xff]  ;;  %v715_v46 = vld [vmem:[%s16805_s2 + $0x180] sm:$0xff] }
  0x18   :  { %513 = vmatpush1.bf16.msra.mxu1 %v10450_v47  ;;  %544 = vmatprep.mubr.bf16.mxu1 %v12435_v6  ;;  %v719_v47 = vld [vmem:[%s16805_s2 + $0x1a0] sm:$0xff]  ;;  %v10523_v52 = vcombine.high %v708_v42, %v712_v43  ;;  %v10522_v57 = vcombine.low %v708_v42, %v712_v43  ;;  %v740_v11 = vld [vmem:[%s16805_s2 + $0x248] sm:$0xff] }
  0x19   :  { %514 = vmatprep.subr.bf16.mxu1 %v10467_v50  ;;  %v716_v50 = vld [vmem:[%s16805_s2 + $0x188] sm:$0xff]  ;;  %v10529_v56 = vcombine.high %v715_v46, %v719_v47  ;;  %v10528_v61 = vcombine.low %v715_v46, %v719_v47  ;;  %v759_v23 = vld [vmem:[%s16805_s2 + $0x2e0] sm:$0xff] }
  0x1a   :  { %474 = vmatpush1.bf16.msra.mxu0 %v10464_v51  ;;  %v720_v51 = vld [vmem:[%s16805_s2 + $0x1a8] sm:$0xff]  ;;  %v771_v38 = vld [vmem:[%s16805_s2 + $0x340] sm:$0xff] }
  0x1b   :  { %553 = vmatprep.subr.bf16.mxu0 %v10453_v54  ;;  %v723_v54 = vld [vmem:[%s16805_s2 + $0x1c0] sm:$0xff]  ;;  %v10531_v60 = vcombine.high %v716_v50, %v720_v51  ;;  %v10530_v1 = vcombine.low %v716_v50, %v720_v51  ;;  %v744_v12 = vld [vmem:[%s16805_s2 + $0x268] sm:$0xff] }
  0x1c   :  { %515 = vmatpush1.bf16.msra.mxu1 %v10466_v55  ;;  %v727_v55 = vld [vmem:[%s16805_s2 + $0x1e0] sm:$0xff]  ;;  %v748_v18 = vld [vmem:[%s16805_s2 + $0x288] sm:$0xff] }
  0x1d   :  { %10476 = vmatmul.mubr.msk.bf16.vlgmr.msra.gmra.mrb[8].mxu0 %vm303_vm0, %v12519_v25  ;;  %594 = vmatprep.subr.bf16.mxu1 %v10455_v58  ;;  %v724_v58 = vld [vmem:[%s16805_s2 + $0x1c8] sm:$0xff]  ;;  %v10537_v0 = vcombine.high %v723_v54, %v727_v55  ;;  %v10536_v5 = vcombine.low %v723_v54, %v727_v55  ;;  %v775_v39 = vld [vmem:[%s16805_s2 + $0x360] sm:$0xff] }
  0x1e   :  { %554 = vmatpush1.bf16.msra.mxu0 %v10452_v59  ;;  %585 = vmatprep.mubr.bf16.mxu0 %v12435_v6  ;;  %v728_v59 = vld [vmem:[%s16805_s2 + $0x1e8] sm:$0xff]  ;;  %v10585_v46 = vcombine.high %v771_v38, %v775_v39  ;;  %v779_v51 = vld [vmem:[%s16805_s2 + $0x380] sm:$0xff] }
  0x1f   :  { %10477 = vmatmul.mubr.msk.bf16.vlgmr.msra.gmra.mrb[8].mxu1 %vm303_vm0, %v12519_v25  ;;  %555 = vmatprep.subr.bf16.mxu0 %v10469_v62  ;;  %v731_v62 = vld [vmem:[%s16805_s2 + $0x200] sm:$0xff]  ;;  %v10539_v4 = vcombine.high %v724_v58, %v728_v59  ;;  %v752_v19 = vld [vmem:[%s16805_s2 + $0x2a8] sm:$0xff] }
  0x20   :  { %595 = vmatpush1.bf16.msra.mxu1 %v10454_v63  ;;  %626 = vmatprep.mubr.bf16.mxu1 %v12435_v6  ;;  %v687_v6 = vld [vmem:[%s16805_s2 + $0xa0] sm:$0xff]  ;;  %v756_v27 = vld [vmem:[%s16805_s2 + $0x2c8] sm:$0xff] }
  0x21   :  { %596 = vmatprep.subr.bf16.mxu1 %v10471_v2  ;;  %v10497_v24 = vcombine.high %v683_v15, %v687_v6  ;;  %v10496_v30 = vcombine.low %v683_v15, %v687_v6  ;;  %v735_v63 = vld [vmem:[%s16805_s2 + $0x220] sm:$0xff]  ;;  %v732_v2 = vld [vmem:[%s16805_s2 + $0x208] sm:$0xff] }
  0x22   :  { %556 = vmatpush1.bf16.msra.mxu0 %v10468_v3  ;;  %v736_v3 = vld [vmem:[%s16805_s2 + $0x228] sm:$0xff]  ;;  %v10545_v9 = vcombine.high %v731_v62, %v735_v63  ;;  %v747_v15 = vld [vmem:[%s16805_s2 + $0x280] sm:$0xff] }
  0x23   :  { %6853 = vmatprep.subr.bf16.mxu0 %v10481_v7  ;;  %v739_v7 = vld [vmem:[%s16805_s2 + $0x240] sm:$0xff]  ;;  %v760_v28 = vld [vmem:[%s16805_s2 + $0x2e8] sm:$0xff] }
  0x24   :  { %597 = vmatpush1.bf16.msra.mxu1 %v10470_v10  ;;  %v10538_v10 = vcombine.low %v724_v58, %v728_v59  ;;  %v751_v6 = vld [vmem:[%s16805_s2 + $0x2a0] sm:$0xff]  ;;  %v764_v34 = vld [vmem:[%s16805_s2 + $0x308] sm:$0xff] }
  0x25   :  { %10478 = vmatmul.mubr.msk.bf16.vlgmr.msra.gmra.mrb[12].mxu0 %vm303_vm0, %v12519_v25  ;;  %7181 = vmatprep.subr.bf16.mxu1 %v10483_v13  ;;  %v10547_v13 = vcombine.high %v732_v2, %v736_v3  ;;  %v768_v35 = vld [vmem:[%s16805_s2 + $0x328] sm:$0xff]  ;;  %v787_v59 = vld [vmem:[%s16805_s2 + $0x3c0] sm:$0xff] }
  0x26   :  { %6854 = vmatpush1.bf16.msra.mxu0 %v10480_v14  ;;  %v10544_v14 = vcombine.low %v731_v62, %v735_v63  ;;  %v772_v42 = vld [vmem:[%s16805_s2 + $0x348] sm:$0xff]  ;;  %v10578_v47 = vcombine.low %v764_v34, %v768_v35 }
  0x27   :  { %10479 = vmatmul.mubr.msk.bf16.vlgmr.msra.gmra.mrb[12].mxu1 %vm303_vm0, %v12519_v25  ;;  %6855 = vmatprep.subr.bf16.mxu0 %v10489_v16  ;;  %v699_v25 = vld [vmem:[%s16805_s2 + $0x100] sm:$0xff]  ;;  %v10553_v16 = vcombine.high %v739_v7, %v743_v8  ;;  %v776_v43 = vld [vmem:[%s16805_s2 + $0x368] sm:$0xff] }
  0x28   :  { %7182 = vmatpush1.bf16.msra.mxu1 %v10482_v17  ;;  %v10513_v40 = vcombine.high %v699_v25, %v703_v31  ;;  %v10512_v45 = vcombine.low %v699_v25, %v703_v31  ;;  %v10546_v17 = vcombine.low %v732_v2, %v736_v3  ;;  %v763_v25 = vld [vmem:[%s16805_s2 + $0x300] sm:$0xff]  ;;  %v10586_v50 = vcombine.low %v772_v42, %v776_v43  ;;  %v784_v55 = vld [vmem:[%s16805_s2 + $0x3a8] sm:$0xff] }
  0x29   :  { %7183 = vmatprep.subr.bf16.mxu1 %v10491_v20  ;;  %v10555_v20 = vcombine.high %v740_v11, %v744_v12  ;;  %v767_v31 = vld [vmem:[%s16805_s2 + $0x320] sm:$0xff]  ;;  %v792_v63 = vld [vmem:[%s16805_s2 + $0x3e8] sm:$0xff] }
  0x2a   :  { %6856 = vmatpush1.bf16.msra.mxu0 %v10488_v21  ;;  %v10552_v21 = vcombine.low %v739_v7, %v743_v8  ;;  %v795_v3 = vld [vmem:[%s16805_s2 + $0x400] sm:$0xff]  ;;  %v800_v8 = vld [vmem:[%s16805_s2 + $0x428] sm:$0xff] }
  0x2b   :  { %6857 = vmatprep.subr.bf16.mxu0 %v10497_v24  ;;  %v10561_v24 = vcombine.high %v747_v15, %v751_v6 }
  0x2c   :  { %7184 = vmatpush1.bf16.msra.mxu1 %v10490_v26  ;;  %v10554_v26 = vcombine.low %v740_v11, %v744_v12 }
  0x2d   :  { %7185 = vmatprep.subr.bf16.mxu1 %v10499_v29  ;;  %v10563_v29 = vcombine.high %v748_v18, %v752_v19 }
  0x2e   :  { %6858 = vmatpush1.bf16.msra.mxu0 %v10496_v30  ;;  %v10560_v30 = vcombine.low %v747_v15, %v751_v6 }
  0x2f   :  { %6859 = vmatprep.subr.bf16.mxu0 %v10505_v32  ;;  %v10569_v32 = vcombine.high %v755_v22, %v759_v23 }
  0x30   :  { %7186 = vmatpush1.bf16.msra.mxu1 %v10498_v33  ;;  %v10562_v33 = vcombine.low %v748_v18, %v752_v19 }
  0x31   :  { %7187 = vmatprep.subr.bf16.mxu1 %v10507_v36  ;;  %v10571_v36 = vcombine.high %v756_v27, %v760_v28 }
  0x32   :  { %6860 = vmatpush1.bf16.msra.mxu0 %v10504_v37  ;;  %v10568_v37 = vcombine.low %v755_v22, %v759_v23 }
  0x33   :  { %6861 = vmatprep.subr.bf16.mxu0 %v10513_v40  ;;  %v10577_v40 = vcombine.high %v763_v25, %v767_v31 }
  0x34   :  { %7188 = vmatpush1.bf16.msra.mxu1 %v10506_v41  ;;  %v10570_v41 = vcombine.low %v756_v27, %v760_v28 }
  0x35   :  { %7189 = vmatprep.subr.bf16.mxu1 %v10515_v44  ;;  %v10579_v44 = vcombine.high %v764_v34, %v768_v35 }
  0x36   :  { %6862 = vmatpush1.bf16.msra.mxu0 %v10512_v45  ;;  %v10576_v45 = vcombine.low %v763_v25, %v767_v31 }
  0x37   :  { %6863 = vmatprep.subr.bf16.mxu0 %v10521_v48  ;;  %v10587_v48 = vcombine.high %v772_v42, %v776_v43 }
  0x38   :  { %7190 = vmatpush1.bf16.msra.mxu1 %v10514_v49  ;;  %v10584_v49 = vcombine.low %v771_v38, %v775_v39 }
  0x39   :  { %7191 = vmatprep.subr.bf16.mxu1 %v10523_v52  ;;  %v783_v52 = vld [vmem:[%s16805_s2 + $0x3a0] sm:$0xff] }
  0x3a   :  { %6864 = vmatpush1.bf16.msra.mxu0 %v10520_v53  ;;  %v780_v53 = vld [vmem:[%s16805_s2 + $0x388] sm:$0xff]  ;;  %v10593_v54 = vcombine.high %v779_v51, %v783_v52 }
  0x3b   :  { %6865 = vmatprep.subr.bf16.mxu0 %v10529_v56  ;;  %v10592_v56 = vcombine.low %v779_v51, %v783_v52  ;;  %v10595_v58 = vcombine.high %v780_v53, %v784_v55 }
  0x3c   :  { %7192 = vmatpush1.bf16.msra.mxu1 %v10522_v57  ;;  %v10594_v57 = vcombine.low %v780_v53, %v784_v55 }
  0x3d   :  { %7193 = vmatprep.subr.bf16.mxu1 %v10531_v60  ;;  %v791_v60 = vld [vmem:[%s16805_s2 + $0x3e0] sm:$0xff] }
  0x3e   :  { %6866 = vmatpush1.bf16.msra.mxu0 %v10528_v61  ;;  %v788_v61 = vld [vmem:[%s16805_s2 + $0x3c8] sm:$0xff]  ;;  %v10601_v62 = vcombine.high %v787_v59, %v791_v60 }
  0x3f   :  { %6867 = vmatprep.subr.bf16.mxu0 %v10537_v0  ;;  %v10600_v0 = vcombine.low %v787_v59, %v791_v60  ;;  %v10603_v2 = vcombine.high %v788_v61, %v792_v63 }
  0x40   :  { %7194 = vmatpush1.bf16.msra.mxu1 %v10530_v1  ;;  %v10602_v1 = vcombine.low %v788_v61, %v792_v63 }
  0x41   :  { %7195 = vmatprep.subr.bf16.mxu1 %v10539_v4  ;;  %v799_v4 = vld [vmem:[%s16805_s2 + $0x420] sm:$0xff] }
  0x42   :  { %6868 = vmatpush1.bf16.msra.mxu0 %v10536_v5  ;;  %v796_v5 = vld [vmem:[%s16805_s2 + $0x408] sm:$0xff]  ;;  %v10609_v7 = vcombine.high %v795_v3, %v799_v4 }
  0x43   :  { %6869 = vmatprep.subr.bf16.mxu0 %v10545_v9  ;;  %v10608_v9 = vcombine.low %v795_v3, %v799_v4  ;;  %v10611_v11 = vcombine.high %v796_v5, %v800_v8 }
  0x44   :  { %7196 = vmatpush1.bf16.msra.mxu1 %v10538_v10  ;;  %v10610_v10 = vcombine.low %v796_v5, %v800_v8 }
  0x45   :  { %7197 = vmatprep.subr.bf16.mxu1 %v10547_v13 }
  0x46   :  { %6870 = vmatpush1.bf16.msra.mxu0 %v10544_v14 }
  0x47   :  { %6871 = vmatprep.subr.bf16.mxu0 %v10553_v16 }
  0x48   :  { %7198 = vmatpush1.bf16.msra.mxu1 %v10546_v17 }
  0x49   :  { %7199 = vmatprep.subr.bf16.mxu1 %v10555_v20 }
  0x4a   :  { %6872 = vmatpush1.bf16.msra.mxu0 %v10552_v21 }
  0x4b   :  { %6873 = vmatprep.subr.bf16.mxu0 %v10561_v24 }
  0x4c   :  { %7200 = vmatpush1.bf16.msra.mxu1 %v10554_v26 }
  0x4d   :  { %7201 = vmatprep.subr.bf16.mxu1 %v10563_v29 }
  0x4e   :  { %6874 = vmatpush1.bf16.msra.mxu0 %v10560_v30 }
  0x4f   :  { %6875 = vmatprep.subr.bf16.mxu0 %v10569_v32 }
  0x50   :  { %7202 = vmatpush1.bf16.msra.mxu1 %v10562_v33 }
  0x51   :  { %7203 = vmatprep.subr.bf16.mxu1 %v10571_v36 }
  0x52   :  { %6876 = vmatpush1.bf16.msra.mxu0 %v10568_v37 }
  0x53   :  { %6877 = vmatprep.subr.bf16.mxu0 %v10577_v40 }
  0x54   :  { %7204 = vmatpush1.bf16.msra.mxu1 %v10570_v41 }
  0x55   :  { %7205 = vmatprep.subr.bf16.mxu1 %v10579_v44 }
  0x56   :  { %6878 = vmatpush1.bf16.msra.mxu0 %v10576_v45 }
  0x57   :  { %6879 = vmatprep.subr.bf16.mxu0 %v10585_v46 }
  0x58   :  { %7206 = vmatpush1.bf16.msra.mxu1 %v10578_v47 }
  0x59   :  { %7207 = vmatprep.subr.bf16.mxu1 %v10587_v48 }
  0x5a   :  { %6880 = vmatpush1.bf16.msra.mxu0 %v10584_v49 }
  0x5b   :  { %6881 = vmatprep.subr.bf16.mxu0 %v10593_v54 }
  0x5c   :  { %7208 = vmatpush1.bf16.msra.mxu1 %v10586_v50 }
  0x5d   :  { %7209 = vmatprep.subr.bf16.mxu1 %v10595_v58 }
  0x5e   :  { %6882 = vmatpush1.bf16.msra.mxu0 %v10592_v56 }
  0x5f   :  { %6883 = vmatprep.subr.bf16.mxu0 %v10601_v62 }
  0x60   :  { %7210 = vmatpush1.bf16.msra.mxu1 %v10594_v57 }
  0x61   :  { %7211 = vmatprep.subr.bf16.mxu1 %v10603_v2 }
  0x62   :  { %6884 = vmatpush1.bf16.msra.mxu0 %v10600_v0 }
  0x63   :  { %6894 = vmatprep.subr.bf16.mxu0 %v10609_v7 }
  0x64   :  { %7212 = vmatpush1.bf16.msra.mxu1 %v10602_v1 }
  0x65   :  { %7222 = vmatprep.subr.bf16.mxu1 %v10611_v11 }
  0x66   :  { %11 = vsyncpa [#allocation3], 0  ;;  %v63_v12 = vlaneseq  ;;  %v12809_v15 = vld [vmem:[%s16808_s5] sm:$0xff]  ;;  %v804_v32 = vld [vmem:[%s16805_s2 + $0x448] sm:$0xff]  ;;  %s12436_s26 = smov [#allocation2]   ;;  %vm10424_vm1 = vcmask 64512  }
  0x67   :  { %v803_v29 = vld [vmem:[%s16805_s2 + $0x440] sm:$0xff]  ;;  %v808_v33 = vld [vmem:[%s16805_s2 + $0x468] sm:$0xff]  ;;  %s10432_s0 = sshll.u32 %s12436_s26, 4  ;;  %s10433_s0 = int_to_ptr.vmem [resolvable:$true] %s10432_s0 }
  0x68   :  { %v12801_v13 = vshrl.u32 %v63_v12, 7  ;;  %v807_v31 = vld [vmem:[%s16805_s2 + $0x460] sm:$0xff]  ;;  %v10619_v41 = vcombine.high %v804_v32, %v808_v33  ;;  %v812_v44 = vld [vmem:[%s16805_s2 + $0x488] sm:$0xff]  ;;  %v10618_v50 = vcombine.low %v804_v32, %v808_v33  ;;  %p12416_p1 = scmp.lt.s32.totalorder %s10433_s0, %s10433_s0 }
  0x69   :  { %v10617_v40 = vcombine.high %v803_v29, %v807_v31  ;;  %v811_v42 = vld [vmem:[%s16805_s2 + $0x480] sm:$0xff]  ;;  %v816_v45 = vld [vmem:[%s16805_s2 + $0x4a8] sm:$0xff]  ;;  %v10616_v49 = vcombine.low %v803_v29, %v807_v31 }
  0x6a   :  { %v12804_v14 = vsub.s32 0, %v12801_v13  ;;  %v12812_v6 = vsub.s32 1, %v12801_v13  ;;  %v12815_v16 = vsub.s32 3, %v12801_v13  ;;  %v815_v43 = vld [vmem:[%s16805_s2 + $0x4a0] sm:$0xff]  ;;  %v10627_v53 = vcombine.high %v812_v44, %v816_v45  ;;  %v820_v57 = vld [vmem:[%s16805_s2 + $0x4c8] sm:$0xff] }
  0x6b   :  { %v10625_v52 = vcombine.high %v811_v42, %v815_v43  ;;  %v819_v54 = vld [vmem:[%s16805_s2 + $0x4c0] sm:$0xff]  ;;  %v824_v58 = vld [vmem:[%s16805_s2 + $0x4e8] sm:$0xff]  ;;  %v10624_v59 = vcombine.low %v811_v42, %v815_v43  ;;  %v10626_v60 = vcombine.low %v812_v44, %v816_v45  ;;  %v12928_v32 = vsub.s32 5, %v12801_v13 }
  0x6c   :  { %v66_v17 = vrot.slane %v12809_v15, %v12804_v14  ;;  %v70_v18 = vrot.slane %v12809_v15, %v12812_v6  ;;  %v78_v20 = vrot.slane %v12809_v15, %v12815_v16  ;;  %v823_v56 = vld [vmem:[%s16805_s2 + $0x4e0] sm:$0xff]  ;;  %v10635_v62 = vcombine.high %v820_v57, %v824_v58  ;;  %v828_v1 = vld [vmem:[%s16805_s2 + $0x508] sm:$0xff] }
  0x6d   :  { %v10633_v61 = vcombine.high %v819_v54, %v823_v56  ;;  %v827_v63 = vld [vmem:[%s16805_s2 + $0x500] sm:$0xff]  ;;  %v832_v2 = vld [vmem:[%s16805_s2 + $0x528] sm:$0xff]  ;;  %v10632_v4 = vcombine.low %v819_v54, %v823_v56  ;;  %v10634_v5 = vcombine.low %v820_v57, %v824_v58 }
  0x6e   :  { %v831_v0 = vld [vmem:[%s16805_s2 + $0x520] sm:$0xff]  ;;  %v848_v31 = vld [vmem:[%s16805_s2 + $0x5a8] sm:$0xff] }
  0x6f   :  { %v10641_v8 = vcombine.high %v827_v63, %v831_v0  ;;  %v839_v12 = vld [vmem:[%s16805_s2 + $0x560] sm:$0xff] }
  0x70   :  { %v851_v43 = vld [vmem:[%s16805_s2 + $0x5c0] sm:$0xff] }
  0x71   :  { %v855_v45 = vld [vmem:[%s16805_s2 + $0x5e0] sm:$0xff] }
  0x72   :  { %v859_v57 = vld [vmem:[%s16805_s2 + $0x600] sm:$0xff] }
  0x73   :  { %v863_v58 = vld [vmem:[%s16805_s2 + $0x620] sm:$0xff] }
  0xe0   :  { %v341_v19 = vpop.f32.mrb[0].mxu0  ;;  %v12823_v26 = vpop.f32.mrb[0].mxu1 }
  0xe1   :  { %v342_v21 = vadd.f32 %v341_v19, %v66_v17  ;;  %v343_v22 = vpop.f32.mrb[1].mxu0  ;;  %v384_v30 = vpop.f32.mrb[1].mxu1  ;;  %v836_v17 = vld [vmem:[%s16805_s2 + $0x548] sm:$0xff] }
  0xe2   :  { %v344_v23 = vadd.f32 %v343_v22, %v70_v18  ;;  %v345_v24 = vpop.f32.mrb[2].mxu0  ;;  %v385_v34 = vadd.f32 %v384_v30, %v78_v20  ;;  %v386_v35 = vpop.f32.mrb[2].mxu1  ;;  %v840_v18 = vld [vmem:[%s16805_s2 + $0x568] sm:$0xff]  ;;  %v12906_v20 = vsub.s32 4, %v12801_v13  ;;  %v10642_v22 = vcombine.low %v828_v1, %v832_v2  ;;  %v847_v30 = vld [vmem:[%s16805_s2 + $0x5a0] sm:$0xff] }
  0xe3   :  { %v635_v27 = vmax.f32 %v342_v21, 0.0  ;;  %v346_v28 = vpop.f32.mrb[3].mxu0  ;;  %v387_v36 = vpop.f32.mrb[3].mxu1  ;;  %v10640_v21 = vcombine.low %v827_v63, %v831_v0  ;;  %v10673_v63 = vcombine.high %v859_v57, %v863_v58 }
  0xe4   :  { %v636_v25 = vmax.f32 %v344_v23, 0.0  ;;  %v638_v38 = vmax.f32 %v385_v34, 0.0  ;;  %v12911_v23 = vld [vmem:[%s16808_s5 + $0x8] sm:$0xff]  ;;  %v843_v28 = vld [vmem:[%s16805_s2 + $0x580] sm:$0xff]  ;;  %v10650_v36 = vcombine.low %v836_v17, %v840_v18 }
  0xe5   :  { %v12839_v39 = vpack.c.bf16 %v635_v27, %v635_v27  ;;  %v10651_v27 = vcombine.high %v836_v17, %v840_v18  ;;  %v114_v29 = vrot.slane %v12911_v23, %v12906_v20  ;;  %v875_v17 = vld [vmem:[%s16805_s2 + $0x680] sm:$0xff] }
  0xe6   :  { %v12837_v37 = vpack.c.bf16 %v636_v25, %v636_v25  ;;  %v12855_v46 = vpack.c.bf16 %v638_v38, %v638_v38  ;;  %v844_v25 = vld [vmem:[%s16805_s2 + $0x588] sm:$0xff]  ;;  %v118_v38 = vrot.slane %v12911_v23, %v12928_v32 }
  0xe7   :  { %v10659_v42 = vcombine.high %v844_v25, %v848_v31  ;;  %v10658_v54 = vcombine.low %v844_v25, %v848_v31  ;;  %v883_v31 = vld [vmem:[%s16805_s2 + $0x6c0] sm:$0xff] }
  0xe8   :  { %6885 = vmatprep.mubr.bf16.mxu0 %v12837_v37  ;;  %7213 = vmatprep.mubr.bf16.mxu1 %v12837_v37  ;;  %v12857_v47 = vpop.f32.mrb[4].mxu0 }
  0xe9   :  { %6886 = vmatmul.mubr.bf16.vlgmr.msra.gmra.mrb[16].mxu0 %v12839_v39  ;;  %7214 = vmatmul.mubr.bf16.vlgmr.msra.gmra.mrb[16].mxu1 %v12839_v39  ;;  %v12861_v48 = vpop.f32.mrb[5].mxu0 }
  0xea   :  { %6895 = vmatpush1.bf16.msra.mxu0 %v10608_v9  ;;  %7223 = vmatpush1.bf16.msra.mxu1 %v10610_v10  ;;  %v427_v51 = vpop.f32.mrb[6].mxu0  ;;  %v10643_v9 = vcombine.high %v828_v1, %v832_v2  ;;  %v835_v10 = vld [vmem:[%s16805_s2 + $0x540] sm:$0xff] }
  0xeb   :  { %6896 = vmatprep.subr.bf16.mxu0 %v10617_v40  ;;  %7224 = vmatprep.subr.bf16.mxu1 %v10619_v41  ;;  %v428_v55 = vpop.f32.mrb[7].mxu0  ;;  %v10649_v24 = vcombine.high %v835_v10, %v839_v12  ;;  %v10648_v35 = vcombine.low %v835_v10, %v839_v12  ;;  %v10657_v41 = vcombine.high %v843_v28, %v847_v30  ;;  %v867_v1 = vld [vmem:[%s16805_s2 + $0x640] sm:$0xff]  ;;  %v12972_v10 = vpop.f32.mrb[4].mxu1 }
  0xec   :  { %6926 = vmatprep.mubr.bf16.mxu0 %v12855_v46  ;;  %7254 = vmatprep.mubr.bf16.mxu1 %v12855_v46  ;;  %v10665_v55 = vcombine.high %v851_v43, %v855_v45  ;;  %v871_v2 = vld [vmem:[%s16805_s2 + $0x660] sm:$0xff]  ;;  %v12977_v18 = vpop.f32.mrb[5].mxu1 }
  0xee   :  { %6897 = vmatpush1.bf16.msra.mxu0 %v10616_v49  ;;  %7225 = vmatpush1.bf16.msra.mxu1 %v10618_v50  ;;  %v852_v49 = vld [vmem:[%s16805_s2 + $0x5c8] sm:$0xff] }
  0xef   :  { %6898 = vmatprep.subr.bf16.mxu0 %v10625_v52  ;;  %7226 = vmatprep.subr.bf16.mxu1 %v10627_v53  ;;  %v856_v50 = vld [vmem:[%s16805_s2 + $0x5e8] sm:$0xff]  ;;  %v10656_v53 = vcombine.low %v843_v28, %v847_v30  ;;  %v10680_v28 = vcombine.low %v867_v1, %v871_v2 }
  0xf0   :  { %v12889_v3 = vpop.f32.mrb[8].mxu0  ;;  %v10667_v56 = vcombine.high %v852_v49, %v856_v50 }
  0xf1   :  { %v12891_v7 = vpop.f32.mrb[9].mxu0 }
  0xf2   :  { %6899 = vmatpush1.bf16.msra.mxu0 %v10624_v59  ;;  %7227 = vmatpush1.bf16.msra.mxu1 %v10626_v60  ;;  %v509_v11 = vpop.f32.mrb[10].mxu0  ;;  %v860_v59 = vld [vmem:[%s16805_s2 + $0x608] sm:$0xff] }
  0xf3   :  { %6900 = vmatprep.subr.bf16.mxu0 %v10633_v61  ;;  %7228 = vmatprep.subr.bf16.mxu1 %v10635_v62  ;;  %v510_v19 = vpop.f32.mrb[11].mxu0  ;;  %v864_v60 = vld [vmem:[%s16805_s2 + $0x628] sm:$0xff]  ;;  %v10664_v61 = vcombine.low %v851_v43, %v855_v45  ;;  %v10666_v62 = vcombine.low %v852_v49, %v856_v50  ;;  %v10681_v11 = vcombine.high %v867_v1, %v871_v2  ;;  %v891_v49 = vld [vmem:[%s16805_s2 + $0x700] sm:$0xff] }
  0xf4   :  { %v10675_v0 = vcombine.high %v860_v59, %v864_v60  ;;  %v879_v19 = vld [vmem:[%s16805_s2 + $0x6a0] sm:$0xff]  ;;  %v110_v50 = vrot.slane %v12911_v23, %v12815_v16  ;;  %v900_v2 = vld [vmem:[%s16805_s2 + $0x748] sm:$0xff] }
  0xf5   :  { %v10689_v30 = vcombine.high %v875_v17, %v879_v19  ;;  %v903_v1 = vld [vmem:[%s16805_s2 + $0x760] sm:$0xff] }
  0xf6   :  { %6901 = vmatpush1.bf16.msra.mxu0 %v10632_v4  ;;  %7229 = vmatpush1.bf16.msra.mxu1 %v10634_v5  ;;  %v868_v4 = vld [vmem:[%s16805_s2 + $0x648] sm:$0xff] }
  0xf7   :  { %6902 = vmatprep.subr.bf16.mxu0 %v10641_v8  ;;  %7230 = vmatprep.subr.bf16.mxu1 %v10643_v9  ;;  %v872_v5 = vld [vmem:[%s16805_s2 + $0x668] sm:$0xff]  ;;  %v10672_v8 = vcombine.low %v859_v57, %v863_v58  ;;  %v10674_v9 = vcombine.low %v860_v59, %v864_v60 }
  0xf8   :  { %v587_v33 = vpop.f32.mrb[12].mxu0  ;;  %v10683_v12 = vcombine.high %v868_v4, %v872_v5 }
  0xf9   :  { %v12930_v34 = vadd.f32 %v587_v33, %v114_v29  ;;  %v589_v40 = vpop.f32.mrb[13].mxu0  ;;  %v10682_v29 = vcombine.low %v868_v4, %v872_v5  ;;  %v887_v33 = vld [vmem:[%s16805_s2 + $0x6e0] sm:$0xff]  ;;  %v904_v4 = vld [vmem:[%s16805_s2 + $0x768] sm:$0xff]  ;;  %v13036_v5 = vsub.s32 6, %v12801_v13 }
  0xfa   :  { %6903 = vmatpush1.bf16.msra.mxu0 %v10640_v21  ;;  %7231 = vmatpush1.bf16.msra.mxu1 %v10642_v22  ;;  %v591_v44 = vpop.f32.mrb[14].mxu0  ;;  %v12946_v51 = vadd.f32 %v589_v40, %v118_v38  ;;  %v876_v21 = vld [vmem:[%s16805_s2 + $0x688] sm:$0xff]  ;;  %v13001_v38 = vsub.s32 2, %v12801_v13  ;;  %v10688_v40 = vcombine.low %v875_v17, %v879_v19  ;;  %v10696_v60 = vcombine.low %v883_v31, %v887_v33 }
  0xfb   :  { %6904 = vmatprep.subr.bf16.mxu0 %v10649_v24  ;;  %7232 = vmatprep.subr.bf16.mxu1 %v10651_v27  ;;  %v592_v52 = vpop.f32.mrb[15].mxu0  ;;  %v880_v22 = vld [vmem:[%s16805_s2 + $0x6a8] sm:$0xff]  ;;  %v468_v24 = vpop.f32.mrb[6].mxu1  ;;  %v10697_v44 = vcombine.high %v883_v31, %v887_v33 }
  0xfc   :  { %v469_v27 = vpop.f32.mrb[7].mxu1  ;;  %v10691_v25 = vcombine.high %v876_v21, %v880_v22  ;;  %v74_v31 = vrot.slane %v12809_v15, %v13001_v38 }
  0xfd   :  { %v546_v43 = vpop.f32.mrb[8].mxu1  ;;  %v911_v27 = vld [vmem:[%s16805_s2 + $0x7a0] sm:$0xff] }
  0xfe   :  { %6905 = vmatpush1.bf16.msra.mxu0 %v10648_v35  ;;  %7233 = vmatpush1.bf16.msra.mxu1 %v10650_v36  ;;  %v884_v35 = vld [vmem:[%s16805_s2 + $0x6c8] sm:$0xff]  ;;  %v548_v52 = vpop.f32.mrb[9].mxu1 }
  0xff   :  { %6906 = vmatprep.subr.bf16.mxu0 %v10657_v41  ;;  %7234 = vmatprep.subr.bf16.mxu1 %v10659_v42  ;;  %v888_v36 = vld [vmem:[%s16805_s2 + $0x6e8] sm:$0xff]  ;;  %v10690_v41 = vcombine.low %v876_v21, %v880_v22  ;;  %v106_v42 = vrot.slane %v12911_v23, %v13001_v38  ;;  %v550_v57 = vpop.f32.mrb[10].mxu1  ;;  %v13021_v58 = vadd.f32 %v548_v52, %v110_v50 }
 0x100   :  { %v10699_v45 = vcombine.high %v884_v35, %v888_v36  ;;  %v551_v59 = vpop.f32.mrb[11].mxu1  ;;  %v10715_v22 = vcombine.high %v900_v2, %v904_v4  ;;  %v383_v50 = vadd.f32 %v12823_v26, %v74_v31  ;;  %v923_v57 = vld [vmem:[%s16805_s2 + $0x800] sm:$0xff]  ;;  %v924_v26 = vld [vmem:[%s16805_s2 + $0x808] sm:$0xff] }
 0x101   :  { %v628_v17 = vpop.f32.mrb[12].mxu1  ;;  %v927_v59 = vld [vmem:[%s16805_s2 + $0x820] sm:$0xff] }
 0x102   :  { %6907 = vmatpush1.bf16.msra.mxu0 %v10656_v53  ;;  %7235 = vmatpush1.bf16.msra.mxu1 %v10658_v54  ;;  %v895_v53 = vld [vmem:[%s16805_s2 + $0x720] sm:$0xff]  ;;  %v892_v54 = vld [vmem:[%s16805_s2 + $0x708] sm:$0xff]  ;;  %v630_v24 = vpop.f32.mrb[13].mxu1 }
 0x103   :  { %6908 = vmatprep.subr.bf16.mxu0 %v10665_v55  ;;  %7236 = vmatprep.subr.bf16.mxu1 %v10667_v56  ;;  %v896_v55 = vld [vmem:[%s16805_s2 + $0x728] sm:$0xff]  ;;  %v13019_v56 = vadd.f32 %v546_v43, %v106_v42  ;;  %v915_v42 = vld [vmem:[%s16805_s2 + $0x7c0] sm:$0xff] }
 0x104   :  { %v919_v43 = vld [vmem:[%s16805_s2 + $0x7e0] sm:$0xff] }
 0x106   :  { %6909 = vmatpush1.bf16.msra.mxu0 %v10664_v61  ;;  %7237 = vmatpush1.bf16.msra.mxu1 %v10666_v62  ;;  %v10698_v61 = vcombine.low %v884_v35, %v888_v36  ;;  %v10705_v62 = vcombine.high %v891_v49, %v895_v53  ;;  %v10714_v36 = vcombine.low %v900_v2, %v904_v4  ;;  %v931_v4 = vld [vmem:[%s16805_s2 + $0x840] sm:$0xff] }
 0x107   :  { %6910 = vmatprep.subr.bf16.mxu0 %v10673_v63  ;;  %7238 = vmatprep.subr.bf16.mxu1 %v10675_v0  ;;  %v10707_v63 = vcombine.high %v892_v54, %v896_v55  ;;  %v899_v0 = vld [vmem:[%s16805_s2 + $0x740] sm:$0xff] }
 0x108   :  { %v10713_v21 = vcombine.high %v899_v0, %v903_v1  ;;  %v10712_v35 = vcombine.low %v899_v0, %v903_v1  ;;  %v10737_v1 = vcombine.high %v923_v57, %v927_v59 }
 0x10a   :  { %6911 = vmatpush1.bf16.msra.mxu0 %v10672_v8  ;;  %7239 = vmatpush1.bf16.msra.mxu1 %v10674_v9  ;;  %v13039_v8 = vsub.s32 7, %v12801_v13  ;;  %v10704_v9 = vcombine.low %v891_v49, %v895_v53  ;;  %v907_v13 = vld [vmem:[%s16805_s2 + $0x780] sm:$0xff]  ;;  %v86_v49 = vrot.slane %v12809_v15, %v12928_v32 }
 0x10b   :  { %6912 = vmatprep.subr.bf16.mxu0 %v10681_v11  ;;  %7240 = vmatprep.subr.bf16.mxu1 %v10683_v12  ;;  %v10706_v11 = vcombine.low %v892_v54, %v896_v55  ;;  %v122_v12 = vrot.slane %v12911_v23, %v13036_v5  ;;  %v10720_v52 = vcombine.low %v907_v13, %v911_v27 }
 0x10c   :  { %v126_v19 = vrot.slane %v12911_v23, %v13039_v8  ;;  %v912_v23 = vld [vmem:[%s16805_s2 + $0x7a8] sm:$0xff]  ;;  %v10729_v54 = vcombine.high %v915_v42, %v919_v43 }
 0x10e   :  { %6913 = vmatpush1.bf16.msra.mxu0 %v10680_v28  ;;  %7241 = vmatpush1.bf16.msra.mxu1 %v10682_v29  ;;  %v908_v28 = vld [vmem:[%s16805_s2 + $0x788] sm:$0xff]  ;;  %v13057_v29 = vadd.f32 %v628_v17, %v122_v12 }
 0x10f   :  { %6914 = vmatprep.subr.bf16.mxu0 %v10689_v30  ;;  %7242 = vmatprep.subr.bf16.mxu1 %v10691_v25  ;;  %v13059_v30 = vadd.f32 %v630_v24, %v126_v19  ;;  %v632_v25 = vpop.f32.mrb[14].mxu1  ;;  %v10722_v53 = vcombine.low %v908_v28, %v912_v23  ;;  %v10736_v19 = vcombine.low %v923_v57, %v927_v59  ;;  %v939_v24 = vld [vmem:[%s16805_s2 + $0x880] sm:$0xff] }
 0x110   :  { %v633_v33 = vpop.f32.mrb[15].mxu1 }
 0x112   :  { %6915 = vmatpush1.bf16.msra.mxu0 %v10688_v40  ;;  %7243 = vmatpush1.bf16.msra.mxu1 %v10690_v41  ;;  %v10721_v40 = vcombine.high %v907_v13, %v911_v27  ;;  %v10723_v41 = vcombine.high %v908_v28, %v912_v23  ;;  %v943_v27 = vld [vmem:[%s16805_s2 + $0x8a0] sm:$0xff]  ;;  %v940_v28 = vld [vmem:[%s16805_s2 + $0x888] sm:$0xff] }
 0x113   :  { %6916 = vmatprep.subr.bf16.mxu0 %v10697_v44  ;;  %7244 = vmatprep.subr.bf16.mxu1 %v10699_v45  ;;  %v916_v44 = vld [vmem:[%s16805_s2 + $0x7c8] sm:$0xff] }
 0x114   :  { %v920_v45 = vld [vmem:[%s16805_s2 + $0x7e8] sm:$0xff] }
 0x115   :  { %v10731_v55 = vcombine.high %v916_v44, %v920_v45  ;;  %v10730_v0 = vcombine.low %v916_v44, %v920_v45  ;;  %v944_v23 = vld [vmem:[%s16805_s2 + $0x8a8] sm:$0xff]  ;;  %v10752_v44 = vcombine.low %v939_v24, %v943_v27 }
 0x116   :  { %6917 = vmatpush1.bf16.msra.mxu0 %v10696_v60  ;;  %7245 = vmatpush1.bf16.msra.mxu1 %v10698_v61  ;;  %v928_v60 = vld [vmem:[%s16805_s2 + $0x828] sm:$0xff]  ;;  %v426_v61 = vadd.f32 %v12861_v48, %v86_v49  ;;  %v10754_v45 = vcombine.low %v940_v28, %v944_v23 }
 0x117   :  { %6918 = vmatprep.subr.bf16.mxu0 %v10705_v62  ;;  %7246 = vmatprep.subr.bf16.mxu1 %v10707_v63  ;;  %v637_v62 = vmax.f32 %v383_v50, 0.0  ;;  %v10728_v63 = vcombine.low %v915_v42, %v919_v43  ;;  %v10739_v2 = vcombine.high %v924_v26, %v928_v60  ;;  %v932_v48 = vld [vmem:[%s16805_s2 + $0x848] sm:$0xff] }
 0x118   :  { %v640_v12 = vmax.f32 %v426_v61, 0.0  ;;  %v948_v42 = vld [vmem:[%s16805_s2 + $0x8c8] sm:$0xff]  ;;  %v963_v61 = vld [vmem:[%s16805_s2 + $0x940] sm:$0xff] }
 0x119   :  { %v13103_v17 = vpack.c.bf16 %v637_v62, %v637_v62  ;;  %v952_v43 = vld [vmem:[%s16805_s2 + $0x8e8] sm:$0xff]  ;;  %v967_v62 = vld [vmem:[%s16805_s2 + $0x960] sm:$0xff] }
 0x11a   :  { %6919 = vmatpush1.bf16.msra.mxu0 %v10704_v9  ;;  %7247 = vmatpush1.bf16.msra.mxu1 %v10706_v11  ;;  %v935_v9 = vld [vmem:[%s16805_s2 + $0x860] sm:$0xff]  ;;  %v936_v11 = vld [vmem:[%s16805_s2 + $0x868] sm:$0xff]  ;;  %v13117_v25 = vpack.c.bf16 %v640_v12, %v640_v12  ;;  %v10763_v50 = vcombine.high %v948_v42, %v952_v43  ;;  %v10762_v59 = vcombine.low %v948_v42, %v952_v43 }
 0x11b   :  { %6920 = vmatprep.subr.bf16.mxu0 %v10713_v21  ;;  %7248 = vmatprep.subr.bf16.mxu1 %v10715_v22  ;;  %v10738_v21 = vcombine.low %v924_v26, %v928_v60  ;;  %v10745_v22 = vcombine.high %v931_v4, %v935_v9  ;;  %v10747_v13 = vcombine.high %v932_v48, %v936_v11  ;;  %v972_v12 = vld [vmem:[%s16805_s2 + $0x988] sm:$0xff]  ;;  %v991_v42 = vld [vmem:[%s16805_s2 + $0xa20] sm:$0xff] }
 0x11c   :  { %v10744_v31 = vcombine.low %v931_v4, %v935_v9  ;;  %v10746_v33 = vcombine.low %v932_v48, %v936_v11  ;;  %v10777_v4 = vcombine.high %v963_v61, %v967_v62  ;;  %v971_v48 = vld [vmem:[%s16805_s2 + $0x980] sm:$0xff]  ;;  %v988_v43 = vld [vmem:[%s16805_s2 + $0xa08] sm:$0xff] }
 0x11d   :  { %v975_v11 = vld [vmem:[%s16805_s2 + $0x9a0] sm:$0xff] }
 0x11e   :  { %6921 = vmatpush1.bf16.msra.mxu0 %v10712_v35  ;;  %7249 = vmatpush1.bf16.msra.mxu1 %v10714_v36  ;;  %v10753_v35 = vcombine.high %v939_v24, %v943_v27  ;;  %v10755_v36 = vcombine.high %v940_v28, %v944_v23  ;;  %v979_v27 = vld [vmem:[%s16805_s2 + $0x9c0] sm:$0xff]  ;;  %v980_v23 = vld [vmem:[%s16805_s2 + $0x9c8] sm:$0xff] }
 0x11f   :  { %6922 = vmatprep.subr.bf16.mxu0 %v10721_v40  ;;  %7250 = vmatprep.subr.bf16.mxu1 %v10723_v41  ;;  %v947_v40 = vld [vmem:[%s16805_s2 + $0x8c0] sm:$0xff] }
 0x120   :  { %v951_v41 = vld [vmem:[%s16805_s2 + $0x8e0] sm:$0xff] }
 0x121   :  { %v10761_v49 = vcombine.high %v947_v40, %v951_v41  ;;  %v10760_v57 = vcombine.low %v947_v40, %v951_v41  ;;  %v983_v28 = vld [vmem:[%s16805_s2 + $0x9e0] sm:$0xff] }
 0x122   :  { %6923 = vmatpush1.bf16.msra.mxu0 %v10720_v52  ;;  %7251 = vmatpush1.bf16.msra.mxu1 %v10722_v53  ;;  %v955_v52 = vld [vmem:[%s16805_s2 + $0x900] sm:$0xff] }
 0x123   :  { %6924 = vmatprep.subr.bf16.mxu0 %v10729_v54  ;;  %7252 = vmatprep.subr.bf16.mxu1 %v10731_v55  ;;  %v959_v53 = vld [vmem:[%s16805_s2 + $0x920] sm:$0xff]  ;;  %v956_v54 = vld [vmem:[%s16805_s2 + $0x908] sm:$0xff] }
 0x124   :  { %v960_v55 = vld [vmem:[%s16805_s2 + $0x928] sm:$0xff]  ;;  %v10769_v26 = vcombine.high %v955_v52, %v959_v53  ;;  %v987_v41 = vld [vmem:[%s16805_s2 + $0xa00] sm:$0xff] }
 0x125   :  { %v10771_v60 = vcombine.high %v956_v54, %v960_v55 }
 0x126   :  { %6925 = vmatpush1.bf16.msra.mxu0 %v10728_v63  ;;  %7253 = vmatpush1.bf16.msra.mxu1 %v10730_v0  ;;  %v964_v63 = vld [vmem:[%s16805_s2 + $0x948] sm:$0xff] }
 0x127   :  { %6935 = vmatprep.subr.bf16.mxu0 %v10737_v1  ;;  %7263 = vmatprep.subr.bf16.mxu1 %v10739_v2  ;;  %v968_v0 = vld [vmem:[%s16805_s2 + $0x968] sm:$0xff]  ;;  %v10768_v1 = vcombine.low %v955_v52, %v959_v53  ;;  %v10770_v2 = vcombine.low %v956_v54, %v960_v55  ;;  %v995_v53 = vld [vmem:[%s16805_s2 + $0xa40] sm:$0xff] }
 0x128   :  { %v10779_v9 = vcombine.high %v964_v63, %v968_v0  ;;  %v999_v54 = vld [vmem:[%s16805_s2 + $0xa60] sm:$0xff]  ;;  %v996_v55 = vld [vmem:[%s16805_s2 + $0xa48] sm:$0xff] }
 0x129   :  { %6927 = vmatmul.mubr.bf16.vlgmr.msra.gmra.mrb[16].mxu0 %v13103_v17  ;;  %7255 = vmatmul.mubr.bf16.vlgmr.msra.gmra.mrb[16].mxu1 %v13103_v17 }
 0x12a   :  { %6936 = vmatpush1.bf16.msra.mxu0 %v10736_v19  ;;  %7264 = vmatpush1.bf16.msra.mxu1 %v10738_v21  ;;  %v976_v19 = vld [vmem:[%s16805_s2 + $0x9a8] sm:$0xff]  ;;  %v10776_v21 = vcombine.low %v963_v61, %v967_v62  ;;  %v1003_v62 = vld [vmem:[%s16805_s2 + $0xa80] sm:$0xff] }
 0x12b   :  { %6937 = vmatprep.subr.bf16.mxu0 %v10745_v22  ;;  %7265 = vmatprep.subr.bf16.mxu1 %v10747_v13  ;;  %v10778_v22 = vcombine.low %v964_v63, %v968_v0  ;;  %v10785_v13 = vcombine.high %v971_v48, %v975_v11  ;;  %v10787_v24 = vcombine.high %v972_v12, %v976_v19  ;;  %v1007_v63 = vld [vmem:[%s16805_s2 + $0xaa0] sm:$0xff]  ;;  %v1004_v0 = vld [vmem:[%s16805_s2 + $0xa88] sm:$0xff] }
 0x12c   :  { %6967 = vmatprep.mubr.bf16.mxu0 %v13117_v25  ;;  %7295 = vmatprep.mubr.bf16.mxu1 %v13117_v25 }
 0x12e   :  { %6938 = vmatpush1.bf16.msra.mxu0 %v10744_v31  ;;  %7266 = vmatpush1.bf16.msra.mxu1 %v10746_v33  ;;  %v984_v31 = vld [vmem:[%s16805_s2 + $0x9e8] sm:$0xff]  ;;  %v10784_v33 = vcombine.low %v971_v48, %v975_v11  ;;  %v1011_v11 = vld [vmem:[%s16805_s2 + $0xac0] sm:$0xff] }
 0x12f   :  { %6939 = vmatprep.subr.bf16.mxu0 %v10753_v35  ;;  %7267 = vmatprep.subr.bf16.mxu1 %v10755_v36  ;;  %v10786_v35 = vcombine.low %v972_v12, %v976_v19  ;;  %v10793_v36 = vcombine.high %v979_v27, %v983_v28  ;;  %v10795_v40 = vcombine.high %v980_v23, %v984_v31  ;;  %v1015_v12 = vld [vmem:[%s16805_s2 + $0xae0] sm:$0xff]  ;;  %v1012_v19 = vld [vmem:[%s16805_s2 + $0xac8] sm:$0xff] }
 0x132   :  { %6940 = vmatpush1.bf16.msra.mxu0 %v10752_v44  ;;  %7268 = vmatpush1.bf16.msra.mxu1 %v10754_v45  ;;  %v992_v44 = vld [vmem:[%s16805_s2 + $0xa28] sm:$0xff]  ;;  %v10792_v45 = vcombine.low %v979_v27, %v983_v28  ;;  %v1019_v28 = vld [vmem:[%s16805_s2 + $0xb00] sm:$0xff] }
 0x133   :  { %6941 = vmatprep.subr.bf16.mxu0 %v10761_v49  ;;  %7269 = vmatprep.subr.bf16.mxu1 %v10763_v50  ;;  %v10794_v49 = vcombine.low %v980_v23, %v984_v31  ;;  %v10801_v50 = vcombine.high %v987_v41, %v991_v42  ;;  %v10803_v52 = vcombine.high %v988_v43, %v992_v44  ;;  %v1023_v23 = vld [vmem:[%s16805_s2 + $0xb20] sm:$0xff]  ;;  %v1020_v31 = vld [vmem:[%s16805_s2 + $0xb08] sm:$0xff] }
 0x136   :  { %6942 = vmatpush1.bf16.msra.mxu0 %v10760_v57  ;;  %7270 = vmatpush1.bf16.msra.mxu1 %v10762_v59  ;;  %v1000_v57 = vld [vmem:[%s16805_s2 + $0xa68] sm:$0xff]  ;;  %v10800_v59 = vcombine.low %v987_v41, %v991_v42  ;;  %v1027_v42 = vld [vmem:[%s16805_s2 + $0xb40] sm:$0xff] }
 0x137   :  { %6943 = vmatprep.subr.bf16.mxu0 %v10769_v26  ;;  %7271 = vmatprep.subr.bf16.mxu1 %v10771_v60  ;;  %v10802_v26 = vcombine.low %v988_v43, %v992_v44  ;;  %v10809_v60 = vcombine.high %v995_v53, %v999_v54  ;;  %v10811_v61 = vcombine.high %v996_v55, %v1000_v57  ;;  %v1031_v43 = vld [vmem:[%s16805_s2 + $0xb60] sm:$0xff]  ;;  %v1028_v44 = vld [vmem:[%s16805_s2 + $0xb48] sm:$0xff] }
 0x13a   :  { %6944 = vmatpush1.bf16.msra.mxu0 %v10768_v1  ;;  %7272 = vmatpush1.bf16.msra.mxu1 %v10770_v2  ;;  %v1008_v1 = vld [vmem:[%s16805_s2 + $0xaa8] sm:$0xff]  ;;  %v10808_v2 = vcombine.low %v995_v53, %v999_v54  ;;  %v1035_v54 = vld [vmem:[%s16805_s2 + $0xb80] sm:$0xff] }
 0x13b   :  { %6945 = vmatprep.subr.bf16.mxu0 %v10777_v4  ;;  %7273 = vmatprep.subr.bf16.mxu1 %v10779_v9  ;;  %v10810_v4 = vcombine.low %v996_v55, %v1000_v57  ;;  %v10817_v9 = vcombine.high %v1003_v62, %v1007_v63  ;;  %v10819_v48 = vcombine.high %v1004_v0, %v1008_v1  ;;  %v1039_v55 = vld [vmem:[%s16805_s2 + $0xba0] sm:$0xff]  ;;  %v1036_v57 = vld [vmem:[%s16805_s2 + $0xb88] sm:$0xff] }
 0x13e   :  { %6946 = vmatpush1.bf16.msra.mxu0 %v10776_v21  ;;  %7274 = vmatpush1.bf16.msra.mxu1 %v10778_v22  ;;  %v1016_v21 = vld [vmem:[%s16805_s2 + $0xae8] sm:$0xff]  ;;  %v10816_v22 = vcombine.low %v1003_v62, %v1007_v63  ;;  %v10849_v62 = vcombine.high %v1035_v54, %v1039_v55 }
 0x13f   :  { %6947 = vmatprep.subr.bf16.mxu0 %v10785_v13  ;;  %7275 = vmatprep.subr.bf16.mxu1 %v10787_v24  ;;  %v10818_v13 = vcombine.low %v1004_v0, %v1008_v1  ;;  %v10825_v24 = vcombine.high %v1011_v11, %v1015_v12  ;;  %v10827_v27 = vcombine.high %v1012_v19, %v1016_v21  ;;  %v1043_v0 = vld [vmem:[%s16805_s2 + $0xbc0] sm:$0xff] }
 0x140   :  { %v1047_v1 = vld [vmem:[%s16805_s2 + $0xbe0] sm:$0xff] }
 0x142   :  { %6948 = vmatpush1.bf16.msra.mxu0 %v10784_v33  ;;  %7276 = vmatpush1.bf16.msra.mxu1 %v10786_v35  ;;  %v1024_v33 = vld [vmem:[%s16805_s2 + $0xb28] sm:$0xff]  ;;  %v10824_v35 = vcombine.low %v1011_v11, %v1015_v12  ;;  %v10848_v11 = vcombine.low %v1035_v54, %v1039_v55 }
 0x143   :  { %6949 = vmatprep.subr.bf16.mxu0 %v10793_v36  ;;  %7277 = vmatprep.subr.bf16.mxu1 %v10795_v40  ;;  %v10826_v36 = vcombine.low %v1012_v19, %v1016_v21  ;;  %v10833_v40 = vcombine.high %v1019_v28, %v1023_v23  ;;  %v10835_v41 = vcombine.high %v1020_v31, %v1024_v33  ;;  %v1072_v54 = vld [vmem:[%s16805_s2 + $0xca8] sm:$0xff] }
 0x144   :  { %v10857_v19 = vcombine.high %v1043_v0, %v1047_v1 }
 0x146   :  { %6950 = vmatpush1.bf16.msra.mxu0 %v10792_v45  ;;  %7278 = vmatpush1.bf16.msra.mxu1 %v10794_v49  ;;  %v1032_v45 = vld [vmem:[%s16805_s2 + $0xb68] sm:$0xff]  ;;  %v10832_v49 = vcombine.low %v1019_v28, %v1023_v23  ;;  %v10856_v28 = vcombine.low %v1043_v0, %v1047_v1 }
 0x147   :  { %6951 = vmatprep.subr.bf16.mxu0 %v10801_v50  ;;  %7279 = vmatprep.subr.bf16.mxu1 %v10803_v52  ;;  %v10834_v50 = vcombine.low %v1020_v31, %v1024_v33  ;;  %v10841_v52 = vcombine.high %v1027_v42, %v1031_v43  ;;  %v10843_v53 = vcombine.high %v1028_v44, %v1032_v45  ;;  %v1080_v0 = vld [vmem:[%s16805_s2 + $0xce8] sm:$0xff] }
 0x14a   :  { %6952 = vmatpush1.bf16.msra.mxu0 %v10800_v59  ;;  %7280 = vmatpush1.bf16.msra.mxu1 %v10802_v26  ;;  %v1040_v59 = vld [vmem:[%s16805_s2 + $0xba8] sm:$0xff]  ;;  %v82_v26 = vrot.slane %v12809_v15, %v12906_v20 }
 0x14b   :  { %6953 = vmatprep.subr.bf16.mxu0 %v10809_v60  ;;  %7281 = vmatprep.subr.bf16.mxu1 %v10811_v61  ;;  %v10840_v60 = vcombine.low %v1027_v42, %v1031_v43  ;;  %v10842_v61 = vcombine.low %v1028_v44, %v1032_v45  ;;  %v10851_v63 = vcombine.high %v1036_v57, %v1040_v59 }
 0x14c   :  { %v10850_v12 = vcombine.low %v1036_v57, %v1040_v59 }
 0x14e   :  { %6954 = vmatpush1.bf16.msra.mxu0 %v10808_v2  ;;  %7282 = vmatpush1.bf16.msra.mxu1 %v10810_v4  ;;  %v1044_v2 = vld [vmem:[%s16805_s2 + $0xbc8] sm:$0xff] }
 0x14f   :  { %6955 = vmatprep.subr.bf16.mxu0 %v10817_v9  ;;  %7283 = vmatprep.subr.bf16.mxu1 %v10819_v48  ;;  %v1048_v4 = vld [vmem:[%s16805_s2 + $0xbe8] sm:$0xff]  ;;  %v94_v9 = vrot.slane %v12809_v15, %v13039_v8  ;;  %v424_v48 = vadd.f32 %v12857_v47, %v82_v26 }
 0x150   :  { %v10859_v21 = vcombine.high %v1044_v2, %v1048_v4  ;;  %v1052_v15 = vld [vmem:[%s16805_s2 + $0xc08] sm:$0xff]  ;;  %v10858_v23 = vcombine.low %v1044_v2, %v1048_v4 }
 0x151   :  { %v1056_v47 = vld [vmem:[%s16805_s2 + $0xc28] sm:$0xff] }
 0x152   :  { %6956 = vmatpush1.bf16.msra.mxu0 %v10816_v22  ;;  %7284 = vmatpush1.bf16.msra.mxu1 %v10818_v13  ;;  %v1051_v22 = vld [vmem:[%s16805_s2 + $0xc00] sm:$0xff]  ;;  %v10867_v33 = vcombine.high %v1052_v15, %v1056_v47  ;;  %v10866_v44 = vcombine.low %v1052_v15, %v1056_v47 }
 0x153   :  { %6957 = vmatprep.subr.bf16.mxu0 %v10825_v24  ;;  %7285 = vmatprep.subr.bf16.mxu1 %v10827_v27  ;;  %v1055_v13 = vld [vmem:[%s16805_s2 + $0xc20] sm:$0xff]  ;;  %v467_v24 = vadd.f32 %v12977_v18, %v94_v9  ;;  %v639_v27 = vmax.f32 %v424_v48, 0.0  ;;  %v1060_v18 = vld [vmem:[%s16805_s2 + $0xc48] sm:$0xff] }
 0x154   :  { %v10865_v31 = vcombine.high %v1051_v22, %v1055_v13  ;;  %v10864_v43 = vcombine.low %v1051_v22, %v1055_v13  ;;  %v1083_v48 = vld [vmem:[%s16805_s2 + $0xd00] sm:$0xff] }
 0x155   :  { %v13309_v42 = vpack.c.bf16 %v639_v27, %v639_v27  ;;  %v1091_v47 = vld [vmem:[%s16805_s2 + $0xd40] sm:$0xff]  ;;  %v1092_v27 = vld [vmem:[%s16805_s2 + $0xd48] sm:$0xff] }
 0x156   :  { %6958 = vmatpush1.bf16.msra.mxu0 %v10824_v35  ;;  %7286 = vmatpush1.bf16.msra.mxu1 %v10826_v36  ;;  %v1059_v35 = vld [vmem:[%s16805_s2 + $0xc40] sm:$0xff] }
 0x157   :  { %6959 = vmatprep.subr.bf16.mxu0 %v10833_v40  ;;  %7287 = vmatprep.subr.bf16.mxu1 %v10835_v41  ;;  %v1063_v36 = vld [vmem:[%s16805_s2 + $0xc60] sm:$0xff]  ;;  %v1064_v40 = vld [vmem:[%s16805_s2 + $0xc68] sm:$0xff]  ;;  %v642_v41 = vmax.f32 %v467_v24, 0.0 }
 0x158   :  { %v10873_v45 = vcombine.high %v1059_v35, %v1063_v36  ;;  %v10872_v57 = vcombine.low %v1059_v35, %v1063_v36  ;;  %v10874_v59 = vcombine.low %v1060_v18, %v1064_v40  ;;  %v1095_v24 = vld [vmem:[%s16805_s2 + $0xd60] sm:$0xff] }
 0x159   :  { %v13323_v55 = vpack.c.bf16 %v642_v41, %v642_v41  ;;  %v1099_v36 = vld [vmem:[%s16805_s2 + $0xd80] sm:$0xff]  ;;  %v1104_v41 = vld [vmem:[%s16805_s2 + $0xda8] sm:$0xff] }
 0x15a   :  { %6960 = vmatpush1.bf16.msra.mxu0 %v10832_v49  ;;  %7288 = vmatpush1.bf16.msra.mxu1 %v10834_v50  ;;  %v10875_v49 = vcombine.high %v1060_v18, %v1064_v40  ;;  %v1067_v50 = vld [vmem:[%s16805_s2 + $0xc80] sm:$0xff]  ;;  %v1100_v40 = vld [vmem:[%s16805_s2 + $0xd88] sm:$0xff] }
 0x15b   :  { %6961 = vmatprep.subr.bf16.mxu0 %v10841_v52  ;;  %7289 = vmatprep.subr.bf16.mxu1 %v10843_v53  ;;  %v1071_v52 = vld [vmem:[%s16805_s2 + $0xca0] sm:$0xff]  ;;  %v1068_v53 = vld [vmem:[%s16805_s2 + $0xc88] sm:$0xff] }
 0x15c   :  { %v10881_v26 = vcombine.high %v1067_v50, %v1071_v52  ;;  %v10880_v1 = vcombine.low %v1067_v50, %v1071_v52  ;;  %v10882_v2 = vcombine.low %v1068_v53, %v1072_v54  ;;  %v1103_v18 = vld [vmem:[%s16805_s2 + $0xda0] sm:$0xff] }
 0x15d   :  { %v1107_v50 = vld [vmem:[%s16805_s2 + $0xdc0] sm:$0xff] }
 0x15e   :  { %6962 = vmatpush1.bf16.msra.mxu0 %v10840_v60  ;;  %7290 = vmatpush1.bf16.msra.mxu1 %v10842_v61  ;;  %v10883_v60 = vcombine.high %v1068_v53, %v1072_v54  ;;  %v1075_v61 = vld [vmem:[%s16805_s2 + $0xcc0] sm:$0xff]  ;;  %v1108_v53 = vld [vmem:[%s16805_s2 + $0xdc8] sm:$0xff] }
 0x15f   :  { %6963 = vmatprep.subr.bf16.mxu0 %v10849_v62  ;;  %7291 = vmatprep.subr.bf16.mxu1 %v10851_v63  ;;  %v1079_v62 = vld [vmem:[%s16805_s2 + $0xce0] sm:$0xff]  ;;  %v1076_v63 = vld [vmem:[%s16805_s2 + $0xcc8] sm:$0xff] }
 0x160   :  { %v10889_v4 = vcombine.high %v1075_v61, %v1079_v62  ;;  %v10891_v9 = vcombine.high %v1076_v63, %v1080_v0  ;;  %v10890_v22 = vcombine.low %v1076_v63, %v1080_v0  ;;  %v1111_v52 = vld [vmem:[%s16805_s2 + $0xde0] sm:$0xff]  ;;  %v1112_v54 = vld [vmem:[%s16805_s2 + $0xde8] sm:$0xff] }
 0x161   :  { %v1116_v63 = vld [vmem:[%s16805_s2 + $0xe08] sm:$0xff] }
 0x162   :  { %6964 = vmatpush1.bf16.msra.mxu0 %v10848_v11  ;;  %7292 = vmatpush1.bf16.msra.mxu1 %v10850_v12  ;;  %v1087_v11 = vld [vmem:[%s16805_s2 + $0xd20] sm:$0xff]  ;;  %v1084_v12 = vld [vmem:[%s16805_s2 + $0xd08] sm:$0xff] }
 0x163   :  { %6965 = vmatprep.subr.bf16.mxu0 %v10857_v19  ;;  %7293 = vmatprep.subr.bf16.mxu1 %v10859_v21  ;;  %v1088_v19 = vld [vmem:[%s16805_s2 + $0xd28] sm:$0xff]  ;;  %v10888_v21 = vcombine.low %v1075_v61, %v1079_v62  ;;  %v10897_v13 = vcombine.high %v1083_v48, %v1087_v11  ;;  %v1115_v61 = vld [vmem:[%s16805_s2 + $0xe00] sm:$0xff] }
 0x164   :  { %v10899_v15 = vcombine.high %v1084_v12, %v1088_v19  ;;  %v1119_v62 = vld [vmem:[%s16805_s2 + $0xe20] sm:$0xff]  ;;  %v1120_v0 = vld [vmem:[%s16805_s2 + $0xe28] sm:$0xff] }
 0x166   :  { %6966 = vmatpush1.bf16.msra.mxu0 %v10856_v28  ;;  %7294 = vmatpush1.bf16.msra.mxu1 %v10858_v23  ;;  %v1096_v28 = vld [vmem:[%s16805_s2 + $0xd68] sm:$0xff]  ;;  %v10896_v23 = vcombine.low %v1083_v48, %v1087_v11  ;;  %v1123_v48 = vld [vmem:[%s16805_s2 + $0xe40] sm:$0xff] }
 0x167   :  { %6976 = vmatprep.subr.bf16.mxu0 %v10865_v31  ;;  %7304 = vmatprep.subr.bf16.mxu1 %v10867_v33  ;;  %v10898_v31 = vcombine.low %v1084_v12, %v1088_v19  ;;  %v10905_v33 = vcombine.high %v1091_v47, %v1095_v24  ;;  %v10907_v35 = vcombine.high %v1092_v27, %v1096_v28  ;;  %v1127_v11 = vld [vmem:[%s16805_s2 + $0xe60] sm:$0xff]  ;;  %v1124_v12 = vld [vmem:[%s16805_s2 + $0xe48] sm:$0xff] }
 0x168   :  { %v1128_v19 = vld [vmem:[%s16805_s2 + $0xe68] sm:$0xff] }
 0x169   :  { %6968 = vmatmul.mubr.bf16.vlgmr.msra.gmra.mrb[16].mxu0 %v13309_v42  ;;  %7296 = vmatmul.mubr.bf16.vlgmr.msra.gmra.mrb[16].mxu1 %v13309_v42 }
 0x16a   :  { %6977 = vmatpush1.bf16.msra.mxu0 %v10864_v43  ;;  %7305 = vmatpush1.bf16.msra.mxu1 %v10866_v44  ;;  %v10904_v43 = vcombine.low %v1091_v47, %v1095_v24  ;;  %v10906_v44 = vcombine.low %v1092_v27, %v1096_v28  ;;  %v1131_v47 = vld [vmem:[%s16805_s2 + $0xe80] sm:$0xff]  ;;  %v1132_v27 = vld [vmem:[%s16805_s2 + $0xe88] sm:$0xff] }
 0x16b   :  { %6978 = vmatprep.subr.bf16.mxu0 %v10873_v45  ;;  %7306 = vmatprep.subr.bf16.mxu1 %v10875_v49  ;;  %v10913_v45 = vcombine.high %v1099_v36, %v1103_v18  ;;  %v10915_v49 = vcombine.high %v1100_v40, %v1104_v41  ;;  %v1135_v24 = vld [vmem:[%s16805_s2 + $0xea0] sm:$0xff]  ;;  %v1136_v28 = vld [vmem:[%s16805_s2 + $0xea8] sm:$0xff] }
 0x16c   :  { %7008 = vmatprep.mubr.bf16.mxu0 %v13323_v55  ;;  %7336 = vmatprep.mubr.bf16.mxu1 %v13323_v55 }
 0x16e   :  { %6979 = vmatpush1.bf16.msra.mxu0 %v10872_v57  ;;  %7307 = vmatpush1.bf16.msra.mxu1 %v10874_v59  ;;  %v10912_v57 = vcombine.low %v1099_v36, %v1103_v18  ;;  %v10914_v59 = vcombine.low %v1100_v40, %v1104_v41  ;;  %v1139_v36 = vld [vmem:[%s16805_s2 + $0xec0] sm:$0xff]  ;;  %v1140_v40 = vld [vmem:[%s16805_s2 + $0xec8] sm:$0xff] }
 0x16f   :  { %6980 = vmatprep.subr.bf16.mxu0 %v10881_v26  ;;  %7308 = vmatprep.subr.bf16.mxu1 %v10883_v60  ;;  %v10921_v26 = vcombine.high %v1107_v50, %v1111_v52  ;;  %v10923_v60 = vcombine.high %v1108_v53, %v1112_v54  ;;  %v1143_v18 = vld [vmem:[%s16805_s2 + $0xee0] sm:$0xff]  ;;  %v1144_v41 = vld [vmem:[%s16805_s2 + $0xee8] sm:$0xff] }
 0x172   :  { %6981 = vmatpush1.bf16.msra.mxu0 %v10880_v1  ;;  %7309 = vmatpush1.bf16.msra.mxu1 %v10882_v2  ;;  %v10920_v1 = vcombine.low %v1107_v50, %v1111_v52  ;;  %v10922_v2 = vcombine.low %v1108_v53, %v1112_v54  ;;  %v1147_v50 = vld [vmem:[%s16805_s2 + $0xf00] sm:$0xff]  ;;  %v1148_v53 = vld [vmem:[%s16805_s2 + $0xf08] sm:$0xff] }
 0x173   :  { %6982 = vmatprep.subr.bf16.mxu0 %v10889_v4  ;;  %7310 = vmatprep.subr.bf16.mxu1 %v10891_v9  ;;  %v10929_v4 = vcombine.high %v1115_v61, %v1119_v62  ;;  %v10931_v9 = vcombine.high %v1116_v63, %v1120_v0  ;;  %v1151_v52 = vld [vmem:[%s16805_s2 + $0xf20] sm:$0xff]  ;;  %v1152_v54 = vld [vmem:[%s16805_s2 + $0xf28] sm:$0xff] }
 0x176   :  { %6983 = vmatpush1.bf16.msra.mxu0 %v10888_v21  ;;  %7311 = vmatpush1.bf16.msra.mxu1 %v10890_v22  ;;  %v10928_v21 = vcombine.low %v1115_v61, %v1119_v62  ;;  %v10930_v22 = vcombine.low %v1116_v63, %v1120_v0  ;;  %v1155_v61 = vld [vmem:[%s16805_s2 + $0xf40] sm:$0xff]  ;;  %v1156_v63 = vld [vmem:[%s16805_s2 + $0xf48] sm:$0xff] }
 0x177   :  { %6984 = vmatprep.subr.bf16.mxu0 %v10897_v13  ;;  %7312 = vmatprep.subr.bf16.mxu1 %v10899_v15  ;;  %v10937_v13 = vcombine.high %v1123_v48, %v1127_v11  ;;  %v10939_v15 = vcombine.high %v1124_v12, %v1128_v19  ;;  %v1159_v62 = vld [vmem:[%s16805_s2 + $0xf60] sm:$0xff]  ;;  %v1160_v0 = vld [vmem:[%s16805_s2 + $0xf68] sm:$0xff] }
 0x17a   :  { %6985 = vmatpush1.bf16.msra.mxu0 %v10896_v23  ;;  %7313 = vmatpush1.bf16.msra.mxu1 %v10898_v31  ;;  %v10936_v23 = vcombine.low %v1123_v48, %v1127_v11  ;;  %v10938_v31 = vcombine.low %v1124_v12, %v1128_v19  ;;  %v1163_v48 = vld [vmem:[%s16805_s2 + $0xf80] sm:$0xff]  ;;  %v1164_v12 = vld [vmem:[%s16805_s2 + $0xf88] sm:$0xff] }
 0x17b   :  { %6986 = vmatprep.subr.bf16.mxu0 %v10905_v33  ;;  %7314 = vmatprep.subr.bf16.mxu1 %v10907_v35  ;;  %v10945_v33 = vcombine.high %v1131_v47, %v1135_v24  ;;  %v10947_v35 = vcombine.high %v1132_v27, %v1136_v28  ;;  %v1167_v11 = vld [vmem:[%s16805_s2 + $0xfa0] sm:$0xff]  ;;  %v1168_v19 = vld [vmem:[%s16805_s2 + $0xfa8] sm:$0xff] }
 0x17e   :  { %6987 = vmatpush1.bf16.msra.mxu0 %v10904_v43  ;;  %7315 = vmatpush1.bf16.msra.mxu1 %v10906_v44  ;;  %v10944_v43 = vcombine.low %v1131_v47, %v1135_v24  ;;  %v10946_v44 = vcombine.low %v1132_v27, %v1136_v28  ;;  %v10977_v47 = vcombine.high %v1163_v48, %v1167_v11  ;;  %v1171_v27 = vld [vmem:[%s16805_s2 + $0xfc0] sm:$0xff]  ;;  %v13483_v28 = vld [vmem:[%s16808_s5 + $0x8] sm:$0xff] }
 0x17f   :  { %6988 = vmatprep.subr.bf16.mxu0 %v10913_v45  ;;  %7316 = vmatprep.subr.bf16.mxu1 %v10915_v49  ;;  %v10953_v45 = vcombine.high %v1139_v36, %v1143_v18  ;;  %v10955_v49 = vcombine.high %v1140_v40, %v1144_v41  ;;  %v10979_v24 = vcombine.high %v1164_v12, %v1168_v19 }
 0x182   :  { %6989 = vmatpush1.bf16.msra.mxu0 %v10912_v57  ;;  %7317 = vmatpush1.bf16.msra.mxu1 %v10914_v59  ;;  %v10952_v57 = vcombine.low %v1139_v36, %v1143_v18  ;;  %v10954_v59 = vcombine.low %v1140_v40, %v1144_v41  ;;  %v10976_v36 = vcombine.low %v1163_v48, %v1167_v11  ;;  %v1195_v48 = vld [vmem:[%s16805_s2 + $0x1080] sm:$0xff] }
 0x183   :  { %6990 = vmatprep.subr.bf16.mxu0 %v10921_v26  ;;  %7318 = vmatprep.subr.bf16.mxu1 %v10923_v60  ;;  %v10961_v26 = vcombine.high %v1147_v50, %v1151_v52  ;;  %v10963_v60 = vcombine.high %v1148_v53, %v1152_v54  ;;  %v10978_v18 = vcombine.low %v1164_v12, %v1168_v19  ;;  %v1199_v11 = vld [vmem:[%s16805_s2 + $0x10a0] sm:$0xff]  ;;  %v1196_v12 = vld [vmem:[%s16805_s2 + $0x1088] sm:$0xff] }
 0x184   :  { %v1200_v19 = vld [vmem:[%s16805_s2 + $0x10a8] sm:$0xff] }
 0x186   :  { %6991 = vmatpush1.bf16.msra.mxu0 %v10920_v1  ;;  %7319 = vmatpush1.bf16.msra.mxu1 %v10922_v2  ;;  %v10960_v1 = vcombine.low %v1147_v50, %v1151_v52  ;;  %v10962_v2 = vcombine.low %v1148_v53, %v1152_v54  ;;  %v1180_v50 = vld [vmem:[%s16805_s2 + $0x1008] sm:$0xff] }
 0x187   :  { %6992 = vmatprep.subr.bf16.mxu0 %v10929_v4  ;;  %7320 = vmatprep.subr.bf16.mxu1 %v10931_v9  ;;  %v10969_v4 = vcombine.high %v1155_v61, %v1159_v62  ;;  %v10971_v9 = vcombine.high %v1156_v63, %v1160_v0 }
 0x18a   :  { %6993 = vmatpush1.bf16.msra.mxu0 %v10928_v21  ;;  %7321 = vmatpush1.bf16.msra.mxu1 %v10930_v22  ;;  %v10968_v21 = vcombine.low %v1155_v61, %v1159_v62  ;;  %v10970_v22 = vcombine.low %v1156_v63, %v1160_v0  ;;  %v1188_v61 = vld [vmem:[%s16805_s2 + $0x1048] sm:$0xff] }
 0x18b   :  { %6994 = vmatprep.subr.bf16.mxu0 %v10937_v13  ;;  %7322 = vmatprep.subr.bf16.mxu1 %v10939_v15  ;;  %v12408_v13 = vld [vmem:[%s16808_s5] sm:$0xff]  ;;  %v1192_v62 = vld [vmem:[%s16805_s2 + $0x1068] sm:$0xff] }
 0x18c   :  { %v90_v15 = vrot.slane %v12408_v13, %v13036_v5  ;;  %v11009_v13 = vcombine.high %v1195_v48, %v1199_v11 }
 0x18e   :  { %6995 = vmatpush1.bf16.msra.mxu0 %v10936_v23  ;;  %7323 = vmatpush1.bf16.msra.mxu1 %v10938_v31  ;;  %v102_v23 = vrot.slane %v13483_v28, %v12812_v6  ;;  %v1175_v31 = vld [vmem:[%s16805_s2 + $0xfe0] sm:$0xff]  ;;  %v465_v40 = vadd.f32 %v12972_v10, %v90_v15  ;;  %v1184_v10 = vld [vmem:[%s16805_s2 + $0x1028] sm:$0xff]  ;;  %v11011_v15 = vcombine.high %v1196_v12, %v1200_v19 }
 0x18f   :  { %6996 = vmatprep.subr.bf16.mxu0 %v10945_v33  ;;  %7324 = vmatprep.subr.bf16.mxu1 %v10947_v35  ;;  %v1172_v33 = vld [vmem:[%s16805_s2 + $0xfc8] sm:$0xff]  ;;  %v10985_v41 = vcombine.high %v1171_v27, %v1175_v31  ;;  %v10984_v52 = vcombine.low %v1171_v27, %v1175_v31  ;;  %v11008_v31 = vcombine.low %v1195_v48, %v1199_v11  ;;  %v1235_v11 = vld [vmem:[%s16805_s2 + $0x11c0] sm:$0xff] }
 0x190   :  { %v1176_v35 = vld [vmem:[%s16805_s2 + $0xfe8] sm:$0xff]  ;;  %v641_v54 = vmax.f32 %v465_v40, 0.0  ;;  %v1215_v40 = vld [vmem:[%s16805_s2 + $0x1120] sm:$0xff] }
 0x191   :  { %v10986_v53 = vcombine.low %v1172_v33, %v1176_v35  ;;  %v1204_v27 = vld [vmem:[%s16805_s2 + $0x10c8] sm:$0xff] }
 0x192   :  { %6997 = vmatpush1.bf16.msra.mxu0 %v10944_v43  ;;  %7325 = vmatpush1.bf16.msra.mxu1 %v10946_v44  ;;  %v10987_v43 = vcombine.high %v1172_v33, %v1176_v35  ;;  %v1179_v44 = vld [vmem:[%s16805_s2 + $0x1000] sm:$0xff]  ;;  %v13522_v0 = vpack.c.bf16 %v641_v54, %v641_v54  ;;  %v11010_v33 = vcombine.low %v1196_v12, %v1200_v19  ;;  %v1224_v54 = vld [vmem:[%s16805_s2 + $0x1168] sm:$0xff] }
 0x193   :  { %6998 = vmatprep.subr.bf16.mxu0 %v10953_v45  ;;  %7326 = vmatprep.subr.bf16.mxu1 %v10955_v49  ;;  %v508_v45 = vadd.f32 %v12891_v7, %v102_v23  ;;  %v1183_v49 = vld [vmem:[%s16805_s2 + $0x1020] sm:$0xff]  ;;  %v1208_v23 = vld [vmem:[%s16805_s2 + $0x10e8] sm:$0xff] }
 0x194   :  { %v10993_v7 = vcombine.high %v1179_v44, %v1183_v49  ;;  %v10992_v63 = vcombine.low %v1179_v44, %v1183_v49  ;;  %v1239_v12 = vld [vmem:[%s16805_s2 + $0x11e0] sm:$0xff]  ;;  %v1236_v19 = vld [vmem:[%s16805_s2 + $0x11c8] sm:$0xff] }
 0x196   :  { %6999 = vmatpush1.bf16.msra.mxu0 %v10952_v57  ;;  %7327 = vmatpush1.bf16.msra.mxu1 %v10954_v59  ;;  %v10995_v57 = vcombine.high %v1180_v50, %v1184_v10  ;;  %v644_v59 = vmax.f32 %v508_v45, 0.0  ;;  %v11018_v45 = vcombine.low %v1204_v27, %v1208_v23 }
 0x197   :  { %7000 = vmatprep.subr.bf16.mxu0 %v10961_v26  ;;  %7328 = vmatprep.subr.bf16.mxu1 %v10963_v60  ;;  %v1187_v26 = vld [vmem:[%s16805_s2 + $0x1040] sm:$0xff] }
 0x198   :  { %v1191_v60 = vld [vmem:[%s16805_s2 + $0x1060] sm:$0xff] }
 0x19a   :  { %7001 = vmatpush1.bf16.msra.mxu0 %v10960_v1  ;;  %7329 = vmatpush1.bf16.msra.mxu1 %v10962_v2  ;;  %v10994_v1 = vcombine.low %v1180_v50, %v1184_v10  ;;  %v13524_v2 = vpack.c.bf16 %v644_v59, %v644_v59  ;;  %v1219_v10 = vld [vmem:[%s16805_s2 + $0x1140] sm:$0xff] }
 0x19b   :  { %7002 = vmatprep.subr.bf16.mxu0 %v10969_v4  ;;  %7330 = vmatprep.subr.bf16.mxu1 %v10971_v9  ;;  %v11001_v4 = vcombine.high %v1187_v26, %v1191_v60  ;;  %v11003_v9 = vcombine.high %v1188_v61, %v1192_v62 }
 0x19e   :  { %7003 = vmatpush1.bf16.msra.mxu0 %v10968_v21  ;;  %7331 = vmatpush1.bf16.msra.mxu1 %v10970_v22  ;;  %v11000_v21 = vcombine.low %v1187_v26, %v1191_v60  ;;  %v11002_v22 = vcombine.low %v1188_v61, %v1192_v62  ;;  %v1227_v60 = vld [vmem:[%s16805_s2 + $0x1180] sm:$0xff]  ;;  %v1228_v62 = vld [vmem:[%s16805_s2 + $0x1188] sm:$0xff] }
 0x19f   :  { %7004 = vmatprep.subr.bf16.mxu0 %v10977_v47  ;;  %7332 = vmatprep.subr.bf16.mxu1 %v10979_v24  ;;  %v1203_v47 = vld [vmem:[%s16805_s2 + $0x10c0] sm:$0xff] }
 0x1a0   :  { %v1207_v24 = vld [vmem:[%s16805_s2 + $0x10e0] sm:$0xff] }
 0x1a1   :  { %v11017_v35 = vcombine.high %v1203_v47, %v1207_v24  ;;  %v11016_v44 = vcombine.low %v1203_v47, %v1207_v24  ;;  %v1231_v61 = vld [vmem:[%s16805_s2 + $0x11a0] sm:$0xff] }
 0x1a2   :  { %7005 = vmatpush1.bf16.msra.mxu0 %v10976_v36  ;;  %7333 = vmatpush1.bf16.msra.mxu1 %v10978_v18  ;;  %v11019_v36 = vcombine.high %v1204_v27, %v1208_v23  ;;  %v1211_v18 = vld [vmem:[%s16805_s2 + $0x1100] sm:$0xff]  ;;  %v1244_v23 = vld [vmem:[%s16805_s2 + $0x1208] sm:$0xff] }
 0x1a3   :  { %7006 = vmatprep.subr.bf16.mxu0 %v10985_v41  ;;  %7334 = vmatprep.subr.bf16.mxu1 %v10987_v43  ;;  %v1212_v41 = vld [vmem:[%s16805_s2 + $0x1108] sm:$0xff]  ;;  %v11025_v49 = vcombine.high %v1211_v18, %v1215_v40  ;;  %v1243_v24 = vld [vmem:[%s16805_s2 + $0x1200] sm:$0xff] }
 0x1a4   :  { %v1216_v43 = vld [vmem:[%s16805_s2 + $0x1128] sm:$0xff]  ;;  %v1247_v27 = vld [vmem:[%s16805_s2 + $0x1220] sm:$0xff] }
 0x1a5   :  { %v11027_v50 = vcombine.high %v1212_v41, %v1216_v43 }
 0x1a6   :  { %7007 = vmatpush1.bf16.msra.mxu0 %v10984_v52  ;;  %7335 = vmatpush1.bf16.msra.mxu1 %v10986_v53  ;;  %v1223_v52 = vld [vmem:[%s16805_s2 + $0x1160] sm:$0xff]  ;;  %v1220_v53 = vld [vmem:[%s16805_s2 + $0x1148] sm:$0xff] }
 0x1a7   :  { %7017 = vmatprep.subr.bf16.mxu0 %v10993_v7  ;;  %7345 = vmatprep.subr.bf16.mxu1 %v10995_v57  ;;  %v11024_v7 = vcombine.low %v1211_v18, %v1215_v40  ;;  %v11026_v57 = vcombine.low %v1212_v41, %v1216_v43  ;;  %v11033_v59 = vcombine.high %v1219_v10, %v1223_v52  ;;  %v1251_v40 = vld [vmem:[%s16805_s2 + $0x1240] sm:$0xff]  ;;  %v1252_v43 = vld [vmem:[%s16805_s2 + $0x1248] sm:$0xff] }
 0x1a8   :  { %v11035_v26 = vcombine.high %v1220_v53, %v1224_v54  ;;  %v1255_v41 = vld [vmem:[%s16805_s2 + $0x1260] sm:$0xff] }
 0x1a9   :  { %7009 = vmatmul.mubr.bf16.vlgmr.msra.gmra.mrb[16].mxu0 %v13522_v0  ;;  %7337 = vmatmul.mubr.bf16.vlgmr.msra.gmra.mrb[16].mxu1 %v13522_v0 }
 0x1aa   :  { %7018 = vmatpush1.bf16.msra.mxu0 %v10992_v63  ;;  %7049 = vmatprep.mubr.bf16.mxu0 %v13524_v2  ;;  %v1232_v63 = vld [vmem:[%s16805_s2 + $0x11a8] sm:$0xff] }
 0x1ab   :  { %7346 = vmatpush1.bf16.msra.mxu1 %v10994_v1  ;;  %7377 = vmatprep.mubr.bf16.mxu1 %v13524_v2  ;;  %v11032_v1 = vcombine.low %v1219_v10, %v1223_v52  ;;  %v11043_v48 = vcombine.high %v1228_v62, %v1232_v63  ;;  %v1259_v52 = vld [vmem:[%s16805_s2 + $0x1280] sm:$0xff] }
 0x1ac   :  { %7019 = vmatprep.subr.bf16.mxu0 %v11001_v4  ;;  %7347 = vmatprep.subr.bf16.mxu1 %v11003_v9  ;;  %v11034_v4 = vcombine.low %v1220_v53, %v1224_v54  ;;  %v11041_v9 = vcombine.high %v1227_v60, %v1231_v61  ;;  %v1263_v53 = vld [vmem:[%s16805_s2 + $0x12a0] sm:$0xff]  ;;  %v1260_v54 = vld [vmem:[%s16805_s2 + $0x1288] sm:$0xff] }
 0x1ae   :  { %7020 = vmatpush1.bf16.msra.mxu0 %v11000_v21  ;;  %v1240_v21 = vld [vmem:[%s16805_s2 + $0x11e8] sm:$0xff] }
 0x1af   :  { %7348 = vmatpush1.bf16.msra.mxu1 %v11002_v22  ;;  %7021 = vmatprep.subr.bf16.mxu0 %v11009_v13  ;;  %v11040_v22 = vcombine.low %v1227_v60, %v1231_v61  ;;  %v11042_v13 = vcombine.low %v1228_v62, %v1232_v63  ;;  %v11051_v47 = vcombine.high %v1236_v19, %v1240_v21  ;;  %v1267_v61 = vld [vmem:[%s16805_s2 + $0x12c0] sm:$0xff]  ;;  %v1268_v63 = vld [vmem:[%s16805_s2 + $0x12c8] sm:$0xff] }
 0x1b0   :  { %7349 = vmatprep.subr.bf16.mxu1 %v11011_v15  ;;  %v11049_v15 = vcombine.high %v1235_v11, %v1239_v12  ;;  %v1271_v62 = vld [vmem:[%s16805_s2 + $0x12e0] sm:$0xff] }
 0x1b2   :  { %7022 = vmatpush1.bf16.msra.mxu0 %v11008_v31  ;;  %v1248_v31 = vld [vmem:[%s16805_s2 + $0x1228] sm:$0xff] }
 0x1b3   :  { %7350 = vmatpush1.bf16.msra.mxu1 %v11010_v33  ;;  %7023 = vmatprep.subr.bf16.mxu0 %v11017_v35  ;;  %v11048_v33 = vcombine.low %v1235_v11, %v1239_v12  ;;  %v11050_v35 = vcombine.low %v1236_v19, %v1240_v21  ;;  %v11059_v18 = vcombine.high %v1244_v23, %v1248_v31  ;;  %v1275_v12 = vld [vmem:[%s16805_s2 + $0x1300] sm:$0xff]  ;;  %v1276_v21 = vld [vmem:[%s16805_s2 + $0x1308] sm:$0xff] }
 0x1b4   :  { %7351 = vmatprep.subr.bf16.mxu1 %v11019_v36  ;;  %v11057_v36 = vcombine.high %v1243_v24, %v1247_v27  ;;  %v1279_v19 = vld [vmem:[%s16805_s2 + $0x1320] sm:$0xff] }
 0x1b6   :  { %7024 = vmatpush1.bf16.msra.mxu0 %v11016_v44  ;;  %v1256_v44 = vld [vmem:[%s16805_s2 + $0x1268] sm:$0xff] }
 0x1b7   :  { %7352 = vmatpush1.bf16.msra.mxu1 %v11018_v45  ;;  %7025 = vmatprep.subr.bf16.mxu0 %v11025_v49  ;;  %v11056_v45 = vcombine.low %v1243_v24, %v1247_v27  ;;  %v11058_v49 = vcombine.low %v1244_v23, %v1248_v31  ;;  %v11067_v10 = vcombine.high %v1252_v43, %v1256_v44  ;;  %v1283_v27 = vld [vmem:[%s16805_s2 + $0x1340] sm:$0xff]  ;;  %v1284_v31 = vld [vmem:[%s16805_s2 + $0x1348] sm:$0xff] }
 0x1b8   :  { %7353 = vmatprep.subr.bf16.mxu1 %v11027_v50  ;;  %v11065_v50 = vcombine.high %v1251_v40, %v1255_v41  ;;  %v1287_v23 = vld [vmem:[%s16805_s2 + $0x1360] sm:$0xff] }
 0x1ba   :  { %7026 = vmatpush1.bf16.msra.mxu0 %v11024_v7  ;;  %v1264_v7 = vld [vmem:[%s16805_s2 + $0x12a8] sm:$0xff] }
 0x1bb   :  { %7354 = vmatpush1.bf16.msra.mxu1 %v11026_v57  ;;  %7027 = vmatprep.subr.bf16.mxu0 %v11033_v59  ;;  %v11064_v57 = vcombine.low %v1251_v40, %v1255_v41  ;;  %v11066_v59 = vcombine.low %v1252_v43, %v1256_v44  ;;  %v11075_v60 = vcombine.high %v1260_v54, %v1264_v7  ;;  %v1291_v41 = vld [vmem:[%s16805_s2 + $0x1380] sm:$0xff]  ;;  %v1292_v44 = vld [vmem:[%s16805_s2 + $0x1388] sm:$0xff] }
 0x1bc   :  { %7355 = vmatprep.subr.bf16.mxu1 %v11035_v26  ;;  %v11073_v26 = vcombine.high %v1259_v52, %v1263_v53  ;;  %v1295_v43 = vld [vmem:[%s16805_s2 + $0x13a0] sm:$0xff] }
 0x1be   :  { %7028 = vmatpush1.bf16.msra.mxu0 %v11032_v1  ;;  %v1272_v1 = vld [vmem:[%s16805_s2 + $0x12e8] sm:$0xff] }
 0x1bf   :  { %7356 = vmatpush1.bf16.msra.mxu1 %v11034_v4  ;;  %7029 = vmatprep.subr.bf16.mxu0 %v11041_v9  ;;  %v11072_v4 = vcombine.low %v1259_v52, %v1263_v53  ;;  %v11074_v9 = vcombine.low %v1260_v54, %v1264_v7  ;;  %v11083_v11 = vcombine.high %v1268_v63, %v1272_v1  ;;  %v1299_v54 = vld [vmem:[%s16805_s2 + $0x13c0] sm:$0xff] }
 0x1c0   :  { %7357 = vmatprep.subr.bf16.mxu1 %v11043_v48  ;;  %v11081_v48 = vcombine.high %v1267_v61, %v1271_v62  ;;  %v11105_v52 = vcombine.high %v1291_v41, %v1295_v43  ;;  %v1303_v7 = vld [vmem:[%s16805_s2 + $0x13e0] sm:$0xff] }
 0x1c2   :  { %7030 = vmatpush1.bf16.msra.mxu0 %v11040_v22  ;;  %v1280_v22 = vld [vmem:[%s16805_s2 + $0x1328] sm:$0xff] }
 0x1c3   :  { %7358 = vmatpush1.bf16.msra.mxu1 %v11042_v13  ;;  %7031 = vmatprep.subr.bf16.mxu0 %v11049_v15  ;;  %v11080_v13 = vcombine.low %v1267_v61, %v1271_v62  ;;  %v11082_v15 = vcombine.low %v1268_v63, %v1272_v1  ;;  %v11091_v24 = vcombine.high %v1276_v21, %v1280_v22  ;;  %v1307_v63 = vld [vmem:[%s16805_s2 + $0x1400] sm:$0xff] }
 0x1c4   :  { %7359 = vmatprep.subr.bf16.mxu1 %v11051_v47  ;;  %v11089_v47 = vcombine.high %v1275_v12, %v1279_v19  ;;  %v11113_v61 = vcombine.high %v1299_v54, %v1303_v7  ;;  %v1311_v1 = vld [vmem:[%s16805_s2 + $0x1420] sm:$0xff] }
 0x1c6   :  { %7032 = vmatpush1.bf16.msra.mxu0 %v11048_v33  ;;  %v1288_v33 = vld [vmem:[%s16805_s2 + $0x1368] sm:$0xff] }
 0x1c7   :  { %7360 = vmatpush1.bf16.msra.mxu1 %v11050_v35  ;;  %7033 = vmatprep.subr.bf16.mxu0 %v11057_v36  ;;  %v11088_v35 = vcombine.low %v1275_v12, %v1279_v19  ;;  %v11090_v36 = vcombine.low %v1276_v21, %v1280_v22  ;;  %v11099_v40 = vcombine.high %v1284_v31, %v1288_v33  ;;  %v646_v21 = vmax.f32 %v13021_v58, 0.0  ;;  %v1315_v22 = vld [vmem:[%s16805_s2 + $0x1440] sm:$0xff] }
 0x1c8   :  { %7361 = vmatprep.subr.bf16.mxu1 %v11059_v18  ;;  %v11097_v18 = vcombine.high %v1283_v27, %v1287_v23  ;;  %v11121_v12 = vcombine.high %v1307_v63, %v1311_v1 }
 0x1ca   :  { %7034 = vmatpush1.bf16.msra.mxu0 %v11056_v45  ;;  %v1296_v45 = vld [vmem:[%s16805_s2 + $0x13a8] sm:$0xff] }
 0x1cb   :  { %7362 = vmatpush1.bf16.msra.mxu1 %v11058_v49  ;;  %7035 = vmatprep.subr.bf16.mxu0 %v11065_v50  ;;  %v11096_v49 = vcombine.low %v1283_v27, %v1287_v23  ;;  %v98_v50 = vrot.slane %v13483_v28, %v12804_v14  ;;  %v11107_v53 = vcombine.high %v1292_v44, %v1296_v45  ;;  %v1304_v28 = vld [vmem:[%s16805_s2 + $0x13e8] sm:$0xff] }
 0x1cc   :  { %7363 = vmatprep.subr.bf16.mxu1 %v11067_v10  ;;  %v11098_v10 = vcombine.low %v1284_v31, %v1288_v33  ;;  %v1323_v31 = vld [vmem:[%s16805_s2 + $0x1480] sm:$0xff] }
 0x1cd   :  { %v1327_v33 = vld [vmem:[%s16805_s2 + $0x14a0] sm:$0xff] }
 0x1ce   :  { %7036 = vmatpush1.bf16.msra.mxu0 %v11064_v57  ;;  %v1300_v57 = vld [vmem:[%s16805_s2 + $0x13c8] sm:$0xff] }
 0x1cf   :  { %7364 = vmatpush1.bf16.msra.mxu1 %v11066_v59  ;;  %7037 = vmatprep.subr.bf16.mxu0 %v11073_v26  ;;  %v11104_v59 = vcombine.low %v1291_v41, %v1295_v43  ;;  %v506_v26 = vadd.f32 %v12889_v3, %v98_v50  ;;  %v11115_v62 = vcombine.high %v1300_v57, %v1304_v28  ;;  %v1312_v3 = vld [vmem:[%s16805_s2 + $0x1428] sm:$0xff]  ;;  %v1335_v50 = vld [vmem:[%s16805_s2 + $0x14e0] sm:$0xff] }
 0x1d0   :  { %7365 = vmatprep.subr.bf16.mxu1 %v11075_v60  ;;  %v11106_v60 = vcombine.low %v1292_v44, %v1296_v45  ;;  %v11137_v44 = vcombine.high %v1323_v31, %v1327_v33 }
 0x1d2   :  { %7038 = vmatpush1.bf16.msra.mxu0 %v11072_v4  ;;  %v1308_v4 = vld [vmem:[%s16805_s2 + $0x1408] sm:$0xff] }
 0x1d3   :  { %7366 = vmatpush1.bf16.msra.mxu1 %v11074_v9  ;;  %7039 = vmatprep.subr.bf16.mxu0 %v11081_v48  ;;  %v11112_v9 = vcombine.low %v1299_v54, %v1303_v7  ;;  %v643_v48 = vmax.f32 %v506_v26, 0.0  ;;  %v11123_v19 = vcombine.high %v1308_v4, %v1312_v3  ;;  %v11122_v58 = vcombine.low %v1308_v4, %v1312_v3  ;;  %v1340_v26 = vld [vmem:[%s16805_s2 + $0x1508] sm:$0xff]  ;;  %v1347_v4 = vld [vmem:[%s16805_s2 + $0x1540] sm:$0xff] }
 0x1d4   :  { %7367 = vmatprep.subr.bf16.mxu1 %v11083_v11  ;;  %v11114_v11 = vcombine.low %v1300_v57, %v1304_v28  ;;  %v1339_v28 = vld [vmem:[%s16805_s2 + $0x1500] sm:$0xff] }
 0x1d5   :  { %v13726_v27 = vpack.c.bf16 %v643_v48, %v643_v48  ;;  %v1351_v3 = vld [vmem:[%s16805_s2 + $0x1560] sm:$0xff]  ;;  %v1352_v48 = vld [vmem:[%s16805_s2 + $0x1568] sm:$0xff] }
 0x1d6   :  { %7040 = vmatpush1.bf16.msra.mxu0 %v11080_v13  ;;  %v1319_v13 = vld [vmem:[%s16805_s2 + $0x1460] sm:$0xff] }
 0x1d7   :  { %7368 = vmatpush1.bf16.msra.mxu1 %v11082_v15  ;;  %7041 = vmatprep.subr.bf16.mxu0 %v11089_v47  ;;  %v11120_v15 = vcombine.low %v1307_v63, %v1311_v1  ;;  %v1316_v47 = vld [vmem:[%s16805_s2 + $0x1448] sm:$0xff]  ;;  %v11129_v23 = vcombine.high %v1315_v22, %v1319_v13  ;;  %v11128_v41 = vcombine.low %v1315_v22, %v1319_v13  ;;  %v1355_v22 = vld [vmem:[%s16805_s2 + $0x1580] sm:$0xff] }
 0x1d8   :  { %7369 = vmatprep.subr.bf16.mxu1 %v11091_v24  ;;  %v1320_v24 = vld [vmem:[%s16805_s2 + $0x1468] sm:$0xff]  ;;  %v1359_v13 = vld [vmem:[%s16805_s2 + $0x15a0] sm:$0xff] }
 0x1d9   :  { %v11130_v43 = vcombine.low %v1316_v47, %v1320_v24 }
 0x1da   :  { %7042 = vmatpush1.bf16.msra.mxu0 %v11088_v35  ;;  %v13734_v35 = vpack.c.bf16 %v646_v21, %v646_v21 }
 0x1db   :  { %7370 = vmatpush1.bf16.msra.mxu1 %v11090_v36  ;;  %7043 = vmatprep.subr.bf16.mxu0 %v11097_v18  ;;  %v11131_v36 = vcombine.high %v1316_v47, %v1320_v24  ;;  %v1324_v18 = vld [vmem:[%s16805_s2 + $0x1488] sm:$0xff]  ;;  %v11160_v24 = vcombine.low %v1347_v4, %v1351_v3 }
 0x1dc   :  { %7371 = vmatprep.subr.bf16.mxu1 %v11099_v40  ;;  %v1328_v40 = vld [vmem:[%s16805_s2 + $0x14a8] sm:$0xff] }
 0x1dd   :  { %v11139_v45 = vcombine.high %v1324_v18, %v1328_v40  ;;  %v11138_v54 = vcombine.low %v1324_v18, %v1328_v40  ;;  %v1360_v47 = vld [vmem:[%s16805_s2 + $0x15a8] sm:$0xff] }
 0x1de   :  { %7044 = vmatpush1.bf16.msra.mxu0 %v11096_v49  ;;  %v1331_v49 = vld [vmem:[%s16805_s2 + $0x14c0] sm:$0xff]  ;;  %v1364_v18 = vld [vmem:[%s16805_s2 + $0x15c8] sm:$0xff] }
 0x1df   :  { %7372 = vmatpush1.bf16.msra.mxu1 %v11098_v10  ;;  %7045 = vmatprep.subr.bf16.mxu0 %v11105_v52  ;;  %v1332_v10 = vld [vmem:[%s16805_s2 + $0x14c8] sm:$0xff]  ;;  %v11145_v7 = vcombine.high %v1331_v49, %v1335_v50 }
 0x1e0   :  { %7373 = vmatprep.subr.bf16.mxu1 %v11107_v53  ;;  %v1336_v52 = vld [vmem:[%s16805_s2 + $0x14e8] sm:$0xff]  ;;  %v11136_v53 = vcombine.low %v1323_v31, %v1327_v33  ;;  %v1363_v33 = vld [vmem:[%s16805_s2 + $0x15c0] sm:$0xff] }
 0x1e1   :  { %v11147_v57 = vcombine.high %v1332_v10, %v1336_v52  ;;  %v1368_v40 = vld [vmem:[%s16805_s2 + $0x15e8] sm:$0xff] }
 0x1e2   :  { %7046 = vmatpush1.bf16.msra.mxu0 %v11104_v59  ;;  %v1343_v59 = vld [vmem:[%s16805_s2 + $0x1520] sm:$0xff] }
 0x1e3   :  { %7374 = vmatpush1.bf16.msra.mxu1 %v11106_v60  ;;  %7047 = vmatprep.subr.bf16.mxu0 %v11113_v61  ;;  %v1344_v60 = vld [vmem:[%s16805_s2 + $0x1528] sm:$0xff]  ;;  %v11144_v61 = vcombine.low %v1331_v49, %v1335_v50  ;;  %v11153_v63 = vcombine.high %v1339_v28, %v1343_v59  ;;  %v1371_v49 = vld [vmem:[%s16805_s2 + $0x1600] sm:$0xff] }
 0x1e4   :  { %7375 = vmatprep.subr.bf16.mxu1 %v11115_v62  ;;  %v11146_v62 = vcombine.low %v1332_v10, %v1336_v52  ;;  %v11155_v1 = vcombine.high %v1340_v26, %v1344_v60  ;;  %v1375_v50 = vld [vmem:[%s16805_s2 + $0x1620] sm:$0xff]  ;;  %v1372_v10 = vld [vmem:[%s16805_s2 + $0x1608] sm:$0xff] }
 0x1e5   :  { %v1376_v52 = vld [vmem:[%s16805_s2 + $0x1628] sm:$0xff] }
 0x1e6   :  { %7048 = vmatpush1.bf16.msra.mxu0 %v11112_v9  ;;  %v1348_v9 = vld [vmem:[%s16805_s2 + $0x1548] sm:$0xff] }
 0x1e7   :  { %7376 = vmatpush1.bf16.msra.mxu1 %v11114_v11  ;;  %7058 = vmatprep.subr.bf16.mxu0 %v11121_v12  ;;  %v11152_v11 = vcombine.low %v1339_v28, %v1343_v59  ;;  %v11154_v12 = vcombine.low %v1340_v26, %v1344_v60  ;;  %v11163_v21 = vcombine.high %v1348_v9, %v1352_v48  ;;  %v1379_v28 = vld [vmem:[%s16805_s2 + $0x1640] sm:$0xff]  ;;  %v1380_v26 = vld [vmem:[%s16805_s2 + $0x1648] sm:$0xff] }
 0x1e8   :  { %7386 = vmatprep.subr.bf16.mxu1 %v11123_v19  ;;  %v11161_v19 = vcombine.high %v1347_v4, %v1351_v3  ;;  %v1383_v59 = vld [vmem:[%s16805_s2 + $0x1660] sm:$0xff]  ;;  %v1384_v60 = vld [vmem:[%s16805_s2 + $0x1668] sm:$0xff] }
 0x1e9   :  { %7050 = vmatmul.mubr.bf16.vlgmr.msra.gmra.mrb[16].mxu0 %v13726_v27  ;;  %v1387_v4 = vld [vmem:[%s16805_s2 + $0x1680] sm:$0xff] }
 0x1ea   :  { %7378 = vmatmul.mubr.bf16.vlgmr.msra.gmra.mrb[16].mxu1 %v13726_v27  ;;  %7059 = vmatpush1.bf16.msra.mxu0 %v11120_v15  ;;  %v1356_v15 = vld [vmem:[%s16805_s2 + $0x1588] sm:$0xff]  ;;  %v1391_v3 = vld [vmem:[%s16805_s2 + $0x16a0] sm:$0xff] }
 0x1eb   :  { %7090 = vmatprep.mubr.bf16.mxu0 %v13734_v35  ;;  %7387 = vmatpush1.bf16.msra.mxu1 %v11122_v58  ;;  %v11162_v58 = vcombine.low %v1348_v9, %v1352_v48  ;;  %v11171_v31 = vcombine.high %v1356_v15, %v1360_v47  ;;  %v1388_v9 = vld [vmem:[%s16805_s2 + $0x1688] sm:$0xff] }
 0x1ec   :  { %7418 = vmatprep.mubr.bf16.mxu1 %v13734_v35  ;;  %7060 = vmatprep.subr.bf16.mxu0 %v11129_v23  ;;  %v11169_v23 = vcombine.high %v1355_v22, %v1359_v13  ;;  %v1392_v48 = vld [vmem:[%s16805_s2 + $0x16a8] sm:$0xff] }
 0x1ed   :  { %7388 = vmatprep.subr.bf16.mxu1 %v11131_v36  ;;  %v1367_v36 = vld [vmem:[%s16805_s2 + $0x15e0] sm:$0xff] }
 0x1ee   :  { %7061 = vmatpush1.bf16.msra.mxu0 %v11128_v41  ;;  %v11168_v41 = vcombine.low %v1355_v22, %v1359_v13  ;;  %v1395_v22 = vld [vmem:[%s16805_s2 + $0x16c0] sm:$0xff] }
 0x1ef   :  { %7389 = vmatpush1.bf16.msra.mxu1 %v11130_v43  ;;  %7062 = vmatprep.subr.bf16.mxu0 %v11137_v44  ;;  %v11170_v43 = vcombine.low %v1356_v15, %v1360_v47  ;;  %v11177_v44 = vcombine.high %v1363_v33, %v1367_v36  ;;  %v1399_v13 = vld [vmem:[%s16805_s2 + $0x16e0] sm:$0xff]  ;;  %v1396_v15 = vld [vmem:[%s16805_s2 + $0x16c8] sm:$0xff] }
 0x1f0   :  { %7390 = vmatprep.subr.bf16.mxu1 %v11139_v45  ;;  %v11179_v45 = vcombine.high %v1364_v18, %v1368_v40  ;;  %v1400_v47 = vld [vmem:[%s16805_s2 + $0x16e8] sm:$0xff] }
 0x1f2   :  { %7063 = vmatpush1.bf16.msra.mxu0 %v11136_v53  ;;  %v11176_v53 = vcombine.low %v1363_v33, %v1367_v36  ;;  %v1403_v33 = vld [vmem:[%s16805_s2 + $0x1700] sm:$0xff] }
 0x1f3   :  { %7391 = vmatpush1.bf16.msra.mxu1 %v11138_v54  ;;  %7064 = vmatprep.subr.bf16.mxu0 %v11145_v7  ;;  %v11178_v54 = vcombine.low %v1364_v18, %v1368_v40  ;;  %v11185_v7 = vcombine.high %v1371_v49, %v1375_v50  ;;  %v1407_v36 = vld [vmem:[%s16805_s2 + $0x1720] sm:$0xff]  ;;  %v1404_v18 = vld [vmem:[%s16805_s2 + $0x1708] sm:$0xff] }
 0x1f4   :  { %7392 = vmatprep.subr.bf16.mxu1 %v11147_v57  ;;  %v11187_v57 = vcombine.high %v1372_v10, %v1376_v52  ;;  %v1408_v40 = vld [vmem:[%s16805_s2 + $0x1728] sm:$0xff] }
 0x1f6   :  { %7065 = vmatpush1.bf16.msra.mxu0 %v11144_v61  ;;  %v11184_v61 = vcombine.low %v1371_v49, %v1375_v50  ;;  %v1411_v49 = vld [vmem:[%s16805_s2 + $0x1740] sm:$0xff] }
 0x1f7   :  { %7393 = vmatpush1.bf16.msra.mxu1 %v11146_v62  ;;  %7066 = vmatprep.subr.bf16.mxu0 %v11153_v63  ;;  %v11186_v62 = vcombine.low %v1372_v10, %v1376_v52  ;;  %v11193_v63 = vcombine.high %v1379_v28, %v1383_v59  ;;  %v1415_v50 = vld [vmem:[%s16805_s2 + $0x1760] sm:$0xff]  ;;  %v1412_v10 = vld [vmem:[%s16805_s2 + $0x1748] sm:$0xff] }
 0x1f8   :  { %7394 = vmatprep.subr.bf16.mxu1 %v11155_v1  ;;  %v11195_v1 = vcombine.high %v1380_v26, %v1384_v60  ;;  %v1416_v52 = vld [vmem:[%s16805_s2 + $0x1768] sm:$0xff] }
 0x1fa   :  { %7067 = vmatpush1.bf16.msra.mxu0 %v11152_v11  ;;  %v11192_v11 = vcombine.low %v1379_v28, %v1383_v59  ;;  %v1419_v28 = vld [vmem:[%s16805_s2 + $0x1780] sm:$0xff] }
 0x1fb   :  { %7395 = vmatpush1.bf16.msra.mxu1 %v11154_v12  ;;  %7068 = vmatprep.subr.bf16.mxu0 %v11161_v19  ;;  %v11194_v12 = vcombine.low %v1380_v26, %v1384_v60  ;;  %v11201_v19 = vcombine.high %v1387_v4, %v1391_v3  ;;  %v1423_v59 = vld [vmem:[%s16805_s2 + $0x17a0] sm:$0xff]  ;;  %v1420_v26 = vld [vmem:[%s16805_s2 + $0x1788] sm:$0xff] }
 0x1fc   :  { %7396 = vmatprep.subr.bf16.mxu1 %v11163_v21  ;;  %v11203_v21 = vcombine.high %v1388_v9, %v1392_v48  ;;  %v1424_v60 = vld [vmem:[%s16805_s2 + $0x17a8] sm:$0xff] }
 0x1fe   :  { %7069 = vmatpush1.bf16.msra.mxu0 %v11160_v24  ;;  %v11200_v24 = vcombine.low %v1387_v4, %v1391_v3  ;;  %v1427_v4 = vld [vmem:[%s16805_s2 + $0x17c0] sm:$0xff] }
 0x1ff   :  { %7397 = vmatpush1.bf16.msra.mxu1 %v11162_v58  ;;  %7070 = vmatprep.subr.bf16.mxu0 %v11169_v23  ;;  %v11202_v58 = vcombine.low %v1388_v9, %v1392_v48  ;;  %v11209_v23 = vcombine.high %v1395_v22, %v1399_v13  ;;  %v1431_v3 = vld [vmem:[%s16805_s2 + $0x17e0] sm:$0xff]  ;;  %v1428_v9 = vld [vmem:[%s16805_s2 + $0x17c8] sm:$0xff] }
 0x200   :  { %7398 = vmatprep.subr.bf16.mxu1 %v11171_v31  ;;  %v11211_v31 = vcombine.high %v1396_v15, %v1400_v47  ;;  %v1432_v48 = vld [vmem:[%s16805_s2 + $0x17e8] sm:$0xff] }
 0x202   :  { %7071 = vmatpush1.bf16.msra.mxu0 %v11168_v41  ;;  %v11208_v41 = vcombine.low %v1395_v22, %v1399_v13  ;;  %v1435_v22 = vld [vmem:[%s16805_s2 + $0x1800] sm:$0xff] }
 0x203   :  { %7399 = vmatpush1.bf16.msra.mxu1 %v11170_v43  ;;  %7072 = vmatprep.subr.bf16.mxu0 %v11177_v44  ;;  %v11210_v43 = vcombine.low %v1396_v15, %v1400_v47  ;;  %v11217_v44 = vcombine.high %v1403_v33, %v1407_v36  ;;  %v1439_v13 = vld [vmem:[%s16805_s2 + $0x1820] sm:$0xff]  ;;  %v1436_v15 = vld [vmem:[%s16805_s2 + $0x1808] sm:$0xff] }
 0x204   :  { %7400 = vmatprep.subr.bf16.mxu1 %v11179_v45  ;;  %v11219_v45 = vcombine.high %v1404_v18, %v1408_v40  ;;  %v1440_v47 = vld [vmem:[%s16805_s2 + $0x1828] sm:$0xff] }
 0x206   :  { %7073 = vmatpush1.bf16.msra.mxu0 %v11176_v53  ;;  %v11216_v53 = vcombine.low %v1403_v33, %v1407_v36  ;;  %v11251_v33 = vcombine.high %v1436_v15, %v1440_v47  ;;  %v648_v36 = vmax.f32 %v12946_v51, 0.0  ;;  %v11250_v51 = vcombine.low %v1436_v15, %v1440_v47  ;;  %v1475_v15 = vld [vmem:[%s16805_s2 + $0x1940] sm:$0xff] }
 0x207   :  { %7401 = vmatpush1.bf16.msra.mxu1 %v11178_v54  ;;  %7074 = vmatprep.subr.bf16.mxu0 %v11185_v7  ;;  %v11218_v54 = vcombine.low %v1404_v18, %v1408_v40  ;;  %v11225_v7 = vcombine.high %v1411_v49, %v1415_v50  ;;  %v1443_v18 = vld [vmem:[%s16805_s2 + $0x1840] sm:$0xff] }
 0x208   :  { %7402 = vmatprep.subr.bf16.mxu1 %v11187_v57  ;;  %v11227_v57 = vcombine.high %v1412_v10, %v1416_v52  ;;  %v1447_v40 = vld [vmem:[%s16805_s2 + $0x1860] sm:$0xff] }
 0x209   :  { %v1479_v47 = vld [vmem:[%s16805_s2 + $0x1960] sm:$0xff] }
 0x20a   :  { %7075 = vmatpush1.bf16.msra.mxu0 %v11184_v61  ;;  %v11224_v61 = vcombine.low %v1411_v49, %v1415_v50  ;;  %v1451_v49 = vld [vmem:[%s16805_s2 + $0x1880] sm:$0xff] }
 0x20b   :  { %7403 = vmatpush1.bf16.msra.mxu1 %v11186_v62  ;;  %7076 = vmatprep.subr.bf16.mxu0 %v11193_v63  ;;  %v11226_v62 = vcombine.low %v1412_v10, %v1416_v52  ;;  %v11233_v63 = vcombine.high %v1419_v28, %v1423_v59  ;;  %v1455_v50 = vld [vmem:[%s16805_s2 + $0x18a0] sm:$0xff]  ;;  %v13936_v10 = vpack.c.bf16 %v648_v36, %v648_v36 }
 0x20c   :  { %7404 = vmatprep.subr.bf16.mxu1 %v11195_v1  ;;  %v11235_v1 = vcombine.high %v1420_v26, %v1424_v60 }
 0x20e   :  { %7077 = vmatpush1.bf16.msra.mxu0 %v11192_v11  ;;  %v11232_v11 = vcombine.low %v1419_v28, %v1423_v59  ;;  %v11265_v28 = vcombine.high %v1451_v49, %v1455_v50 }
 0x20f   :  { %7405 = vmatpush1.bf16.msra.mxu1 %v11194_v12  ;;  %7078 = vmatprep.subr.bf16.mxu0 %v11201_v19  ;;  %v11234_v12 = vcombine.low %v1420_v26, %v1424_v60  ;;  %v11241_v19 = vcombine.high %v1427_v4, %v1431_v3  ;;  %v1459_v26 = vld [vmem:[%s16805_s2 + $0x18c0] sm:$0xff] }
 0x210   :  { %7406 = vmatprep.subr.bf16.mxu1 %v11203_v21  ;;  %v11243_v21 = vcombine.high %v1428_v9, %v1432_v48  ;;  %v1463_v60 = vld [vmem:[%s16805_s2 + $0x18e0] sm:$0xff] }
 0x212   :  { %7079 = vmatpush1.bf16.msra.mxu0 %v11200_v24  ;;  %v11240_v24 = vcombine.low %v1427_v4, %v1431_v3  ;;  %v11273_v4 = vcombine.high %v1459_v26, %v1463_v60 }
 0x213   :  { %7407 = vmatpush1.bf16.msra.mxu1 %v11202_v58  ;;  %7080 = vmatprep.subr.bf16.mxu0 %v11209_v23  ;;  %v645_v58 = vmax.f32 %v13019_v56, 0.0  ;;  %v11242_v23 = vcombine.low %v1428_v9, %v1432_v48  ;;  %v1444_v56 = vld [vmem:[%s16805_s2 + $0x1848] sm:$0xff]  ;;  %v1467_v9 = vld [vmem:[%s16805_s2 + $0x1900] sm:$0xff] }
 0x214   :  { %7408 = vmatprep.subr.bf16.mxu1 %v11211_v31  ;;  %v11249_v31 = vcombine.high %v1435_v22, %v1439_v13  ;;  %v1471_v48 = vld [vmem:[%s16805_s2 + $0x1920] sm:$0xff] }
 0x216   :  { %7081 = vmatpush1.bf16.msra.mxu0 %v11208_v41  ;;  %v11248_v41 = vcombine.low %v1435_v22, %v1439_v13  ;;  %v11281_v22 = vcombine.high %v1467_v9, %v1471_v48 }
 0x217   :  { %7409 = vmatpush1.bf16.msra.mxu1 %v11210_v43  ;;  %7082 = vmatprep.subr.bf16.mxu0 %v11217_v44  ;;  %v1448_v43 = vld [vmem:[%s16805_s2 + $0x1868] sm:$0xff]  ;;  %v13928_v44 = vpack.c.bf16 %v645_v58, %v645_v58 }
 0x218   :  { %7410 = vmatprep.subr.bf16.mxu1 %v11219_v45  ;;  %v11257_v45 = vcombine.high %v1443_v18, %v1447_v40  ;;  %v11259_v52 = vcombine.high %v1444_v56, %v1448_v43  ;;  %v1480_v58 = vld [vmem:[%s16805_s2 + $0x1968] sm:$0xff] }
 0x21a   :  { %7083 = vmatpush1.bf16.msra.mxu0 %v11216_v53  ;;  %v1452_v53 = vld [vmem:[%s16805_s2 + $0x1888] sm:$0xff] }
 0x21b   :  { %7411 = vmatpush1.bf16.msra.mxu1 %v11218_v54  ;;  %7084 = vmatprep.subr.bf16.mxu0 %v11225_v7  ;;  %v1456_v54 = vld [vmem:[%s16805_s2 + $0x18a8] sm:$0xff]  ;;  %v11256_v7 = vcombine.low %v1443_v18, %v1447_v40  ;;  %v1483_v18 = vld [vmem:[%s16805_s2 + $0x1980] sm:$0xff] }
 0x21c   :  { %7412 = vmatprep.subr.bf16.mxu1 %v11227_v57  ;;  %v11258_v57 = vcombine.low %v1444_v56, %v1448_v43  ;;  %v11267_v59 = vcombine.high %v1452_v53, %v1456_v54  ;;  %v1487_v40 = vld [vmem:[%s16805_s2 + $0x19a0] sm:$0xff]  ;;  %v1488_v56 = vld [vmem:[%s16805_s2 + $0x19a8] sm:$0xff]  ;;  %v11288_v43 = vcombine.low %v1475_v15, %v1479_v47 }
 0x21e   :  { %7085 = vmatpush1.bf16.msra.mxu0 %v11224_v61  ;;  %v1460_v61 = vld [vmem:[%s16805_s2 + $0x18c8] sm:$0xff] }
 0x21f   :  { %7413 = vmatpush1.bf16.msra.mxu1 %v11226_v62  ;;  %7086 = vmatprep.subr.bf16.mxu0 %v11233_v63  ;;  %v1464_v62 = vld [vmem:[%s16805_s2 + $0x18e8] sm:$0xff]  ;;  %v11264_v63 = vcombine.low %v1451_v49, %v1455_v50  ;;  %v1491_v50 = vld [vmem:[%s16805_s2 + $0x19c0] sm:$0xff] }
 0x220   :  { %7414 = vmatprep.subr.bf16.mxu1 %v11235_v1  ;;  %v11266_v1 = vcombine.low %v1452_v53, %v1456_v54  ;;  %v11275_v3 = vcombine.high %v1460_v61, %v1464_v62  ;;  %v1492_v53 = vld [vmem:[%s16805_s2 + $0x19c8] sm:$0xff] }
 0x221   :  { %v1496_v54 = vld [vmem:[%s16805_s2 + $0x19e8] sm:$0xff] }
 0x222   :  { %7087 = vmatpush1.bf16.msra.mxu0 %v11232_v11  ;;  %v1468_v11 = vld [vmem:[%s16805_s2 + $0x1908] sm:$0xff] }
 0x223   :  { %7415 = vmatpush1.bf16.msra.mxu1 %v11234_v12  ;;  %7088 = vmatprep.subr.bf16.mxu0 %v11241_v19  ;;  %v1472_v12 = vld [vmem:[%s16805_s2 + $0x1928] sm:$0xff]  ;;  %v11272_v19 = vcombine.low %v1459_v26, %v1463_v60  ;;  %v1499_v26 = vld [vmem:[%s16805_s2 + $0x1a00] sm:$0xff] }
 0x224   :  { %7416 = vmatprep.subr.bf16.mxu1 %v11243_v21  ;;  %v11274_v21 = vcombine.low %v1460_v61, %v1464_v62  ;;  %v11283_v13 = vcombine.high %v1468_v11, %v1472_v12  ;;  %v1503_v60 = vld [vmem:[%s16805_s2 + $0x1a20] sm:$0xff]  ;;  %v1500_v61 = vld [vmem:[%s16805_s2 + $0x1a08] sm:$0xff] }
 0x225   :  { %v1504_v62 = vld [vmem:[%s16805_s2 + $0x1a28] sm:$0xff] }
 0x226   :  { %7089 = vmatpush1.bf16.msra.mxu0 %v11240_v24  ;;  %v1476_v24 = vld [vmem:[%s16805_s2 + $0x1948] sm:$0xff] }
 0x227   :  { %7417 = vmatpush1.bf16.msra.mxu1 %v11242_v23  ;;  %7099 = vmatprep.subr.bf16.mxu0 %v11249_v31  ;;  %v11280_v23 = vcombine.low %v1467_v9, %v1471_v48  ;;  %v11282_v31 = vcombine.low %v1468_v11, %v1472_v12  ;;  %v11291_v36 = vcombine.high %v1476_v24, %v1480_v58  ;;  %v1507_v9 = vld [vmem:[%s16805_s2 + $0x1a40] sm:$0xff]  ;;  %v1508_v11 = vld [vmem:[%s16805_s2 + $0x1a48] sm:$0xff] }
 0x228   :  { %7427 = vmatprep.subr.bf16.mxu1 %v11251_v33  ;;  %v11289_v33 = vcombine.high %v1475_v15, %v1479_v47  ;;  %v1511_v48 = vld [vmem:[%s16805_s2 + $0x1a60] sm:$0xff]  ;;  %v1512_v12 = vld [vmem:[%s16805_s2 + $0x1a68] sm:$0xff] }
 0x229   :  { %7091 = vmatmul.mubr.bf16.vlgmr.msra.gmra.mrb[16].mxu0 %v13928_v44  ;;  %v1515_v15 = vld [vmem:[%s16805_s2 + $0x1a80] sm:$0xff] }
 0x22a   :  { %7419 = vmatmul.mubr.bf16.vlgmr.msra.gmra.mrb[16].mxu1 %v13928_v44  ;;  %7100 = vmatpush1.bf16.msra.mxu0 %v11248_v41  ;;  %v1484_v41 = vld [vmem:[%s16805_s2 + $0x1988] sm:$0xff]  ;;  %v1519_v47 = vld [vmem:[%s16805_s2 + $0x1aa0] sm:$0xff] }
 0x22b   :  { %7131 = vmatprep.mubr.bf16.mxu0 %v13936_v10  ;;  %7428 = vmatpush1.bf16.msra.mxu1 %v11250_v51  ;;  %v11290_v51 = vcombine.low %v1476_v24, %v1480_v58  ;;  %v11299_v49 = vcombine.high %v1484_v41, %v1488_v56  ;;  %v1516_v24 = vld [vmem:[%s16805_s2 + $0x1a88] sm:$0xff] }
 0x22c   :  { %7459 = vmatprep.mubr.bf16.mxu1 %v13936_v10  ;;  %7101 = vmatprep.subr.bf16.mxu0 %v11257_v45  ;;  %v11297_v45 = vcombine.high %v1483_v18, %v1487_v40  ;;  %v1520_v58 = vld [vmem:[%s16805_s2 + $0x1aa8] sm:$0xff] }
 0x22d   :  { %7429 = vmatprep.subr.bf16.mxu1 %v11259_v52  ;;  %v1495_v52 = vld [vmem:[%s16805_s2 + $0x19e0] sm:$0xff] }
 0x22e   :  { %7102 = vmatpush1.bf16.msra.mxu0 %v11256_v7  ;;  %v11296_v7 = vcombine.low %v1483_v18, %v1487_v40  ;;  %v1523_v18 = vld [vmem:[%s16805_s2 + $0x1ac0] sm:$0xff] }
 0x22f   :  { %7430 = vmatpush1.bf16.msra.mxu1 %v11258_v57  ;;  %7103 = vmatprep.subr.bf16.mxu0 %v11265_v28  ;;  %v11298_v57 = vcombine.low %v1484_v41, %v1488_v56  ;;  %v11305_v28 = vcombine.high %v1491_v50, %v1495_v52  ;;  %v1527_v40 = vld [vmem:[%s16805_s2 + $0x1ae0] sm:$0xff]  ;;  %v1524_v41 = vld [vmem:[%s16805_s2 + $0x1ac8] sm:$0xff] }
 0x230   :  { %7431 = vmatprep.subr.bf16.mxu1 %v11267_v59  ;;  %v11307_v59 = vcombine.high %v1492_v53, %v1496_v54  ;;  %v1528_v56 = vld [vmem:[%s16805_s2 + $0x1ae8] sm:$0xff] }
 0x232   :  { %7104 = vmatpush1.bf16.msra.mxu0 %v11264_v63  ;;  %v11304_v63 = vcombine.low %v1491_v50, %v1495_v52  ;;  %v1531_v50 = vld [vmem:[%s16805_s2 + $0x1b00] sm:$0xff] }
 0x233   :  { %7432 = vmatpush1.bf16.msra.mxu1 %v11266_v1  ;;  %7105 = vmatprep.subr.bf16.mxu0 %v11273_v4  ;;  %v11306_v1 = vcombine.low %v1492_v53, %v1496_v54  ;;  %v11313_v4 = vcombine.high %v1499_v26, %v1503_v60  ;;  %v1535_v52 = vld [vmem:[%s16805_s2 + $0x1b20] sm:$0xff]  ;;  %v1532_v53 = vld [vmem:[%s16805_s2 + $0x1b08] sm:$0xff] }
 0x234   :  { %7433 = vmatprep.subr.bf16.mxu1 %v11275_v3  ;;  %v11315_v3 = vcombine.high %v1500_v61, %v1504_v62  ;;  %v1536_v54 = vld [vmem:[%s16805_s2 + $0x1b28] sm:$0xff] }
 0x236   :  { %7106 = vmatpush1.bf16.msra.mxu0 %v11272_v19  ;;  %v11312_v19 = vcombine.low %v1499_v26, %v1503_v60  ;;  %v1539_v26 = vld [vmem:[%s16805_s2 + $0x1b40] sm:$0xff] }
 0x237   :  { %7434 = vmatpush1.bf16.msra.mxu1 %v11274_v21  ;;  %7107 = vmatprep.subr.bf16.mxu0 %v11281_v22  ;;  %v11314_v21 = vcombine.low %v1500_v61, %v1504_v62  ;;  %v11321_v22 = vcombine.high %v1507_v9, %v1511_v48  ;;  %v1543_v60 = vld [vmem:[%s16805_s2 + $0x1b60] sm:$0xff]  ;;  %v1540_v61 = vld [vmem:[%s16805_s2 + $0x1b48] sm:$0xff] }
 0x238   :  { %7435 = vmatprep.subr.bf16.mxu1 %v11283_v13  ;;  %v11323_v13 = vcombine.high %v1508_v11, %v1512_v12  ;;  %v1544_v62 = vld [vmem:[%s16805_s2 + $0x1b68] sm:$0xff] }
 0x23a   :  { %7108 = vmatpush1.bf16.msra.mxu0 %v11280_v23  ;;  %v11320_v23 = vcombine.low %v1507_v9, %v1511_v48  ;;  %v1547_v9 = vld [vmem:[%s16805_s2 + $0x1b80] sm:$0xff] }
 0x23b   :  { %7436 = vmatpush1.bf16.msra.mxu1 %v11282_v31  ;;  %7109 = vmatprep.subr.bf16.mxu0 %v11289_v33  ;;  %v11322_v31 = vcombine.low %v1508_v11, %v1512_v12  ;;  %v11329_v33 = vcombine.high %v1515_v15, %v1519_v47  ;;  %v1551_v48 = vld [vmem:[%s16805_s2 + $0x1ba0] sm:$0xff]  ;;  %v1548_v11 = vld [vmem:[%s16805_s2 + $0x1b88] sm:$0xff] }
 0x23c   :  { %7437 = vmatprep.subr.bf16.mxu1 %v11291_v36  ;;  %v11331_v36 = vcombine.high %v1516_v24, %v1520_v58  ;;  %v1552_v12 = vld [vmem:[%s16805_s2 + $0x1ba8] sm:$0xff] }
 0x23e   :  { %7110 = vmatpush1.bf16.msra.mxu0 %v11288_v43  ;;  %v11328_v43 = vcombine.low %v1515_v15, %v1519_v47  ;;  %v1555_v15 = vld [vmem:[%s16805_s2 + $0x1bc0] sm:$0xff] }
 0x23f   :  { %7438 = vmatpush1.bf16.msra.mxu1 %v11290_v51  ;;  %7111 = vmatprep.subr.bf16.mxu0 %v11297_v45  ;;  %v11330_v51 = vcombine.low %v1516_v24, %v1520_v58  ;;  %v11337_v45 = vcombine.high %v1523_v18, %v1527_v40  ;;  %v1559_v47 = vld [vmem:[%s16805_s2 + $0x1be0] sm:$0xff]  ;;  %v1556_v24 = vld [vmem:[%s16805_s2 + $0x1bc8] sm:$0xff] }
 0x240   :  { %7439 = vmatprep.subr.bf16.mxu1 %v11299_v49  ;;  %v11339_v49 = vcombine.high %v1524_v41, %v1528_v56  ;;  %v1560_v58 = vld [vmem:[%s16805_s2 + $0x1be8] sm:$0xff] }
 0x242   :  { %7112 = vmatpush1.bf16.msra.mxu0 %v11296_v7  ;;  %v11336_v7 = vcombine.low %v1523_v18, %v1527_v40  ;;  %v1563_v18 = vld [vmem:[%s16805_s2 + $0x1c00] sm:$0xff] }
 0x243   :  { %7440 = vmatpush1.bf16.msra.mxu1 %v11298_v57  ;;  %7113 = vmatprep.subr.bf16.mxu0 %v11305_v28  ;;  %v11338_v57 = vcombine.low %v1524_v41, %v1528_v56  ;;  %v11345_v28 = vcombine.high %v1531_v50, %v1535_v52  ;;  %v1567_v40 = vld [vmem:[%s16805_s2 + $0x1c20] sm:$0xff]  ;;  %v1564_v41 = vld [vmem:[%s16805_s2 + $0x1c08] sm:$0xff] }
 0x244   :  { %7441 = vmatprep.subr.bf16.mxu1 %v11307_v59  ;;  %v11347_v59 = vcombine.high %v1532_v53, %v1536_v54  ;;  %v1568_v56 = vld [vmem:[%s16805_s2 + $0x1c28] sm:$0xff] }
 0x246   :  { %7114 = vmatpush1.bf16.msra.mxu0 %v11304_v63  ;;  %v11344_v63 = vcombine.low %v1531_v50, %v1535_v52  ;;  %v11379_v50 = vcombine.high %v1564_v41, %v1568_v56  ;;  %v650_v52 = vmax.f32 %v13059_v30, 0.0  ;;  %v11378_v30 = vcombine.low %v1564_v41, %v1568_v56  ;;  %v1603_v41 = vld [vmem:[%s16805_s2 + $0x1d40] sm:$0xff] }
 0x247   :  { %7442 = vmatpush1.bf16.msra.mxu1 %v11306_v1  ;;  %7115 = vmatprep.subr.bf16.mxu0 %v11313_v4  ;;  %v11346_v1 = vcombine.low %v1532_v53, %v1536_v54  ;;  %v11353_v4 = vcombine.high %v1539_v26, %v1543_v60  ;;  %v1571_v53 = vld [vmem:[%s16805_s2 + $0x1c40] sm:$0xff] }
 0x248   :  { %7443 = vmatprep.subr.bf16.mxu1 %v11315_v3  ;;  %v11355_v3 = vcombine.high %v1540_v61, %v1544_v62  ;;  %v1575_v54 = vld [vmem:[%s16805_s2 + $0x1c60] sm:$0xff] }
 0x249   :  { %v1607_v56 = vld [vmem:[%s16805_s2 + $0x1d60] sm:$0xff] }
 0x24a   :  { %7116 = vmatpush1.bf16.msra.mxu0 %v11312_v19  ;;  %v11352_v19 = vcombine.low %v1539_v26, %v1543_v60  ;;  %v1579_v26 = vld [vmem:[%s16805_s2 + $0x1c80] sm:$0xff] }
 0x24b   :  { %7444 = vmatpush1.bf16.msra.mxu1 %v11314_v21  ;;  %7117 = vmatprep.subr.bf16.mxu0 %v11321_v22  ;;  %v11354_v21 = vcombine.low %v1540_v61, %v1544_v62  ;;  %v11361_v22 = vcombine.high %v1547_v9, %v1551_v48  ;;  %v1583_v60 = vld [vmem:[%s16805_s2 + $0x1ca0] sm:$0xff]  ;;  %v14138_v61 = vpack.c.bf16 %v650_v52, %v650_v52 }
 0x24c   :  { %7445 = vmatprep.subr.bf16.mxu1 %v11323_v13  ;;  %v11363_v13 = vcombine.high %v1548_v11, %v1552_v12 }
 0x24e   :  { %7118 = vmatpush1.bf16.msra.mxu0 %v11320_v23  ;;  %v11360_v23 = vcombine.low %v1547_v9, %v1551_v48  ;;  %v11393_v9 = vcombine.high %v1579_v26, %v1583_v60 }
 0x24f   :  { %7446 = vmatpush1.bf16.msra.mxu1 %v11322_v31  ;;  %7119 = vmatprep.subr.bf16.mxu0 %v11329_v33  ;;  %v11362_v31 = vcombine.low %v1548_v11, %v1552_v12  ;;  %v11369_v33 = vcombine.high %v1555_v15, %v1559_v47  ;;  %v1587_v11 = vld [vmem:[%s16805_s2 + $0x1cc0] sm:$0xff] }
 0x250   :  { %7447 = vmatprep.subr.bf16.mxu1 %v11331_v36  ;;  %v11371_v36 = vcombine.high %v1556_v24, %v1560_v58  ;;  %v1591_v12 = vld [vmem:[%s16805_s2 + $0x1ce0] sm:$0xff] }
 0x252   :  { %7120 = vmatpush1.bf16.msra.mxu0 %v11328_v43  ;;  %v11368_v43 = vcombine.low %v1555_v15, %v1559_v47  ;;  %v11401_v15 = vcombine.high %v1587_v11, %v1591_v12 }
 0x253   :  { %7448 = vmatpush1.bf16.msra.mxu1 %v11330_v51  ;;  %7121 = vmatprep.subr.bf16.mxu0 %v11337_v45  ;;  %v647_v51 = vmax.f32 %v12930_v34, 0.0  ;;  %v11370_v45 = vcombine.low %v1556_v24, %v1560_v58  ;;  %v1572_v34 = vld [vmem:[%s16805_s2 + $0x1c48] sm:$0xff]  ;;  %v1595_v24 = vld [vmem:[%s16805_s2 + $0x1d00] sm:$0xff] }
 0x254   :  { %7449 = vmatprep.subr.bf16.mxu1 %v11339_v49  ;;  %v11377_v49 = vcombine.high %v1563_v18, %v1567_v40  ;;  %v1599_v58 = vld [vmem:[%s16805_s2 + $0x1d20] sm:$0xff] }
 0x256   :  { %7122 = vmatpush1.bf16.msra.mxu0 %v11336_v7  ;;  %v11376_v7 = vcombine.low %v1563_v18, %v1567_v40  ;;  %v11409_v18 = vcombine.high %v1595_v24, %v1599_v58 }
 0x257   :  { %7450 = vmatpush1.bf16.msra.mxu1 %v11338_v57  ;;  %7123 = vmatprep.subr.bf16.mxu0 %v11345_v28  ;;  %v1576_v57 = vld [vmem:[%s16805_s2 + $0x1c68] sm:$0xff]  ;;  %v14130_v28 = vpack.c.bf16 %v647_v51, %v647_v51 }
 0x258   :  { %7451 = vmatprep.subr.bf16.mxu1 %v11347_v59  ;;  %v11385_v59 = vcombine.high %v1571_v53, %v1575_v54  ;;  %v11387_v62 = vcombine.high %v1572_v34, %v1576_v57  ;;  %v1608_v51 = vld [vmem:[%s16805_s2 + $0x1d68] sm:$0xff] }
 0x25a   :  { %7124 = vmatpush1.bf16.msra.mxu0 %v11344_v63  ;;  %v1580_v63 = vld [vmem:[%s16805_s2 + $0x1c88] sm:$0xff] }
 0x25b   :  { %7452 = vmatpush1.bf16.msra.mxu1 %v11346_v1  ;;  %7125 = vmatprep.subr.bf16.mxu0 %v11353_v4  ;;  %v1584_v1 = vld [vmem:[%s16805_s2 + $0x1ca8] sm:$0xff]  ;;  %v11384_v4 = vcombine.low %v1571_v53, %v1575_v54  ;;  %v1611_v53 = vld [vmem:[%s16805_s2 + $0x1d80] sm:$0xff] }
 0x25c   :  { %7453 = vmatprep.subr.bf16.mxu1 %v11355_v3  ;;  %v11386_v3 = vcombine.low %v1572_v34, %v1576_v57  ;;  %v11395_v48 = vcombine.high %v1580_v63, %v1584_v1  ;;  %v1615_v54 = vld [vmem:[%s16805_s2 + $0x1da0] sm:$0xff]  ;;  %v1616_v34 = vld [vmem:[%s16805_s2 + $0x1da8] sm:$0xff]  ;;  %v11416_v57 = vcombine.low %v1603_v41, %v1607_v56 }
 0x25e   :  { %7126 = vmatpush1.bf16.msra.mxu0 %v11352_v19  ;;  %v1588_v19 = vld [vmem:[%s16805_s2 + $0x1cc8] sm:$0xff] }
 0x25f   :  { %7454 = vmatpush1.bf16.msra.mxu1 %v11354_v21  ;;  %7127 = vmatprep.subr.bf16.mxu0 %v11361_v22  ;;  %v1592_v21 = vld [vmem:[%s16805_s2 + $0x1ce8] sm:$0xff]  ;;  %v11392_v22 = vcombine.low %v1579_v26, %v1583_v60  ;;  %v1619_v60 = vld [vmem:[%s16805_s2 + $0x1dc0] sm:$0xff] }
 0x260   :  { %7455 = vmatprep.subr.bf16.mxu1 %v11363_v13  ;;  %v11394_v13 = vcombine.low %v1580_v63, %v1584_v1  ;;  %v11403_v47 = vcombine.high %v1588_v19, %v1592_v21  ;;  %v1620_v63 = vld [vmem:[%s16805_s2 + $0x1dc8] sm:$0xff] }
 0x261   :  { %v1624_v1 = vld [vmem:[%s16805_s2 + $0x1de8] sm:$0xff] }
 0x262   :  { %7128 = vmatpush1.bf16.msra.mxu0 %v11360_v23  ;;  %v1596_v23 = vld [vmem:[%s16805_s2 + $0x1d08] sm:$0xff] }
 0x263   :  { %7456 = vmatpush1.bf16.msra.mxu1 %v11362_v31  ;;  %7129 = vmatprep.subr.bf16.mxu0 %v11369_v33  ;;  %v1600_v31 = vld [vmem:[%s16805_s2 + $0x1d28] sm:$0xff]  ;;  %v11400_v33 = vcombine.low %v1587_v11, %v1591_v12  ;;  %v1627_v11 = vld [vmem:[%s16805_s2 + $0x1e00] sm:$0xff] }
 0x264   :  { %7457 = vmatprep.subr.bf16.mxu1 %v11371_v36  ;;  %v11402_v36 = vcombine.low %v1588_v19, %v1592_v21  ;;  %v11411_v40 = vcombine.high %v1596_v23, %v1600_v31  ;;  %v1631_v12 = vld [vmem:[%s16805_s2 + $0x1e20] sm:$0xff]  ;;  %v1628_v19 = vld [vmem:[%s16805_s2 + $0x1e08] sm:$0xff] }
 0x265   :  { %v1632_v21 = vld [vmem:[%s16805_s2 + $0x1e28] sm:$0xff] }
 0x266   :  { %7130 = vmatpush1.bf16.msra.mxu0 %v11368_v43  ;;  %v1604_v43 = vld [vmem:[%s16805_s2 + $0x1d48] sm:$0xff] }
 0x267   :  { %7458 = vmatpush1.bf16.msra.mxu1 %v11370_v45  ;;  %7140 = vmatprep.subr.bf16.mxu0 %v11377_v49  ;;  %v11408_v45 = vcombine.low %v1595_v24, %v1599_v58  ;;  %v11410_v49 = vcombine.low %v1596_v23, %v1600_v31  ;;  %v11419_v52 = vcombine.high %v1604_v43, %v1608_v51  ;;  %v1635_v24 = vld [vmem:[%s16805_s2 + $0x1e40] sm:$0xff]  ;;  %v1636_v23 = vld [vmem:[%s16805_s2 + $0x1e48] sm:$0xff] }
 0x268   :  { %7468 = vmatprep.subr.bf16.mxu1 %v11379_v50  ;;  %v11417_v50 = vcombine.high %v1603_v41, %v1607_v56  ;;  %v1639_v58 = vld [vmem:[%s16805_s2 + $0x1e60] sm:$0xff]  ;;  %v1640_v31 = vld [vmem:[%s16805_s2 + $0x1e68] sm:$0xff] }
 0x269   :  { %7132 = vmatmul.mubr.bf16.vlgmr.msra.gmra.mrb[16].mxu0 %v14130_v28  ;;  %v1643_v41 = vld [vmem:[%s16805_s2 + $0x1e80] sm:$0xff] }
 0x26a   :  { %7460 = vmatmul.mubr.bf16.vlgmr.msra.gmra.mrb[16].mxu1 %v14130_v28  ;;  %7141 = vmatpush1.bf16.msra.mxu0 %v11376_v7  ;;  %v1612_v7 = vld [vmem:[%s16805_s2 + $0x1d88] sm:$0xff]  ;;  %v1647_v56 = vld [vmem:[%s16805_s2 + $0x1ea0] sm:$0xff] }
 0x26b   :  { %7172 = vmatprep.mubr.bf16.mxu0 %v14138_v61  ;;  %7469 = vmatpush1.bf16.msra.mxu1 %v11378_v30  ;;  %v11418_v30 = vcombine.low %v1604_v43, %v1608_v51  ;;  %v11427_v26 = vcombine.high %v1612_v7, %v1616_v34  ;;  %v1644_v43 = vld [vmem:[%s16805_s2 + $0x1e88] sm:$0xff] }
 0x26c   :  { %7500 = vmatprep.mubr.bf16.mxu1 %v14138_v61  ;;  %7142 = vmatprep.subr.bf16.mxu0 %v11385_v59  ;;  %v11425_v59 = vcombine.high %v1611_v53, %v1615_v54  ;;  %v1648_v51 = vld [vmem:[%s16805_s2 + $0x1ea8] sm:$0xff] }
 0x26d   :  { %7470 = vmatprep.subr.bf16.mxu1 %v11387_v62  ;;  %v1623_v62 = vld [vmem:[%s16805_s2 + $0x1de0] sm:$0xff] }
 0x26e   :  { %7143 = vmatpush1.bf16.msra.mxu0 %v11384_v4  ;;  %v11424_v4 = vcombine.low %v1611_v53, %v1615_v54  ;;  %v1651_v53 = vld [vmem:[%s16805_s2 + $0x1ec0] sm:$0xff] }
 0x26f   :  { %7471 = vmatpush1.bf16.msra.mxu1 %v11386_v3  ;;  %7144 = vmatprep.subr.bf16.mxu0 %v11393_v9  ;;  %v11426_v3 = vcombine.low %v1612_v7, %v1616_v34  ;;  %v11433_v9 = vcombine.high %v1619_v60, %v1623_v62  ;;  %v1655_v54 = vld [vmem:[%s16805_s2 + $0x1ee0] sm:$0xff]  ;;  %v1652_v7 = vld [vmem:[%s16805_s2 + $0x1ec8] sm:$0xff] }
 0x270   :  { %7472 = vmatprep.subr.bf16.mxu1 %v11395_v48  ;;  %v11435_v48 = vcombine.high %v1620_v63, %v1624_v1  ;;  %v1656_v34 = vld [vmem:[%s16805_s2 + $0x1ee8] sm:$0xff] }
 0x272   :  { %7145 = vmatpush1.bf16.msra.mxu0 %v11392_v22  ;;  %v11432_v22 = vcombine.low %v1619_v60, %v1623_v62  ;;  %v1659_v60 = vld [vmem:[%s16805_s2 + $0x1f00] sm:$0xff] }
 0x273   :  { %7473 = vmatpush1.bf16.msra.mxu1 %v11394_v13  ;;  %7146 = vmatprep.subr.bf16.mxu0 %v11401_v15  ;;  %v11434_v13 = vcombine.low %v1620_v63, %v1624_v1  ;;  %v11441_v15 = vcombine.high %v1627_v11, %v1631_v12  ;;  %v1663_v62 = vld [vmem:[%s16805_s2 + $0x1f20] sm:$0xff]  ;;  %v1660_v63 = vld [vmem:[%s16805_s2 + $0x1f08] sm:$0xff] }
 0x274   :  { %7474 = vmatprep.subr.bf16.mxu1 %v11403_v47  ;;  %v11443_v47 = vcombine.high %v1628_v19, %v1632_v21  ;;  %v1664_v1 = vld [vmem:[%s16805_s2 + $0x1f28] sm:$0xff] }
 0x276   :  { %7147 = vmatpush1.bf16.msra.mxu0 %v11400_v33  ;;  %v11440_v33 = vcombine.low %v1627_v11, %v1631_v12  ;;  %v1667_v11 = vld [vmem:[%s16805_s2 + $0x1f40] sm:$0xff] }
 0x277   :  { %7475 = vmatpush1.bf16.msra.mxu1 %v11402_v36  ;;  %7148 = vmatprep.subr.bf16.mxu0 %v11409_v18  ;;  %v11442_v36 = vcombine.low %v1628_v19, %v1632_v21  ;;  %v11449_v18 = vcombine.high %v1635_v24, %v1639_v58  ;;  %v1671_v12 = vld [vmem:[%s16805_s2 + $0x1f60] sm:$0xff]  ;;  %v1668_v19 = vld [vmem:[%s16805_s2 + $0x1f48] sm:$0xff] }
 0x278   :  { %7476 = vmatprep.subr.bf16.mxu1 %v11411_v40  ;;  %v11451_v40 = vcombine.high %v1636_v23, %v1640_v31  ;;  %v1672_v21 = vld [vmem:[%s16805_s2 + $0x1f68] sm:$0xff] }
 0x27a   :  { %7149 = vmatpush1.bf16.msra.mxu0 %v11408_v45  ;;  %v11448_v45 = vcombine.low %v1635_v24, %v1639_v58  ;;  %v1675_v24 = vld [vmem:[%s16805_s2 + $0x1f80] sm:$0xff] }
 0x27b   :  { %7477 = vmatpush1.bf16.msra.mxu1 %v11410_v49  ;;  %7150 = vmatprep.subr.bf16.mxu0 %v11417_v50  ;;  %v11450_v49 = vcombine.low %v1636_v23, %v1640_v31  ;;  %v11457_v50 = vcombine.high %v1643_v41, %v1647_v56  ;;  %v1679_v58 = vld [vmem:[%s16805_s2 + $0x1fa0] sm:$0xff]  ;;  %v1676_v23 = vld [vmem:[%s16805_s2 + $0x1f88] sm:$0xff] }
 0x27c   :  { %7478 = vmatprep.subr.bf16.mxu1 %v11419_v52  ;;  %v11459_v52 = vcombine.high %v1644_v43, %v1648_v51  ;;  %v1680_v31 = vld [vmem:[%s16805_s2 + $0x1fa8] sm:$0xff] }
 0x27e   :  { %7151 = vmatpush1.bf16.msra.mxu0 %v11416_v57  ;;  %v11456_v57 = vcombine.low %v1643_v41, %v1647_v56  ;;  %v1683_v41 = vld [vmem:[%s16805_s2 + $0x1fc0] sm:$0xff] }
 0x27f   :  { %7479 = vmatpush1.bf16.msra.mxu1 %v11418_v30  ;;  %7152 = vmatprep.subr.bf16.mxu0 %v11425_v59  ;;  %v11458_v30 = vcombine.low %v1644_v43, %v1648_v51  ;;  %v11465_v59 = vcombine.high %v1651_v53, %v1655_v54  ;;  %v1687_v56 = vld [vmem:[%s16805_s2 + $0x1fe0] sm:$0xff]  ;;  %v1684_v43 = vld [vmem:[%s16805_s2 + $0x1fc8] sm:$0xff] }
 0x280   :  { %7480 = vmatprep.subr.bf16.mxu1 %v11427_v26  ;;  %v11467_v26 = vcombine.high %v1652_v7, %v1656_v34  ;;  %v1688_v51 = vld [vmem:[%s16805_s2 + $0x1fe8] sm:$0xff] }
 0x282   :  { %7153 = vmatpush1.bf16.msra.mxu0 %v11424_v4  ;;  %v11464_v4 = vcombine.low %v1651_v53, %v1655_v54  ;;  %v669_v53 = vld [vmem:[%s16805_s2 + $0x10] sm:$0xff] }
 0x283   :  { %7481 = vmatpush1.bf16.msra.mxu1 %v11426_v3  ;;  %7154 = vmatprep.subr.bf16.mxu0 %v11433_v9  ;;  %v11466_v3 = vcombine.low %v1652_v7, %v1656_v34  ;;  %v11473_v9 = vcombine.high %v1659_v60, %v1663_v62  ;;  %v673_v54 = vld [vmem:[%s16805_s2 + $0x30] sm:$0xff]  ;;  %v670_v7 = vld [vmem:[%s16805_s2 + $0x18] sm:$0xff] }
 0x284   :  { %7482 = vmatprep.subr.bf16.mxu1 %v11435_v48  ;;  %v11475_v48 = vcombine.high %v1660_v63, %v1664_v1  ;;  %v674_v34 = vld [vmem:[%s16805_s2 + $0x38] sm:$0xff] }
 0x286   :  { %7155 = vmatpush1.bf16.msra.mxu0 %v11432_v22  ;;  %v11472_v22 = vcombine.low %v1659_v60, %v1663_v62  ;;  %v10487_v60 = vcombine.high %v670_v7, %v674_v34  ;;  %v677_v62 = vld [vmem:[%s16805_s2 + $0x50] sm:$0xff] }
 0x287   :  { %7483 = vmatpush1.bf16.msra.mxu1 %v11434_v13  ;;  %7156 = vmatprep.subr.bf16.mxu0 %v11441_v15  ;;  %v11474_v13 = vcombine.low %v1660_v63, %v1664_v1  ;;  %v11481_v15 = vcombine.high %v1667_v11, %v1671_v12  ;;  %v681_v63 = vld [vmem:[%s16805_s2 + $0x70] sm:$0xff]  ;;  %v10484_v1 = vcombine.low %v669_v53, %v673_v54 }
 0x288   :  { %7484 = vmatprep.subr.bf16.mxu1 %v11443_v47  ;;  %v11483_v47 = vcombine.high %v1668_v19, %v1672_v21 }
 0x28a   :  { %7157 = vmatpush1.bf16.msra.mxu0 %v11440_v33  ;;  %v11480_v33 = vcombine.low %v1667_v11, %v1671_v12  ;;  %v685_v11 = vld [vmem:[%s16805_s2 + $0x90] sm:$0xff] }
 0x28b   :  { %7485 = vmatpush1.bf16.msra.mxu1 %v11442_v36  ;;  %7158 = vmatprep.subr.bf16.mxu0 %v11449_v18  ;;  %v11482_v36 = vcombine.low %v1668_v19, %v1672_v21  ;;  %v11489_v18 = vcombine.high %v1675_v24, %v1679_v58  ;;  %v689_v12 = vld [vmem:[%s16805_s2 + $0xb0] sm:$0xff]  ;;  %v686_v21 = vld [vmem:[%s16805_s2 + $0x98] sm:$0xff] }
 0x28c   :  { %7486 = vmatprep.subr.bf16.mxu1 %v11451_v40  ;;  %v11491_v40 = vcombine.high %v1676_v23, %v1680_v31 }
 0x28e   :  { %7159 = vmatpush1.bf16.msra.mxu0 %v11448_v45  ;;  %v11488_v45 = vcombine.low %v1675_v24, %v1679_v58  ;;  %v693_v58 = vld [vmem:[%s16805_s2 + $0xd0] sm:$0xff] }
 0x28f   :  { %7487 = vmatpush1.bf16.msra.mxu1 %v11450_v49  ;;  %7160 = vmatprep.subr.bf16.mxu0 %v11457_v50  ;;  %v11490_v49 = vcombine.low %v1676_v23, %v1680_v31  ;;  %v11497_v50 = vcombine.high %v1683_v41, %v1687_v56  ;;  %v697_v23 = vld [vmem:[%s16805_s2 + $0xf0] sm:$0xff]  ;;  %v694_v31 = vld [vmem:[%s16805_s2 + $0xd8] sm:$0xff] }
 0x290   :  { %7488 = vmatprep.subr.bf16.mxu1 %v11459_v52  ;;  %v11499_v52 = vcombine.high %v1684_v43, %v1688_v51 }
 0x292   :  { %7161 = vmatpush1.bf16.msra.mxu0 %v11456_v57  ;;  %v11496_v57 = vcombine.low %v1683_v41, %v1687_v56  ;;  %v701_v41 = vld [vmem:[%s16805_s2 + $0x110] sm:$0xff] }
 0x293   :  { %7489 = vmatpush1.bf16.msra.mxu1 %v11458_v30  ;;  %7162 = vmatprep.subr.bf16.mxu0 %v11465_v59  ;;  %v649_v30 = vmax.f32 %v13057_v29, 0.0  ;;  %v11498_v59 = vcombine.low %v1684_v43, %v1688_v51  ;;  %v678_v29 = vld [vmem:[%s16805_s2 + $0x58] sm:$0xff]  ;;  %v705_v56 = vld [vmem:[%s16805_s2 + $0x130] sm:$0xff] }
 0x294   :  { %7490 = vmatprep.subr.bf16.mxu1 %v11467_v26  ;;  %v10485_v26 = vcombine.high %v669_v53, %v673_v54  ;;  %v702_v43 = vld [vmem:[%s16805_s2 + $0x118] sm:$0xff]  ;;  %v709_v53 = vld [vmem:[%s16805_s2 + $0x150] sm:$0xff] }
 0x295   :  { %v706_v51 = vld [vmem:[%s16805_s2 + $0x138] sm:$0xff]  ;;  %v713_v54 = vld [vmem:[%s16805_s2 + $0x170] sm:$0xff] }
 0x296   :  { %7163 = vmatpush1.bf16.msra.mxu0 %v11464_v4  ;;  %v682_v4 = vld [vmem:[%s16805_s2 + $0x78] sm:$0xff] }
 0x297   :  { %7491 = vmatpush1.bf16.msra.mxu1 %v11466_v3  ;;  %7164 = vmatprep.subr.bf16.mxu0 %v11473_v9  ;;  %v14331_v3 = vpack.c.bf16 %v649_v30, %v649_v30  ;;  %v10486_v9 = vcombine.low %v670_v7, %v674_v34  ;;  %v10495_v19 = vcombine.high %v678_v29, %v682_v4  ;;  %v710_v7 = vld [vmem:[%s16805_s2 + $0x158] sm:$0xff] }
 0x298   :  { %7492 = vmatprep.subr.bf16.mxu1 %v11475_v48  ;;  %v10493_v48 = vcombine.high %v677_v62, %v681_v63  ;;  %v714_v34 = vld [vmem:[%s16805_s2 + $0x178] sm:$0xff]  ;;  %v10518_v30 = vcombine.low %v702_v43, %v706_v51 }
 0x29a   :  { %7165 = vmatpush1.bf16.msra.mxu0 %v11472_v22  ;;  %v690_v22 = vld [vmem:[%s16805_s2 + $0xb8] sm:$0xff] }
 0x29b   :  { %7493 = vmatpush1.bf16.msra.mxu1 %v11474_v13  ;;  %7166 = vmatprep.subr.bf16.mxu0 %v11481_v15  ;;  %v10492_v13 = vcombine.low %v677_v62, %v681_v63  ;;  %v10494_v15 = vcombine.low %v678_v29, %v682_v4  ;;  %v10503_v24 = vcombine.high %v686_v21, %v690_v22  ;;  %v721_v62 = vld [vmem:[%s16805_s2 + $0x1b0] sm:$0xff]  ;;  %v718_v63 = vld [vmem:[%s16805_s2 + $0x198] sm:$0xff] }
 0x29c   :  { %7494 = vmatprep.subr.bf16.mxu1 %v11483_v47  ;;  %v10501_v47 = vcombine.high %v685_v11, %v689_v12  ;;  %v10524_v29 = vcombine.low %v709_v53, %v713_v54  ;;  %v10526_v4 = vcombine.low %v710_v7, %v714_v34 }
 0x29e   :  { %7167 = vmatpush1.bf16.msra.mxu0 %v11480_v33  ;;  %v698_v33 = vld [vmem:[%s16805_s2 + $0xf8] sm:$0xff] }
 0x29f   :  { %7495 = vmatpush1.bf16.msra.mxu1 %v11482_v36  ;;  %7168 = vmatprep.subr.bf16.mxu0 %v11489_v18  ;;  %v10502_v36 = vcombine.low %v686_v21, %v690_v22  ;;  %v10509_v18 = vcombine.high %v693_v58, %v697_v23  ;;  %v730_v21 = vld [vmem:[%s16805_s2 + $0x1f8] sm:$0xff] }
 0x2a0   :  { %7496 = vmatprep.subr.bf16.mxu1 %v11491_v40  ;;  %v10511_v40 = vcombine.high %v694_v31, %v698_v33 }
 0x2a2   :  { %7169 = vmatpush1.bf16.msra.mxu0 %v11488_v45  ;;  %v10508_v45 = vcombine.low %v693_v58, %v697_v23  ;;  %v737_v58 = vld [vmem:[%s16805_s2 + $0x230] sm:$0xff]  ;;  %v734_v23 = vld [vmem:[%s16805_s2 + $0x218] sm:$0xff] }
 0x2a3   :  { %7497 = vmatpush1.bf16.msra.mxu1 %v11490_v49  ;;  %7170 = vmatprep.subr.bf16.mxu0 %v11497_v50  ;;  %v10510_v49 = vcombine.low %v694_v31, %v698_v33  ;;  %v10517_v50 = vcombine.high %v701_v41, %v705_v56  ;;  %v738_v31 = vld [vmem:[%s16805_s2 + $0x238] sm:$0xff] }
 0x2a4   :  { %7498 = vmatprep.subr.bf16.mxu1 %v11499_v52  ;;  %v10519_v52 = vcombine.high %v702_v43, %v706_v51  ;;  %v746_v43 = vld [vmem:[%s16805_s2 + $0x278] sm:$0xff] }
 0x2a6   :  { %7171 = vmatpush1.bf16.msra.mxu0 %v11496_v57  ;;  %v10516_v57 = vcombine.low %v701_v41, %v705_v56  ;;  %v745_v41 = vld [vmem:[%s16805_s2 + $0x270] sm:$0xff]  ;;  %v742_v56 = vld [vmem:[%s16805_s2 + $0x258] sm:$0xff] }
 0x2a7   :  { %7499 = vmatpush1.bf16.msra.mxu1 %v11498_v59  ;;  %7509 = vmatprep.subr.bf16.mxu0 %v10485_v26  ;;  %v10525_v59 = vcombine.high %v709_v53, %v713_v54  ;;  %v10527_v26 = vcombine.high %v710_v7, %v714_v34  ;;  %v753_v53 = vld [vmem:[%s16805_s2 + $0x2b0] sm:$0xff]  ;;  %v750_v54 = vld [vmem:[%s16805_s2 + $0x298] sm:$0xff] }
 0x2a8   :  { %7837 = vmatprep.subr.bf16.mxu1 %v10487_v60  ;;  %v717_v60 = vld [vmem:[%s16805_s2 + $0x190] sm:$0xff]  ;;  %v754_v7 = vld [vmem:[%s16805_s2 + $0x2b8] sm:$0xff] }
 0x2a9   :  { %7173 = vmatmul.mubr.bf16.vlgmr.msra.gmra.mrb[16].mxu0 %v14331_v3  ;;  %v10532_v22 = vcombine.low %v717_v60, %v721_v62 }
 0x2aa   :  { %7501 = vmatmul.mubr.bf16.vlgmr.msra.gmra.mrb[16].mxu1 %v14331_v3  ;;  %7510 = vmatpush1.bf16.msra.mxu0 %v10484_v1  ;;  %v722_v1 = vld [vmem:[%s16805_s2 + $0x1b8] sm:$0xff] }
 0x2ab   :  { %7541 = vmatprep.mubr.bf16.mxu0 %v12837_v37  ;;  %7838 = vmatpush1.bf16.msra.mxu1 %v10486_v9  ;;  %v10533_v9 = vcombine.high %v717_v60, %v721_v62  ;;  %v761_v60 = vld [vmem:[%s16805_s2 + $0x2f0] sm:$0xff]  ;;  %v758_v62 = vld [vmem:[%s16805_s2 + $0x2d8] sm:$0xff] }
 0x2ac   :  { %7869 = vmatprep.mubr.bf16.mxu1 %v12837_v37  ;;  %7511 = vmatprep.subr.bf16.mxu0 %v10493_v48  ;;  %v10500_v37 = vcombine.low %v685_v11, %v689_v12  ;;  %v10535_v48 = vcombine.high %v718_v63, %v722_v1  ;;  %v725_v11 = vld [vmem:[%s16805_s2 + $0x1d0] sm:$0xff] }
 0x2ad   :  { %7839 = vmatprep.subr.bf16.mxu1 %v10495_v19  ;;  %v729_v12 = vld [vmem:[%s16805_s2 + $0x1f0] sm:$0xff]  ;;  %v726_v19 = vld [vmem:[%s16805_s2 + $0x1d8] sm:$0xff] }
 0x2ae   :  { %7512 = vmatpush1.bf16.msra.mxu0 %v10492_v13  ;;  %v10534_v13 = vcombine.low %v718_v63, %v722_v1  ;;  %v10540_v33 = vcombine.low %v725_v11, %v729_v12  ;;  %v762_v63 = vld [vmem:[%s16805_s2 + $0x2f8] sm:$0xff] }
 0x2af   :  { %7840 = vmatpush1.bf16.msra.mxu1 %v10494_v15  ;;  %7513 = vmatprep.subr.bf16.mxu0 %v10501_v47  ;;  %v10541_v15 = vcombine.high %v725_v11, %v729_v12  ;;  %v10543_v47 = vcombine.high %v726_v19, %v730_v21  ;;  %v769_v11 = vld [vmem:[%s16805_s2 + $0x330] sm:$0xff]  ;;  %v766_v12 = vld [vmem:[%s16805_s2 + $0x318] sm:$0xff] }
 0x2b0   :  { %7841 = vmatprep.subr.bf16.mxu1 %v10503_v24  ;;  %v733_v24 = vld [vmem:[%s16805_s2 + $0x210] sm:$0xff] }
 0x2b1   :  { %v10548_v51 = vcombine.low %v733_v24, %v737_v58 }
 0x2b2   :  { %7514 = vmatpush1.bf16.msra.mxu0 %v10500_v37  ;;  %v10542_v37 = vcombine.low %v726_v19, %v730_v21  ;;  %v770_v19 = vld [vmem:[%s16805_s2 + $0x338] sm:$0xff] }
 0x2b3   :  { %7842 = vmatpush1.bf16.msra.mxu1 %v10502_v36  ;;  %7515 = vmatprep.subr.bf16.mxu0 %v10509_v18  ;;  %v10549_v36 = vcombine.high %v733_v24, %v737_v58  ;;  %v10551_v18 = vcombine.high %v734_v23, %v738_v31  ;;  %v777_v24 = vld [vmem:[%s16805_s2 + $0x370] sm:$0xff]  ;;  %v774_v58 = vld [vmem:[%s16805_s2 + $0x358] sm:$0xff] }
 0x2b4   :  { %7843 = vmatprep.subr.bf16.mxu1 %v10511_v40  ;;  %v741_v40 = vld [vmem:[%s16805_s2 + $0x250] sm:$0xff] }
 0x2b5   :  { %v10556_v34 = vcombine.low %v741_v40, %v745_v41 }
 0x2b6   :  { %7516 = vmatpush1.bf16.msra.mxu0 %v10508_v45  ;;  %v10550_v45 = vcombine.low %v734_v23, %v738_v31  ;;  %v778_v23 = vld [vmem:[%s16805_s2 + $0x378] sm:$0xff] }
 0x2b7   :  { %7844 = vmatpush1.bf16.msra.mxu1 %v10510_v49  ;;  %7517 = vmatprep.subr.bf16.mxu0 %v10517_v50  ;;  %v10557_v49 = vcombine.high %v741_v40, %v745_v41  ;;  %v10559_v50 = vcombine.high %v742_v56, %v746_v43  ;;  %v785_v40 = vld [vmem:[%s16805_s2 + $0x3b0] sm:$0xff]  ;;  %v782_v41 = vld [vmem:[%s16805_s2 + $0x398] sm:$0xff] }
 0x2b8   :  { %7845 = vmatprep.subr.bf16.mxu1 %v10519_v52  ;;  %v749_v52 = vld [vmem:[%s16805_s2 + $0x290] sm:$0xff] }
 0x2b9   :  { %v10564_v1 = vcombine.low %v749_v52, %v753_v53 }
 0x2ba   :  { %7518 = vmatpush1.bf16.msra.mxu0 %v10516_v57  ;;  %v10558_v57 = vcombine.low %v742_v56, %v746_v43  ;;  %v786_v56 = vld [vmem:[%s16805_s2 + $0x3b8] sm:$0xff] }
 0x2bb   :  { %7846 = vmatpush1.bf16.msra.mxu1 %v10518_v30  ;;  %7519 = vmatprep.subr.bf16.mxu0 %v10525_v59  ;;  %v10565_v30 = vcombine.high %v749_v52, %v753_v53  ;;  %v10567_v59 = vcombine.high %v750_v54, %v754_v7  ;;  %v793_v52 = vld [vmem:[%s16805_s2 + $0x3f0] sm:$0xff]  ;;  %v790_v53 = vld [vmem:[%s16805_s2 + $0x3d8] sm:$0xff] }
 0x2bc   :  { %7847 = vmatprep.subr.bf16.mxu1 %v10527_v26  ;;  %v757_v26 = vld [vmem:[%s16805_s2 + $0x2d0] sm:$0xff] }
 0x2bd   :  { %v10572_v21 = vcombine.low %v757_v26, %v761_v60 }
 0x2be   :  { %7520 = vmatpush1.bf16.msra.mxu0 %v10524_v29  ;;  %v10566_v29 = vcombine.low %v750_v54, %v754_v7  ;;  %v794_v54 = vld [vmem:[%s16805_s2 + $0x3f8] sm:$0xff] }
 0x2bf   :  { %7848 = vmatpush1.bf16.msra.mxu1 %v10526_v4  ;;  %7521 = vmatprep.subr.bf16.mxu0 %v10533_v9  ;;  %v10573_v4 = vcombine.high %v757_v26, %v761_v60  ;;  %v10575_v9 = vcombine.high %v758_v62, %v762_v63  ;;  %v801_v26 = vld [vmem:[%s16805_s2 + $0x430] sm:$0xff]  ;;  %v798_v60 = vld [vmem:[%s16805_s2 + $0x418] sm:$0xff] }
 0x2c0   :  { %7849 = vmatprep.subr.bf16.mxu1 %v10535_v48  ;;  %v765_v48 = vld [vmem:[%s16805_s2 + $0x310] sm:$0xff] }
 0x2c1   :  { %v10580_v31 = vcombine.low %v765_v48, %v769_v11 }
 0x2c2   :  { %7522 = vmatpush1.bf16.msra.mxu0 %v10532_v22  ;;  %v10574_v22 = vcombine.low %v758_v62, %v762_v63  ;;  %v802_v62 = vld [vmem:[%s16805_s2 + $0x438] sm:$0xff] }
 0x2c3   :  { %7850 = vmatpush1.bf16.msra.mxu1 %v10534_v13  ;;  %7523 = vmatprep.subr.bf16.mxu0 %v10541_v15  ;;  %v10581_v13 = vcombine.high %v765_v48, %v769_v11  ;;  %v10583_v15 = vcombine.high %v766_v12, %v770_v19  ;;  %v809_v48 = vld [vmem:[%s16805_s2 + $0x470] sm:$0xff] }
 0x2c4   :  { %7851 = vmatprep.subr.bf16.mxu1 %v10543_v47  ;;  %v773_v47 = vld [vmem:[%s16805_s2 + $0x350] sm:$0xff] }
 0x2c5   :  { %v10588_v43 = vcombine.low %v773_v47, %v777_v24 }
 0x2c6   :  { %7524 = vmatpush1.bf16.msra.mxu0 %v10540_v33  ;;  %v10582_v33 = vcombine.low %v766_v12, %v770_v19  ;;  %v806_v12 = vld [vmem:[%s16805_s2 + $0x458] sm:$0xff] }
 0x2c7   :  { %7852 = vmatpush1.bf16.msra.mxu1 %v10542_v37  ;;  %7525 = vmatprep.subr.bf16.mxu0 %v10549_v36  ;;  %v10589_v37 = vcombine.high %v773_v47, %v777_v24  ;;  %v10591_v36 = vcombine.high %v774_v58, %v778_v23  ;;  %v810_v19 = vld [vmem:[%s16805_s2 + $0x478] sm:$0xff] }
 0x2c8   :  { %7853 = vmatprep.subr.bf16.mxu1 %v10551_v18  ;;  %v781_v18 = vld [vmem:[%s16805_s2 + $0x390] sm:$0xff]  ;;  %v10623_v47 = vcombine.high %v806_v12, %v810_v19  ;;  %v814_v24 = vld [vmem:[%s16805_s2 + $0x498] sm:$0xff] }
 0x2c9   :  { %v10596_v7 = vcombine.low %v781_v18, %v785_v40 }
 0x2ca   :  { %7526 = vmatpush1.bf16.msra.mxu0 %v10548_v51  ;;  %v10590_v51 = vcombine.low %v774_v58, %v778_v23  ;;  %v818_v58 = vld [vmem:[%s16805_s2 + $0x4b8] sm:$0xff] }
 0x2cb   :  { %7854 = vmatpush1.bf16.msra.mxu1 %v10550_v45  ;;  %7527 = vmatprep.subr.bf16.mxu0 %v10557_v49  ;;  %v10597_v45 = vcombine.high %v781_v18, %v785_v40  ;;  %v10599_v49 = vcombine.high %v782_v41, %v786_v56  ;;  %v825_v18 = vld [vmem:[%s16805_s2 + $0x4f0] sm:$0xff]  ;;  %v826_v40 = vld [vmem:[%s16805_s2 + $0x4f8] sm:$0xff] }
 0x2cc   :  { %7855 = vmatprep.subr.bf16.mxu1 %v10559_v50  ;;  %v789_v50 = vld [vmem:[%s16805_s2 + $0x3d0] sm:$0xff] }
 0x2cd   :  { %v10604_v63 = vcombine.low %v789_v50, %v793_v52 }
 0x2ce   :  { %7528 = vmatpush1.bf16.msra.mxu0 %v10556_v34  ;;  %v10598_v34 = vcombine.low %v782_v41, %v786_v56  ;;  %v10630_v41 = vcombine.low %v814_v24, %v818_v58 }
 0x2cf   :  { %7856 = vmatpush1.bf16.msra.mxu1 %v10558_v57  ;;  %7529 = vmatprep.subr.bf16.mxu0 %v10565_v30  ;;  %v10605_v57 = vcombine.high %v789_v50, %v793_v52  ;;  %v10607_v30 = vcombine.high %v790_v53, %v794_v54  ;;  %v834_v50 = vld [vmem:[%s16805_s2 + $0x538] sm:$0xff] }
 0x2d0   :  { %7857 = vmatprep.subr.bf16.mxu1 %v10567_v59  ;;  %v797_v59 = vld [vmem:[%s16805_s2 + $0x410] sm:$0xff] }
 0x2d1   :  { %v10612_v11 = vcombine.low %v797_v59, %v801_v26 }
 0x2d2   :  { %7530 = vmatpush1.bf16.msra.mxu0 %v10564_v1  ;;  %v10606_v1 = vcombine.low %v790_v53, %v794_v54 }
 0x2d3   :  { %7858 = vmatpush1.bf16.msra.mxu1 %v10566_v29  ;;  %7531 = vmatprep.subr.bf16.mxu0 %v10573_v4  ;;  %v10613_v29 = vcombine.high %v797_v59, %v801_v26  ;;  %v10615_v4 = vcombine.high %v798_v60, %v802_v62  ;;  %v842_v59 = vld [vmem:[%s16805_s2 + $0x578] sm:$0xff] }
 0x2d4   :  { %7859 = vmatprep.subr.bf16.mxu1 %v10575_v9  ;;  %v805_v9 = vld [vmem:[%s16805_s2 + $0x450] sm:$0xff] }
 0x2d5   :  { %v10620_v23 = vcombine.low %v805_v9, %v809_v48 }
 0x2d6   :  { %7532 = vmatpush1.bf16.msra.mxu0 %v10572_v21  ;;  %v10614_v21 = vcombine.low %v798_v60, %v802_v62 }
 0x2d7   :  { %7860 = vmatpush1.bf16.msra.mxu1 %v10574_v22  ;;  %7533 = vmatprep.subr.bf16.mxu0 %v10581_v13  ;;  %v10621_v22 = vcombine.high %v805_v9, %v809_v48  ;;  %v813_v13 = vld [vmem:[%s16805_s2 + $0x490] sm:$0xff]  ;;  %v850_v9 = vld [vmem:[%s16805_s2 + $0x5b8] sm:$0xff] }
 0x2d8   :  { %7861 = vmatprep.subr.bf16.mxu1 %v10583_v15  ;;  %v817_v15 = vld [vmem:[%s16805_s2 + $0x4b0] sm:$0xff] }
 0x2da   :  { %7534 = vmatpush1.bf16.msra.mxu0 %v10580_v31  ;;  %v10622_v31 = vcombine.low %v806_v12, %v810_v19 }
 0x2db   :  { %7862 = vmatpush1.bf16.msra.mxu1 %v10582_v33  ;;  %7535 = vmatprep.subr.bf16.mxu0 %v10589_v37  ;;  %v10629_v33 = vcombine.high %v813_v13, %v817_v15  ;;  %v10631_v37 = vcombine.high %v814_v24, %v818_v58 }
 0x2dc   :  { %7863 = vmatprep.subr.bf16.mxu1 %v10591_v36  ;;  %v821_v36 = vld [vmem:[%s16805_s2 + $0x4d0] sm:$0xff] }
 0x2dd   :  { %v10637_v56 = vcombine.high %v821_v36, %v825_v18  ;;  %v10636_v52 = vcombine.low %v821_v36, %v825_v18  ;;  %v866_v36 = vld [vmem:[%s16805_s2 + $0x638] sm:$0xff] }
 0x2de   :  { %7536 = vmatpush1.bf16.msra.mxu0 %v10588_v43 }
 0x2df   :  { %7864 = vmatpush1.bf16.msra.mxu1 %v10590_v51  ;;  %7537 = vmatprep.subr.bf16.mxu0 %v10597_v45  ;;  %v829_v51 = vld [vmem:[%s16805_s2 + $0x510] sm:$0xff] }
 0x2e0   :  { %7865 = vmatprep.subr.bf16.mxu1 %v10599_v49  ;;  %v833_v45 = vld [vmem:[%s16805_s2 + $0x530] sm:$0xff]  ;;  %v830_v49 = vld [vmem:[%s16805_s2 + $0x518] sm:$0xff] }
 0x2e1   :  { %v10645_v54 = vcombine.high %v829_v51, %v833_v45  ;;  %v10644_v26 = vcombine.low %v829_v51, %v833_v45  ;;  %v10646_v60 = vcombine.low %v830_v49, %v834_v50  ;;  %v874_v51 = vld [vmem:[%s16805_s2 + $0x678] sm:$0xff] }
 0x2e2   :  { %7538 = vmatpush1.bf16.msra.mxu0 %v10596_v7  ;;  %v10647_v7 = vcombine.high %v830_v49, %v834_v50 }
 0x2e3   :  { %7866 = vmatpush1.bf16.msra.mxu1 %v10598_v34  ;;  %7539 = vmatprep.subr.bf16.mxu0 %v10605_v57  ;;  %v837_v34 = vld [vmem:[%s16805_s2 + $0x550] sm:$0xff] }
 0x2e4   :  { %7867 = vmatprep.subr.bf16.mxu1 %v10607_v30  ;;  %v841_v57 = vld [vmem:[%s16805_s2 + $0x570] sm:$0xff]  ;;  %v838_v30 = vld [vmem:[%s16805_s2 + $0x558] sm:$0xff] }
 0x2e5   :  { %v10653_v62 = vcombine.high %v837_v34, %v841_v57  ;;  %v10652_v48 = vcombine.low %v837_v34, %v841_v57  ;;  %v882_v34 = vld [vmem:[%s16805_s2 + $0x6b8] sm:$0xff] }
 0x2e6   :  { %7540 = vmatpush1.bf16.msra.mxu0 %v10604_v63  ;;  %v10655_v63 = vcombine.high %v838_v30, %v842_v59 }
 0x2e7   :  { %7868 = vmatpush1.bf16.msra.mxu1 %v10606_v1  ;;  %7550 = vmatprep.subr.bf16.mxu0 %v10613_v29  ;;  %v845_v1 = vld [vmem:[%s16805_s2 + $0x590] sm:$0xff] }
 0x2e8   :  { %7878 = vmatprep.subr.bf16.mxu1 %v10615_v4  ;;  %v849_v29 = vld [vmem:[%s16805_s2 + $0x5b0] sm:$0xff]  ;;  %v846_v4 = vld [vmem:[%s16805_s2 + $0x598] sm:$0xff] }
 0x2e9   :  { %7542 = vmatmul.mubr.bf16.vlgmr.msra.gmra.mrb[20].mxu0 %v12839_v39  ;;  %v10661_v12 = vcombine.high %v845_v1, %v849_v29  ;;  %v10663_v19 = vcombine.high %v846_v4, %v850_v9  ;;  %v10662_v24 = vcombine.low %v846_v4, %v850_v9 }
 0x2ea   :  { %7870 = vmatmul.mubr.bf16.vlgmr.msra.gmra.mrb[20].mxu1 %v12839_v39  ;;  %7551 = vmatpush1.bf16.msra.mxu0 %v10612_v11  ;;  %v822_v39 = vld [vmem:[%s16805_s2 + $0x4d8] sm:$0xff]  ;;  %v10654_v11 = vcombine.low %v838_v30, %v842_v59 }
 0x2eb   :  { %7582 = vmatprep.mubr.bf16.mxu0 %v12855_v46  ;;  %7879 = vmatpush1.bf16.msra.mxu1 %v10614_v21  ;;  %v10639_v43 = vcombine.high %v822_v39, %v826_v40  ;;  %v10638_v53 = vcombine.low %v822_v39, %v826_v40  ;;  %v853_v21 = vld [vmem:[%s16805_s2 + $0x5d0] sm:$0xff] }
 0x2ec   :  { %7910 = vmatprep.mubr.bf16.mxu1 %v12855_v46  ;;  %7552 = vmatprep.subr.bf16.mxu0 %v10621_v22  ;;  %v10628_v46 = vcombine.low %v813_v13, %v817_v15  ;;  %v857_v22 = vld [vmem:[%s16805_s2 + $0x5f0] sm:$0xff]  ;;  %v854_v13 = vld [vmem:[%s16805_s2 + $0x5d8] sm:$0xff] }
 0x2ed   :  { %7880 = vmatprep.subr.bf16.mxu1 %v10623_v47  ;;  %v858_v15 = vld [vmem:[%s16805_s2 + $0x5f8] sm:$0xff]  ;;  %v10660_v47 = vcombine.low %v845_v1, %v849_v29  ;;  %v10669_v58 = vcombine.high %v853_v21, %v857_v22  ;;  %v10668_v18 = vcombine.low %v853_v21, %v857_v22 }
 0x2ee   :  { %7553 = vmatpush1.bf16.msra.mxu0 %v10620_v23  ;;  %v10671_v23 = vcombine.high %v854_v13, %v858_v15  ;;  %v10670_v39 = vcombine.low %v854_v13, %v858_v15  ;;  %v890_v1 = vld [vmem:[%s16805_s2 + $0x6f8] sm:$0xff] }
 0x2ef   :  { %7881 = vmatpush1.bf16.msra.mxu1 %v10622_v31  ;;  %7554 = vmatprep.subr.bf16.mxu0 %v10629_v33  ;;  %v861_v31 = vld [vmem:[%s16805_s2 + $0x610] sm:$0xff]  ;;  %v898_v21 = vld [vmem:[%s16805_s2 + $0x738] sm:$0xff] }
 0x2f0   :  { %7882 = vmatprep.subr.bf16.mxu1 %v10631_v37  ;;  %v865_v33 = vld [vmem:[%s16805_s2 + $0x630] sm:$0xff]  ;;  %v862_v37 = vld [vmem:[%s16805_s2 + $0x618] sm:$0xff] }
 0x2f1   :  { %v10677_v40 = vcombine.high %v861_v31, %v865_v33  ;;  %v10676_v45 = vcombine.low %v861_v31, %v865_v33  ;;  %v10678_v49 = vcombine.low %v862_v37, %v866_v36  ;;  %v906_v31 = vld [vmem:[%s16805_s2 + $0x778] sm:$0xff] }
 0x2f2   :  { %7555 = vmatpush1.bf16.msra.mxu0 %v10628_v46  ;;  %v10679_v46 = vcombine.high %v862_v37, %v866_v36 }
 0x2f3   :  { %7883 = vmatpush1.bf16.msra.mxu1 %v10630_v41  ;;  %7556 = vmatprep.subr.bf16.mxu0 %v10637_v56  ;;  %v869_v41 = vld [vmem:[%s16805_s2 + $0x650] sm:$0xff] }
 0x2f4   :  { %7884 = vmatprep.subr.bf16.mxu1 %v10639_v43  ;;  %v873_v56 = vld [vmem:[%s16805_s2 + $0x670] sm:$0xff]  ;;  %v870_v43 = vld [vmem:[%s16805_s2 + $0x658] sm:$0xff] }
 0x2f5   :  { %v10685_v50 = vcombine.high %v869_v41, %v873_v56  ;;  %v10684_v57 = vcombine.low %v869_v41, %v873_v56  ;;  %v10686_v30 = vcombine.low %v870_v43, %v874_v51  ;;  %v914_v41 = vld [vmem:[%s16805_s2 + $0x7b8] sm:$0xff] }
 0x2f6   :  { %7557 = vmatpush1.bf16.msra.mxu0 %v10636_v52  ;;  %v10687_v52 = vcombine.high %v870_v43, %v874_v51 }
 0x2f7   :  { %7885 = vmatpush1.bf16.msra.mxu1 %v10638_v53  ;;  %7558 = vmatprep.subr.bf16.mxu0 %v10645_v54  ;;  %v877_v53 = vld [vmem:[%s16805_s2 + $0x690] sm:$0xff] }
 0x2f8   :  { %7886 = vmatprep.subr.bf16.mxu1 %v10647_v7  ;;  %v881_v54 = vld [vmem:[%s16805_s2 + $0x6b0] sm:$0xff]  ;;  %v878_v7 = vld [vmem:[%s16805_s2 + $0x698] sm:$0xff] }
 0x2f9   :  { %v10693_v59 = vcombine.high %v877_v53, %v881_v54  ;;  %v10692_v29 = vcombine.low %v877_v53, %v881_v54  ;;  %v10694_v4 = vcombine.low %v878_v7, %v882_v34  ;;  %v922_v53 = vld [vmem:[%s16805_s2 + $0x7f8] sm:$0xff] }
 0x2fa   :  { %7559 = vmatpush1.bf16.msra.mxu0 %v10644_v26  ;;  %v10695_v26 = vcombine.high %v878_v7, %v882_v34 }
 0x2fb   :  { %7887 = vmatpush1.bf16.msra.mxu1 %v10646_v60  ;;  %7560 = vmatprep.subr.bf16.mxu0 %v10653_v62  ;;  %v885_v60 = vld [vmem:[%s16805_s2 + $0x6d0] sm:$0xff] }
 0x2fc   :  { %7888 = vmatprep.subr.bf16.mxu1 %v10655_v63  ;;  %v889_v62 = vld [vmem:[%s16805_s2 + $0x6f0] sm:$0xff]  ;;  %v886_v63 = vld [vmem:[%s16805_s2 + $0x6d8] sm:$0xff] }
 0x2fd   :  { %v10701_v9 = vcombine.high %v885_v60, %v889_v62  ;;  %v10700_v22 = vcombine.low %v885_v60, %v889_v62  ;;  %v10702_v13 = vcombine.low %v886_v63, %v890_v1  ;;  %v930_v60 = vld [vmem:[%s16805_s2 + $0x838] sm:$0xff] }
 0x2fe   :  { %7561 = vmatpush1.bf16.msra.mxu0 %v10652_v48  ;;  %v10703_v48 = vcombine.high %v886_v63, %v890_v1 }
 0x2ff   :  { %7889 = vmatpush1.bf16.msra.mxu1 %v10654_v11  ;;  %7562 = vmatprep.subr.bf16.mxu0 %v10661_v12  ;;  %v893_v11 = vld [vmem:[%s16805_s2 + $0x710] sm:$0xff] }
 0x300   :  { %7890 = vmatprep.subr.bf16.mxu1 %v10663_v19  ;;  %v897_v12 = vld [vmem:[%s16805_s2 + $0x730] sm:$0xff]  ;;  %v894_v19 = vld [vmem:[%s16805_s2 + $0x718] sm:$0xff] }
 0x301   :  { %v10709_v15 = vcombine.high %v893_v11, %v897_v12  ;;  %v10708_v33 = vcombine.low %v893_v11, %v897_v12  ;;  %v10710_v37 = vcombine.low %v894_v19, %v898_v21  ;;  %v934_v11 = vld [vmem:[%s16805_s2 + $0x858] sm:$0xff] }
 0x302   :  { %7563 = vmatpush1.bf16.msra.mxu0 %v10660_v47  ;;  %v10711_v47 = vcombine.high %v894_v19, %v898_v21  ;;  %v938_v12 = vld [vmem:[%s16805_s2 + $0x878] sm:$0xff] }
 0x303   :  { %7891 = vmatpush1.bf16.msra.mxu1 %v10662_v24  ;;  %7564 = vmatprep.subr.bf16.mxu0 %v10669_v58  ;;  %v901_v24 = vld [vmem:[%s16805_s2 + $0x750] sm:$0xff] }
 0x304   :  { %7892 = vmatprep.subr.bf16.mxu1 %v10671_v23  ;;  %v905_v58 = vld [vmem:[%s16805_s2 + $0x770] sm:$0xff]  ;;  %v902_v23 = vld [vmem:[%s16805_s2 + $0x758] sm:$0xff] }
 0x305   :  { %v10717_v36 = vcombine.high %v901_v24, %v905_v58  ;;  %v10716_v56 = vcombine.low %v901_v24, %v905_v58  ;;  %v10718_v43 = vcombine.low %v902_v23, %v906_v31  ;;  %v946_v24 = vld [vmem:[%s16805_s2 + $0x8b8] sm:$0xff] }
 0x306   :  { %7565 = vmatpush1.bf16.msra.mxu0 %v10668_v18  ;;  %v10719_v18 = vcombine.high %v902_v23, %v906_v31  ;;  %v10750_v23 = vcombine.low %v934_v11, %v938_v12 }
 0x307   :  { %7893 = vmatpush1.bf16.msra.mxu1 %v10670_v39  ;;  %7566 = vmatprep.subr.bf16.mxu0 %v10677_v40  ;;  %v909_v39 = vld [vmem:[%s16805_s2 + $0x790] sm:$0xff] }
 0x308   :  { %7894 = vmatprep.subr.bf16.mxu1 %v10679_v46  ;;  %v913_v40 = vld [vmem:[%s16805_s2 + $0x7b0] sm:$0xff]  ;;  %v910_v46 = vld [vmem:[%s16805_s2 + $0x798] sm:$0xff] }
 0x309   :  { %v10725_v51 = vcombine.high %v909_v39, %v913_v40  ;;  %v10724_v54 = vcombine.low %v909_v39, %v913_v40  ;;  %v10726_v7 = vcombine.low %v910_v46, %v914_v41 }
 0x30a   :  { %7567 = vmatpush1.bf16.msra.mxu0 %v10676_v45  ;;  %v10727_v45 = vcombine.high %v910_v46, %v914_v41  ;;  %v957_v41 = vld [vmem:[%s16805_s2 + $0x910] sm:$0xff] }
 0x30b   :  { %7895 = vmatpush1.bf16.msra.mxu1 %v10678_v49  ;;  %7568 = vmatprep.subr.bf16.mxu0 %v10685_v50  ;;  %v917_v49 = vld [vmem:[%s16805_s2 + $0x7d0] sm:$0xff] }
 0x30c   :  { %7896 = vmatprep.subr.bf16.mxu1 %v10687_v52  ;;  %v921_v50 = vld [vmem:[%s16805_s2 + $0x7f0] sm:$0xff]  ;;  %v918_v52 = vld [vmem:[%s16805_s2 + $0x7d8] sm:$0xff] }
 0x30d   :  { %v10733_v34 = vcombine.high %v917_v49, %v921_v50  ;;  %v10732_v62 = vcombine.low %v917_v49, %v921_v50  ;;  %v10734_v63 = vcombine.low %v918_v52, %v922_v53 }
 0x30e   :  { %7569 = vmatpush1.bf16.msra.mxu0 %v10684_v57  ;;  %v10735_v57 = vcombine.high %v918_v52, %v922_v53  ;;  %v965_v53 = vld [vmem:[%s16805_s2 + $0x950] sm:$0xff] }
 0x30f   :  { %7897 = vmatpush1.bf16.msra.mxu1 %v10686_v30  ;;  %7570 = vmatprep.subr.bf16.mxu0 %v10693_v59  ;;  %v925_v30 = vld [vmem:[%s16805_s2 + $0x810] sm:$0xff] }
 0x310   :  { %7898 = vmatprep.subr.bf16.mxu1 %v10695_v26  ;;  %v929_v59 = vld [vmem:[%s16805_s2 + $0x830] sm:$0xff]  ;;  %v926_v26 = vld [vmem:[%s16805_s2 + $0x818] sm:$0xff] }
 0x311   :  { %v10741_v1 = vcombine.high %v925_v30, %v929_v59  ;;  %v10742_v19 = vcombine.low %v926_v26, %v930_v60 }
 0x312   :  { %7571 = vmatpush1.bf16.msra.mxu0 %v10692_v29  ;;  %v10743_v29 = vcombine.high %v926_v26, %v930_v60  ;;  %v973_v60 = vld [vmem:[%s16805_s2 + $0x990] sm:$0xff] }
 0x313   :  { %7899 = vmatpush1.bf16.msra.mxu1 %v10694_v4  ;;  %7572 = vmatprep.subr.bf16.mxu0 %v10701_v9  ;;  %v933_v4 = vld [vmem:[%s16805_s2 + $0x850] sm:$0xff] }
 0x314   :  { %7900 = vmatprep.subr.bf16.mxu1 %v10703_v48  ;;  %v937_v9 = vld [vmem:[%s16805_s2 + $0x870] sm:$0xff]  ;;  %v10740_v48 = vcombine.low %v925_v30, %v929_v59 }
 0x315   :  { %v10749_v21 = vcombine.high %v933_v4, %v937_v9  ;;  %v10748_v58 = vcombine.low %v933_v4, %v937_v9 }
 0x316   :  { %7573 = vmatpush1.bf16.msra.mxu0 %v10700_v22  ;;  %v941_v22 = vld [vmem:[%s16805_s2 + $0x890] sm:$0xff] }
 0x317   :  { %7901 = vmatpush1.bf16.msra.mxu1 %v10702_v13  ;;  %7574 = vmatprep.subr.bf16.mxu0 %v10709_v15  ;;  %v945_v13 = vld [vmem:[%s16805_s2 + $0x8b0] sm:$0xff]  ;;  %v10751_v15 = vcombine.high %v934_v11, %v938_v12 }
 0x318   :  { %7902 = vmatprep.subr.bf16.mxu1 %v10711_v47  ;;  %v942_v47 = vld [vmem:[%s16805_s2 + $0x898] sm:$0xff]  ;;  %v10757_v31 = vcombine.high %v941_v22, %v945_v13  ;;  %v981_v11 = vld [vmem:[%s16805_s2 + $0x9d0] sm:$0xff] }
 0x319   :  { %v10758_v39 = vcombine.low %v942_v47, %v946_v24  ;;  %v985_v12 = vld [vmem:[%s16805_s2 + $0x9f0] sm:$0xff] }
 0x31a   :  { %7575 = vmatpush1.bf16.msra.mxu0 %v10708_v33  ;;  %v10759_v33 = vcombine.high %v942_v47, %v946_v24  ;;  %v989_v24 = vld [vmem:[%s16805_s2 + $0xa10] sm:$0xff] }
 0x31b   :  { %7903 = vmatpush1.bf16.msra.mxu1 %v10710_v37  ;;  %7576 = vmatprep.subr.bf16.mxu0 %v10717_v36  ;;  %v949_v37 = vld [vmem:[%s16805_s2 + $0x8d0] sm:$0xff] }
 0x31c   :  { %7904 = vmatprep.subr.bf16.mxu1 %v10719_v18  ;;  %v953_v36 = vld [vmem:[%s16805_s2 + $0x8f0] sm:$0xff]  ;;  %v954_v18 = vld [vmem:[%s16805_s2 + $0x8f8] sm:$0xff] }
 0x31d   :  { %v10765_v40 = vcombine.high %v949_v37, %v953_v36 }
 0x31e   :  { %7577 = vmatpush1.bf16.msra.mxu0 %v10716_v56  ;;  %v961_v56 = vld [vmem:[%s16805_s2 + $0x930] sm:$0xff] }
 0x31f   :  { %7905 = vmatpush1.bf16.msra.mxu1 %v10718_v43  ;;  %7578 = vmatprep.subr.bf16.mxu0 %v10725_v51  ;;  %v958_v43 = vld [vmem:[%s16805_s2 + $0x918] sm:$0xff]  ;;  %v10773_v50 = vcombine.high %v957_v41, %v961_v56 }
 0x320   :  { %7906 = vmatprep.subr.bf16.mxu1 %v10727_v45  ;;  %v962_v51 = vld [vmem:[%s16805_s2 + $0x938] sm:$0xff]  ;;  %v10764_v45 = vcombine.low %v949_v37, %v953_v36 }
 0x321   :  { %v10775_v52 = vcombine.high %v958_v43, %v962_v51  ;;  %v10774_v30 = vcombine.low %v958_v43, %v962_v51  ;;  %v1005_v51 = vld [vmem:[%s16805_s2 + $0xa90] sm:$0xff] }
 0x322   :  { %7579 = vmatpush1.bf16.msra.mxu0 %v10724_v54  ;;  %v969_v54 = vld [vmem:[%s16805_s2 + $0x970] sm:$0xff] }
 0x323   :  { %7907 = vmatpush1.bf16.msra.mxu1 %v10726_v7  ;;  %7580 = vmatprep.subr.bf16.mxu0 %v10733_v34  ;;  %v966_v7 = vld [vmem:[%s16805_s2 + $0x958] sm:$0xff]  ;;  %v10781_v59 = vcombine.high %v965_v53, %v969_v54 }
 0x324   :  { %7908 = vmatprep.subr.bf16.mxu1 %v10735_v57  ;;  %v970_v34 = vld [vmem:[%s16805_s2 + $0x978] sm:$0xff]  ;;  %v10772_v57 = vcombine.low %v957_v41, %v961_v56 }
 0x325   :  { %v10783_v26 = vcombine.high %v966_v7, %v970_v34  ;;  %v10782_v4 = vcombine.low %v966_v7, %v970_v34  ;;  %v1013_v34 = vld [vmem:[%s16805_s2 + $0xad0] sm:$0xff] }
 0x326   :  { %7581 = vmatpush1.bf16.msra.mxu0 %v10732_v62  ;;  %v977_v62 = vld [vmem:[%s16805_s2 + $0x9b0] sm:$0xff] }
 0x327   :  { %7909 = vmatpush1.bf16.msra.mxu1 %v10734_v63  ;;  %7591 = vmatprep.subr.bf16.mxu0 %v10741_v1  ;;  %v974_v63 = vld [vmem:[%s16805_s2 + $0x998] sm:$0xff]  ;;  %v10789_v9 = vcombine.high %v973_v60, %v977_v62 }
 0x328   :  { %7919 = vmatprep.subr.bf16.mxu1 %v10743_v29  ;;  %v978_v1 = vld [vmem:[%s16805_s2 + $0x9b8] sm:$0xff]  ;;  %v10780_v29 = vcombine.low %v965_v53, %v969_v54 }
 0x329   :  { %7583 = vmatmul.mubr.bf16.vlgmr.msra.gmra.mrb[20].mxu0 %v13103_v17 }
 0x32a   :  { %7911 = vmatmul.mubr.bf16.vlgmr.msra.gmra.mrb[20].mxu1 %v13103_v17  ;;  %7592 = vmatpush1.bf16.msra.mxu0 %v10740_v48  ;;  %v950_v17 = vld [vmem:[%s16805_s2 + $0x8d8] sm:$0xff]  ;;  %v10791_v48 = vcombine.high %v974_v63, %v978_v1 }
 0x32b   :  { %7623 = vmatprep.mubr.bf16.mxu0 %v13117_v25  ;;  %7920 = vmatpush1.bf16.msra.mxu1 %v10742_v19  ;;  %v10767_v46 = vcombine.high %v950_v17, %v954_v18  ;;  %v10766_v49 = vcombine.low %v950_v17, %v954_v18  ;;  %v982_v19 = vld [vmem:[%s16805_s2 + $0x9d8] sm:$0xff]  ;;  %v997_v18 = vld [vmem:[%s16805_s2 + $0xa50] sm:$0xff] }
 0x32c   :  { %7951 = vmatprep.mubr.bf16.mxu1 %v13117_v25  ;;  %7593 = vmatprep.subr.bf16.mxu0 %v10749_v21  ;;  %v10756_v25 = vcombine.low %v941_v22, %v945_v13  ;;  %v986_v21 = vld [vmem:[%s16805_s2 + $0x9f8] sm:$0xff]  ;;  %v10788_v22 = vcombine.low %v973_v60, %v977_v62  ;;  %v10790_v13 = vcombine.low %v974_v63, %v978_v1  ;;  %v1021_v1 = vld [vmem:[%s16805_s2 + $0xb10] sm:$0xff] }
 0x32d   :  { %7921 = vmatprep.subr.bf16.mxu1 %v10751_v15  ;;  %v10797_v15 = vcombine.high %v981_v11, %v985_v12  ;;  %v10799_v47 = vcombine.high %v982_v19, %v986_v21  ;;  %v10798_v37 = vcombine.low %v982_v19, %v986_v21  ;;  %v1029_v21 = vld [vmem:[%s16805_s2 + $0xb50] sm:$0xff] }
 0x32e   :  { %7594 = vmatpush1.bf16.msra.mxu0 %v10748_v58  ;;  %v993_v58 = vld [vmem:[%s16805_s2 + $0xa30] sm:$0xff] }
 0x32f   :  { %7922 = vmatpush1.bf16.msra.mxu1 %v10750_v23  ;;  %7595 = vmatprep.subr.bf16.mxu0 %v10757_v31  ;;  %v990_v23 = vld [vmem:[%s16805_s2 + $0xa18] sm:$0xff]  ;;  %v10805_v36 = vcombine.high %v989_v24, %v993_v58 }
 0x330   :  { %7923 = vmatprep.subr.bf16.mxu1 %v10759_v33  ;;  %v994_v31 = vld [vmem:[%s16805_s2 + $0xa38] sm:$0xff]  ;;  %v10796_v33 = vcombine.low %v981_v11, %v985_v12 }
 0x331   :  { %v10807_v17 = vcombine.high %v990_v23, %v994_v31  ;;  %v10806_v41 = vcombine.low %v990_v23, %v994_v31  ;;  %v1037_v31 = vld [vmem:[%s16805_s2 + $0xb90] sm:$0xff] }
 0x332   :  { %7596 = vmatpush1.bf16.msra.mxu0 %v10756_v25  ;;  %v1001_v25 = vld [vmem:[%s16805_s2 + $0xa70] sm:$0xff] }
 0x333   :  { %7924 = vmatpush1.bf16.msra.mxu1 %v10758_v39  ;;  %7597 = vmatprep.subr.bf16.mxu0 %v10765_v40  ;;  %v998_v39 = vld [vmem:[%s16805_s2 + $0xa58] sm:$0xff]  ;;  %v10813_v56 = vcombine.high %v997_v18, %v1001_v25 }
 0x334   :  { %7925 = vmatprep.subr.bf16.mxu1 %v10767_v46  ;;  %v1002_v40 = vld [vmem:[%s16805_s2 + $0xa78] sm:$0xff]  ;;  %v10804_v46 = vcombine.low %v989_v24, %v993_v58 }
 0x335   :  { %v10815_v43 = vcombine.high %v998_v39, %v1002_v40  ;;  %v10814_v53 = vcombine.low %v998_v39, %v1002_v40  ;;  %v1045_v40 = vld [vmem:[%s16805_s2 + $0xbd0] sm:$0xff] }
 0x336   :  { %7598 = vmatpush1.bf16.msra.mxu0 %v10764_v45  ;;  %v1009_v45 = vld [vmem:[%s16805_s2 + $0xab0] sm:$0xff] }
 0x337   :  { %7926 = vmatpush1.bf16.msra.mxu1 %v10766_v49  ;;  %7599 = vmatprep.subr.bf16.mxu0 %v10773_v50  ;;  %v1006_v49 = vld [vmem:[%s16805_s2 + $0xa98] sm:$0xff]  ;;  %v10821_v54 = vcombine.high %v1005_v51, %v1009_v45 }
 0x338   :  { %7927 = vmatprep.subr.bf16.mxu1 %v10775_v52  ;;  %v1010_v50 = vld [vmem:[%s16805_s2 + $0xab8] sm:$0xff]  ;;  %v10812_v52 = vcombine.low %v997_v18, %v1001_v25 }
 0x339   :  { %v10823_v7 = vcombine.high %v1006_v49, %v1010_v50  ;;  %v10822_v60 = vcombine.low %v1006_v49, %v1010_v50  ;;  %v1053_v50 = vld [vmem:[%s16805_s2 + $0xc10] sm:$0xff] }
 0x33a   :  { %7600 = vmatpush1.bf16.msra.mxu0 %v10772_v57  ;;  %v1017_v57 = vld [vmem:[%s16805_s2 + $0xaf0] sm:$0xff] }
 0x33b   :  { %7928 = vmatpush1.bf16.msra.mxu1 %v10774_v30  ;;  %7601 = vmatprep.subr.bf16.mxu0 %v10781_v59  ;;  %v1014_v30 = vld [vmem:[%s16805_s2 + $0xad8] sm:$0xff]  ;;  %v10829_v62 = vcombine.high %v1013_v34, %v1017_v57 }
 0x33c   :  { %7929 = vmatprep.subr.bf16.mxu1 %v10783_v26  ;;  %v1018_v59 = vld [vmem:[%s16805_s2 + $0xaf8] sm:$0xff]  ;;  %v10820_v26 = vcombine.low %v1005_v51, %v1009_v45 }
 0x33d   :  { %v10831_v63 = vcombine.high %v1014_v30, %v1018_v59  ;;  %v10830_v11 = vcombine.low %v1014_v30, %v1018_v59  ;;  %v1061_v59 = vld [vmem:[%s16805_s2 + $0xc50] sm:$0xff] }
 0x33e   :  { %7602 = vmatpush1.bf16.msra.mxu0 %v10780_v29  ;;  %v1025_v29 = vld [vmem:[%s16805_s2 + $0xb30] sm:$0xff] }
 0x33f   :  { %7930 = vmatpush1.bf16.msra.mxu1 %v10782_v4  ;;  %7603 = vmatprep.subr.bf16.mxu0 %v10789_v9  ;;  %v1022_v4 = vld [vmem:[%s16805_s2 + $0xb18] sm:$0xff]  ;;  %v10837_v12 = vcombine.high %v1021_v1, %v1025_v29 }
 0x340   :  { %7931 = vmatprep.subr.bf16.mxu1 %v10791_v48  ;;  %v1026_v9 = vld [vmem:[%s16805_s2 + $0xb38] sm:$0xff]  ;;  %v10828_v48 = vcombine.low %v1013_v34, %v1017_v57 }
 0x341   :  { %v10839_v19 = vcombine.high %v1022_v4, %v1026_v9  ;;  %v10838_v24 = vcombine.low %v1022_v4, %v1026_v9  ;;  %v1069_v4 = vld [vmem:[%s16805_s2 + $0xc90] sm:$0xff] }
 0x342   :  { %7604 = vmatpush1.bf16.msra.mxu0 %v10788_v22  ;;  %v1033_v22 = vld [vmem:[%s16805_s2 + $0xb70] sm:$0xff] }
 0x343   :  { %7932 = vmatpush1.bf16.msra.mxu1 %v10790_v13  ;;  %7605 = vmatprep.subr.bf16.mxu0 %v10797_v15  ;;  %v1030_v13 = vld [vmem:[%s16805_s2 + $0xb58] sm:$0xff]  ;;  %v10845_v58 = vcombine.high %v1029_v21, %v1033_v22  ;;  %v1073_v9 = vld [vmem:[%s16805_s2 + $0xcb0] sm:$0xff] }
 0x344   :  { %7933 = vmatprep.subr.bf16.mxu1 %v10799_v47  ;;  %v1034_v15 = vld [vmem:[%s16805_s2 + $0xb78] sm:$0xff]  ;;  %v10836_v47 = vcombine.low %v1021_v1, %v1025_v29 }
 0x345   :  { %v10847_v23 = vcombine.high %v1030_v13, %v1034_v15  ;;  %v10846_v18 = vcombine.low %v1030_v13, %v1034_v15  ;;  %v1077_v15 = vld [vmem:[%s16805_s2 + $0xcd0] sm:$0xff] }
 0x346   :  { %7606 = vmatpush1.bf16.msra.mxu0 %v10796_v33  ;;  %v1041_v33 = vld [vmem:[%s16805_s2 + $0xbb0] sm:$0xff] }
 0x347   :  { %7934 = vmatpush1.bf16.msra.mxu1 %v10798_v37  ;;  %7607 = vmatprep.subr.bf16.mxu0 %v10805_v36  ;;  %v1038_v37 = vld [vmem:[%s16805_s2 + $0xb98] sm:$0xff]  ;;  %v10853_v25 = vcombine.high %v1037_v31, %v1041_v33 }
 0x348   :  { %7935 = vmatprep.subr.bf16.mxu1 %v10807_v17  ;;  %v1042_v36 = vld [vmem:[%s16805_s2 + $0xbb8] sm:$0xff]  ;;  %v10844_v17 = vcombine.low %v1029_v21, %v1033_v22  ;;  %v10885_v22 = vcombine.high %v1069_v4, %v1073_v9 }
 0x349   :  { %v10855_v39 = vcombine.high %v1038_v37, %v1042_v36  ;;  %v10854_v51 = vcombine.low %v1038_v37, %v1042_v36  ;;  %v1089_v37 = vld [vmem:[%s16805_s2 + $0xd30] sm:$0xff]  ;;  %v1086_v36 = vld [vmem:[%s16805_s2 + $0xd18] sm:$0xff] }
 0x34a   :  { %7608 = vmatpush1.bf16.msra.mxu0 %v10804_v46  ;;  %v1049_v46 = vld [vmem:[%s16805_s2 + $0xbf0] sm:$0xff] }
 0x34b   :  { %7936 = vmatpush1.bf16.msra.mxu1 %v10806_v41  ;;  %7609 = vmatprep.subr.bf16.mxu0 %v10813_v56  ;;  %v1046_v41 = vld [vmem:[%s16805_s2 + $0xbd8] sm:$0xff]  ;;  %v10861_v45 = vcombine.high %v1045_v40, %v1049_v46 }
 0x34c   :  { %7937 = vmatprep.subr.bf16.mxu1 %v10815_v43  ;;  %v1050_v56 = vld [vmem:[%s16805_s2 + $0xbf8] sm:$0xff]  ;;  %v10852_v43 = vcombine.low %v1037_v31, %v1041_v33  ;;  %v1085_v33 = vld [vmem:[%s16805_s2 + $0xd10] sm:$0xff] }
 0x34d   :  { %v10863_v49 = vcombine.high %v1046_v41, %v1050_v56  ;;  %v10862_v34 = vcombine.low %v1046_v41, %v1050_v56  ;;  %v1097_v41 = vld [vmem:[%s16805_s2 + $0xd70] sm:$0xff]  ;;  %v1094_v56 = vld [vmem:[%s16805_s2 + $0xd58] sm:$0xff] }
 0x34e   :  { %7610 = vmatpush1.bf16.msra.mxu0 %v10812_v52  ;;  %v1057_v52 = vld [vmem:[%s16805_s2 + $0xc30] sm:$0xff] }
 0x34f   :  { %7938 = vmatpush1.bf16.msra.mxu1 %v10814_v53  ;;  %7611 = vmatprep.subr.bf16.mxu0 %v10821_v54  ;;  %v1054_v53 = vld [vmem:[%s16805_s2 + $0xc18] sm:$0xff]  ;;  %v10869_v57 = vcombine.high %v1053_v50, %v1057_v52 }
 0x350   :  { %7939 = vmatprep.subr.bf16.mxu1 %v10823_v7  ;;  %v1058_v54 = vld [vmem:[%s16805_s2 + $0xc38] sm:$0xff]  ;;  %v10860_v7 = vcombine.low %v1045_v40, %v1049_v46  ;;  %v1093_v46 = vld [vmem:[%s16805_s2 + $0xd50] sm:$0xff] }
 0x351   :  { %v10871_v30 = vcombine.high %v1054_v53, %v1058_v54  ;;  %v10870_v1 = vcombine.low %v1054_v53, %v1058_v54  ;;  %v1105_v53 = vld [vmem:[%s16805_s2 + $0xdb0] sm:$0xff]  ;;  %v1102_v54 = vld [vmem:[%s16805_s2 + $0xd98] sm:$0xff] }
 0x352   :  { %7612 = vmatpush1.bf16.msra.mxu0 %v10820_v26  ;;  %v1065_v26 = vld [vmem:[%s16805_s2 + $0xc70] sm:$0xff] }
 0x353   :  { %7940 = vmatpush1.bf16.msra.mxu1 %v10822_v60  ;;  %7613 = vmatprep.subr.bf16.mxu0 %v10829_v62  ;;  %v10868_v60 = vcombine.low %v1053_v50, %v1057_v52  ;;  %v1062_v62 = vld [vmem:[%s16805_s2 + $0xc58] sm:$0xff]  ;;  %v10877_v29 = vcombine.high %v1061_v59, %v1065_v26  ;;  %v1101_v52 = vld [vmem:[%s16805_s2 + $0xd90] sm:$0xff] }
 0x354   :  { %7941 = vmatprep.subr.bf16.mxu1 %v10831_v63  ;;  %v1066_v63 = vld [vmem:[%s16805_s2 + $0xc78] sm:$0xff] }
 0x355   :  { %v10878_v21 = vcombine.low %v1062_v62, %v1066_v63 }
 0x356   :  { %7614 = vmatpush1.bf16.msra.mxu0 %v10828_v48  ;;  %v10879_v48 = vcombine.high %v1062_v62, %v1066_v63  ;;  %v1113_v62 = vld [vmem:[%s16805_s2 + $0xdf0] sm:$0xff] }
 0x357   :  { %7942 = vmatpush1.bf16.msra.mxu1 %v10830_v11  ;;  %7615 = vmatprep.subr.bf16.mxu0 %v10837_v12  ;;  %v1070_v11 = vld [vmem:[%s16805_s2 + $0xc98] sm:$0xff] }
 0x358   :  { %7943 = vmatprep.subr.bf16.mxu1 %v10839_v19  ;;  %v1074_v12 = vld [vmem:[%s16805_s2 + $0xcb8] sm:$0xff]  ;;  %v10876_v19 = vcombine.low %v1061_v59, %v1065_v26 }
 0x359   :  { %v10887_v13 = vcombine.high %v1070_v11, %v1074_v12 }
 0x35a   :  { %7616 = vmatpush1.bf16.msra.mxu0 %v10836_v47  ;;  %v1081_v47 = vld [vmem:[%s16805_s2 + $0xcf0] sm:$0xff] }
 0x35b   :  { %7944 = vmatpush1.bf16.msra.mxu1 %v10838_v24  ;;  %7617 = vmatprep.subr.bf16.mxu0 %v10845_v58  ;;  %v1082_v24 = vld [vmem:[%s16805_s2 + $0xcf8] sm:$0xff]  ;;  %v10886_v58 = vcombine.low %v1070_v11, %v1074_v12  ;;  %v10916_v11 = vcombine.low %v1101_v52, %v1105_v53 }
 0x35c   :  { %7945 = vmatprep.subr.bf16.mxu1 %v10847_v23  ;;  %v10893_v23 = vcombine.high %v1077_v15, %v1081_v47 }
 0x35e   :  { %7618 = vmatpush1.bf16.msra.mxu0 %v10844_v17  ;;  %v1090_v17 = vld [vmem:[%s16805_s2 + $0xd38] sm:$0xff] }
 0x35f   :  { %7946 = vmatpush1.bf16.msra.mxu1 %v10846_v18  ;;  %7619 = vmatprep.subr.bf16.mxu0 %v10853_v25  ;;  %v10892_v18 = vcombine.low %v1077_v15, %v1081_v47  ;;  %v10903_v40 = vcombine.high %v1086_v36, %v1090_v17  ;;  %v1117_v47 = vld [vmem:[%s16805_s2 + $0xe10] sm:$0xff] }
 0x360   :  { %7947 = vmatprep.subr.bf16.mxu1 %v10855_v39  ;;  %v10901_v39 = vcombine.high %v1085_v33, %v1089_v37 }
 0x362   :  { %7620 = vmatpush1.bf16.msra.mxu0 %v10852_v43  ;;  %v1098_v43 = vld [vmem:[%s16805_s2 + $0xd78] sm:$0xff] }
 0x363   :  { %7948 = vmatpush1.bf16.msra.mxu1 %v10854_v51  ;;  %7621 = vmatprep.subr.bf16.mxu0 %v10861_v45  ;;  %v10900_v51 = vcombine.low %v1085_v33, %v1089_v37  ;;  %v10902_v45 = vcombine.low %v1086_v36, %v1090_v17  ;;  %v10911_v50 = vcombine.high %v1094_v56, %v1098_v43  ;;  %v1125_v37 = vld [vmem:[%s16805_s2 + $0xe50] sm:$0xff]  ;;  %v1126_v17 = vld [vmem:[%s16805_s2 + $0xe58] sm:$0xff] }
 0x364   :  { %7949 = vmatprep.subr.bf16.mxu1 %v10863_v49  ;;  %v10909_v49 = vcombine.high %v1093_v46, %v1097_v41  ;;  %v1129_v36 = vld [vmem:[%s16805_s2 + $0xe70] sm:$0xff] }
 0x366   :  { %7622 = vmatpush1.bf16.msra.mxu0 %v10860_v7  ;;  %v1106_v7 = vld [vmem:[%s16805_s2 + $0xdb8] sm:$0xff] }
 0x367   :  { %7950 = vmatpush1.bf16.msra.mxu1 %v10862_v34  ;;  %7632 = vmatprep.subr.bf16.mxu0 %v10869_v57  ;;  %v10908_v34 = vcombine.low %v1093_v46, %v1097_v41  ;;  %v10910_v57 = vcombine.low %v1094_v56, %v1098_v43  ;;  %v10919_v26 = vcombine.high %v1102_v54, %v1106_v7  ;;  %v1133_v41 = vld [vmem:[%s16805_s2 + $0xe90] sm:$0xff]  ;;  %v1134_v43 = vld [vmem:[%s16805_s2 + $0xe98] sm:$0xff] }
 0x368   :  { %7960 = vmatprep.subr.bf16.mxu1 %v10871_v30  ;;  %v10917_v30 = vcombine.high %v1101_v52, %v1105_v53  ;;  %v1137_v56 = vld [vmem:[%s16805_s2 + $0xeb0] sm:$0xff] }
 0x369   :  { %7624 = vmatmul.mubr.bf16.vlgmr.msra.gmra.mrb[20].mxu0 %v13309_v42  ;;  %v1141_v53 = vld [vmem:[%s16805_s2 + $0xed0] sm:$0xff] }
 0x36a   :  { %7952 = vmatmul.mubr.bf16.vlgmr.msra.gmra.mrb[20].mxu1 %v13309_v42  ;;  %7633 = vmatpush1.bf16.msra.mxu0 %v10868_v60  ;;  %v1078_v42 = vld [vmem:[%s16805_s2 + $0xcd8] sm:$0xff]  ;;  %v1109_v60 = vld [vmem:[%s16805_s2 + $0xdd0] sm:$0xff] }
 0x36b   :  { %7664 = vmatprep.mubr.bf16.mxu0 %v13323_v55  ;;  %7961 = vmatpush1.bf16.msra.mxu1 %v10870_v1  ;;  %v10895_v31 = vcombine.high %v1078_v42, %v1082_v24  ;;  %v10894_v25 = vcombine.low %v1078_v42, %v1082_v24  ;;  %v1121_v42 = vld [vmem:[%s16805_s2 + $0xe30] sm:$0xff]  ;;  %v1118_v24 = vld [vmem:[%s16805_s2 + $0xe18] sm:$0xff] }
 0x36c   :  { %7992 = vmatprep.mubr.bf16.mxu1 %v13323_v55  ;;  %7634 = vmatprep.subr.bf16.mxu0 %v10877_v29  ;;  %v10884_v55 = vcombine.low %v1069_v4, %v1073_v9  ;;  %v1110_v29 = vld [vmem:[%s16805_s2 + $0xdd8] sm:$0xff] }
 0x36d   :  { %7962 = vmatprep.subr.bf16.mxu1 %v10879_v48  ;;  %v1114_v4 = vld [vmem:[%s16805_s2 + $0xdf8] sm:$0xff] }
 0x36e   :  { %7635 = vmatpush1.bf16.msra.mxu0 %v10876_v19  ;;  %v10927_v15 = vcombine.high %v1110_v29, %v1114_v4 }
 0x36f   :  { %7963 = vmatpush1.bf16.msra.mxu1 %v10878_v21  ;;  %7636 = vmatprep.subr.bf16.mxu0 %v10885_v22  ;;  %v10918_v21 = vcombine.low %v1102_v54, %v1106_v7  ;;  %v10925_v22 = vcombine.high %v1109_v60, %v1113_v62  ;;  %v1145_v54 = vld [vmem:[%s16805_s2 + $0xef0] sm:$0xff]  ;;  %v1142_v7 = vld [vmem:[%s16805_s2 + $0xed8] sm:$0xff] }
 0x370   :  { %7964 = vmatprep.subr.bf16.mxu1 %v10887_v13 }
 0x372   :  { %7637 = vmatpush1.bf16.msra.mxu0 %v10884_v55  ;;  %v1122_v55 = vld [vmem:[%s16805_s2 + $0xe38] sm:$0xff] }
 0x373   :  { %7965 = vmatpush1.bf16.msra.mxu1 %v10886_v58  ;;  %7638 = vmatprep.subr.bf16.mxu0 %v10893_v23  ;;  %v10924_v58 = vcombine.low %v1109_v60, %v1113_v62  ;;  %v10926_v23 = vcombine.low %v1110_v29, %v1114_v4  ;;  %v10935_v33 = vcombine.high %v1118_v24, %v1122_v55  ;;  %v1149_v62 = vld [vmem:[%s16805_s2 + $0xf10] sm:$0xff]  ;;  %v1150_v4 = vld [vmem:[%s16805_s2 + $0xf18] sm:$0xff] }
 0x374   :  { %7966 = vmatprep.subr.bf16.mxu1 %v10895_v31  ;;  %v10933_v31 = vcombine.high %v1117_v47, %v1121_v42  ;;  %v1153_v29 = vld [vmem:[%s16805_s2 + $0xf30] sm:$0xff] }
 0x376   :  { %7639 = vmatpush1.bf16.msra.mxu0 %v10892_v18  ;;  %v1130_v18 = vld [vmem:[%s16805_s2 + $0xe78] sm:$0xff] }
 0x377   :  { %7967 = vmatpush1.bf16.msra.mxu1 %v10894_v25  ;;  %7640 = vmatprep.subr.bf16.mxu0 %v10901_v39  ;;  %v10932_v25 = vcombine.low %v1117_v47, %v1121_v42  ;;  %v10934_v39 = vcombine.low %v1118_v24, %v1122_v55  ;;  %v10943_v46 = vcombine.high %v1126_v17, %v1130_v18  ;;  %v1162_v47 = vld [vmem:[%s16805_s2 + $0xf78] sm:$0xff] }
 0x378   :  { %7968 = vmatprep.subr.bf16.mxu1 %v10903_v40  ;;  %v10941_v40 = vcombine.high %v1125_v37, %v1129_v36  ;;  %v10964_v42 = vcombine.low %v1149_v62, %v1153_v29 }
 0x37a   :  { %7641 = vmatpush1.bf16.msra.mxu0 %v10900_v51  ;;  %v1138_v51 = vld [vmem:[%s16805_s2 + $0xeb8] sm:$0xff] }
 0x37b   :  { %7969 = vmatpush1.bf16.msra.mxu1 %v10902_v45  ;;  %7642 = vmatprep.subr.bf16.mxu0 %v10909_v49  ;;  %v10940_v45 = vcombine.low %v1125_v37, %v1129_v36  ;;  %v10942_v49 = vcombine.low %v1126_v17, %v1130_v18  ;;  %v10951_v52 = vcombine.high %v1134_v43, %v1138_v51  ;;  %v1170_v37 = vld [vmem:[%s16805_s2 + $0xfb8] sm:$0xff] }
 0x37c   :  { %v14985_v59 = vpop.f32.mrb[16].mxu0  ;;  %7970 = vmatprep.subr.bf16.mxu1 %v10911_v50  ;;  %v10949_v50 = vcombine.high %v1133_v41, %v1137_v56 }
 0x37d   :  { %v14993_v63 = vpop.f32.mrb[16].mxu1  ;;  %v14995_v1 = vpop.f32.mrb[17].mxu0 }
 0x37e   :  { %v15003_v9 = vpop.f32.mrb[17].mxu1  ;;  %v7178_v48 = vpop.f32.mrb[18].mxu0  ;;  %7643 = vmatpush1.bf16.msra.mxu0 %v10908_v34  ;;  %v1146_v34 = vld [vmem:[%s16805_s2 + $0xef8] sm:$0xff] }
 0x37f   :  { %v7506_v12 = vpop.f32.mrb[18].mxu1  ;;  %7971 = vmatpush1.bf16.msra.mxu1 %v10910_v57  ;;  %v7179_v19 = vpop.f32.mrb[19].mxu0  ;;  %7644 = vmatprep.subr.bf16.mxu0 %v10917_v30  ;;  %v10948_v57 = vcombine.low %v1133_v41, %v1137_v56  ;;  %v10950_v30 = vcombine.low %v1134_v43, %v1138_v51  ;;  %v10959_v60 = vcombine.high %v1142_v7, %v1146_v34  ;;  %v1154_v48 = vld [vmem:[%s16805_s2 + $0xf38] sm:$0xff] }
 0x380   :  { %v7507_v13 = vpop.f32.mrb[19].mxu1  ;;  %7972 = vmatprep.subr.bf16.mxu1 %v10919_v26  ;;  %v10957_v26 = vcombine.high %v1141_v53, %v1145_v54  ;;  %v10958_v12 = vcombine.low %v1142_v7, %v1146_v34  ;;  %v10965_v19 = vcombine.high %v1149_v62, %v1153_v29  ;;  %v10966_v24 = vcombine.low %v1150_v4, %v1154_v48  ;;  %v1178_v41 = vld [vmem:[%s16805_s2 + $0xff8] sm:$0xff] }
 0x381   :  { %v1161_v13 = vld [vmem:[%s16805_s2 + $0xf70] sm:$0xff]  ;;  %v1190_v62 = vld [vmem:[%s16805_s2 + $0x1058] sm:$0xff] }
 0x382   :  { %7645 = vmatpush1.bf16.msra.mxu0 %v10916_v11  ;;  %v10956_v11 = vcombine.low %v1141_v53, %v1145_v54  ;;  %v1186_v53 = vld [vmem:[%s16805_s2 + $0x1038] sm:$0xff] }
 0x383   :  { %7973 = vmatpush1.bf16.msra.mxu1 %v10918_v21  ;;  %7646 = vmatprep.subr.bf16.mxu0 %v10925_v22  ;;  %v10967_v21 = vcombine.high %v1150_v4, %v1154_v48  ;;  %v1157_v22 = vld [vmem:[%s16805_s2 + $0xf50] sm:$0xff]  ;;  %v1194_v29 = vld [vmem:[%s16805_s2 + $0x1078] sm:$0xff] }
 0x384   :  { %7974 = vmatprep.subr.bf16.mxu1 %v10927_v15  ;;  %v1158_v15 = vld [vmem:[%s16805_s2 + $0xf58] sm:$0xff]  ;;  %v10973_v55 = vcombine.high %v1157_v22, %v1161_v13  ;;  %v10972_v36 = vcombine.low %v1157_v22, %v1161_v13 }
 0x385   :  { %v10974_v17 = vcombine.low %v1158_v15, %v1162_v47  ;;  %v1202_v22 = vld [vmem:[%s16805_s2 + $0x10b8] sm:$0xff] }
 0x386   :  { %7647 = vmatpush1.bf16.msra.mxu0 %v10924_v58  ;;  %v10975_v58 = vcombine.high %v1158_v15, %v1162_v47  ;;  %v11006_v15 = vcombine.low %v1190_v62, %v1194_v29 }
 0x387   :  { %7975 = vmatpush1.bf16.msra.mxu1 %v10926_v23  ;;  %7648 = vmatprep.subr.bf16.mxu0 %v10933_v31  ;;  %v1165_v23 = vld [vmem:[%s16805_s2 + $0xf90] sm:$0xff] }
 0x388   :  { %7976 = vmatprep.subr.bf16.mxu1 %v10935_v33  ;;  %v1169_v31 = vld [vmem:[%s16805_s2 + $0xfb0] sm:$0xff]  ;;  %v1166_v33 = vld [vmem:[%s16805_s2 + $0xf98] sm:$0xff] }
 0x389   :  { %v10981_v18 = vcombine.high %v1165_v23, %v1169_v31  ;;  %v10980_v56 = vcombine.low %v1165_v23, %v1169_v31  ;;  %v10982_v43 = vcombine.low %v1166_v33, %v1170_v37 }
 0x38a   :  { %7649 = vmatpush1.bf16.msra.mxu0 %v10932_v25  ;;  %v10983_v25 = vcombine.high %v1166_v33, %v1170_v37  ;;  %v1213_v37 = vld [vmem:[%s16805_s2 + $0x1110] sm:$0xff] }
 0x38b   :  { %7977 = vmatpush1.bf16.msra.mxu1 %v10934_v39  ;;  %7650 = vmatprep.subr.bf16.mxu0 %v10941_v40  ;;  %v1173_v39 = vld [vmem:[%s16805_s2 + $0xfd0] sm:$0xff] }
 0x38c   :  { %7978 = vmatprep.subr.bf16.mxu1 %v10943_v46  ;;  %v1177_v40 = vld [vmem:[%s16805_s2 + $0xff0] sm:$0xff]  ;;  %v1174_v46 = vld [vmem:[%s16805_s2 + $0xfd8] sm:$0xff] }
 0x38d   :  { %v10989_v51 = vcombine.high %v1173_v39, %v1177_v40  ;;  %v10988_v54 = vcombine.low %v1173_v39, %v1177_v40  ;;  %v10990_v7 = vcombine.low %v1174_v46, %v1178_v41 }
 0x38e   :  { %7651 = vmatpush1.bf16.msra.mxu0 %v10940_v45  ;;  %v10991_v45 = vcombine.high %v1174_v46, %v1178_v41  ;;  %v1221_v41 = vld [vmem:[%s16805_s2 + $0x1150] sm:$0xff] }
 0x38f   :  { %7979 = vmatpush1.bf16.msra.mxu1 %v10942_v49  ;;  %7652 = vmatprep.subr.bf16.mxu0 %v10949_v50  ;;  %v1181_v49 = vld [vmem:[%s16805_s2 + $0x1010] sm:$0xff] }
 0x390   :  { %7980 = vmatprep.subr.bf16.mxu1 %v10951_v52  ;;  %v1185_v50 = vld [vmem:[%s16805_s2 + $0x1030] sm:$0xff]  ;;  %v1182_v52 = vld [vmem:[%s16805_s2 + $0x1018] sm:$0xff] }
 0x391   :  { %v10997_v34 = vcombine.high %v1181_v49, %v1185_v50  ;;  %v10998_v4 = vcombine.low %v1182_v52, %v1186_v53 }
 0x392   :  { %7653 = vmatpush1.bf16.msra.mxu0 %v10948_v57  ;;  %v10999_v57 = vcombine.high %v1182_v52, %v1186_v53  ;;  %v1229_v53 = vld [vmem:[%s16805_s2 + $0x1190] sm:$0xff] }
 0x393   :  { %7981 = vmatpush1.bf16.msra.mxu1 %v10950_v30  ;;  %7654 = vmatprep.subr.bf16.mxu0 %v10957_v26  ;;  %v1189_v30 = vld [vmem:[%s16805_s2 + $0x1050] sm:$0xff] }
 0x394   :  { %7982 = vmatprep.subr.bf16.mxu1 %v10959_v60  ;;  %v1193_v26 = vld [vmem:[%s16805_s2 + $0x1070] sm:$0xff]  ;;  %v10996_v60 = vcombine.low %v1181_v49, %v1185_v50 }
 0x395   :  { %v11005_v48 = vcombine.high %v1189_v30, %v1193_v26  ;;  %v11004_v13 = vcombine.low %v1189_v30, %v1193_v26 }
 0x396   :  { %7655 = vmatpush1.bf16.msra.mxu0 %v10956_v11  ;;  %v1197_v11 = vld [vmem:[%s16805_s2 + $0x1090] sm:$0xff] }
 0x397   :  { %7983 = vmatpush1.bf16.msra.mxu1 %v10958_v12  ;;  %7656 = vmatprep.subr.bf16.mxu0 %v10965_v19  ;;  %v1201_v12 = vld [vmem:[%s16805_s2 + $0x10b0] sm:$0xff]  ;;  %v11007_v19 = vcombine.high %v1190_v62, %v1194_v29 }
 0x398   :  { %7984 = vmatprep.subr.bf16.mxu1 %v10967_v21  ;;  %v1198_v21 = vld [vmem:[%s16805_s2 + $0x1098] sm:$0xff]  ;;  %v11013_v47 = vcombine.high %v1197_v11, %v1201_v12  ;;  %v1237_v62 = vld [vmem:[%s16805_s2 + $0x11d0] sm:$0xff] }
 0x399   :  { %v11014_v23 = vcombine.low %v1198_v21, %v1202_v22  ;;  %v1241_v29 = vld [vmem:[%s16805_s2 + $0x11f0] sm:$0xff] }
 0x39a   :  { %7657 = vmatpush1.bf16.msra.mxu0 %v10964_v42  ;;  %v11015_v42 = vcombine.high %v1198_v21, %v1202_v22  ;;  %v1245_v22 = vld [vmem:[%s16805_s2 + $0x1210] sm:$0xff] }
 0x39b   :  { %7985 = vmatpush1.bf16.msra.mxu1 %v10966_v24  ;;  %7658 = vmatprep.subr.bf16.mxu0 %v10973_v55  ;;  %v1205_v24 = vld [vmem:[%s16805_s2 + $0x10d0] sm:$0xff] }
 0x39c   :  { %7986 = vmatprep.subr.bf16.mxu1 %v10975_v58  ;;  %v1209_v55 = vld [vmem:[%s16805_s2 + $0x10f0] sm:$0xff]  ;;  %v1210_v58 = vld [vmem:[%s16805_s2 + $0x10f8] sm:$0xff] }
 0x39d   :  { %v11021_v31 = vcombine.high %v1205_v24, %v1209_v55 }
 0x39e   :  { %7659 = vmatpush1.bf16.msra.mxu0 %v10972_v36  ;;  %v1217_v36 = vld [vmem:[%s16805_s2 + $0x1130] sm:$0xff] }
 0x39f   :  { %7987 = vmatpush1.bf16.msra.mxu1 %v10974_v17  ;;  %7660 = vmatprep.subr.bf16.mxu0 %v10981_v18  ;;  %v1214_v17 = vld [vmem:[%s16805_s2 + $0x1118] sm:$0xff]  ;;  %v11029_v40 = vcombine.high %v1213_v37, %v1217_v36 }
 0x3a0   :  { %7988 = vmatprep.subr.bf16.mxu1 %v10983_v25  ;;  %v1218_v18 = vld [vmem:[%s16805_s2 + $0x1138] sm:$0xff]  ;;  %v11020_v25 = vcombine.low %v1205_v24, %v1209_v55 }
 0x3a1   :  { %v11031_v46 = vcombine.high %v1214_v17, %v1218_v18  ;;  %v11030_v49 = vcombine.low %v1214_v17, %v1218_v18  ;;  %v1261_v18 = vld [vmem:[%s16805_s2 + $0x1290] sm:$0xff] }
 0x3a2   :  { %7661 = vmatpush1.bf16.msra.mxu0 %v10980_v56  ;;  %v1225_v56 = vld [vmem:[%s16805_s2 + $0x1170] sm:$0xff] }
 0x3a3   :  { %7989 = vmatpush1.bf16.msra.mxu1 %v10982_v43  ;;  %7662 = vmatprep.subr.bf16.mxu0 %v10989_v51  ;;  %v1222_v43 = vld [vmem:[%s16805_s2 + $0x1158] sm:$0xff]  ;;  %v11037_v50 = vcombine.high %v1221_v41, %v1225_v56 }
 0x3a4   :  { %7990 = vmatprep.subr.bf16.mxu1 %v10991_v45  ;;  %v1226_v51 = vld [vmem:[%s16805_s2 + $0x1178] sm:$0xff]  ;;  %v11028_v45 = vcombine.low %v1213_v37, %v1217_v36 }
 0x3a5   :  { %v11039_v52 = vcombine.high %v1222_v43, %v1226_v51  ;;  %v11038_v30 = vcombine.low %v1222_v43, %v1226_v51  ;;  %v1269_v51 = vld [vmem:[%s16805_s2 + $0x12d0] sm:$0xff] }
 0x3a6   :  { %7663 = vmatpush1.bf16.msra.mxu0 %v10988_v54  ;;  %v1233_v54 = vld [vmem:[%s16805_s2 + $0x11b0] sm:$0xff] }
 0x3a7   :  { %7991 = vmatpush1.bf16.msra.mxu1 %v10990_v7  ;;  %7673 = vmatprep.subr.bf16.mxu0 %v10997_v34  ;;  %v1230_v7 = vld [vmem:[%s16805_s2 + $0x1198] sm:$0xff]  ;;  %v11045_v26 = vcombine.high %v1229_v53, %v1233_v54 }
 0x3a8   :  { %8001 = vmatprep.subr.bf16.mxu1 %v10999_v57  ;;  %v1234_v34 = vld [vmem:[%s16805_s2 + $0x11b8] sm:$0xff]  ;;  %v11036_v57 = vcombine.low %v1221_v41, %v1225_v56 }
 0x3a9   :  { %7665 = vmatmul.mubr.bf16.vlgmr.msra.gmra.mrb[20].mxu0 %v13522_v0 }
 0x3aa   :  { %7993 = vmatmul.mubr.bf16.vlgmr.msra.gmra.mrb[20].mxu1 %v13522_v0  ;;  %7674 = vmatpush1.bf16.msra.mxu0 %v10996_v60  ;;  %v1206_v0 = vld [vmem:[%s16805_s2 + $0x10d8] sm:$0xff]  ;;  %v11047_v60 = vcombine.high %v1230_v7, %v1234_v34 }
 0x3ab   :  { %7705 = vmatprep.mubr.bf16.mxu0 %v13524_v2  ;;  %8002 = vmatpush1.bf16.msra.mxu1 %v10998_v4  ;;  %v11023_v33 = vcombine.high %v1206_v0, %v1210_v58  ;;  %v11022_v39 = vcombine.low %v1206_v0, %v1210_v58  ;;  %v1238_v4 = vld [vmem:[%s16805_s2 + $0x11d8] sm:$0xff]  ;;  %v1253_v58 = vld [vmem:[%s16805_s2 + $0x1250] sm:$0xff] }
 0x3ac   :  { %8033 = vmatprep.mubr.bf16.mxu1 %v13524_v2  ;;  %7675 = vmatprep.subr.bf16.mxu0 %v11005_v48  ;;  %v11012_v2 = vcombine.low %v1197_v11, %v1201_v12  ;;  %v1242_v48 = vld [vmem:[%s16805_s2 + $0x11f8] sm:$0xff]  ;;  %v11044_v11 = vcombine.low %v1229_v53, %v1233_v54  ;;  %v11046_v12 = vcombine.low %v1230_v7, %v1234_v34  ;;  %v1277_v34 = vld [vmem:[%s16805_s2 + $0x1310] sm:$0xff] }
 0x3ad   :  { %8003 = vmatprep.subr.bf16.mxu1 %v11007_v19  ;;  %v11053_v19 = vcombine.high %v1237_v62, %v1241_v29  ;;  %v11055_v21 = vcombine.high %v1238_v4, %v1242_v48  ;;  %v11054_v24 = vcombine.low %v1238_v4, %v1242_v48  ;;  %v1285_v48 = vld [vmem:[%s16805_s2 + $0x1350] sm:$0xff] }
 0x3ae   :  { %7676 = vmatpush1.bf16.msra.mxu0 %v11004_v13  ;;  %v1249_v13 = vld [vmem:[%s16805_s2 + $0x1230] sm:$0xff] }
 0x3af   :  { %8004 = vmatpush1.bf16.msra.mxu1 %v11006_v15  ;;  %7677 = vmatprep.subr.bf16.mxu0 %v11013_v47  ;;  %v1246_v15 = vld [vmem:[%s16805_s2 + $0x1218] sm:$0xff]  ;;  %v11061_v55 = vcombine.high %v1245_v22, %v1249_v13 }
 0x3b0   :  { %8005 = vmatprep.subr.bf16.mxu1 %v11015_v42  ;;  %v1250_v47 = vld [vmem:[%s16805_s2 + $0x1238] sm:$0xff]  ;;  %v11052_v42 = vcombine.low %v1237_v62, %v1241_v29 }
 0x3b1   :  { %v11063_v0 = vcombine.high %v1246_v15, %v1250_v47  ;;  %v11062_v37 = vcombine.low %v1246_v15, %v1250_v47  ;;  %v1293_v47 = vld [vmem:[%s16805_s2 + $0x1390] sm:$0xff] }
 0x3b2   :  { %7678 = vmatpush1.bf16.msra.mxu0 %v11012_v2  ;;  %v1257_v2 = vld [vmem:[%s16805_s2 + $0x1270] sm:$0xff] }
 0x3b3   :  { %8006 = vmatpush1.bf16.msra.mxu1 %v11014_v23  ;;  %7679 = vmatprep.subr.bf16.mxu0 %v11021_v31  ;;  %v1254_v23 = vld [vmem:[%s16805_s2 + $0x1258] sm:$0xff]  ;;  %v11069_v36 = vcombine.high %v1253_v58, %v1257_v2 }
 0x3b4   :  { %8007 = vmatprep.subr.bf16.mxu1 %v11023_v33  ;;  %v1258_v31 = vld [vmem:[%s16805_s2 + $0x1278] sm:$0xff]  ;;  %v11060_v33 = vcombine.low %v1245_v22, %v1249_v13 }
 0x3b5   :  { %v11071_v17 = vcombine.high %v1254_v23, %v1258_v31  ;;  %v11070_v41 = vcombine.low %v1254_v23, %v1258_v31  ;;  %v1301_v31 = vld [vmem:[%s16805_s2 + $0x13d0] sm:$0xff] }
 0x3b6   :  { %7680 = vmatpush1.bf16.msra.mxu0 %v11020_v25  ;;  %v1265_v25 = vld [vmem:[%s16805_s2 + $0x12b0] sm:$0xff] }
 0x3b7   :  { %8008 = vmatpush1.bf16.msra.mxu1 %v11022_v39  ;;  %7681 = vmatprep.subr.bf16.mxu0 %v11029_v40  ;;  %v1262_v39 = vld [vmem:[%s16805_s2 + $0x1298] sm:$0xff]  ;;  %v11077_v56 = vcombine.high %v1261_v18, %v1265_v25 }
 0x3b8   :  { %8009 = vmatprep.subr.bf16.mxu1 %v11031_v46  ;;  %v1266_v40 = vld [vmem:[%s16805_s2 + $0x12b8] sm:$0xff]  ;;  %v11068_v46 = vcombine.low %v1253_v58, %v1257_v2 }
 0x3b9   :  { %v11079_v43 = vcombine.high %v1262_v39, %v1266_v40  ;;  %v11078_v53 = vcombine.low %v1262_v39, %v1266_v40  ;;  %v1309_v40 = vld [vmem:[%s16805_s2 + $0x1410] sm:$0xff] }
 0x3ba   :  { %7682 = vmatpush1.bf16.msra.mxu0 %v11028_v45  ;;  %v1273_v45 = vld [vmem:[%s16805_s2 + $0x12f0] sm:$0xff] }
 0x3bb   :  { %8010 = vmatpush1.bf16.msra.mxu1 %v11030_v49  ;;  %7683 = vmatprep.subr.bf16.mxu0 %v11037_v50  ;;  %v1270_v49 = vld [vmem:[%s16805_s2 + $0x12d8] sm:$0xff]  ;;  %v11085_v54 = vcombine.high %v1269_v51, %v1273_v45 }
 0x3bc   :  { %8011 = vmatprep.subr.bf16.mxu1 %v11039_v52  ;;  %v1274_v50 = vld [vmem:[%s16805_s2 + $0x12f8] sm:$0xff]  ;;  %v11076_v52 = vcombine.low %v1261_v18, %v1265_v25 }
 0x3bd   :  { %v11087_v7 = vcombine.high %v1270_v49, %v1274_v50  ;;  %v11086_v62 = vcombine.low %v1270_v49, %v1274_v50  ;;  %v1317_v50 = vld [vmem:[%s16805_s2 + $0x1450] sm:$0xff] }
 0x3be   :  { %7684 = vmatpush1.bf16.msra.mxu0 %v11036_v57  ;;  %v1281_v57 = vld [vmem:[%s16805_s2 + $0x1330] sm:$0xff] }
 0x3bf   :  { %8012 = vmatpush1.bf16.msra.mxu1 %v11038_v30  ;;  %7685 = vmatprep.subr.bf16.mxu0 %v11045_v26  ;;  %v1278_v30 = vld [vmem:[%s16805_s2 + $0x1318] sm:$0xff]  ;;  %v11093_v29 = vcombine.high %v1277_v34, %v1281_v57 }
 0x3c0   :  { %8013 = vmatprep.subr.bf16.mxu1 %v11047_v60  ;;  %v1282_v26 = vld [vmem:[%s16805_s2 + $0x1338] sm:$0xff]  ;;  %v11084_v60 = vcombine.low %v1269_v51, %v1273_v45 }
 0x3c1   :  { %v11095_v4 = vcombine.high %v1278_v30, %v1282_v26  ;;  %v11094_v22 = vcombine.low %v1278_v30, %v1282_v26  ;;  %v1325_v30 = vld [vmem:[%s16805_s2 + $0x1490] sm:$0xff] }
 0x3c2   :  { %7686 = vmatpush1.bf16.msra.mxu0 %v11044_v11  ;;  %v1289_v11 = vld [vmem:[%s16805_s2 + $0x1370] sm:$0xff] }
 0x3c3   :  { %8014 = vmatpush1.bf16.msra.mxu1 %v11046_v12  ;;  %7687 = vmatprep.subr.bf16.mxu0 %v11053_v19  ;;  %v1286_v12 = vld [vmem:[%s16805_s2 + $0x1358] sm:$0xff]  ;;  %v11101_v13 = vcombine.high %v1285_v48, %v1289_v11  ;;  %v1329_v26 = vld [vmem:[%s16805_s2 + $0x14b0] sm:$0xff] }
 0x3c4   :  { %8015 = vmatprep.subr.bf16.mxu1 %v11055_v21  ;;  %v1290_v19 = vld [vmem:[%s16805_s2 + $0x1378] sm:$0xff]  ;;  %v11092_v21 = vcombine.low %v1277_v34, %v1281_v57 }
 0x3c5   :  { %v11103_v15 = vcombine.high %v1286_v12, %v1290_v19  ;;  %v11102_v58 = vcombine.low %v1286_v12, %v1290_v19  ;;  %v1333_v19 = vld [vmem:[%s16805_s2 + $0x14d0] sm:$0xff] }
 0x3c6   :  { %7688 = vmatpush1.bf16.msra.mxu0 %v11052_v42  ;;  %v1297_v42 = vld [vmem:[%s16805_s2 + $0x13b0] sm:$0xff] }
 0x3c7   :  { %8016 = vmatpush1.bf16.msra.mxu1 %v11054_v24  ;;  %7689 = vmatprep.subr.bf16.mxu0 %v11061_v55  ;;  %v1294_v24 = vld [vmem:[%s16805_s2 + $0x1398] sm:$0xff]  ;;  %v11109_v2 = vcombine.high %v1293_v47, %v1297_v42 }
 0x3c8   :  { %8017 = vmatprep.subr.bf16.mxu1 %v11063_v0  ;;  %v1298_v55 = vld [vmem:[%s16805_s2 + $0x13b8] sm:$0xff]  ;;  %v11100_v0 = vcombine.low %v1285_v48, %v1289_v11  ;;  %v11141_v11 = vcombine.high %v1325_v30, %v1329_v26 }
 0x3c9   :  { %v11111_v23 = vcombine.high %v1294_v24, %v1298_v55  ;;  %v11110_v18 = vcombine.low %v1294_v24, %v1298_v55  ;;  %v1345_v24 = vld [vmem:[%s16805_s2 + $0x1530] sm:$0xff]  ;;  %v1342_v55 = vld [vmem:[%s16805_s2 + $0x1518] sm:$0xff] }
 0x3ca   :  { %7690 = vmatpush1.bf16.msra.mxu0 %v11060_v33  ;;  %v1305_v33 = vld [vmem:[%s16805_s2 + $0x13f0] sm:$0xff] }
 0x3cb   :  { %8018 = vmatpush1.bf16.msra.mxu1 %v11062_v37  ;;  %7691 = vmatprep.subr.bf16.mxu0 %v11069_v36  ;;  %v1302_v37 = vld [vmem:[%s16805_s2 + $0x13d8] sm:$0xff]  ;;  %v11117_v25 = vcombine.high %v1301_v31, %v1305_v33 }
 0x3cc   :  { %8019 = vmatprep.subr.bf16.mxu1 %v11071_v17  ;;  %v1306_v36 = vld [vmem:[%s16805_s2 + $0x13f8] sm:$0xff]  ;;  %v11108_v17 = vcombine.low %v1293_v47, %v1297_v42  ;;  %v1341_v42 = vld [vmem:[%s16805_s2 + $0x1510] sm:$0xff] }
 0x3cd   :  { %v11119_v39 = vcombine.high %v1302_v37, %v1306_v36  ;;  %v11118_v51 = vcombine.low %v1302_v37, %v1306_v36  ;;  %v1353_v37 = vld [vmem:[%s16805_s2 + $0x1570] sm:$0xff]  ;;  %v1350_v36 = vld [vmem:[%s16805_s2 + $0x1558] sm:$0xff] }
 0x3ce   :  { %7692 = vmatpush1.bf16.msra.mxu0 %v11068_v46  ;;  %v1313_v46 = vld [vmem:[%s16805_s2 + $0x1430] sm:$0xff] }
 0x3cf   :  { %8020 = vmatpush1.bf16.msra.mxu1 %v11070_v41  ;;  %7693 = vmatprep.subr.bf16.mxu0 %v11077_v56  ;;  %v1310_v41 = vld [vmem:[%s16805_s2 + $0x1418] sm:$0xff]  ;;  %v11125_v45 = vcombine.high %v1309_v40, %v1313_v46 }
 0x3d0   :  { %8021 = vmatprep.subr.bf16.mxu1 %v11079_v43  ;;  %v1314_v56 = vld [vmem:[%s16805_s2 + $0x1438] sm:$0xff]  ;;  %v11116_v43 = vcombine.low %v1301_v31, %v1305_v33  ;;  %v1349_v33 = vld [vmem:[%s16805_s2 + $0x1550] sm:$0xff] }
 0x3d1   :  { %v11127_v49 = vcombine.high %v1310_v41, %v1314_v56  ;;  %v11126_v34 = vcombine.low %v1310_v41, %v1314_v56  ;;  %v1361_v41 = vld [vmem:[%s16805_s2 + $0x15b0] sm:$0xff]  ;;  %v1358_v56 = vld [vmem:[%s16805_s2 + $0x1598] sm:$0xff] }
 0x3d2   :  { %7694 = vmatpush1.bf16.msra.mxu0 %v11076_v52  ;;  %v1321_v52 = vld [vmem:[%s16805_s2 + $0x1470] sm:$0xff] }
 0x3d3   :  { %8022 = vmatpush1.bf16.msra.mxu1 %v11078_v53  ;;  %7695 = vmatprep.subr.bf16.mxu0 %v11085_v54  ;;  %v11124_v53 = vcombine.low %v1309_v40, %v1313_v46  ;;  %v1318_v54 = vld [vmem:[%s16805_s2 + $0x1458] sm:$0xff]  ;;  %v11133_v57 = vcombine.high %v1317_v50, %v1321_v52  ;;  %v1357_v46 = vld [vmem:[%s16805_s2 + $0x1590] sm:$0xff] }
 0x3d4   :  { %8023 = vmatprep.subr.bf16.mxu1 %v11087_v7  ;;  %v1322_v7 = vld [vmem:[%s16805_s2 + $0x1478] sm:$0xff] }
 0x3d5   :  { %v11134_v48 = vcombine.low %v1318_v54, %v1322_v7 }
 0x3d6   :  { %7696 = vmatpush1.bf16.msra.mxu0 %v11084_v60  ;;  %v11135_v60 = vcombine.high %v1318_v54, %v1322_v7  ;;  %v1366_v54 = vld [vmem:[%s16805_s2 + $0x15d8] sm:$0xff] }
 0x3d7   :  { %8024 = vmatpush1.bf16.msra.mxu1 %v11086_v62  ;;  %7697 = vmatprep.subr.bf16.mxu0 %v11093_v29  ;;  %v1326_v62 = vld [vmem:[%s16805_s2 + $0x1498] sm:$0xff] }
 0x3d8   :  { %8025 = vmatprep.subr.bf16.mxu1 %v11095_v4  ;;  %v1330_v29 = vld [vmem:[%s16805_s2 + $0x14b8] sm:$0xff]  ;;  %v11132_v4 = vcombine.low %v1317_v50, %v1321_v52  ;;  %v1365_v52 = vld [vmem:[%s16805_s2 + $0x15d0] sm:$0xff] }
 0x3d9   :  { %v11143_v12 = vcombine.high %v1326_v62, %v1330_v29  ;;  %v1370_v7 = vld [vmem:[%s16805_s2 + $0x15f8] sm:$0xff] }
 0x3da   :  { %7698 = vmatpush1.bf16.msra.mxu0 %v11092_v21  ;;  %v1337_v21 = vld [vmem:[%s16805_s2 + $0x14f0] sm:$0xff] }
 0x3db   :  { %8026 = vmatpush1.bf16.msra.mxu1 %v11094_v22  ;;  %7699 = vmatprep.subr.bf16.mxu0 %v11101_v13  ;;  %v1338_v22 = vld [vmem:[%s16805_s2 + $0x14f8] sm:$0xff]  ;;  %v11142_v13 = vcombine.low %v1326_v62, %v1330_v29  ;;  %v1377_v62 = vld [vmem:[%s16805_s2 + $0x1630] sm:$0xff] }
 0x3dc   :  { %8027 = vmatprep.subr.bf16.mxu1 %v11103_v15  ;;  %v11149_v15 = vcombine.high %v1333_v19, %v1337_v21  ;;  %v1374_v29 = vld [vmem:[%s16805_s2 + $0x1618] sm:$0xff] }
 0x3de   :  { %7700 = vmatpush1.bf16.msra.mxu0 %v11100_v0  ;;  %v1346_v0 = vld [vmem:[%s16805_s2 + $0x1538] sm:$0xff] }
 0x3df   :  { %8028 = vmatpush1.bf16.msra.mxu1 %v11102_v58  ;;  %7701 = vmatprep.subr.bf16.mxu0 %v11109_v2  ;;  %v11148_v58 = vcombine.low %v1333_v19, %v1337_v21  ;;  %v11159_v31 = vcombine.high %v1342_v55, %v1346_v0  ;;  %v1381_v21 = vld [vmem:[%s16805_s2 + $0x1650] sm:$0xff] }
 0x3e0   :  { %8029 = vmatprep.subr.bf16.mxu1 %v11111_v23  ;;  %v11157_v23 = vcombine.high %v1341_v42, %v1345_v24 }
 0x3e2   :  { %7702 = vmatpush1.bf16.msra.mxu0 %v11108_v17  ;;  %v1354_v17 = vld [vmem:[%s16805_s2 + $0x1578] sm:$0xff] }
 0x3e3   :  { %8030 = vmatpush1.bf16.msra.mxu1 %v11110_v18  ;;  %7703 = vmatprep.subr.bf16.mxu0 %v11117_v25  ;;  %v11156_v18 = vcombine.low %v1341_v42, %v1345_v24  ;;  %v11158_v25 = vcombine.low %v1342_v55, %v1346_v0  ;;  %v11167_v40 = vcombine.high %v1350_v36, %v1354_v17  ;;  %v1389_v24 = vld [vmem:[%s16805_s2 + $0x1690] sm:$0xff]  ;;  %v1390_v0 = vld [vmem:[%s16805_s2 + $0x1698] sm:$0xff] }
 0x3e4   :  { %8031 = vmatprep.subr.bf16.mxu1 %v11119_v39  ;;  %v11165_v39 = vcombine.high %v1349_v33, %v1353_v37  ;;  %v1393_v55 = vld [vmem:[%s16805_s2 + $0x16b0] sm:$0xff] }
 0x3e6   :  { %7704 = vmatpush1.bf16.msra.mxu0 %v11116_v43  ;;  %v1362_v43 = vld [vmem:[%s16805_s2 + $0x15b8] sm:$0xff] }
 0x3e7   :  { %8032 = vmatpush1.bf16.msra.mxu1 %v11118_v51  ;;  %7714 = vmatprep.subr.bf16.mxu0 %v11125_v45  ;;  %v11164_v51 = vcombine.low %v1349_v33, %v1353_v37  ;;  %v11166_v45 = vcombine.low %v1350_v36, %v1354_v17  ;;  %v11175_v50 = vcombine.high %v1358_v56, %v1362_v43  ;;  %v1397_v37 = vld [vmem:[%s16805_s2 + $0x16d0] sm:$0xff]  ;;  %v1398_v17 = vld [vmem:[%s16805_s2 + $0x16d8] sm:$0xff] }
 0x3e8   :  { %8042 = vmatprep.subr.bf16.mxu1 %v11127_v49  ;;  %v11173_v49 = vcombine.high %v1357_v46, %v1361_v41  ;;  %v1401_v36 = vld [vmem:[%s16805_s2 + $0x16f0] sm:$0xff] }
 0x3e9   :  { %7706 = vmatmul.mubr.bf16.vlgmr.msra.gmra.mrb[20].mxu0 %v13726_v27 }
 0x3ea   :  { %8034 = vmatmul.mubr.bf16.vlgmr.msra.gmra.mrb[20].mxu1 %v13726_v27  ;;  %7715 = vmatpush1.bf16.msra.mxu0 %v11124_v53  ;;  %v1334_v27 = vld [vmem:[%s16805_s2 + $0x14d8] sm:$0xff]  ;;  %v1369_v53 = vld [vmem:[%s16805_s2 + $0x15f0] sm:$0xff] }
 0x3eb   :  { %7746 = vmatprep.mubr.bf16.mxu0 %v13734_v35  ;;  %8043 = vmatpush1.bf16.msra.mxu1 %v11126_v34  ;;  %v11151_v47 = vcombine.high %v1334_v27, %v1338_v22  ;;  %v11150_v2 = vcombine.low %v1334_v27, %v1338_v22  ;;  %v11172_v34 = vcombine.low %v1357_v46, %v1361_v41  ;;  %v1385_v27 = vld [vmem:[%s16805_s2 + $0x1670] sm:$0xff]  ;;  %v1382_v22 = vld [vmem:[%s16805_s2 + $0x1658] sm:$0xff] }
 0x3ec   :  { %8074 = vmatprep.mubr.bf16.mxu1 %v13734_v35  ;;  %7716 = vmatprep.subr.bf16.mxu0 %v11133_v57  ;;  %v11140_v35 = vcombine.low %v1325_v30, %v1329_v26  ;;  %v11174_v57 = vcombine.low %v1358_v56, %v1362_v43  ;;  %v11181_v30 = vcombine.high %v1365_v52, %v1369_v53  ;;  %v1405_v41 = vld [vmem:[%s16805_s2 + $0x1710] sm:$0xff]  ;;  %v1406_v43 = vld [vmem:[%s16805_s2 + $0x1718] sm:$0xff] }
 0x3ed   :  { %8044 = vmatprep.subr.bf16.mxu1 %v11135_v60  ;;  %v11183_v26 = vcombine.high %v1366_v54, %v1370_v7  ;;  %v1373_v60 = vld [vmem:[%s16805_s2 + $0x1610] sm:$0xff] }
 0x3ee   :  { %7717 = vmatpush1.bf16.msra.mxu0 %v11132_v4  ;;  %v1378_v4 = vld [vmem:[%s16805_s2 + $0x1638] sm:$0xff]  ;;  %v1409_v56 = vld [vmem:[%s16805_s2 + $0x1730] sm:$0xff] }
 0x3ef   :  { %8045 = vmatpush1.bf16.msra.mxu1 %v11134_v48  ;;  %7718 = vmatprep.subr.bf16.mxu0 %v11141_v11  ;;  %v11180_v48 = vcombine.low %v1365_v52, %v1369_v53  ;;  %v11182_v11 = vcombine.low %v1366_v54, %v1370_v7  ;;  %v11191_v19 = vcombine.high %v1374_v29, %v1378_v4  ;;  %v1413_v53 = vld [vmem:[%s16805_s2 + $0x1750] sm:$0xff]  ;;  %v1414_v7 = vld [vmem:[%s16805_s2 + $0x1758] sm:$0xff] }
 0x3f0   :  { %8046 = vmatprep.subr.bf16.mxu1 %v11143_v12  ;;  %v11189_v12 = vcombine.high %v1373_v60, %v1377_v62  ;;  %v1417_v54 = vld [vmem:[%s16805_s2 + $0x1770] sm:$0xff] }
 0x3f2   :  { %7719 = vmatpush1.bf16.msra.mxu0 %v11140_v35  ;;  %v1386_v35 = vld [vmem:[%s16805_s2 + $0x1678] sm:$0xff] }
 0x3f3   :  { %8047 = vmatpush1.bf16.msra.mxu1 %v11142_v13  ;;  %7720 = vmatprep.subr.bf16.mxu0 %v11149_v15  ;;  %v11188_v13 = vcombine.low %v1373_v60, %v1377_v62  ;;  %v11190_v15 = vcombine.low %v1374_v29, %v1378_v4  ;;  %v11199_v42 = vcombine.high %v1382_v22, %v1386_v35  ;;  %v1421_v62 = vld [vmem:[%s16805_s2 + $0x1790] sm:$0xff]  ;;  %v1422_v4 = vld [vmem:[%s16805_s2 + $0x1798] sm:$0xff] }
 0x3f4   :  { %8048 = vmatprep.subr.bf16.mxu1 %v11151_v47  ;;  %v11197_v47 = vcombine.high %v1381_v21, %v1385_v27  ;;  %v1425_v29 = vld [vmem:[%s16805_s2 + $0x17b0] sm:$0xff] }
 0x3f6   :  { %7721 = vmatpush1.bf16.msra.mxu0 %v11148_v58  ;;  %v1394_v58 = vld [vmem:[%s16805_s2 + $0x16b8] sm:$0xff] }
 0x3f7   :  { %8049 = vmatpush1.bf16.msra.mxu1 %v11150_v2  ;;  %7722 = vmatprep.subr.bf16.mxu0 %v11157_v23  ;;  %v11196_v2 = vcombine.low %v1381_v21, %v1385_v27  ;;  %v11198_v23 = vcombine.low %v1382_v22, %v1386_v35  ;;  %v11207_v33 = vcombine.high %v1390_v0, %v1394_v58  ;;  %v1429_v27 = vld [vmem:[%s16805_s2 + $0x17d0] sm:$0xff]  ;;  %v1430_v35 = vld [vmem:[%s16805_s2 + $0x17d8] sm:$0xff] }
 0x3f8   :  { %8050 = vmatprep.subr.bf16.mxu1 %v11159_v31  ;;  %v11205_v31 = vcombine.high %v1389_v24, %v1393_v55  ;;  %v1433_v22 = vld [vmem:[%s16805_s2 + $0x17f0] sm:$0xff] }
 0x3fa   :  { %7723 = vmatpush1.bf16.msra.mxu0 %v11156_v18  ;;  %v1402_v18 = vld [vmem:[%s16805_s2 + $0x16f8] sm:$0xff] }
 0x3fb   :  { %8051 = vmatpush1.bf16.msra.mxu1 %v11158_v25  ;;  %7724 = vmatprep.subr.bf16.mxu0 %v11165_v39  ;;  %v11204_v25 = vcombine.low %v1389_v24, %v1393_v55  ;;  %v11206_v39 = vcombine.low %v1390_v0, %v1394_v58  ;;  %v11215_v46 = vcombine.high %v1398_v17, %v1402_v18  ;;  %v1437_v55 = vld [vmem:[%s16805_s2 + $0x1810] sm:$0xff]  ;;  %v1438_v58 = vld [vmem:[%s16805_s2 + $0x1818] sm:$0xff] }
 0x3fc   :  { %8052 = vmatprep.subr.bf16.mxu1 %v11167_v40  ;;  %v11213_v40 = vcombine.high %v1397_v37, %v1401_v36  ;;  %v1441_v0 = vld [vmem:[%s16805_s2 + $0x1830] sm:$0xff] }
 0x3fe   :  { %7725 = vmatpush1.bf16.msra.mxu0 %v11164_v51  ;;  %v1410_v51 = vld [vmem:[%s16805_s2 + $0x1738] sm:$0xff] }
 0x3ff   :  { %8053 = vmatpush1.bf16.msra.mxu1 %v11166_v45  ;;  %7726 = vmatprep.subr.bf16.mxu0 %v11173_v49  ;;  %v11212_v45 = vcombine.low %v1397_v37, %v1401_v36  ;;  %v11214_v49 = vcombine.low %v1398_v17, %v1402_v18  ;;  %v11223_v52 = vcombine.high %v1406_v43, %v1410_v51  ;;  %v1445_v36 = vld [vmem:[%s16805_s2 + $0x1850] sm:$0xff] }
 0x400   :  { %8054 = vmatprep.subr.bf16.mxu1 %v11175_v50  ;;  %v11221_v50 = vcombine.high %v1405_v41, %v1409_v56  ;;  %v1449_v17 = vld [vmem:[%s16805_s2 + $0x1870] sm:$0xff]  ;;  %v11252_v18 = vcombine.low %v1437_v55, %v1441_v0 }
 0x402   :  { %7727 = vmatpush1.bf16.msra.mxu0 %v11172_v34  ;;  %v1418_v34 = vld [vmem:[%s16805_s2 + $0x1778] sm:$0xff] }
 0x403   :  { %8055 = vmatpush1.bf16.msra.mxu1 %v11174_v57  ;;  %7728 = vmatprep.subr.bf16.mxu0 %v11181_v30  ;;  %v11220_v57 = vcombine.low %v1405_v41, %v1409_v56  ;;  %v11222_v30 = vcombine.low %v1406_v43, %v1410_v51  ;;  %v11231_v60 = vcombine.high %v1414_v7, %v1418_v34  ;;  %v1453_v41 = vld [vmem:[%s16805_s2 + $0x1890] sm:$0xff]  ;;  %v1454_v51 = vld [vmem:[%s16805_s2 + $0x1898] sm:$0xff] }
 0x404   :  { %8056 = vmatprep.subr.bf16.mxu1 %v11183_v26  ;;  %v11229_v26 = vcombine.high %v1413_v53, %v1417_v54  ;;  %v1457_v56 = vld [vmem:[%s16805_s2 + $0x18b0] sm:$0xff] }
 0x406   :  { %7729 = vmatpush1.bf16.msra.mxu0 %v11180_v48  ;;  %v1426_v48 = vld [vmem:[%s16805_s2 + $0x17b8] sm:$0xff] }
 0x407   :  { %8057 = vmatpush1.bf16.msra.mxu1 %v11182_v11  ;;  %7730 = vmatprep.subr.bf16.mxu0 %v11189_v12  ;;  %v11228_v11 = vcombine.low %v1413_v53, %v1417_v54  ;;  %v11230_v12 = vcombine.low %v1414_v7, %v1418_v34  ;;  %v11239_v21 = vcombine.high %v1422_v4, %v1426_v48  ;;  %v1461_v54 = vld [vmem:[%s16805_s2 + $0x18d0] sm:$0xff]  ;;  %v1466_v34 = vld [vmem:[%s16805_s2 + $0x18f8] sm:$0xff] }
 0x408   :  { %8058 = vmatprep.subr.bf16.mxu1 %v11191_v19  ;;  %v11237_v19 = vcombine.high %v1421_v62, %v1425_v29  ;;  %v1465_v7 = vld [vmem:[%s16805_s2 + $0x18f0] sm:$0xff] }
 0x40a   :  { %7731 = vmatpush1.bf16.msra.mxu0 %v11188_v13  ;;  %v1434_v13 = vld [vmem:[%s16805_s2 + $0x17f8] sm:$0xff] }
 0x40b   :  { %8059 = vmatpush1.bf16.msra.mxu1 %v11190_v15  ;;  %7732 = vmatprep.subr.bf16.mxu0 %v11197_v47  ;;  %v11236_v15 = vcombine.low %v1421_v62, %v1425_v29  ;;  %v11238_v47 = vcombine.low %v1422_v4, %v1426_v48  ;;  %v11247_v24 = vcombine.high %v1430_v35, %v1434_v13  ;;  %v1473_v62 = vld [vmem:[%s16805_s2 + $0x1930] sm:$0xff]  ;;  %v1470_v29 = vld [vmem:[%s16805_s2 + $0x1918] sm:$0xff] }
 0x40c   :  { %8060 = vmatprep.subr.bf16.mxu1 %v11199_v42  ;;  %v11245_v42 = vcombine.high %v1429_v27, %v1433_v22  ;;  %v1474_v4 = vld [vmem:[%s16805_s2 + $0x1938] sm:$0xff]  ;;  %v11276_v48 = vcombine.low %v1461_v54, %v1465_v7 }
 0x40e   :  { %7733 = vmatpush1.bf16.msra.mxu0 %v11196_v2  ;;  %v1442_v2 = vld [vmem:[%s16805_s2 + $0x1838] sm:$0xff] }
 0x40f   :  { %8061 = vmatpush1.bf16.msra.mxu1 %v11198_v23  ;;  %7734 = vmatprep.subr.bf16.mxu0 %v11205_v31  ;;  %v11244_v23 = vcombine.low %v1429_v27, %v1433_v22  ;;  %v11246_v31 = vcombine.low %v1430_v35, %v1434_v13  ;;  %v11255_v37 = vcombine.high %v1438_v58, %v1442_v2  ;;  %v1481_v27 = vld [vmem:[%s16805_s2 + $0x1970] sm:$0xff]  ;;  %v1478_v22 = vld [vmem:[%s16805_s2 + $0x1958] sm:$0xff] }
 0x410   :  { %8062 = vmatprep.subr.bf16.mxu1 %v11207_v33  ;;  %v11253_v33 = vcombine.high %v1437_v55, %v1441_v0  ;;  %v1482_v35 = vld [vmem:[%s16805_s2 + $0x1978] sm:$0xff]  ;;  %v1489_v55 = vld [vmem:[%s16805_s2 + $0x19b0] sm:$0xff] }
 0x411   :  { %v1486_v0 = vld [vmem:[%s16805_s2 + $0x1998] sm:$0xff] }
 0x412   :  { %7735 = vmatpush1.bf16.msra.mxu0 %v11204_v25  ;;  %v1446_v25 = vld [vmem:[%s16805_s2 + $0x1858] sm:$0xff] }
 0x413   :  { %8063 = vmatpush1.bf16.msra.mxu1 %v11206_v39  ;;  %7736 = vmatprep.subr.bf16.mxu0 %v11213_v40  ;;  %v1450_v39 = vld [vmem:[%s16805_s2 + $0x1878] sm:$0xff]  ;;  %v11254_v40 = vcombine.low %v1438_v58, %v1442_v2 }
 0x414   :  { %8064 = vmatprep.subr.bf16.mxu1 %v11215_v46  ;;  %v11261_v46 = vcombine.high %v1445_v36, %v1449_v17  ;;  %v11263_v43 = vcombine.high %v1446_v25, %v1450_v39  ;;  %v1490_v58 = vld [vmem:[%s16805_s2 + $0x19b8] sm:$0xff] }
 0x416   :  { %7737 = vmatpush1.bf16.msra.mxu0 %v11212_v45  ;;  %v1458_v45 = vld [vmem:[%s16805_s2 + $0x18b8] sm:$0xff] }
 0x417   :  { %8065 = vmatpush1.bf16.msra.mxu1 %v11214_v49  ;;  %7738 = vmatprep.subr.bf16.mxu0 %v11221_v50  ;;  %v11260_v49 = vcombine.low %v1445_v36, %v1449_v17  ;;  %v11262_v50 = vcombine.low %v1446_v25, %v1450_v39  ;;  %v11271_v53 = vcombine.high %v1454_v51, %v1458_v45  ;;  %v1497_v36 = vld [vmem:[%s16805_s2 + $0x19f0] sm:$0xff]  ;;  %v1494_v17 = vld [vmem:[%s16805_s2 + $0x19d8] sm:$0xff] }
 0x418   :  { %8066 = vmatprep.subr.bf16.mxu1 %v11223_v52  ;;  %v11269_v52 = vcombine.high %v1453_v41, %v1457_v56  ;;  %v11302_v39 = vcombine.low %v1486_v0, %v1490_v58 }
 0x41a   :  { %7739 = vmatpush1.bf16.msra.mxu0 %v11220_v57  ;;  %v11270_v57 = vcombine.low %v1454_v51, %v1458_v45  ;;  %v1506_v51 = vld [vmem:[%s16805_s2 + $0x1a38] sm:$0xff] }
 0x41b   :  { %8067 = vmatpush1.bf16.msra.mxu1 %v11222_v30  ;;  %7740 = vmatprep.subr.bf16.mxu0 %v11229_v26  ;;  %v11277_v30 = vcombine.high %v1461_v54, %v1465_v7  ;;  %v1513_v54 = vld [vmem:[%s16805_s2 + $0x1a70] sm:$0xff]  ;;  %v1510_v7 = vld [vmem:[%s16805_s2 + $0x1a58] sm:$0xff] }
 0x41c   :  { %8068 = vmatprep.subr.bf16.mxu1 %v11231_v60  ;;  %v1469_v60 = vld [vmem:[%s16805_s2 + $0x1910] sm:$0xff] }
 0x41d   :  { %v11284_v13 = vcombine.low %v1469_v60, %v1473_v62 }
 0x41e   :  { %7741 = vmatpush1.bf16.msra.mxu0 %v11228_v11 }
 0x41f   :  { %8069 = vmatpush1.bf16.msra.mxu1 %v11230_v12  ;;  %7742 = vmatprep.subr.bf16.mxu0 %v11237_v19  ;;  %v11285_v12 = vcombine.high %v1469_v60, %v1473_v62  ;;  %v11287_v19 = vcombine.high %v1470_v29, %v1474_v4  ;;  %v1521_v60 = vld [vmem:[%s16805_s2 + $0x1ab0] sm:$0xff]  ;;  %v1518_v62 = vld [vmem:[%s16805_s2 + $0x1a98] sm:$0xff] }
 0x420   :  { %8070 = vmatprep.subr.bf16.mxu1 %v11239_v21  ;;  %v1477_v21 = vld [vmem:[%s16805_s2 + $0x1950] sm:$0xff] }
 0x421   :  { %v11292_v2 = vcombine.low %v1477_v21, %v1481_v27 }
 0x422   :  { %7743 = vmatpush1.bf16.msra.mxu0 %v11236_v15  ;;  %v11286_v15 = vcombine.low %v1470_v29, %v1474_v4  ;;  %v1522_v29 = vld [vmem:[%s16805_s2 + $0x1ab8] sm:$0xff] }
 0x423   :  { %8071 = vmatpush1.bf16.msra.mxu1 %v11238_v47  ;;  %7744 = vmatprep.subr.bf16.mxu0 %v11245_v42  ;;  %v11293_v47 = vcombine.high %v1477_v21, %v1481_v27  ;;  %v11295_v42 = vcombine.high %v1478_v22, %v1482_v35  ;;  %v1529_v21 = vld [vmem:[%s16805_s2 + $0x1af0] sm:$0xff]  ;;  %v1526_v27 = vld [vmem:[%s16805_s2 + $0x1ad8] sm:$0xff] }
 0x424   :  { %8072 = vmatprep.subr.bf16.mxu1 %v11247_v24  ;;  %v1485_v24 = vld [vmem:[%s16805_s2 + $0x1990] sm:$0xff] }
 0x425   :  { %v11300_v25 = vcombine.low %v1485_v24, %v1489_v55 }
 0x426   :  { %7745 = vmatpush1.bf16.msra.mxu0 %v11244_v23  ;;  %v11294_v23 = vcombine.low %v1478_v22, %v1482_v35  ;;  %v1530_v22 = vld [vmem:[%s16805_s2 + $0x1af8] sm:$0xff] }
 0x427   :  { %8073 = vmatpush1.bf16.msra.mxu1 %v11246_v31  ;;  %7755 = vmatprep.subr.bf16.mxu0 %v11253_v33  ;;  %v11301_v31 = vcombine.high %v1485_v24, %v1489_v55  ;;  %v11303_v33 = vcombine.high %v1486_v0, %v1490_v58  ;;  %v1537_v24 = vld [vmem:[%s16805_s2 + $0x1b30] sm:$0xff]  ;;  %v1534_v55 = vld [vmem:[%s16805_s2 + $0x1b18] sm:$0xff] }
 0x428   :  { %8083 = vmatprep.subr.bf16.mxu1 %v11255_v37  ;;  %v1493_v37 = vld [vmem:[%s16805_s2 + $0x19d0] sm:$0xff]  ;;  %v1538_v0 = vld [vmem:[%s16805_s2 + $0x1b38] sm:$0xff] }
 0x429   :  { %7747 = vmatmul.mubr.bf16.vlgmr.msra.gmra.mrb[20].mxu0 %v13928_v44  ;;  %v11308_v45 = vcombine.low %v1493_v37, %v1497_v36 }
 0x42a   :  { %8075 = vmatmul.mubr.bf16.vlgmr.msra.gmra.mrb[20].mxu1 %v13928_v44  ;;  %7756 = vmatpush1.bf16.msra.mxu0 %v11252_v18  ;;  %v1462_v44 = vld [vmem:[%s16805_s2 + $0x18d8] sm:$0xff] }
 0x42b   :  { %7787 = vmatprep.mubr.bf16.mxu0 %v13936_v10  ;;  %8084 = vmatpush1.bf16.msra.mxu1 %v11254_v40  ;;  %v11279_v26 = vcombine.high %v1462_v44, %v1466_v34  ;;  %v11278_v11 = vcombine.low %v1462_v44, %v1466_v34  ;;  %v1498_v18 = vld [vmem:[%s16805_s2 + $0x19f8] sm:$0xff]  ;;  %v11309_v40 = vcombine.high %v1493_v37, %v1497_v36  ;;  %v1545_v37 = vld [vmem:[%s16805_s2 + $0x1b70] sm:$0xff] }
 0x42c   :  { %8115 = vmatprep.mubr.bf16.mxu1 %v13936_v10  ;;  %7757 = vmatprep.subr.bf16.mxu0 %v11261_v46  ;;  %v11268_v10 = vcombine.low %v1453_v41, %v1457_v56  ;;  %v11311_v46 = vcombine.high %v1494_v17, %v1498_v18  ;;  %v1501_v41 = vld [vmem:[%s16805_s2 + $0x1a10] sm:$0xff]  ;;  %v1514_v44 = vld [vmem:[%s16805_s2 + $0x1a78] sm:$0xff] }
 0x42d   :  { %8085 = vmatprep.subr.bf16.mxu1 %v11263_v43  ;;  %v1505_v56 = vld [vmem:[%s16805_s2 + $0x1a30] sm:$0xff]  ;;  %v1502_v43 = vld [vmem:[%s16805_s2 + $0x1a18] sm:$0xff] }
 0x42e   :  { %7758 = vmatpush1.bf16.msra.mxu0 %v11260_v49  ;;  %v11310_v49 = vcombine.low %v1494_v17, %v1498_v18  ;;  %v11316_v34 = vcombine.low %v1501_v41, %v1505_v56  ;;  %v1542_v36 = vld [vmem:[%s16805_s2 + $0x1b58] sm:$0xff] }
 0x42f   :  { %8086 = vmatpush1.bf16.msra.mxu1 %v11262_v50  ;;  %7759 = vmatprep.subr.bf16.mxu0 %v11269_v52  ;;  %v11317_v50 = vcombine.high %v1501_v41, %v1505_v56  ;;  %v11319_v52 = vcombine.high %v1502_v43, %v1506_v51  ;;  %v1546_v17 = vld [vmem:[%s16805_s2 + $0x1b78] sm:$0xff]  ;;  %v1553_v41 = vld [vmem:[%s16805_s2 + $0x1bb0] sm:$0xff] }
 0x430   :  { %8087 = vmatprep.subr.bf16.mxu1 %v11271_v53  ;;  %v1509_v53 = vld [vmem:[%s16805_s2 + $0x1a50] sm:$0xff]  ;;  %v1550_v56 = vld [vmem:[%s16805_s2 + $0x1b98] sm:$0xff] }
 0x431   :  { %v11324_v4 = vcombine.low %v1509_v53, %v1513_v54 }
 0x432   :  { %7760 = vmatpush1.bf16.msra.mxu0 %v11268_v10  ;;  %v11318_v10 = vcombine.low %v1502_v43, %v1506_v51  ;;  %v1554_v43 = vld [vmem:[%s16805_s2 + $0x1bb8] sm:$0xff] }
 0x433   :  { %8088 = vmatpush1.bf16.msra.mxu1 %v11270_v57  ;;  %7761 = vmatprep.subr.bf16.mxu0 %v11277_v30  ;;  %v11325_v57 = vcombine.high %v1509_v53, %v1513_v54  ;;  %v11327_v30 = vcombine.high %v1510_v7, %v1514_v44  ;;  %v1561_v53 = vld [vmem:[%s16805_s2 + $0x1bf0] sm:$0xff]  ;;  %v1558_v54 = vld [vmem:[%s16805_s2 + $0x1bd8] sm:$0xff] }
 0x434   :  { %8089 = vmatprep.subr.bf16.mxu1 %v11279_v26  ;;  %v1517_v26 = vld [vmem:[%s16805_s2 + $0x1a90] sm:$0xff] }
 0x435   :  { %v11332_v35 = vcombine.low %v1517_v26, %v1521_v60 }
 0x436   :  { %7762 = vmatpush1.bf16.msra.mxu0 %v11276_v48  ;;  %v11326_v48 = vcombine.low %v1510_v7, %v1514_v44  ;;  %v1562_v7 = vld [vmem:[%s16805_s2 + $0x1bf8] sm:$0xff] }
 0x437   :  { %8090 = vmatpush1.bf16.msra.mxu1 %v11278_v11  ;;  %7763 = vmatprep.subr.bf16.mxu0 %v11285_v12  ;;  %v11333_v11 = vcombine.high %v1517_v26, %v1521_v60  ;;  %v11335_v12 = vcombine.high %v1518_v62, %v1522_v29  ;;  %v1569_v26 = vld [vmem:[%s16805_s2 + $0x1c30] sm:$0xff]  ;;  %v1566_v60 = vld [vmem:[%s16805_s2 + $0x1c18] sm:$0xff] }
 0x438   :  { %8091 = vmatprep.subr.bf16.mxu1 %v11287_v19  ;;  %v1525_v19 = vld [vmem:[%s16805_s2 + $0x1ad0] sm:$0xff] }
 0x439   :  { %v11340_v58 = vcombine.low %v1525_v19, %v1529_v21 }
 0x43a   :  { %7764 = vmatpush1.bf16.msra.mxu0 %v11284_v13  ;;  %v11334_v13 = vcombine.low %v1518_v62, %v1522_v29  ;;  %v1570_v62 = vld [vmem:[%s16805_s2 + $0x1c38] sm:$0xff] }
 0x43b   :  { %8092 = vmatpush1.bf16.msra.mxu1 %v11286_v15  ;;  %7765 = vmatprep.subr.bf16.mxu0 %v11293_v47  ;;  %v11341_v15 = vcombine.high %v1525_v19, %v1529_v21  ;;  %v11343_v47 = vcombine.high %v1526_v27, %v1530_v22  ;;  %v1577_v19 = vld [vmem:[%s16805_s2 + $0x1c70] sm:$0xff] }
 0x43c   :  { %8093 = vmatprep.subr.bf16.mxu1 %v11295_v42  ;;  %v1533_v42 = vld [vmem:[%s16805_s2 + $0x1b10] sm:$0xff] }
 0x43d   :  { %v11348_v18 = vcombine.low %v1533_v42, %v1537_v24 }
 0x43e   :  { %7766 = vmatpush1.bf16.msra.mxu0 %v11292_v2  ;;  %v11342_v2 = vcombine.low %v1526_v27, %v1530_v22  ;;  %v1574_v27 = vld [vmem:[%s16805_s2 + $0x1c58] sm:$0xff] }
 0x43f   :  { %8094 = vmatpush1.bf16.msra.mxu1 %v11294_v23  ;;  %7767 = vmatprep.subr.bf16.mxu0 %v11301_v31  ;;  %v11349_v23 = vcombine.high %v1533_v42, %v1537_v24  ;;  %v11351_v31 = vcombine.high %v1534_v55, %v1538_v0  ;;  %v1578_v22 = vld [vmem:[%s16805_s2 + $0x1c78] sm:$0xff] }
 0x440   :  { %8095 = vmatprep.subr.bf16.mxu1 %v11303_v33  ;;  %v1541_v33 = vld [vmem:[%s16805_s2 + $0x1b50] sm:$0xff]  ;;  %v11391_v42 = vcombine.high %v1574_v27, %v1578_v22  ;;  %v1582_v24 = vld [vmem:[%s16805_s2 + $0x1c98] sm:$0xff] }
 0x441   :  { %v11356_v51 = vcombine.low %v1541_v33, %v1545_v37 }
 0x442   :  { %7768 = vmatpush1.bf16.msra.mxu0 %v11300_v25  ;;  %v11350_v25 = vcombine.low %v1534_v55, %v1538_v0  ;;  %v1586_v55 = vld [vmem:[%s16805_s2 + $0x1cb8] sm:$0xff] }
 0x443   :  { %8096 = vmatpush1.bf16.msra.mxu1 %v11302_v39  ;;  %7769 = vmatprep.subr.bf16.mxu0 %v11309_v40  ;;  %v11357_v39 = vcombine.high %v1541_v33, %v1545_v37  ;;  %v11359_v40 = vcombine.high %v1542_v36, %v1546_v17  ;;  %v1593_v33 = vld [vmem:[%s16805_s2 + $0x1cf0] sm:$0xff]  ;;  %v1594_v37 = vld [vmem:[%s16805_s2 + $0x1cf8] sm:$0xff] }
 0x444   :  { %8097 = vmatprep.subr.bf16.mxu1 %v11311_v46  ;;  %v1549_v46 = vld [vmem:[%s16805_s2 + $0x1b90] sm:$0xff] }
 0x445   :  { %v11364_v44 = vcombine.low %v1549_v46, %v1553_v41 }
 0x446   :  { %7770 = vmatpush1.bf16.msra.mxu0 %v11308_v45  ;;  %v11358_v45 = vcombine.low %v1542_v36, %v1546_v17  ;;  %v11398_v36 = vcombine.low %v1582_v24, %v1586_v55 }
 0x447   :  { %8098 = vmatpush1.bf16.msra.mxu1 %v11310_v49  ;;  %7771 = vmatprep.subr.bf16.mxu0 %v11317_v50  ;;  %v11365_v49 = vcombine.high %v1549_v46, %v1553_v41  ;;  %v11367_v50 = vcombine.high %v1550_v56, %v1554_v43  ;;  %v1602_v46 = vld [vmem:[%s16805_s2 + $0x1d38] sm:$0xff] }
 0x448   :  { %8099 = vmatprep.subr.bf16.mxu1 %v11319_v52  ;;  %v1557_v52 = vld [vmem:[%s16805_s2 + $0x1bd0] sm:$0xff] }
 0x449   :  { %v11372_v29 = vcombine.low %v1557_v52, %v1561_v53 }
 0x44a   :  { %7772 = vmatpush1.bf16.msra.mxu0 %v11316_v34  ;;  %v11366_v34 = vcombine.low %v1550_v56, %v1554_v43 }
 0x44b   :  { %8100 = vmatpush1.bf16.msra.mxu1 %v11318_v10  ;;  %7773 = vmatprep.subr.bf16.mxu0 %v11325_v57  ;;  %v11373_v10 = vcombine.high %v1557_v52, %v1561_v53  ;;  %v11375_v57 = vcombine.high %v1558_v54, %v1562_v7  ;;  %v1610_v52 = vld [vmem:[%s16805_s2 + $0x1d78] sm:$0xff] }
 0x44c   :  { %8101 = vmatprep.subr.bf16.mxu1 %v11327_v30  ;;  %v1565_v30 = vld [vmem:[%s16805_s2 + $0x1c10] sm:$0xff] }
 0x44d   :  { %v11380_v21 = vcombine.low %v1565_v30, %v1569_v26 }
 0x44e   :  { %7774 = vmatpush1.bf16.msra.mxu0 %v11324_v4  ;;  %v11374_v4 = vcombine.low %v1558_v54, %v1562_v7 }
 0x44f   :  { %8102 = vmatpush1.bf16.msra.mxu1 %v11326_v48  ;;  %7775 = vmatprep.subr.bf16.mxu0 %v11333_v11  ;;  %v11381_v48 = vcombine.high %v1565_v30, %v1569_v26  ;;  %v11383_v11 = vcombine.high %v1566_v60, %v1570_v62  ;;  %v1618_v30 = vld [vmem:[%s16805_s2 + $0x1db8] sm:$0xff] }
 0x450   :  { %8103 = vmatprep.subr.bf16.mxu1 %v11335_v12  ;;  %v1573_v12 = vld [vmem:[%s16805_s2 + $0x1c50] sm:$0xff] }
 0x451   :  { %v11388_v0 = vcombine.low %v1573_v12, %v1577_v19 }
 0x452   :  { %7776 = vmatpush1.bf16.msra.mxu0 %v11332_v35  ;;  %v11382_v35 = vcombine.low %v1566_v60, %v1570_v62 }
 0x453   :  { %8104 = vmatpush1.bf16.msra.mxu1 %v11334_v13  ;;  %7777 = vmatprep.subr.bf16.mxu0 %v11341_v15  ;;  %v11389_v13 = vcombine.high %v1573_v12, %v1577_v19  ;;  %v1581_v15 = vld [vmem:[%s16805_s2 + $0x1c90] sm:$0xff]  ;;  %v1626_v12 = vld [vmem:[%s16805_s2 + $0x1df8] sm:$0xff] }
 0x454   :  { %8105 = vmatprep.subr.bf16.mxu1 %v11343_v47  ;;  %v1585_v47 = vld [vmem:[%s16805_s2 + $0x1cb0] sm:$0xff] }
 0x456   :  { %7778 = vmatpush1.bf16.msra.mxu0 %v11340_v58  ;;  %v11390_v58 = vcombine.low %v1574_v27, %v1578_v22 }
 0x457   :  { %8106 = vmatpush1.bf16.msra.mxu1 %v11342_v2  ;;  %7779 = vmatprep.subr.bf16.mxu0 %v11349_v23  ;;  %v11397_v2 = vcombine.high %v1581_v15, %v1585_v47  ;;  %v11399_v23 = vcombine.high %v1582_v24, %v1586_v55 }
 0x458   :  { %8107 = vmatprep.subr.bf16.mxu1 %v11351_v31  ;;  %v1589_v31 = vld [vmem:[%s16805_s2 + $0x1cd0] sm:$0xff] }
 0x459   :  { %v11405_v17 = vcombine.high %v1589_v31, %v1593_v33  ;;  %v11404_v41 = vcombine.low %v1589_v31, %v1593_v33  ;;  %v1642_v31 = vld [vmem:[%s16805_s2 + $0x1e78] sm:$0xff] }
 0x45a   :  { %7780 = vmatpush1.bf16.msra.mxu0 %v11348_v18 }
 0x45b   :  { %8108 = vmatpush1.bf16.msra.mxu1 %v11350_v25  ;;  %7781 = vmatprep.subr.bf16.mxu0 %v11357_v39  ;;  %v1597_v25 = vld [vmem:[%s16805_s2 + $0x1d10] sm:$0xff] }
 0x45c   :  { %8109 = vmatprep.subr.bf16.mxu1 %v11359_v40  ;;  %v1601_v39 = vld [vmem:[%s16805_s2 + $0x1d30] sm:$0xff]  ;;  %v1598_v40 = vld [vmem:[%s16805_s2 + $0x1d18] sm:$0xff] }
 0x45d   :  { %v11413_v43 = vcombine.high %v1597_v25, %v1601_v39  ;;  %v11412_v53 = vcombine.low %v1597_v25, %v1601_v39  ;;  %v11414_v54 = vcombine.low %v1598_v40, %v1602_v46  ;;  %v1650_v25 = vld [vmem:[%s16805_s2 + $0x1eb8] sm:$0xff] }
 0x45e   :  { %7782 = vmatpush1.bf16.msra.mxu0 %v11356_v51  ;;  %v11415_v51 = vcombine.high %v1598_v40, %v1602_v46 }
 0x45f   :  { %8110 = vmatpush1.bf16.msra.mxu1 %v11358_v45  ;;  %7783 = vmatprep.subr.bf16.mxu0 %v11365_v49  ;;  %v1605_v45 = vld [vmem:[%s16805_s2 + $0x1d50] sm:$0xff] }
 0x460   :  { %8111 = vmatprep.subr.bf16.mxu1 %v11367_v50  ;;  %v1609_v49 = vld [vmem:[%s16805_s2 + $0x1d70] sm:$0xff]  ;;  %v1606_v50 = vld [vmem:[%s16805_s2 + $0x1d58] sm:$0xff] }
 0x461   :  { %v11421_v7 = vcombine.high %v1605_v45, %v1609_v49  ;;  %v11420_v26 = vcombine.low %v1605_v45, %v1609_v49  ;;  %v11422_v60 = vcombine.low %v1606_v50, %v1610_v52  ;;  %v1658_v45 = vld [vmem:[%s16805_s2 + $0x1ef8] sm:$0xff] }
 0x462   :  { %7784 = vmatpush1.bf16.msra.mxu0 %v11364_v44  ;;  %v11423_v44 = vcombine.high %v1606_v50, %v1610_v52 }
 0x463   :  { %8112 = vmatpush1.bf16.msra.mxu1 %v11366_v34  ;;  %7785 = vmatprep.subr.bf16.mxu0 %v11373_v10  ;;  %v1613_v34 = vld [vmem:[%s16805_s2 + $0x1d90] sm:$0xff] }
 0x464   :  { %8113 = vmatprep.subr.bf16.mxu1 %v11375_v57  ;;  %v1617_v10 = vld [vmem:[%s16805_s2 + $0x1db0] sm:$0xff]  ;;  %v1614_v57 = vld [vmem:[%s16805_s2 + $0x1d98] sm:$0xff] }
 0x465   :  { %v11429_v62 = vcombine.high %v1613_v34, %v1617_v10  ;;  %v11428_v19 = vcombine.low %v1613_v34, %v1617_v10  ;;  %v1666_v34 = vld [vmem:[%s16805_s2 + $0x1f38] sm:$0xff] }
 0x466   :  { %7786 = vmatpush1.bf16.msra.mxu0 %v11372_v29  ;;  %v11431_v29 = vcombine.high %v1614_v57, %v1618_v30 }
 0x467   :  { %8114 = vmatpush1.bf16.msra.mxu1 %v11374_v4  ;;  %7796 = vmatprep.subr.bf16.mxu0 %v11381_v48  ;;  %v1621_v4 = vld [vmem:[%s16805_s2 + $0x1dd0] sm:$0xff] }
 0x468   :  { %8124 = vmatprep.subr.bf16.mxu1 %v11383_v11  ;;  %v1625_v48 = vld [vmem:[%s16805_s2 + $0x1df0] sm:$0xff]  ;;  %v1622_v11 = vld [vmem:[%s16805_s2 + $0x1dd8] sm:$0xff] }
 0x469   :  { %7788 = vmatmul.mubr.bf16.vlgmr.msra.gmra.mrb[20].mxu0 %v14130_v28  ;;  %v11437_v27 = vcombine.high %v1621_v4, %v1625_v48  ;;  %v11439_v22 = vcombine.high %v1622_v11, %v1626_v12  ;;  %v11438_v24 = vcombine.low %v1622_v11, %v1626_v12 }
 0x46a   :  { %8116 = vmatmul.mubr.bf16.vlgmr.msra.gmra.mrb[20].mxu1 %v14130_v28  ;;  %7797 = vmatpush1.bf16.msra.mxu0 %v11380_v21  ;;  %v1590_v28 = vld [vmem:[%s16805_s2 + $0x1cd8] sm:$0xff]  ;;  %v11430_v21 = vcombine.low %v1614_v57, %v1618_v30 }
 0x46b   :  { %7828 = vmatprep.mubr.bf16.mxu0 %v14138_v61  ;;  %8125 = vmatpush1.bf16.msra.mxu1 %v11382_v35  ;;  %v11407_v18 = vcombine.high %v1590_v28, %v1594_v37  ;;  %v11406_v56 = vcombine.low %v1590_v28, %v1594_v37  ;;  %v1629_v35 = vld [vmem:[%s16805_s2 + $0x1e10] sm:$0xff] }
 0x46c   :  { %8156 = vmatprep.mubr.bf16.mxu1 %v14138_v61  ;;  %7798 = vmatprep.subr.bf16.mxu0 %v11389_v13  ;;  %v11396_v61 = vcombine.low %v1581_v15, %v1585_v47  ;;  %v1633_v13 = vld [vmem:[%s16805_s2 + $0x1e30] sm:$0xff]  ;;  %v1630_v15 = vld [vmem:[%s16805_s2 + $0x1e18] sm:$0xff] }
 0x46d   :  { %8126 = vmatprep.subr.bf16.mxu1 %v11391_v42  ;;  %v1634_v47 = vld [vmem:[%s16805_s2 + $0x1e38] sm:$0xff]  ;;  %v11436_v42 = vcombine.low %v1621_v4, %v1625_v48  ;;  %v11445_v55 = vcombine.high %v1629_v35, %v1633_v13  ;;  %v11444_v33 = vcombine.low %v1629_v35, %v1633_v13  ;;  %v15876_v13 = vld [vmem:[%s16808_s5 + $0x10] sm:$0xff] }
 0x46e   :  { %7799 = vmatpush1.bf16.msra.mxu0 %v11388_v0  ;;  %v11447_v0 = vcombine.high %v1630_v15, %v1634_v47  ;;  %v11446_v28 = vcombine.low %v1630_v15, %v1634_v47  ;;  %v1674_v4 = vld [vmem:[%s16805_s2 + $0x1f78] sm:$0xff] }
 0x46f   :  { %8127 = vmatpush1.bf16.msra.mxu1 %v11390_v58  ;;  %7800 = vmatprep.subr.bf16.mxu0 %v11397_v2  ;;  %v1637_v58 = vld [vmem:[%s16805_s2 + $0x1e50] sm:$0xff]  ;;  %v1682_v35 = vld [vmem:[%s16805_s2 + $0x1fb8] sm:$0xff] }
 0x470   :  { %8128 = vmatprep.subr.bf16.mxu1 %v11399_v23  ;;  %v1641_v2 = vld [vmem:[%s16805_s2 + $0x1e70] sm:$0xff]  ;;  %v1638_v23 = vld [vmem:[%s16805_s2 + $0x1e58] sm:$0xff] }
 0x471   :  { %v11453_v37 = vcombine.high %v1637_v58, %v1641_v2  ;;  %v11452_v39 = vcombine.low %v1637_v58, %v1641_v2  ;;  %v11454_v40 = vcombine.low %v1638_v23, %v1642_v31  ;;  %v1700_v58 = vrot.slane %v15876_v13, %v12812_v6  ;;  %v1686_v2 = vld [vmem:[%s16805_s2 + $0x1fd8] sm:$0xff] }
 0x472   :  { %7801 = vmatpush1.bf16.msra.mxu0 %v11396_v61  ;;  %v11455_v61 = vcombine.high %v1638_v23, %v1642_v31  ;;  %v1690_v23 = vld [vmem:[%s16805_s2 + $0x1ff8] sm:$0xff] }
 0x473   :  { %8129 = vmatpush1.bf16.msra.mxu1 %v11398_v36  ;;  %7802 = vmatprep.subr.bf16.mxu0 %v11405_v17  ;;  %v1645_v36 = vld [vmem:[%s16805_s2 + $0x1e90] sm:$0xff] }
 0x474   :  { %8130 = vmatprep.subr.bf16.mxu1 %v11407_v18  ;;  %v1649_v17 = vld [vmem:[%s16805_s2 + $0x1eb0] sm:$0xff]  ;;  %v1646_v18 = vld [vmem:[%s16805_s2 + $0x1e98] sm:$0xff] }
 0x475   :  { %v11461_v46 = vcombine.high %v1645_v36, %v1649_v17  ;;  %v11460_v49 = vcombine.low %v1645_v36, %v1649_v17  ;;  %v11462_v50 = vcombine.low %v1646_v18, %v1650_v25  ;;  %v11502_v17 = vcombine.low %v1686_v2, %v1690_v23 }
 0x476   :  { %7803 = vmatpush1.bf16.msra.mxu0 %v11404_v41  ;;  %v11463_v41 = vcombine.high %v1646_v18, %v1650_v25  ;;  %v11990_v18 = vld [vmem:[%s16806_s3 + $0x4] ss:$16 sps:$4 sm:$0xff]   ;;  %v11993_v25 = vld [vmem:[%s16806_s3 + $0xc] ss:$16 sps:$4 sm:$0xff]  }
 0x477   :  { %8131 = vmatpush1.bf16.msra.mxu1 %v11406_v56  ;;  %7804 = vmatprep.subr.bf16.mxu0 %v11413_v43  ;;  %v1653_v56 = vld [vmem:[%s16805_s2 + $0x1ed0] sm:$0xff] }
 0x478   :  { %8132 = vmatprep.subr.bf16.mxu1 %v11415_v51  ;;  %v1657_v43 = vld [vmem:[%s16805_s2 + $0x1ef0] sm:$0xff]  ;;  %v1654_v51 = vld [vmem:[%s16805_s2 + $0x1ed8] sm:$0xff] }
 0x479   :  { %v11469_v52 = vcombine.high %v1653_v56, %v1657_v43  ;;  %v11468_v10 = vcombine.low %v1653_v56, %v1657_v43  ;;  %v11470_v57 = vcombine.low %v1654_v51, %v1658_v45  ;;  %v11999_v56 = vld [vmem:[%s16806_s3 + $0x2c] ss:$16 sps:$4 sm:$0xff]   ;;  %v11994_v43 = vld [vmem:[%s16806_s3 + $0x20] ss:$16 sps:$4 sm:$0xff]  }
 0x47a   :  { %7805 = vmatpush1.bf16.msra.mxu0 %v11412_v53  ;;  %v11471_v53 = vcombine.high %v1654_v51, %v1658_v45  ;;  %v11997_v51 = vld [vmem:[%s16806_s3 + $0x28] ss:$16 sps:$4 sm:$0xff]   ;;  %v12002_v45 = vld [vmem:[%s16806_s3 + $0x44] ss:$16 sps:$4 sm:$0xff]  }
 0x47b   :  { %8133 = vmatpush1.bf16.msra.mxu1 %v11414_v54  ;;  %7806 = vmatprep.subr.bf16.mxu0 %v11421_v7  ;;  %v1661_v54 = vld [vmem:[%s16805_s2 + $0x1f10] sm:$0xff] }
 0x47c   :  { %8134 = vmatprep.subr.bf16.mxu1 %v11423_v44  ;;  %v1665_v7 = vld [vmem:[%s16805_s2 + $0x1f30] sm:$0xff]  ;;  %v1662_v44 = vld [vmem:[%s16805_s2 + $0x1f18] sm:$0xff] }
 0x47d   :  { %v11477_v30 = vcombine.high %v1661_v54, %v1665_v7  ;;  %v11476_v48 = vcombine.low %v1661_v54, %v1665_v7  ;;  %v11478_v11 = vcombine.low %v1662_v44, %v1666_v34  ;;  %v12006_v54 = vld [vmem:[%s16806_s3 + $0x60] ss:$16 sps:$4 sm:$0xff]   ;;  %v12009_v7 = vld [vmem:[%s16806_s3 + $0x68] ss:$16 sps:$4 sm:$0xff]  }
 0x47e   :  { %7807 = vmatpush1.bf16.msra.mxu0 %v11420_v26  ;;  %v11479_v26 = vcombine.high %v1662_v44, %v1666_v34  ;;  %v12014_v44 = vld [vmem:[%s16806_s3 + $0x84] ss:$16 sps:$4 sm:$0xff]   ;;  %v12017_v34 = vld [vmem:[%s16806_s3 + $0x8c] ss:$16 sps:$4 sm:$0xff]  }
 0x47f   :  { %8135 = vmatpush1.bf16.msra.mxu1 %v11422_v60  ;;  %7808 = vmatprep.subr.bf16.mxu0 %v11429_v62  ;;  %v1669_v60 = vld [vmem:[%s16805_s2 + $0x1f50] sm:$0xff] }
 0x480   :  { %8136 = vmatprep.subr.bf16.mxu1 %v11431_v29  ;;  %v1673_v62 = vld [vmem:[%s16805_s2 + $0x1f70] sm:$0xff]  ;;  %v1670_v29 = vld [vmem:[%s16805_s2 + $0x1f58] sm:$0xff] }
 0x481   :  { %v11485_v12 = vcombine.high %v1669_v60, %v1673_v62  ;;  %v11484_v15 = vcombine.low %v1669_v60, %v1673_v62  ;;  %v11486_v47 = vcombine.low %v1670_v29, %v1674_v4  ;;  %v12018_v60 = vld [vmem:[%s16806_s3 + $0xa0] ss:$16 sps:$4 sm:$0xff]   ;;  %v12021_v62 = vld [vmem:[%s16806_s3 + $0xa8] ss:$16 sps:$4 sm:$0xff]  }
 0x482   :  { %7809 = vmatpush1.bf16.msra.mxu0 %v11428_v19  ;;  %v11487_v19 = vcombine.high %v1670_v29, %v1674_v4  ;;  %v12026_v29 = vld [vmem:[%s16806_s3 + $0xc4] ss:$16 sps:$4 sm:$0xff]   ;;  %v12029_v4 = vld [vmem:[%s16806_s3 + $0xcc] ss:$16 sps:$4 sm:$0xff]  }
 0x483   :  { %8137 = vmatpush1.bf16.msra.mxu1 %v11430_v21  ;;  %7810 = vmatprep.subr.bf16.mxu0 %v11437_v27  ;;  %v1677_v21 = vld [vmem:[%s16805_s2 + $0x1f90] sm:$0xff] }
 0x484   :  { %8138 = vmatprep.subr.bf16.mxu1 %v11439_v22  ;;  %v1681_v27 = vld [vmem:[%s16805_s2 + $0x1fb0] sm:$0xff]  ;;  %v1678_v22 = vld [vmem:[%s16805_s2 + $0x1f98] sm:$0xff] }
 0x485   :  { %v11492_v31 = vcombine.low %v1677_v21, %v1681_v27 }
 0x486   :  { %7811 = vmatpush1.bf16.msra.mxu0 %v11436_v42  ;;  %v11493_v42 = vcombine.high %v1677_v21, %v1681_v27  ;;  %v12030_v21 = vld [vmem:[%s16806_s3 + $0xe0] ss:$16 sps:$4 sm:$0xff]   ;;  %v12033_v27 = vld [vmem:[%s16806_s3 + $0xe8] ss:$16 sps:$4 sm:$0xff]  }
 0x487   :  { %8139 = vmatpush1.bf16.msra.mxu1 %v11438_v24  ;;  %7812 = vmatprep.subr.bf16.mxu0 %v11445_v55  ;;  %v11495_v24 = vcombine.high %v1678_v22, %v1682_v35  ;;  %v1685_v55 = vld [vmem:[%s16805_s2 + $0x1fd0] sm:$0xff] }
 0x488   :  { %8140 = vmatprep.subr.bf16.mxu1 %v11447_v0  ;;  %v1689_v0 = vld [vmem:[%s16805_s2 + $0x1ff0] sm:$0xff] }
 0x489   :  { %v11500_v36 = vcombine.low %v1685_v55, %v1689_v0 }
 0x48a   :  { %7813 = vmatpush1.bf16.msra.mxu0 %v11444_v33  ;;  %v11494_v33 = vcombine.low %v1678_v22, %v1682_v35  ;;  %v12038_v22 = vld [vmem:[%s16806_s3 + $0x104] ss:$16 sps:$4 sm:$0xff]   ;;  %v12041_v35 = vld [vmem:[%s16806_s3 + $0x10c] ss:$16 sps:$4 sm:$0xff]  }
 0x48b   :  { %8141 = vmatpush1.bf16.msra.mxu1 %v11446_v28  ;;  %7814 = vmatprep.subr.bf16.mxu0 %v11453_v37  ;;  %v11501_v28 = vcombine.high %v1685_v55, %v1689_v0  ;;  %v11503_v37 = vcombine.high %v1686_v2, %v1690_v23  ;;  %v12042_v55 = vld [vmem:[%s16806_s3 + $0x120] ss:$16 sps:$4 sm:$0xff]   ;;  %v12045_v0 = vld [vmem:[%s16806_s3 + $0x128] ss:$16 sps:$4 sm:$0xff]   ;;  %v12053_v2 = vld [vmem:[%s16806_s3 + $0x14c] ss:$16 sps:$4 sm:$0xff]  }
 0x48c   :  { %8142 = vmatprep.subr.bf16.mxu1 %v11455_v61  ;;  %v11839_v61 = vadd.f32 %v14995_v1, %v1700_v58  ;;  %v11988_v1 = vld [vmem:[%s16806_s3] ss:$16 sps:$4 sm:$0xff]   ;;  %v12050_v58 = vld [vmem:[%s16806_s3 + $0x144] ss:$16 sps:$4 sm:$0xff]  }
 0x48d   :  { %v12048_v23 = vld [vmem:[%s16806_s3 + $0x140] ss:$16 sps:$4 sm:$0xff]  }
 0x48e   :  { %7815 = vmatpush1.bf16.msra.mxu0 %v11452_v39  ;;  %v8166_v39 = vmax.f32 %v11839_v61, 0.0  ;;  %v12057_v61 = vld [vmem:[%s16806_s3 + $0x168] ss:$16 sps:$4 sm:$0xff]  }
 0x48f   :  { %8143 = vmatpush1.bf16.msra.mxu1 %v11454_v40  ;;  %7816 = vmatprep.subr.bf16.mxu0 %v11461_v46  ;;  %v11991_v40 = vld [vmem:[%s16806_s3 + $0x8] ss:$16 sps:$4 sm:$0xff]   ;;  %v11996_v46 = vld [vmem:[%s16806_s3 + $0x24] ss:$16 sps:$4 sm:$0xff]  }
 0x490   :  { %8144 = vmatprep.subr.bf16.mxu1 %v11463_v41  ;;  %v8174_v41 = vpack.c.bf16 %v8166_v39, %v8166_v39  ;;  %v12068_v39 = vld [vmem:[%s16806_s3 + $0x1a4] ss:$16 sps:$4 sm:$0xff]  }
 0x492   :  { %7817 = vmatpush1.bf16.msra.mxu0 %v11460_v49  ;;  %v12000_v49 = vld [vmem:[%s16806_s3 + $0x40] ss:$16 sps:$4 sm:$0xff]  }
 0x493   :  { %8145 = vmatpush1.bf16.msra.mxu1 %v11462_v50  ;;  %7818 = vmatprep.subr.bf16.mxu0 %v11469_v52  ;;  %v12003_v50 = vld [vmem:[%s16806_s3 + $0x48] ss:$16 sps:$4 sm:$0xff]   ;;  %v12008_v52 = vld [vmem:[%s16806_s3 + $0x64] ss:$16 sps:$4 sm:$0xff]  }
 0x494   :  { %8146 = vmatprep.subr.bf16.mxu1 %v11471_v53  ;;  %v12011_v53 = vld [vmem:[%s16806_s3 + $0x6c] ss:$16 sps:$4 sm:$0xff]  }
 0x496   :  { %7819 = vmatpush1.bf16.msra.mxu0 %v11468_v10  ;;  %v12012_v10 = vld [vmem:[%s16806_s3 + $0x80] ss:$16 sps:$4 sm:$0xff]  }
 0x497   :  { %8147 = vmatpush1.bf16.msra.mxu1 %v11470_v57  ;;  %7820 = vmatprep.subr.bf16.mxu0 %v11477_v30  ;;  %v12015_v57 = vld [vmem:[%s16806_s3 + $0x88] ss:$16 sps:$4 sm:$0xff]   ;;  %v12020_v30 = vld [vmem:[%s16806_s3 + $0xa4] ss:$16 sps:$4 sm:$0xff]  }
 0x498   :  { %8148 = vmatprep.subr.bf16.mxu1 %v11479_v26  ;;  %v12023_v26 = vld [vmem:[%s16806_s3 + $0xac] ss:$16 sps:$4 sm:$0xff]  }
 0x49a   :  { %7821 = vmatpush1.bf16.msra.mxu0 %v11476_v48  ;;  %v12024_v48 = vld [vmem:[%s16806_s3 + $0xc0] ss:$16 sps:$4 sm:$0xff]  }
 0x49b   :  { %8149 = vmatpush1.bf16.msra.mxu1 %v11478_v11  ;;  %7822 = vmatprep.subr.bf16.mxu0 %v11485_v12  ;;  %v12027_v11 = vld [vmem:[%s16806_s3 + $0xc8] ss:$16 sps:$4 sm:$0xff]   ;;  %v12032_v12 = vld [vmem:[%s16806_s3 + $0xe4] ss:$16 sps:$4 sm:$0xff]  }
 0x49c   :  { %8150 = vmatprep.subr.bf16.mxu1 %v11487_v19  ;;  %v12035_v19 = vld [vmem:[%s16806_s3 + $0xec] ss:$16 sps:$4 sm:$0xff]  }
 0x49e   :  { %7823 = vmatpush1.bf16.msra.mxu0 %v11484_v15  ;;  %v12036_v15 = vld [vmem:[%s16806_s3 + $0x100] ss:$16 sps:$4 sm:$0xff]  }
 0x49f   :  { %8151 = vmatpush1.bf16.msra.mxu1 %v11486_v47  ;;  %7824 = vmatprep.subr.bf16.mxu0 %v11493_v42  ;;  %v12039_v47 = vld [vmem:[%s16806_s3 + $0x108] ss:$16 sps:$4 sm:$0xff]   ;;  %v12044_v42 = vld [vmem:[%s16806_s3 + $0x124] ss:$16 sps:$4 sm:$0xff]  }
 0x4a0   :  { %8152 = vmatprep.subr.bf16.mxu1 %v11495_v24  ;;  %v12047_v24 = vld [vmem:[%s16806_s3 + $0x12c] ss:$16 sps:$4 sm:$0xff]  }
 0x4a2   :  { %7825 = vmatpush1.bf16.msra.mxu0 %v11492_v31  ;;  %v12051_v31 = vld [vmem:[%s16806_s3 + $0x148] ss:$16 sps:$4 sm:$0xff]  }
 0x4a3   :  { %8153 = vmatpush1.bf16.msra.mxu1 %v11494_v33  ;;  %7826 = vmatprep.subr.bf16.mxu0 %v11501_v28  ;;  %v12056_v33 = vld [vmem:[%s16806_s3 + $0x164] ss:$16 sps:$4 sm:$0xff]   ;;  %v12059_v28 = vld [vmem:[%s16806_s3 + $0x16c] ss:$16 sps:$4 sm:$0xff]  }
 0x4a4   :  { %8154 = vmatprep.subr.bf16.mxu1 %v11503_v37  ;;  %v12054_v37 = vld [vmem:[%s16806_s3 + $0x160] ss:$16 sps:$4 sm:$0xff]  }
 0x4a6   :  { %7827 = vmatpush1.bf16.msra.mxu0 %v11500_v36  ;;  %v12062_v36 = vld [vmem:[%s16806_s3 + $0x184] ss:$16 sps:$4 sm:$0xff]  }
 0x4a7   :  { %8155 = vmatpush1.bf16.msra.mxu1 %v11502_v17  ;;  %9739 = vmatprep.subr.bf16.mxu0 %v11990_v18  ;;  %v12065_v17 = vld [vmem:[%s16806_s3 + $0x18c] ss:$16 sps:$4 sm:$0xff]   ;;  %v12060_v18 = vld [vmem:[%s16806_s3 + $0x180] ss:$16 sps:$4 sm:$0xff]  }
 0x4a8   :  { %9903 = vmatprep.subr.bf16.mxu1 %v11993_v25  ;;  %v12063_v25 = vld [vmem:[%s16806_s3 + $0x188] ss:$16 sps:$4 sm:$0xff]  }
 0x4a9   :  { %7829 = vmatmul.mubr.bf16.vlgmr.msra.gmra.mrb[20].mxu0 %v14331_v3 }
 0x4aa   :  { %8157 = vmatmul.mubr.bf16.vlgmr.msra.gmra.mrb[20].mxu1 %v14331_v3  ;;  %9740 = vmatpush1.bf16.msra.mxu0 %v11988_v1  ;;  %v12005_v3 = vld [vmem:[%s16806_s3 + $0x4c] ss:$16 sps:$4 sm:$0xff]  }
 0x4ab   :  { %9771 = vmatprep.mubr.bf16.mxu0 %v8174_v41  ;;  %9904 = vmatpush1.bf16.msra.mxu1 %v11991_v40  ;;  %v12071_v1 = vld [vmem:[%s16806_s3 + $0x1ac] ss:$16 sps:$4 sm:$0xff]   ;;  %v12066_v40 = vld [vmem:[%s16806_s3 + $0x1a0] ss:$16 sps:$4 sm:$0xff]  }
 0x4ac   :  { %9935 = vmatprep.mubr.bf16.mxu1 %v8174_v41  ;;  %9741 = vmatprep.subr.bf16.mxu0 %v11996_v46  ;;  %v1696_v46 = vrot.slane %v15876_v13, %v12804_v14  ;;  %v12069_v41 = vld [vmem:[%s16806_s3 + $0x1a8] ss:$16 sps:$4 sm:$0xff]  }
 0x4ad   :  { %9905 = vmatprep.subr.bf16.mxu1 %v11999_v56  ;;  %v12074_v56 = vld [vmem:[%s16806_s3 + $0x1c4] ss:$16 sps:$4 sm:$0xff]  }
 0x4ae   :  { %9742 = vmatpush1.bf16.msra.mxu0 %v11994_v43  ;;  %v12077_v43 = vld [vmem:[%s16806_s3 + $0x1cc] ss:$16 sps:$4 sm:$0xff]  }
 0x4af   :  { %9906 = vmatpush1.bf16.msra.mxu1 %v11997_v51  ;;  %9743 = vmatprep.subr.bf16.mxu0 %v12002_v45  ;;  %v1708_v51 = vrot.slane %v15876_v13, %v12815_v16  ;;  %v12072_v45 = vld [vmem:[%s16806_s3 + $0x1c0] ss:$16 sps:$4 sm:$0xff]  }
 0x4b0   :  { %9907 = vmatprep.subr.bf16.mxu1 %v12005_v3  ;;  %v11838_v3 = vadd.f32 %v14985_v59, %v1696_v46  ;;  %v12078_v59 = vld [vmem:[%s16806_s3 + $0x1e0] ss:$16 sps:$4 sm:$0xff]   ;;  %v12143_v46 = vld [vmem:[%s16806_s3 + $0x32c] ss:$16 sps:$4 sm:$0xff]  }
 0x4b2   :  { %9744 = vmatpush1.bf16.msra.mxu0 %v12000_v49  ;;  %v12075_v49 = vld [vmem:[%s16806_s3 + $0x1c8] ss:$16 sps:$4 sm:$0xff]  }
 0x4b3   :  { %9908 = vmatpush1.bf16.msra.mxu1 %v12003_v50  ;;  %9745 = vmatprep.subr.bf16.mxu0 %v12008_v52  ;;  %v12080_v50 = vld [vmem:[%s16806_s3 + $0x1e4] ss:$16 sps:$4 sm:$0xff]   ;;  %v12083_v52 = vld [vmem:[%s16806_s3 + $0x1ec] ss:$16 sps:$4 sm:$0xff]  }
 0x4b4   :  { %9909 = vmatprep.subr.bf16.mxu1 %v12011_v53  ;;  %v11841_v53 = vadd.f32 %v15003_v9, %v1708_v51  ;;  %v12089_v9 = vld [vmem:[%s16806_s3 + $0x20c] ss:$16 sps:$4 sm:$0xff]  }
 0x4b5   :  { %v12149_v51 = vld [vmem:[%s16806_s3 + $0x34c] ss:$16 sps:$4 sm:$0xff]  }
 0x4b6   :  { %9746 = vmatpush1.bf16.msra.mxu0 %v12006_v54  ;;  %v8165_v54 = vmax.f32 %v11838_v3, 0.0  ;;  %v12147_v3 = vld [vmem:[%s16806_s3 + $0x348] ss:$16 sps:$4 sm:$0xff]  }
 0x4b7   :  { %9910 = vmatpush1.bf16.msra.mxu1 %v12009_v7  ;;  %9747 = vmatprep.subr.bf16.mxu0 %v12014_v44  ;;  %v12081_v7 = vld [vmem:[%s16806_s3 + $0x1e8] ss:$16 sps:$4 sm:$0xff]   ;;  %v12086_v44 = vld [vmem:[%s16806_s3 + $0x204] ss:$16 sps:$4 sm:$0xff]  }
 0x4b8   :  { %9911 = vmatprep.subr.bf16.mxu1 %v12017_v34  ;;  %v8168_v34 = vmax.f32 %v11841_v53, 0.0  ;;  %v12153_v53 = vld [vmem:[%s16806_s3 + $0x368] ss:$16 sps:$4 sm:$0xff]  }
 0x4ba   :  { %9748 = vmatpush1.bf16.msra.mxu0 %v12012_v10  ;;  %v12084_v10 = vld [vmem:[%s16806_s3 + $0x200] ss:$16 sps:$4 sm:$0xff]  }
 0x4bb   :  { %9912 = vmatpush1.bf16.msra.mxu1 %v12015_v57  ;;  %9749 = vmatprep.subr.bf16.mxu0 %v12020_v30  ;;  %v8173_v57 = vpack.c.bf16 %v8165_v54, %v8165_v54  ;;  %v12087_v30 = vld [vmem:[%s16806_s3 + $0x208] ss:$16 sps:$4 sm:$0xff]   ;;  %v12161_v54 = vld [vmem:[%s16806_s3 + $0x38c] ss:$16 sps:$4 sm:$0xff]  }
 0x4bc   :  { %9913 = vmatprep.subr.bf16.mxu1 %v12023_v26  ;;  %v12092_v26 = vld [vmem:[%s16806_s3 + $0x224] ss:$16 sps:$4 sm:$0xff]  }
 0x4be   :  { %9750 = vmatpush1.bf16.msra.mxu0 %v12018_v60  ;;  %v8176_v60 = vpack.c.bf16 %v8168_v34, %v8168_v34  ;;  %v12167_v34 = vld [vmem:[%s16806_s3 + $0x3ac] ss:$16 sps:$4 sm:$0xff]  }
 0x4bf   :  { %9914 = vmatpush1.bf16.msra.mxu1 %v12021_v62  ;;  %9751 = vmatprep.subr.bf16.mxu0 %v12026_v29  ;;  %v12095_v62 = vld [vmem:[%s16806_s3 + $0x22c] ss:$16 sps:$4 sm:$0xff]   ;;  %v12090_v29 = vld [vmem:[%s16806_s3 + $0x220] ss:$16 sps:$4 sm:$0xff]  }
 0x4c0   :  { %9915 = vmatprep.subr.bf16.mxu1 %v12029_v4  ;;  %v12093_v4 = vld [vmem:[%s16806_s3 + $0x228] ss:$16 sps:$4 sm:$0xff]  }
 0x4c2   :  { %9752 = vmatpush1.bf16.msra.mxu0 %v12024_v48  ;;  %v12098_v48 = vld [vmem:[%s16806_s3 + $0x244] ss:$16 sps:$4 sm:$0xff]  }
 0x4c3   :  { %9916 = vmatpush1.bf16.msra.mxu1 %v12027_v11  ;;  %9753 = vmatprep.subr.bf16.mxu0 %v12032_v12  ;;  %v12101_v11 = vld [vmem:[%s16806_s3 + $0x24c] ss:$16 sps:$4 sm:$0xff]   ;;  %v12096_v12 = vld [vmem:[%s16806_s3 + $0x240] ss:$16 sps:$4 sm:$0xff]  }
 0x4c4   :  { %9917 = vmatprep.subr.bf16.mxu1 %v12035_v19  ;;  %v12099_v19 = vld [vmem:[%s16806_s3 + $0x248] ss:$16 sps:$4 sm:$0xff]  }
 0x4c6   :  { %9754 = vmatpush1.bf16.msra.mxu0 %v12030_v21  ;;  %v12104_v21 = vld [vmem:[%s16806_s3 + $0x264] ss:$16 sps:$4 sm:$0xff]  }
 0x4c7   :  { %9918 = vmatpush1.bf16.msra.mxu1 %v12033_v27  ;;  %9755 = vmatprep.subr.bf16.mxu0 %v12038_v22  ;;  %v12107_v27 = vld [vmem:[%s16806_s3 + $0x26c] ss:$16 sps:$4 sm:$0xff]   ;;  %v12102_v22 = vld [vmem:[%s16806_s3 + $0x260] ss:$16 sps:$4 sm:$0xff]  }
 0x4c8   :  { %9919 = vmatprep.subr.bf16.mxu1 %v12041_v35  ;;  %v12105_v35 = vld [vmem:[%s16806_s3 + $0x268] ss:$16 sps:$4 sm:$0xff]  }
 0x4ca   :  { %9756 = vmatpush1.bf16.msra.mxu0 %v12036_v15  ;;  %v12110_v15 = vld [vmem:[%s16806_s3 + $0x284] ss:$16 sps:$4 sm:$0xff]  }
 0x4cb   :  { %9920 = vmatpush1.bf16.msra.mxu1 %v12039_v47  ;;  %9757 = vmatprep.subr.bf16.mxu0 %v12044_v42  ;;  %v12113_v47 = vld [vmem:[%s16806_s3 + $0x28c] ss:$16 sps:$4 sm:$0xff]   ;;  %v12108_v42 = vld [vmem:[%s16806_s3 + $0x280] ss:$16 sps:$4 sm:$0xff]  }
 0x4cc   :  { %9921 = vmatprep.subr.bf16.mxu1 %v12047_v24  ;;  %v12111_v24 = vld [vmem:[%s16806_s3 + $0x288] ss:$16 sps:$4 sm:$0xff]  }
 0x4ce   :  { %9758 = vmatpush1.bf16.msra.mxu0 %v12042_v55  ;;  %v12116_v55 = vld [vmem:[%s16806_s3 + $0x2a4] ss:$16 sps:$4 sm:$0xff]  }
 0x4cf   :  { %9922 = vmatpush1.bf16.msra.mxu1 %v12045_v0  ;;  %9759 = vmatprep.subr.bf16.mxu0 %v12050_v58  ;;  %v12119_v0 = vld [vmem:[%s16806_s3 + $0x2ac] ss:$16 sps:$4 sm:$0xff]   ;;  %v12114_v58 = vld [vmem:[%s16806_s3 + $0x2a0] ss:$16 sps:$4 sm:$0xff]  }
 0x4d0   :  { %9923 = vmatprep.subr.bf16.mxu1 %v12053_v2  ;;  %v12117_v2 = vld [vmem:[%s16806_s3 + $0x2a8] ss:$16 sps:$4 sm:$0xff]  }
 0x4d2   :  { %9760 = vmatpush1.bf16.msra.mxu0 %v12048_v23  ;;  %v12122_v23 = vld [vmem:[%s16806_s3 + $0x2c4] ss:$16 sps:$4 sm:$0xff]  }
 0x4d3   :  { %9924 = vmatpush1.bf16.msra.mxu1 %v12051_v31  ;;  %9761 = vmatprep.subr.bf16.mxu0 %v12056_v33  ;;  %v12125_v31 = vld [vmem:[%s16806_s3 + $0x2cc] ss:$16 sps:$4 sm:$0xff]   ;;  %v12120_v33 = vld [vmem:[%s16806_s3 + $0x2c0] ss:$16 sps:$4 sm:$0xff]  }
 0x4d4   :  { %9925 = vmatprep.subr.bf16.mxu1 %v12059_v28  ;;  %v12123_v28 = vld [vmem:[%s16806_s3 + $0x2c8] ss:$16 sps:$4 sm:$0xff]  }
 0x4d6   :  { %9762 = vmatpush1.bf16.msra.mxu0 %v12054_v37  ;;  %v12128_v37 = vld [vmem:[%s16806_s3 + $0x2e4] ss:$16 sps:$4 sm:$0xff]  }
 0x4d7   :  { %9926 = vmatpush1.bf16.msra.mxu1 %v12057_v61  ;;  %9763 = vmatprep.subr.bf16.mxu0 %v12062_v36  ;;  %v12131_v61 = vld [vmem:[%s16806_s3 + $0x2ec] ss:$16 sps:$4 sm:$0xff]   ;;  %v12126_v36 = vld [vmem:[%s16806_s3 + $0x2e0] ss:$16 sps:$4 sm:$0xff]  }
 0x4d8   :  { %9927 = vmatprep.subr.bf16.mxu1 %v12065_v17  ;;  %v12129_v17 = vld [vmem:[%s16806_s3 + $0x2e8] ss:$16 sps:$4 sm:$0xff]  }
 0x4da   :  { %9764 = vmatpush1.bf16.msra.mxu0 %v12060_v18  ;;  %v12134_v18 = vld [vmem:[%s16806_s3 + $0x304] ss:$16 sps:$4 sm:$0xff]  }
 0x4db   :  { %9928 = vmatpush1.bf16.msra.mxu1 %v12063_v25  ;;  %9765 = vmatprep.subr.bf16.mxu0 %v12068_v39  ;;  %v12137_v25 = vld [vmem:[%s16806_s3 + $0x30c] ss:$16 sps:$4 sm:$0xff]   ;;  %v12132_v39 = vld [vmem:[%s16806_s3 + $0x300] ss:$16 sps:$4 sm:$0xff]  }
 0x4dc   :  { %9929 = vmatprep.subr.bf16.mxu1 %v12071_v1  ;;  %v12135_v1 = vld [vmem:[%s16806_s3 + $0x308] ss:$16 sps:$4 sm:$0xff]  }
 0x4de   :  { %9766 = vmatpush1.bf16.msra.mxu0 %v12066_v40  ;;  %v12140_v40 = vld [vmem:[%s16806_s3 + $0x324] ss:$16 sps:$4 sm:$0xff]  }
 0x4df   :  { %9930 = vmatpush1.bf16.msra.mxu1 %v12069_v41  ;;  %9767 = vmatprep.subr.bf16.mxu0 %v12074_v56  ;;  %v12138_v41 = vld [vmem:[%s16806_s3 + $0x320] ss:$16 sps:$4 sm:$0xff]   ;;  %v12141_v56 = vld [vmem:[%s16806_s3 + $0x328] ss:$16 sps:$4 sm:$0xff]  }
 0x4e0   :  { %9931 = vmatprep.subr.bf16.mxu1 %v12077_v43  ;;  %v12146_v43 = vld [vmem:[%s16806_s3 + $0x344] ss:$16 sps:$4 sm:$0xff]  }
 0x4e2   :  { %9768 = vmatpush1.bf16.msra.mxu0 %v12072_v45  ;;  %v12144_v45 = vld [vmem:[%s16806_s3 + $0x340] ss:$16 sps:$4 sm:$0xff]  }
 0x4e3   :  { %9932 = vmatpush1.bf16.msra.mxu1 %v12075_v49  ;;  %9769 = vmatprep.subr.bf16.mxu0 %v12080_v50  ;;  %v12152_v49 = vld [vmem:[%s16806_s3 + $0x364] ss:$16 sps:$4 sm:$0xff]   ;;  %v12155_v50 = vld [vmem:[%s16806_s3 + $0x36c] ss:$16 sps:$4 sm:$0xff]  }
 0x4e4   :  { %9933 = vmatprep.subr.bf16.mxu1 %v12083_v52  ;;  %v12150_v52 = vld [vmem:[%s16806_s3 + $0x360] ss:$16 sps:$4 sm:$0xff]  }
 0x4e6   :  { %9770 = vmatpush1.bf16.msra.mxu0 %v12078_v59  ;;  %v12158_v59 = vld [vmem:[%s16806_s3 + $0x384] ss:$16 sps:$4 sm:$0xff]  }
 0x4e7   :  { %9934 = vmatpush1.bf16.msra.mxu1 %v12081_v7  ;;  %9780 = vmatprep.subr.bf16.mxu0 %v12086_v44  ;;  %v12156_v7 = vld [vmem:[%s16806_s3 + $0x380] ss:$16 sps:$4 sm:$0xff]   ;;  %v12159_v44 = vld [vmem:[%s16806_s3 + $0x388] ss:$16 sps:$4 sm:$0xff]  }
 0x4e8   :  { %9944 = vmatprep.subr.bf16.mxu1 %v12089_v9  ;;  %v12164_v9 = vld [vmem:[%s16806_s3 + $0x3a4] ss:$16 sps:$4 sm:$0xff]  }
 0x4e9   :  { %9772 = vmatmul.mubr.bf16.vlgmr.msra.gmra.mrb[24].mxu0 %v8173_v57 }
 0x4ea   :  { %9936 = vmatmul.mubr.bf16.vlgmr.msra.gmra.mrb[24].mxu1 %v8173_v57  ;;  %9781 = vmatpush1.bf16.msra.mxu0 %v12084_v10  ;;  %v12162_v10 = vld [vmem:[%s16806_s3 + $0x3a0] ss:$16 sps:$4 sm:$0xff]   ;;  %v1704_v57 = vrot.slane %v15876_v13, %v13001_v38 }
 0x4eb   :  { %9812 = vmatprep.mubr.bf16.mxu0 %v8176_v60  ;;  %9945 = vmatpush1.bf16.msra.mxu1 %v12087_v30  ;;  %v12165_v30 = vld [vmem:[%s16806_s3 + $0x3a8] ss:$16 sps:$4 sm:$0xff]  }
 0x4ec   :  { %9976 = vmatprep.mubr.bf16.mxu1 %v8176_v60  ;;  %9782 = vmatprep.subr.bf16.mxu0 %v12092_v26  ;;  %v12170_v26 = vld [vmem:[%s16806_s3 + $0x3c4] ss:$16 sps:$4 sm:$0xff]   ;;  %v12173_v60 = vld [vmem:[%s16806_s3 + $0x3cc] ss:$16 sps:$4 sm:$0xff]  }
 0x4ed   :  { %9946 = vmatprep.subr.bf16.mxu1 %v12095_v62  ;;  %v12168_v62 = vld [vmem:[%s16806_s3 + $0x3c0] ss:$16 sps:$4 sm:$0xff]  }
 0x4ee   :  { %9783 = vmatpush1.bf16.msra.mxu0 %v12090_v29  ;;  %v11840_v29 = vadd.f32 %v14993_v63, %v1704_v57  ;;  %v12174_v63 = vld [vmem:[%s16806_s3 + $0x3e0] ss:$16 sps:$4 sm:$0xff]  }
 0x4ef   :  { %9947 = vmatpush1.bf16.msra.mxu1 %v12093_v4  ;;  %9784 = vmatprep.subr.bf16.mxu0 %v12098_v48  ;;  %v12171_v4 = vld [vmem:[%s16806_s3 + $0x3c8] ss:$16 sps:$4 sm:$0xff]   ;;  %v12176_v48 = vld [vmem:[%s16806_s3 + $0x3e4] ss:$16 sps:$4 sm:$0xff]   ;;  %v12240_v57 = vld [vmem:[%s16806_s3 + $0x540] ss:$16 sps:$4 sm:$0xff]  }
 0x4f0   :  { %9948 = vmatprep.subr.bf16.mxu1 %v12101_v11  ;;  %v12179_v11 = vld [vmem:[%s16806_s3 + $0x3ec] ss:$16 sps:$4 sm:$0xff]  }
 0x4f2   :  { %9785 = vmatpush1.bf16.msra.mxu0 %v12096_v12  ;;  %v8167_v12 = vmax.f32 %v11840_v29, 0.0  ;;  %v12249_v29 = vld [vmem:[%s16806_s3 + $0x568] ss:$16 sps:$4 sm:$0xff]  }
 0x4f3   :  { %9949 = vmatpush1.bf16.msra.mxu1 %v12099_v19  ;;  %9786 = vmatprep.subr.bf16.mxu0 %v12104_v21  ;;  %v12177_v19 = vld [vmem:[%s16806_s3 + $0x3e8] ss:$16 sps:$4 sm:$0xff]   ;;  %v12182_v21 = vld [vmem:[%s16806_s3 + $0x404] ss:$16 sps:$4 sm:$0xff]  }
 0x4f4   :  { %9950 = vmatprep.subr.bf16.mxu1 %v12107_v27  ;;  %v12185_v27 = vld [vmem:[%s16806_s3 + $0x40c] ss:$16 sps:$4 sm:$0xff]  }
 0x4f6   :  { %9787 = vmatpush1.bf16.msra.mxu0 %v12102_v22  ;;  %v12180_v22 = vld [vmem:[%s16806_s3 + $0x400] ss:$16 sps:$4 sm:$0xff]  }
 0x4f7   :  { %9951 = vmatpush1.bf16.msra.mxu1 %v12105_v35  ;;  %9788 = vmatprep.subr.bf16.mxu0 %v12110_v15  ;;  %v8175_v35 = vpack.c.bf16 %v8167_v12, %v8167_v12  ;;  %v12183_v15 = vld [vmem:[%s16806_s3 + $0x408] ss:$16 sps:$4 sm:$0xff]   ;;  %v12260_v12 = vld [vmem:[%s16806_s3 + $0x5a4] ss:$16 sps:$4 sm:$0xff]  }
 0x4f8   :  { %9952 = vmatprep.subr.bf16.mxu1 %v12113_v47  ;;  %v12188_v47 = vld [vmem:[%s16806_s3 + $0x424] ss:$16 sps:$4 sm:$0xff]  }
 0x4fa   :  { %9789 = vmatpush1.bf16.msra.mxu0 %v12108_v42  ;;  %v12191_v42 = vld [vmem:[%s16806_s3 + $0x42c] ss:$16 sps:$4 sm:$0xff]  }
 0x4fb   :  { %9953 = vmatpush1.bf16.msra.mxu1 %v12111_v24  ;;  %9790 = vmatprep.subr.bf16.mxu0 %v12116_v55  ;;  %v12186_v24 = vld [vmem:[%s16806_s3 + $0x420] ss:$16 sps:$4 sm:$0xff]   ;;  %v12189_v55 = vld [vmem:[%s16806_s3 + $0x428] ss:$16 sps:$4 sm:$0xff]  }
 0x4fc   :  { %9954 = vmatprep.subr.bf16.mxu1 %v12119_v0  ;;  %v12194_v0 = vld [vmem:[%s16806_s3 + $0x444] ss:$16 sps:$4 sm:$0xff]  }
 0x4fe   :  { %9791 = vmatpush1.bf16.msra.mxu0 %v12114_v58  ;;  %v12197_v58 = vld [vmem:[%s16806_s3 + $0x44c] ss:$16 sps:$4 sm:$0xff]  }
 0x4ff   :  { %9955 = vmatpush1.bf16.msra.mxu1 %v12117_v2  ;;  %9792 = vmatprep.subr.bf16.mxu0 %v12122_v23  ;;  %v12192_v2 = vld [vmem:[%s16806_s3 + $0x440] ss:$16 sps:$4 sm:$0xff]   ;;  %v12195_v23 = vld [vmem:[%s16806_s3 + $0x448] ss:$16 sps:$4 sm:$0xff]  }
 0x500   :  { %9956 = vmatprep.subr.bf16.mxu1 %v12125_v31  ;;  %v12200_v31 = vld [vmem:[%s16806_s3 + $0x464] ss:$16 sps:$4 sm:$0xff]  }
 0x502   :  { %9793 = vmatpush1.bf16.msra.mxu0 %v12120_v33  ;;  %v12203_v33 = vld [vmem:[%s16806_s3 + $0x46c] ss:$16 sps:$4 sm:$0xff]  }
 0x503   :  { %9957 = vmatpush1.bf16.msra.mxu1 %v12123_v28  ;;  %9794 = vmatprep.subr.bf16.mxu0 %v12128_v37  ;;  %v12198_v28 = vld [vmem:[%s16806_s3 + $0x460] ss:$16 sps:$4 sm:$0xff]   ;;  %v12201_v37 = vld [vmem:[%s16806_s3 + $0x468] ss:$16 sps:$4 sm:$0xff]  }
 0x504   :  { %9958 = vmatprep.subr.bf16.mxu1 %v12131_v61  ;;  %v12206_v61 = vld [vmem:[%s16806_s3 + $0x484] ss:$16 sps:$4 sm:$0xff]  }
 0x506   :  { %9795 = vmatpush1.bf16.msra.mxu0 %v12126_v36  ;;  %v12209_v36 = vld [vmem:[%s16806_s3 + $0x48c] ss:$16 sps:$4 sm:$0xff]  }
 0x507   :  { %9959 = vmatpush1.bf16.msra.mxu1 %v12129_v17  ;;  %9796 = vmatprep.subr.bf16.mxu0 %v12134_v18  ;;  %v12204_v17 = vld [vmem:[%s16806_s3 + $0x480] ss:$16 sps:$4 sm:$0xff]   ;;  %v12207_v18 = vld [vmem:[%s16806_s3 + $0x488] ss:$16 sps:$4 sm:$0xff]  }
 0x508   :  { %9960 = vmatprep.subr.bf16.mxu1 %v12137_v25  ;;  %v12212_v25 = vld [vmem:[%s16806_s3 + $0x4a4] ss:$16 sps:$4 sm:$0xff]  }
 0x50a   :  { %9797 = vmatpush1.bf16.msra.mxu0 %v12132_v39  ;;  %v12215_v39 = vld [vmem:[%s16806_s3 + $0x4ac] ss:$16 sps:$4 sm:$0xff]  }
 0x50b   :  { %9961 = vmatpush1.bf16.msra.mxu1 %v12135_v1  ;;  %9798 = vmatprep.subr.bf16.mxu0 %v12140_v40  ;;  %v12210_v1 = vld [vmem:[%s16806_s3 + $0x4a0] ss:$16 sps:$4 sm:$0xff]   ;;  %v12213_v40 = vld [vmem:[%s16806_s3 + $0x4a8] ss:$16 sps:$4 sm:$0xff]  }
 0x50c   :  { %9962 = vmatprep.subr.bf16.mxu1 %v12143_v46  ;;  %v12218_v46 = vld [vmem:[%s16806_s3 + $0x4c4] ss:$16 sps:$4 sm:$0xff]  }
 0x50e   :  { %9799 = vmatpush1.bf16.msra.mxu0 %v12138_v41  ;;  %v12221_v41 = vld [vmem:[%s16806_s3 + $0x4cc] ss:$16 sps:$4 sm:$0xff]  }
 0x50f   :  { %9963 = vmatpush1.bf16.msra.mxu1 %v12141_v56  ;;  %9800 = vmatprep.subr.bf16.mxu0 %v12146_v43  ;;  %v12216_v56 = vld [vmem:[%s16806_s3 + $0x4c0] ss:$16 sps:$4 sm:$0xff]   ;;  %v12219_v43 = vld [vmem:[%s16806_s3 + $0x4c8] ss:$16 sps:$4 sm:$0xff]  }
 0x510   :  { %9964 = vmatprep.subr.bf16.mxu1 %v12149_v51  ;;  %v12224_v51 = vld [vmem:[%s16806_s3 + $0x4e4] ss:$16 sps:$4 sm:$0xff]  }
 0x512   :  { %9801 = vmatpush1.bf16.msra.mxu0 %v12144_v45  ;;  %v12227_v45 = vld [vmem:[%s16806_s3 + $0x4ec] ss:$16 sps:$4 sm:$0xff]  }
 0x513   :  { %9965 = vmatpush1.bf16.msra.mxu1 %v12147_v3  ;;  %9802 = vmatprep.subr.bf16.mxu0 %v12152_v49  ;;  %v12222_v3 = vld [vmem:[%s16806_s3 + $0x4e0] ss:$16 sps:$4 sm:$0xff]   ;;  %v12225_v49 = vld [vmem:[%s16806_s3 + $0x4e8] ss:$16 sps:$4 sm:$0xff]  }
 0x514   :  { %9966 = vmatprep.subr.bf16.mxu1 %v12155_v50  ;;  %v12230_v50 = vld [vmem:[%s16806_s3 + $0x504] ss:$16 sps:$4 sm:$0xff]  }
 0x516   :  { %9803 = vmatpush1.bf16.msra.mxu0 %v12150_v52  ;;  %v12233_v52 = vld [vmem:[%s16806_s3 + $0x50c] ss:$16 sps:$4 sm:$0xff]  }
 0x517   :  { %9967 = vmatpush1.bf16.msra.mxu1 %v12153_v53  ;;  %9804 = vmatprep.subr.bf16.mxu0 %v12158_v59  ;;  %v12228_v53 = vld [vmem:[%s16806_s3 + $0x500] ss:$16 sps:$4 sm:$0xff]   ;;  %v12231_v59 = vld [vmem:[%s16806_s3 + $0x508] ss:$16 sps:$4 sm:$0xff]  }
 0x518   :  { %9968 = vmatprep.subr.bf16.mxu1 %v12161_v54  ;;  %v12236_v54 = vld [vmem:[%s16806_s3 + $0x524] ss:$16 sps:$4 sm:$0xff]  }
 0x51a   :  { %9805 = vmatpush1.bf16.msra.mxu0 %v12156_v7  ;;  %v12239_v7 = vld [vmem:[%s16806_s3 + $0x52c] ss:$16 sps:$4 sm:$0xff]  }
 0x51b   :  { %9969 = vmatpush1.bf16.msra.mxu1 %v12159_v44  ;;  %9806 = vmatprep.subr.bf16.mxu0 %v12164_v9  ;;  %v12234_v44 = vld [vmem:[%s16806_s3 + $0x520] ss:$16 sps:$4 sm:$0xff]   ;;  %v12237_v9 = vld [vmem:[%s16806_s3 + $0x528] ss:$16 sps:$4 sm:$0xff]  }
 0x51c   :  { %9970 = vmatprep.subr.bf16.mxu1 %v12167_v34  ;;  %v12242_v34 = vld [vmem:[%s16806_s3 + $0x544] ss:$16 sps:$4 sm:$0xff]  }
 0x51e   :  { %9807 = vmatpush1.bf16.msra.mxu0 %v12162_v10  ;;  %v12245_v10 = vld [vmem:[%s16806_s3 + $0x54c] ss:$16 sps:$4 sm:$0xff]  }
 0x51f   :  { %9971 = vmatpush1.bf16.msra.mxu1 %v12165_v30  ;;  %9808 = vmatprep.subr.bf16.mxu0 %v12170_v26  ;;  %v12243_v30 = vld [vmem:[%s16806_s3 + $0x548] ss:$16 sps:$4 sm:$0xff]   ;;  %v12248_v26 = vld [vmem:[%s16806_s3 + $0x564] ss:$16 sps:$4 sm:$0xff]  }
 0x520   :  { %9972 = vmatprep.subr.bf16.mxu1 %v12173_v60  ;;  %v12251_v60 = vld [vmem:[%s16806_s3 + $0x56c] ss:$16 sps:$4 sm:$0xff]  }
 0x522   :  { %9809 = vmatpush1.bf16.msra.mxu0 %v12168_v62  ;;  %v12246_v62 = vld [vmem:[%s16806_s3 + $0x560] ss:$16 sps:$4 sm:$0xff]  }
 0x523   :  { %9973 = vmatpush1.bf16.msra.mxu1 %v12171_v4  ;;  %9810 = vmatprep.subr.bf16.mxu0 %v12176_v48  ;;  %v12254_v4 = vld [vmem:[%s16806_s3 + $0x584] ss:$16 sps:$4 sm:$0xff]   ;;  %v12257_v48 = vld [vmem:[%s16806_s3 + $0x58c] ss:$16 sps:$4 sm:$0xff]  }
 0x524   :  { %9974 = vmatprep.subr.bf16.mxu1 %v12179_v11  ;;  %v12252_v11 = vld [vmem:[%s16806_s3 + $0x580] ss:$16 sps:$4 sm:$0xff]  }
 0x526   :  { %9811 = vmatpush1.bf16.msra.mxu0 %v12174_v63  ;;  %v12255_v63 = vld [vmem:[%s16806_s3 + $0x588] ss:$16 sps:$4 sm:$0xff]  }
 0x527   :  { %9975 = vmatpush1.bf16.msra.mxu1 %v12177_v19  ;;  %9821 = vmatprep.subr.bf16.mxu0 %v12182_v21  ;;  %v12263_v19 = vld [vmem:[%s16806_s3 + $0x5ac] ss:$16 sps:$4 sm:$0xff]   ;;  %v12258_v21 = vld [vmem:[%s16806_s3 + $0x5a0] ss:$16 sps:$4 sm:$0xff]  }
 0x528   :  { %9985 = vmatprep.subr.bf16.mxu1 %v12185_v27  ;;  %v12261_v27 = vld [vmem:[%s16806_s3 + $0x5a8] ss:$16 sps:$4 sm:$0xff]  }
 0x529   :  { %9813 = vmatmul.mubr.bf16.vlgmr.msra.gmra.mrb[24].mxu0 %v8175_v35 }
 0x52a   :  { %9977 = vmatmul.mubr.bf16.vlgmr.msra.gmra.mrb[24].mxu1 %v8175_v35  ;;  %9822 = vmatpush1.bf16.msra.mxu0 %v12180_v22  ;;  %v12266_v22 = vld [vmem:[%s16806_s3 + $0x5c4] ss:$16 sps:$4 sm:$0xff]   ;;  %v12269_v35 = vld [vmem:[%s16806_s3 + $0x5cc] ss:$16 sps:$4 sm:$0xff]  }
 0x52b   :  { %9986 = vmatpush1.bf16.msra.mxu1 %v12183_v15  ;;  %9823 = vmatprep.subr.bf16.mxu0 %v12188_v47  ;;  %v12264_v15 = vld [vmem:[%s16806_s3 + $0x5c0] ss:$16 sps:$4 sm:$0xff]   ;;  %v12267_v47 = vld [vmem:[%s16806_s3 + $0x5c8] ss:$16 sps:$4 sm:$0xff]  }
 0x52c   :  { %9987 = vmatprep.subr.bf16.mxu1 %v12191_v42  ;;  %v12272_v42 = vld [vmem:[%s16806_s3 + $0x5e4] ss:$16 sps:$4 sm:$0xff]  }
 0x52e   :  { %9824 = vmatpush1.bf16.msra.mxu0 %v12186_v24  ;;  %v12275_v24 = vld [vmem:[%s16806_s3 + $0x5ec] ss:$16 sps:$4 sm:$0xff]  }
 0x52f   :  { %9988 = vmatpush1.bf16.msra.mxu1 %v12189_v55  ;;  %9825 = vmatprep.subr.bf16.mxu0 %v12194_v0  ;;  %v12270_v55 = vld [vmem:[%s16806_s3 + $0x5e0] ss:$16 sps:$4 sm:$0xff]   ;;  %v12273_v0 = vld [vmem:[%s16806_s3 + $0x5e8] ss:$16 sps:$4 sm:$0xff]  }
 0x530   :  { %9989 = vmatprep.subr.bf16.mxu1 %v12197_v58  ;;  %v12278_v58 = vld [vmem:[%s16806_s3 + $0x604] ss:$16 sps:$4 sm:$0xff]  }
 0x532   :  { %9826 = vmatpush1.bf16.msra.mxu0 %v12192_v2  ;;  %v12281_v2 = vld [vmem:[%s16806_s3 + $0x60c] ss:$16 sps:$4 sm:$0xff]  }
 0x533   :  { %9990 = vmatpush1.bf16.msra.mxu1 %v12195_v23  ;;  %9827 = vmatprep.subr.bf16.mxu0 %v12200_v31  ;;  %v1712_v23 = vrot.slane %v15876_v13, %v12906_v20  ;;  %v1716_v31 = vrot.slane %v15876_v13, %v12928_v32  ;;  %v12276_v32 = vld [vmem:[%s16806_s3 + $0x600] ss:$16 sps:$4 sm:$0xff]  }
 0x534   :  { %9991 = vmatprep.subr.bf16.mxu1 %v12203_v33  ;;  %v1724_v33 = vrot.slane %v15876_v13, %v13039_v8  ;;  %v12279_v8 = vld [vmem:[%s16806_s3 + $0x608] ss:$16 sps:$4 sm:$0xff]  }
 0x536   :  { %9828 = vmatpush1.bf16.msra.mxu0 %v12198_v28 }
 0x537   :  { %9992 = vmatpush1.bf16.msra.mxu1 %v12201_v37  ;;  %9829 = vmatprep.subr.bf16.mxu0 %v12206_v61 }
 0x538   :  { %9993 = vmatprep.subr.bf16.mxu1 %v12209_v36 }
 0x53a   :  { %9830 = vmatpush1.bf16.msra.mxu0 %v12204_v17 }
 0x53b   :  { %9994 = vmatpush1.bf16.msra.mxu1 %v12207_v18  ;;  %9831 = vmatprep.subr.bf16.mxu0 %v12212_v25 }
 0x53c   :  { %9995 = vmatprep.subr.bf16.mxu1 %v12215_v39 }
 0x53e   :  { %9832 = vmatpush1.bf16.msra.mxu0 %v12210_v1 }
 0x53f   :  { %9996 = vmatpush1.bf16.msra.mxu1 %v12213_v40  ;;  %9833 = vmatprep.subr.bf16.mxu0 %v12218_v46 }
 0x540   :  { %9997 = vmatprep.subr.bf16.mxu1 %v12221_v41 }
 0x542   :  { %9834 = vmatpush1.bf16.msra.mxu0 %v12216_v56 }
 0x543   :  { %9998 = vmatpush1.bf16.msra.mxu1 %v12219_v43  ;;  %9835 = vmatprep.subr.bf16.mxu0 %v12224_v51  ;;  %v12284_v51 = vld [vmem:[%s16806_s3 + $0x624] ss:$16 sps:$4 sm:$0xff]  }
 0x544   :  { %9999 = vmatprep.subr.bf16.mxu1 %v12227_v45  ;;  %v12287_v45 = vld [vmem:[%s16806_s3 + $0x62c] ss:$16 sps:$4 sm:$0xff]  }
 0x546   :  { %9836 = vmatpush1.bf16.msra.mxu0 %v12222_v3 }
 0x547   :  { %10000 = vmatpush1.bf16.msra.mxu1 %v12225_v49  ;;  %9837 = vmatprep.subr.bf16.mxu0 %v12230_v50  ;;  %v12282_v49 = vld [vmem:[%s16806_s3 + $0x620] ss:$16 sps:$4 sm:$0xff]   ;;  %v12285_v50 = vld [vmem:[%s16806_s3 + $0x628] ss:$16 sps:$4 sm:$0xff]  }
 0x548   :  { %10001 = vmatprep.subr.bf16.mxu1 %v12233_v52  ;;  %v12290_v52 = vld [vmem:[%s16806_s3 + $0x644] ss:$16 sps:$4 sm:$0xff]  }
 0x54a   :  { %9838 = vmatpush1.bf16.msra.mxu0 %v12228_v53  ;;  %v12293_v53 = vld [vmem:[%s16806_s3 + $0x64c] ss:$16 sps:$4 sm:$0xff]  }
 0x54b   :  { %10002 = vmatpush1.bf16.msra.mxu1 %v12231_v59  ;;  %9839 = vmatprep.subr.bf16.mxu0 %v12236_v54  ;;  %v12288_v59 = vld [vmem:[%s16806_s3 + $0x640] ss:$16 sps:$4 sm:$0xff]   ;;  %v12291_v54 = vld [vmem:[%s16806_s3 + $0x648] ss:$16 sps:$4 sm:$0xff]  }
 0x54c   :  { %10003 = vmatprep.subr.bf16.mxu1 %v12239_v7  ;;  %v12296_v7 = vld [vmem:[%s16806_s3 + $0x664] ss:$16 sps:$4 sm:$0xff]  }
 0x54e   :  { %9840 = vmatpush1.bf16.msra.mxu0 %v12234_v44  ;;  %v12299_v44 = vld [vmem:[%s16806_s3 + $0x66c] ss:$16 sps:$4 sm:$0xff]  }
 0x54f   :  { %10004 = vmatpush1.bf16.msra.mxu1 %v12237_v9  ;;  %9841 = vmatprep.subr.bf16.mxu0 %v12242_v34  ;;  %v12294_v9 = vld [vmem:[%s16806_s3 + $0x660] ss:$16 sps:$4 sm:$0xff]   ;;  %v12297_v34 = vld [vmem:[%s16806_s3 + $0x668] ss:$16 sps:$4 sm:$0xff]  }
 0x550   :  { %10005 = vmatprep.subr.bf16.mxu1 %v12245_v10  ;;  %v12302_v10 = vld [vmem:[%s16806_s3 + $0x684] ss:$16 sps:$4 sm:$0xff]  }
 0x552   :  { %9842 = vmatpush1.bf16.msra.mxu0 %v12240_v57  ;;  %v12305_v57 = vld [vmem:[%s16806_s3 + $0x68c] ss:$16 sps:$4 sm:$0xff]  }
 0x553   :  { %10006 = vmatpush1.bf16.msra.mxu1 %v12243_v30  ;;  %9843 = vmatprep.subr.bf16.mxu0 %v12248_v26  ;;  %v12300_v30 = vld [vmem:[%s16806_s3 + $0x680] ss:$16 sps:$4 sm:$0xff]   ;;  %v12303_v26 = vld [vmem:[%s16806_s3 + $0x688] ss:$16 sps:$4 sm:$0xff]  }
 0x554   :  { %10007 = vmatprep.subr.bf16.mxu1 %v12251_v60  ;;  %v12308_v60 = vld [vmem:[%s16806_s3 + $0x6a4] ss:$16 sps:$4 sm:$0xff]  }
 0x556   :  { %9844 = vmatpush1.bf16.msra.mxu0 %v12246_v62  ;;  %v12311_v62 = vld [vmem:[%s16806_s3 + $0x6ac] ss:$16 sps:$4 sm:$0xff]  }
 0x557   :  { %10008 = vmatpush1.bf16.msra.mxu1 %v12249_v29  ;;  %9845 = vmatprep.subr.bf16.mxu0 %v12254_v4  ;;  %v12306_v29 = vld [vmem:[%s16806_s3 + $0x6a0] ss:$16 sps:$4 sm:$0xff]   ;;  %v12309_v4 = vld [vmem:[%s16806_s3 + $0x6a8] ss:$16 sps:$4 sm:$0xff]  }
 0x558   :  { %10009 = vmatprep.subr.bf16.mxu1 %v12257_v48  ;;  %v12314_v48 = vld [vmem:[%s16806_s3 + $0x6c4] ss:$16 sps:$4 sm:$0xff]  }
 0x55a   :  { %9846 = vmatpush1.bf16.msra.mxu0 %v12252_v11  ;;  %v12317_v11 = vld [vmem:[%s16806_s3 + $0x6cc] ss:$16 sps:$4 sm:$0xff]  }
 0x55b   :  { %10010 = vmatpush1.bf16.msra.mxu1 %v12255_v63  ;;  %9847 = vmatprep.subr.bf16.mxu0 %v12260_v12  ;;  %v12312_v63 = vld [vmem:[%s16806_s3 + $0x6c0] ss:$16 sps:$4 sm:$0xff]   ;;  %v12315_v12 = vld [vmem:[%s16806_s3 + $0x6c8] ss:$16 sps:$4 sm:$0xff]  }
 0x55c   :  { %10011 = vmatprep.subr.bf16.mxu1 %v12263_v19  ;;  %v12320_v19 = vld [vmem:[%s16806_s3 + $0x6e4] ss:$16 sps:$4 sm:$0xff]  }
 0x55e   :  { %9848 = vmatpush1.bf16.msra.mxu0 %v12258_v21  ;;  %v12323_v21 = vld [vmem:[%s16806_s3 + $0x6ec] ss:$16 sps:$4 sm:$0xff]  }
 0x55f   :  { %10012 = vmatpush1.bf16.msra.mxu1 %v12261_v27  ;;  %9849 = vmatprep.subr.bf16.mxu0 %v12266_v22  ;;  %v12318_v27 = vld [vmem:[%s16806_s3 + $0x6e0] ss:$16 sps:$4 sm:$0xff]   ;;  %v12321_v22 = vld [vmem:[%s16806_s3 + $0x6e8] ss:$16 sps:$4 sm:$0xff]  }
 0x560   :  { %10013 = vmatprep.subr.bf16.mxu1 %v12269_v35  ;;  %v12326_v35 = vld [vmem:[%s16806_s3 + $0x704] ss:$16 sps:$4 sm:$0xff]  }
 0x562   :  { %9850 = vmatpush1.bf16.msra.mxu0 %v12264_v15  ;;  %v12329_v15 = vld [vmem:[%s16806_s3 + $0x70c] ss:$16 sps:$4 sm:$0xff]  }
 0x563   :  { %10014 = vmatpush1.bf16.msra.mxu1 %v12267_v47  ;;  %9851 = vmatprep.subr.bf16.mxu0 %v12272_v42  ;;  %v12324_v47 = vld [vmem:[%s16806_s3 + $0x700] ss:$16 sps:$4 sm:$0xff]   ;;  %v12327_v42 = vld [vmem:[%s16806_s3 + $0x708] ss:$16 sps:$4 sm:$0xff]  }
 0x564   :  { %10015 = vmatprep.subr.bf16.mxu1 %v12275_v24  ;;  %v12332_v24 = vld [vmem:[%s16806_s3 + $0x724] ss:$16 sps:$4 sm:$0xff]  }
 0x566   :  { %9852 = vmatpush1.bf16.msra.mxu0 %v12270_v55  ;;  %v12335_v55 = vld [vmem:[%s16806_s3 + $0x72c] ss:$16 sps:$4 sm:$0xff]  }
 0x567   :  { %10016 = vmatpush1.bf16.msra.mxu1 %v12273_v0  ;;  %9862 = vmatprep.subr.bf16.mxu0 %v12278_v58  ;;  %v12330_v0 = vld [vmem:[%s16806_s3 + $0x720] ss:$16 sps:$4 sm:$0xff]   ;;  %v12333_v58 = vld [vmem:[%s16806_s3 + $0x728] ss:$16 sps:$4 sm:$0xff]  }
 0x568   :  { %10026 = vmatprep.subr.bf16.mxu1 %v12281_v2  ;;  %v12338_v2 = vld [vmem:[%s16806_s3 + $0x744] ss:$16 sps:$4 sm:$0xff]  }
 0x57c   :  { %v7830_v28 = vpop.f32.mrb[20].mxu0 }
 0x57d   :  { %v11842_v37 = vadd.f32 %v7830_v28, %v1712_v23  ;;  %v16492_v61 = vpop.f32.mrb[20].mxu1  ;;  %v7832_v36 = vpop.f32.mrb[21].mxu0  ;;  %v12341_v23 = vld [vmem:[%s16806_s3 + $0x74c] ss:$16 sps:$4 sm:$0xff]   ;;  %v12344_v28 = vld [vmem:[%s16806_s3 + $0x764] ss:$16 sps:$4 sm:$0xff]  }
 0x57e   :  { %v11843_v17 = vadd.f32 %v7832_v36, %v1716_v31  ;;  %v8160_v18 = vpop.f32.mrb[21].mxu1  ;;  %v7834_v25 = vpop.f32.mrb[22].mxu0  ;;  %v12336_v31 = vld [vmem:[%s16806_s3 + $0x740] ss:$16 sps:$4 sm:$0xff]  }
 0x57f   :  { %v8169_v39 = vmax.f32 %v11842_v37, 0.0  ;;  %v11845_v1 = vadd.f32 %v8160_v18, %v1724_v33  ;;  %v8162_v40 = vpop.f32.mrb[22].mxu1  ;;  %v7835_v46 = vpop.f32.mrb[23].mxu0  ;;  %v12339_v33 = vld [vmem:[%s16806_s3 + $0x748] ss:$16 sps:$4 sm:$0xff]  }
 0x580   :  { %v8170_v41 = vmax.f32 %v11843_v17, 0.0  ;;  %v8163_v20 = vpop.f32.mrb[23].mxu1  ;;  %v12347_v37 = vld [vmem:[%s16806_s3 + $0x76c] ss:$16 sps:$4 sm:$0xff]   ;;  %v12342_v36 = vld [vmem:[%s16806_s3 + $0x760] ss:$16 sps:$4 sm:$0xff]  }
 0x581   :  { %v8172_v56 = vmax.f32 %v11845_v1, 0.0  ;;  %v8177_v13 = vpack.c.bf16 %v8169_v39, %v8169_v39  ;;  %v12345_v17 = vld [vmem:[%s16806_s3 + $0x768] ss:$16 sps:$4 sm:$0xff]   ;;  %v12350_v18 = vld [vmem:[%s16806_s3 + $0x784] ss:$16 sps:$4 sm:$0xff]  }
 0x582   :  { %v8178_v43 = vpack.c.bf16 %v8170_v41, %v8170_v41  ;;  %v12353_v25 = vld [vmem:[%s16806_s3 + $0x78c] ss:$16 sps:$4 sm:$0xff]   ;;  %v12348_v39 = vld [vmem:[%s16806_s3 + $0x780] ss:$16 sps:$4 sm:$0xff]   ;;  %v12351_v1 = vld [vmem:[%s16806_s3 + $0x788] ss:$16 sps:$4 sm:$0xff]  }
 0x583   :  { %v8180_v3 = vpack.c.bf16 %v8172_v56, %v8172_v56  ;;  %v12356_v40 = vld [vmem:[%s16806_s3 + $0x7a4] ss:$16 sps:$4 sm:$0xff]   ;;  %v12359_v46 = vld [vmem:[%s16806_s3 + $0x7ac] ss:$16 sps:$4 sm:$0xff]   ;;  %v12354_v41 = vld [vmem:[%s16806_s3 + $0x7a0] ss:$16 sps:$4 sm:$0xff]  }
 0x584   :  { %9853 = vmatprep.mubr.bf16.mxu0 %v8178_v43  ;;  %10017 = vmatprep.mubr.bf16.mxu1 %v8178_v43  ;;  %v12357_v20 = vld [vmem:[%s16806_s3 + $0x7a8] ss:$16 sps:$4 sm:$0xff]   ;;  %v12410_v56 = vld [vmem:[%s16808_s5 + $0x10] sm:$0xff] }
 0x585   :  { %9854 = vmatmul.mubr.bf16.vlgmr.msra.gmra.mrb[24].mxu0 %v8177_v13  ;;  %10018 = vmatmul.mubr.bf16.vlgmr.msra.gmra.mrb[24].mxu1 %v8177_v13  ;;  %v1720_v43 = vrot.slane %v12410_v56, %v13036_v5  ;;  %v12360_v13 = vld [vmem:[%s16806_s3 + $0x7c0] ss:$16 sps:$4 sm:$0xff]   ;;  %v12363_v5 = vld [vmem:[%s16806_s3 + $0x7c8] ss:$16 sps:$4 sm:$0xff]  }
 0x586   :  { %9863 = vmatpush1.bf16.msra.mxu0 %v12276_v32  ;;  %10027 = vmatpush1.bf16.msra.mxu1 %v12279_v8  ;;  %v12362_v32 = vld [vmem:[%s16806_s3 + $0x7c4] ss:$16 sps:$4 sm:$0xff]   ;;  %v12365_v8 = vld [vmem:[%s16806_s3 + $0x7cc] ss:$16 sps:$4 sm:$0xff]  }
 0x587   :  { %9894 = vmatprep.mubr.bf16.mxu0 %v8180_v3  ;;  %10058 = vmatprep.mubr.bf16.mxu1 %v8180_v3  ;;  %v12371_v3 = vld [vmem:[%s16806_s3 + $0x7ec] ss:$16 sps:$4 sm:$0xff]  }
 0x588   :  { %9864 = vmatprep.subr.bf16.mxu0 %v12284_v51  ;;  %10028 = vmatprep.subr.bf16.mxu1 %v12287_v45  ;;  %v11844_v51 = vadd.f32 %v16492_v61, %v1720_v43  ;;  %v12368_v45 = vld [vmem:[%s16806_s3 + $0x7e4] ss:$16 sps:$4 sm:$0xff]   ;;  %v12369_v61 = vld [vmem:[%s16806_s3 + $0x7e8] ss:$16 sps:$4 sm:$0xff]  }
 0x58a   :  { %9865 = vmatpush1.bf16.msra.mxu0 %v12282_v49  ;;  %10029 = vmatpush1.bf16.msra.mxu1 %v12285_v50  ;;  %v12366_v49 = vld [vmem:[%s16806_s3 + $0x7e0] ss:$16 sps:$4 sm:$0xff]   ;;  %v8171_v50 = vmax.f32 %v11844_v51, 0.0 }
 0x58b   :  { %9866 = vmatprep.subr.bf16.mxu0 %v12290_v52  ;;  %10030 = vmatprep.subr.bf16.mxu1 %v12293_v53  ;;  %v12372_v52 = vld [vmem:[%s16807_s4 + $0x40] sm:$0xff]  }
 0x58c   :  { %v12373_v53 = vld [vmem:[%s16807_s4 + $0xc0] sm:$0xff]  }
 0x58e   :  { %9867 = vmatpush1.bf16.msra.mxu0 %v12288_v59  ;;  %10031 = vmatpush1.bf16.msra.mxu1 %v12291_v54  ;;  %v12374_v59 = vld [vmem:[%s16807_s4] sm:$0xff]  }
 0x58f   :  { %9868 = vmatprep.subr.bf16.mxu0 %v12296_v7  ;;  %10032 = vmatprep.subr.bf16.mxu1 %v12299_v44  ;;  %v12375_v54 = vld [vmem:[%s16807_s4 + $0x80] sm:$0xff]   ;;  %v8179_v7 = vpack.c.bf16 %v8171_v50, %v8171_v50  ;;  %v12376_v44 = vld [vmem:[%s16807_s4 + $0x48] sm:$0xff]  }
 0x592   :  { %9869 = vmatpush1.bf16.msra.mxu0 %v12294_v9  ;;  %10033 = vmatpush1.bf16.msra.mxu1 %v12297_v34  ;;  %v12377_v9 = vld [vmem:[%s16807_s4 + $0xc8] sm:$0xff]  }
 0x593   :  { %9870 = vmatprep.subr.bf16.mxu0 %v12302_v10  ;;  %10034 = vmatprep.subr.bf16.mxu1 %v12305_v57  ;;  %v12378_v34 = vld [vmem:[%s16807_s4 + $0x8] sm:$0xff]   ;;  %v12380_v57 = vld [vmem:[%s16807_s4 + $0x50] sm:$0xff]  }
 0x594   :  { %v12379_v10 = vld [vmem:[%s16807_s4 + $0x88] sm:$0xff]  }
 0x596   :  { %9871 = vmatpush1.bf16.msra.mxu0 %v12300_v30  ;;  %10035 = vmatpush1.bf16.msra.mxu1 %v12303_v26  ;;  %v12381_v30 = vld [vmem:[%s16807_s4 + $0xd0] sm:$0xff]  }
 0x597   :  { %9872 = vmatprep.subr.bf16.mxu0 %v12308_v60  ;;  %10036 = vmatprep.subr.bf16.mxu1 %v12311_v62  ;;  %v12382_v26 = vld [vmem:[%s16807_s4 + $0x10] sm:$0xff]   ;;  %v12384_v62 = vld [vmem:[%s16807_s4 + $0x58] sm:$0xff]  }
 0x598   :  { %v12383_v60 = vld [vmem:[%s16807_s4 + $0x90] sm:$0xff]  }
 0x59a   :  { %9873 = vmatpush1.bf16.msra.mxu0 %v12306_v29  ;;  %10037 = vmatpush1.bf16.msra.mxu1 %v12309_v4  ;;  %v12385_v29 = vld [vmem:[%s16807_s4 + $0xd8] sm:$0xff]  }
 0x59b   :  { %9874 = vmatprep.subr.bf16.mxu0 %v12314_v48  ;;  %10038 = vmatprep.subr.bf16.mxu1 %v12317_v11  ;;  %v12386_v4 = vld [vmem:[%s16807_s4 + $0x18] sm:$0xff]   ;;  %v12388_v11 = vld [vmem:[%s16807_s4 + $0x60] sm:$0xff]  }
 0x59c   :  { %v12387_v48 = vld [vmem:[%s16807_s4 + $0x98] sm:$0xff]  }
 0x59e   :  { %9875 = vmatpush1.bf16.msra.mxu0 %v12312_v63  ;;  %10039 = vmatpush1.bf16.msra.mxu1 %v12315_v12  ;;  %v12389_v63 = vld [vmem:[%s16807_s4 + $0xe0] sm:$0xff]  }
 0x59f   :  { %9876 = vmatprep.subr.bf16.mxu0 %v12320_v19  ;;  %10040 = vmatprep.subr.bf16.mxu1 %v12323_v21  ;;  %v12390_v12 = vld [vmem:[%s16807_s4 + $0x20] sm:$0xff]   ;;  %v12392_v21 = vld [vmem:[%s16807_s4 + $0x68] sm:$0xff]  }
 0x5a0   :  { %v12391_v19 = vld [vmem:[%s16807_s4 + $0xa0] sm:$0xff]  }
 0x5a2   :  { %9877 = vmatpush1.bf16.msra.mxu0 %v12318_v27  ;;  %10041 = vmatpush1.bf16.msra.mxu1 %v12321_v22  ;;  %v12393_v27 = vld [vmem:[%s16807_s4 + $0xe8] sm:$0xff]  }
 0x5a3   :  { %9878 = vmatprep.subr.bf16.mxu0 %v12326_v35  ;;  %10042 = vmatprep.subr.bf16.mxu1 %v12329_v15  ;;  %v12394_v22 = vld [vmem:[%s16807_s4 + $0x28] sm:$0xff]   ;;  %v12396_v15 = vld [vmem:[%s16807_s4 + $0x70] sm:$0xff]  }
 0x5a4   :  { %v12395_v35 = vld [vmem:[%s16807_s4 + $0xa8] sm:$0xff]  }
 0x5a6   :  { %9879 = vmatpush1.bf16.msra.mxu0 %v12324_v47  ;;  %10043 = vmatpush1.bf16.msra.mxu1 %v12327_v42  ;;  %v12397_v47 = vld [vmem:[%s16807_s4 + $0xf0] sm:$0xff]  }
 0x5a7   :  { %9880 = vmatprep.subr.bf16.mxu0 %v12332_v24  ;;  %10044 = vmatprep.subr.bf16.mxu1 %v12335_v55  ;;  %v12398_v42 = vld [vmem:[%s16807_s4 + $0x30] sm:$0xff]   ;;  %v12400_v55 = vld [vmem:[%s16807_s4 + $0x78] sm:$0xff]  }
 0x5a8   :  { %v12399_v24 = vld [vmem:[%s16807_s4 + $0xb0] sm:$0xff]  }
 0x5aa   :  { %9881 = vmatpush1.bf16.msra.mxu0 %v12330_v0  ;;  %10045 = vmatpush1.bf16.msra.mxu1 %v12333_v58  ;;  %v12401_v0 = vld [vmem:[%s16807_s4 + $0xf8] sm:$0xff]  }
 0x5ab   :  { %9882 = vmatprep.subr.bf16.mxu0 %v12338_v2  ;;  %10046 = vmatprep.subr.bf16.mxu1 %v12341_v23  ;;  %v12402_v58 = vld [vmem:[%s16807_s4 + $0x38] sm:$0xff]  }
 0x5ac   :  { %v12403_v2 = vld [vmem:[%s16807_s4 + $0xb8] sm:$0xff]  }
 0x5ad   :  { %v8437_v23 = vld [vmem:[%s16808_s5 + $0x18] sm:$0xf] }
 0x5ae   :  { %9883 = vmatpush1.bf16.msra.mxu0 %v12336_v31  ;;  %10047 = vmatpush1.bf16.msra.mxu1 %v12339_v33  ;;  %v8442_v31 = vrot.slane %v8437_v23, %v12804_v14  ;;  %v8450_v33 = vrot.slane %v8437_v23, %v13001_v38 }
 0x5af   :  { %9884 = vmatprep.subr.bf16.mxu0 %v12344_v28  ;;  %10048 = vmatprep.subr.bf16.mxu1 %v12347_v37  ;;  %v8446_v28 = vrot.slane %v8437_v23, %v12812_v6  ;;  %v8454_v37 = vrot.slane %v8437_v23, %v12815_v16 }
 0x5b2   :  { %9885 = vmatpush1.bf16.msra.mxu0 %v12342_v36  ;;  %10049 = vmatpush1.bf16.msra.mxu1 %v12345_v17 }
 0x5b3   :  { %9886 = vmatprep.subr.bf16.mxu0 %v12350_v18  ;;  %10050 = vmatprep.subr.bf16.mxu1 %v12353_v25 }
 0x5b6   :  { %9887 = vmatpush1.bf16.msra.mxu0 %v12348_v39  ;;  %10051 = vmatpush1.bf16.msra.mxu1 %v12351_v1 }
 0x5b7   :  { %9888 = vmatprep.subr.bf16.mxu0 %v12356_v40  ;;  %10052 = vmatprep.subr.bf16.mxu1 %v12359_v46 }
 0x5ba   :  { %9889 = vmatpush1.bf16.msra.mxu0 %v12354_v41  ;;  %10053 = vmatpush1.bf16.msra.mxu1 %v12357_v20 }
 0x5bb   :  { %9890 = vmatprep.subr.bf16.mxu0 %v12362_v32  ;;  %10054 = vmatprep.subr.bf16.mxu1 %v12365_v8 }
 0x5be   :  { %9891 = vmatpush1.bf16.msra.mxu0 %v12360_v13  ;;  %10055 = vmatpush1.bf16.msra.mxu1 %v12363_v5 }
 0x5bf   :  { %9892 = vmatprep.subr.bf16.mxu0 %v12368_v45  ;;  %10056 = vmatprep.subr.bf16.mxu1 %v12371_v3  ;;  %v11760_v3 = vld [vmem:[%s16808_s5 + $0x1c] ss:$0 sm:$0xff]  ;;  %s12411_s5 = scalar_lea.vmem %s10433_s0, 128 }
 0x5c0   :  { %p12412_p0 = scmp.ne.s32.totalorder %s10433_s0, %s12411_s5  ;;  %p12417_p2 = scmp.lt.s32.totalorder %s12411_s5, %s12411_s5 }
 0x5c2   :  { %9893 = vmatpush1.bf16.msra.mxu0 %v12366_v49  ;;  %10057 = vmatpush1.bf16.msra.mxu1 %v12369_v61  ;;  %p12418_p3 = por %p12417_p2, %p12416_p1 }
 0x5c3   :  { %11794 = vmatprep.subr.bf16.mxu0 %v12372_v52  ;;  %11816 = vmatprep.subr.bf16.mxu1 %v12373_v53 }
 0x5c4   :  { %p12419_p4 = pnand %p12418_p3, %p12412_p0 }
 0x5c5   :  { %9895 = vmatmul.mubr.bf16.vlgmr.msra.gmra.mrb[24].mxu0 %v8179_v7  ;;  %10059 = vmatmul.mubr.bf16.vlgmr.msra.gmra.mrb[24].mxu1 %v8179_v7 }
 0x5c6   :  { %11795 = vmatpush3.bf16.msra.mxu0 %v12374_v59  ;;  %11817 = vmatpush3.bf16.msra.mxu1 %v12375_v54 }
 0x5c7   :  { %11796 = vmatprep.subr.bf16.mxu0 %v12376_v44  ;;  %11818 = vmatprep.subr.bf16.mxu1 %v12377_v9 }
 0x5ca   :  { %11797 = vmatpush3.bf16.msra.mxu0 %v12378_v34  ;;  %11819 = vmatpush3.bf16.msra.mxu1 %v12379_v10 }
 0x5cb   :  { %11798 = vmatprep.subr.bf16.mxu0 %v12380_v57  ;;  %11820 = vmatprep.subr.bf16.mxu1 %v12381_v30 }
 0x5ce   :  { %11799 = vmatpush3.bf16.msra.mxu0 %v12382_v26  ;;  %11821 = vmatpush3.bf16.msra.mxu1 %v12383_v60 }
 0x5cf   :  { %11800 = vmatprep.subr.bf16.mxu0 %v12384_v62  ;;  %11822 = vmatprep.subr.bf16.mxu1 %v12385_v29 }
 0x5d2   :  { %11801 = vmatpush3.bf16.msra.mxu0 %v12386_v4  ;;  %11823 = vmatpush3.bf16.msra.mxu1 %v12387_v48 }
 0x5d3   :  { %11802 = vmatprep.subr.bf16.mxu0 %v12388_v11  ;;  %11824 = vmatprep.subr.bf16.mxu1 %v12389_v63 }
 0x5d6   :  { %11803 = vmatpush3.bf16.msra.mxu0 %v12390_v12  ;;  %11825 = vmatpush3.bf16.msra.mxu1 %v12391_v19 }
 0x5d7   :  { %11804 = vmatprep.subr.bf16.mxu0 %v12392_v21  ;;  %11826 = vmatprep.subr.bf16.mxu1 %v12393_v27 }
 0x5da   :  { %11805 = vmatpush3.bf16.msra.mxu0 %v12394_v22  ;;  %11827 = vmatpush3.bf16.msra.mxu1 %v12395_v35 }
 0x5db   :  { %11806 = vmatprep.subr.bf16.mxu0 %v12396_v15  ;;  %11828 = vmatprep.subr.bf16.mxu1 %v12397_v47 }
 0x5de   :  { %11807 = vmatpush3.bf16.msra.mxu0 %v12398_v42  ;;  %11829 = vmatpush3.bf16.msra.mxu1 %v12399_v24 }
 0x5df   :  { %11808 = vmatprep.subr.bf16.mxu0 %v12400_v55  ;;  %11830 = vmatprep.subr.bf16.mxu1 %v12401_v0 }
 0x5e2   :  { %11809 = vmatpush3.bf16.msra.mxu0 %v12402_v58  ;;  %11831 = vmatpush3.bf16.msra.mxu1 %v12403_v2 }
 0x698   :  { %v9896_v36 = vpop.f32.mrb[24].mxu0  ;;  %v10060_v17 = vpop.f32.mrb[24].mxu1 }
 0x699   :  { %v11846_v18 = vadd.f32 %v9896_v36, %v8442_v31  ;;  %v11848_v25 = vadd.f32 %v10060_v17, %v8450_v33  ;;  %v9898_v39 = vpop.f32.mrb[25].mxu0  ;;  %v10062_v1 = vpop.f32.mrb[25].mxu1 }
 0x69a   :  { %v11847_v40 = vadd.f32 %v9898_v39, %v8446_v28  ;;  %v11849_v46 = vadd.f32 %v10062_v1, %v8454_v37  ;;  %v9900_v41 = vpop.f32.mrb[26].mxu0  ;;  %v10064_v20 = vpop.f32.mrb[26].mxu1 }
 0x69b   :  { %v10067_v56 = vmax.f32 %v11846_v18, 0.0  ;;  %v10069_v43 = vmax.f32 %v11848_v25, 0.0  ;;  %v9901_v32 = vpop.f32.mrb[27].mxu0  ;;  %v10065_v14 = vpop.f32.mrb[27].mxu1 }
 0x69c   :  { %v10068_v8 = vmax.f32 %v11847_v40, 0.0  ;;  %v10070_v38 = vmax.f32 %v11849_v46, 0.0 }
 0x69d   :  { %v10071_v5 = vpack.c.bf16 %v10067_v56, %v10067_v56  ;;  %v10073_v16 = vpack.c.bf16 %v10069_v43, %v10069_v43 }
 0x69e   :  { %v10072_v13 = vpack.c.bf16 %v10068_v8, %v10068_v8  ;;  %v10074_v6 = vpack.c.bf16 %v10070_v38, %v10070_v38 }
 0x6a0   :  { %10370 = vmatprep.mubr.bf16.mxu0 %v10072_v13  ;;  %10410 = vmatprep.mubr.bf16.mxu1 %v10074_v6 }
 0x6a1   :  { %10371 = vmatmul.mubr.bf16.vlgmr.msra.gmra.mrb[28].mxu0 %v10071_v5  ;;  %10411 = vmatmul.mubr.bf16.vlgmr.msra.gmra.mrb[28].mxu1 %v10073_v16 }
 0x774   :  { %v11810_v51 = vpop.f32.mrb[28].mxu0  ;;  %v11832_v45 = vpop.f32.mrb[28].mxu1 }
 0x775   :  { %v11811_v49 = vpop.f32.mrb[29].mxu0  ;;  %v11833_v61 = vpop.f32.mrb[29].mxu1 }
 0x776   :  { %v11812_v50 = vadd.f32 %v11811_v49, %v11810_v51  ;;  %v11834_v52 = vadd.f32 %v11833_v61, %v11832_v45  ;;  %v11813_v53 = vpop.f32.mrb[30].mxu0  ;;  %v11835_v59 = vpop.f32.mrb[30].mxu1 }
 0x777   :  { %v11814_v54 = vpop.f32.mrb[31].mxu0  ;;  %v11836_v7 = vpop.f32.mrb[31].mxu1 }
 0x778   :  { %v10373_v44 = vadd.f32 %v11812_v50, %v11760_v3 }
 0x77a   :  { %v10413_v9 = vadd.f32 %v11834_v52, %v10373_v44 }
 0x77c   :  { %v11793_v34 = vmul.f32 -1.442695, %v10413_v9 }
 0x77e   :  { %12404 = vpow2.f32 %v11793_v34 }
 0x788   :  { %v12405_v10 = vpop.eup %12404 }
 0x789   :  { %v10421_v57 = vadd.f32 1.0, %v12405_v10 }
 0x78b   :  { %12406 = vrcp.f32 %v10421_v57 }
 0x795   :  { %v12407_v30 = vpop.eup %12406 }
 0x796   :  { %10425 = vst.msk [vmem:[#allocation2] sm:$0xff] %vm10424_vm1, %v12407_v30 }
 0x797   :  { %12422 = shalt.err (!%p12419_p4)
}
 0x798   :  { %s12423_s29 = scalar_lea.hbm %s16809_s6, 128 }
 0x799   :  { %p12424_p5 = scmp.ne.s32.totalorder %s16809_s6, %s12423_s29  ;;  %p12427_p6 = scmp.lt.u32.totalorder %s12423_s29, %s16809_s6 }
 0x79b   :  { %p12429_p7 = pnand %p12427_p6, %p12424_p5 }
 0x79d   :  { %12432 = shalt.err (!%p12429_p7)
}
 0x79e   :  { %10435 = dma.vmem_to_hbm [thread:$0]  %s10433_s0, 128, %s16809_s6, [#allocation3]  }
 0x79f   :  { %12433 = dma.done.wait [#allocation3], 128  }
 0x7a0   :  { %12434 = vsyncadd [#allocation3], 4294967168 }
 0x7a1   :  { %10439 = vsyncpa [#allocation3], 1 }

</bundles_post_ra>
